<compile_context>
chip_gen: v5e
topology: v5e:2x2
jax: 0.10.0
libtpu: 0.0.40
codegen_flags: <defaults>
</compile_context>

<pallas_src>
import functools

import jax
import jax.numpy as jnp
import numpy as np
from jax.experimental import pallas as pl
from jax.experimental.pallas import tpu as pltpu


def _round_up(x, m):
    return ((x + m - 1) // m) * m


def _vmem_capacity_bytes():
    """Physical VMEM of the attached chip (falls back to v7x's 64 MiB if unknown)."""
    try:
        return int(pltpu.get_tpu_info().vmem_capacity_bytes)
    except Exception:
        return 64 * 1024 * 1024


def _weight_spec_kwargs(weight_buffers):
    """pipeline_mode=pl.Buffered(1) for the grid-invariant (resident) weights, if supported."""
    if weight_buffers == 1 and hasattr(pl, "Buffered"):
        try:
            pl.BlockSpec((8, 128), lambda i, j, k: (0, 0), pipeline_mode=pl.Buffered(1))
            return {"pipeline_mode": pl.Buffered(1)}
        except TypeError:
            pass
    return {}


def _prep_gates(w, d_rnn, h_pad):
    """[..., 4*d_rnn] in PyTorch (i, f, g, o) order -> [..., 4*h_pad] in (i, f, o, g) order,
    each gate block zero-padded to h_pad so gate slices are 128-lane aligned."""
    lead = w.shape[:-1]
    w4 = w.reshape(lead + (4, d_rnn))
    w4 = jnp.take(w4, jnp.array([0, 1, 3, 2]), axis=-2)          # i, f, o, g
    if h_pad != d_rnn:
        w4 = jnp.pad(w4, [(0, 0)] * (len(lead) + 1) + [(0, h_pad - d_rnn)])
    return w4.reshape(lead + (4 * h_pad,))


def _lstm_block_kernel(maxlen_ref, x_ref, len_ref, wih_ref, whh_ref, b_ref, wproj_ref,
                       bproj_ref, out_ref, gx_scr, ho_scr, h_scr, c_scr, *, relayout):
    """One grid step = one (batch block, time block).

    NOTE (correctness): the recurrent h/c state lives in VMEM scratch and is carried across
    time blocks, so the time axis MUST remain the LAST ("arbitrary", sequential) grid axis for
    each batch block; it must never be reordered or marked parallel.
    """
    b_blk = pl.program_id(0)
    t_blk = pl.program_id(1)
    Bb, Tb, d_in = x_ref.shape
    H = whh_ref.shape[0]                      # lane-padded hidden size (multiple of 128)
    D = out_ref.shape[2]                      # lane-padded model size  (multiple of 128)
    t0 = t_blk * Tb

    @pl.when(t_blk == 0)
    def _init():
        h_scr[...] = jnp.zeros_like(h_scr)
        c_scr[...] = jnp.zeros_like(c_scr)

    blk_len = maxlen_ref[b_blk]               # SMEM scalar: max valid length in this batch blk

    @pl.when(t0 < blk_len)
    def _compute():
        len_v = len_ref[...].reshape(Bb, 1)   # [Bb, 1] int32 per-sequence valid lengths

        # --- hoisted input projection: ONE MXU GEMM per time block -> VMEM scratch ---------
        x2 = x_ref[...].reshape(Bb * Tb, d_in)
        gx = jax.lax.dot_general(x2, wih_ref[...], (((1,), (0,)), ((), ())),
                                 preferred_element_type=jnp.float32) + b_ref[...]
        gx_scr[...] = gx.reshape(Bb, Tb, 4 * H)

        # --- recurrence: only h @ W_hh remains inside the (statically unrolled) step loop ---
        w_hh = whh_ref[...]
        h = h_scr[...]
        c = c_scr[...]
        for t in range(Tb):                   # per-step slabs live in scratch, not in regs
            gates = gx_scr[:, t, :] + jnp.dot(h.astype(w_hh.dtype), w_hh,
                                              preferred_element_type=jnp.float32)
            sig = jax.nn.sigmoid(gates[:, :3 * H])        # contiguous (i, f, o) gates
            i_g = sig[:, 0 * H:1 * H]
            f_g = sig[:, 1 * H:2 * H]
            o_g = sig[:, 2 * H:3 * H]
            g_g = jnp.tanh(gates[:, 3 * H:])
            c_new = f_g * c + i_g * g_g
            h_new = o_g * jnp.tanh(c_new)
            valid = (t0 + t) < len_v                      # packed-sequence mask
            h = jnp.where(valid, h_new, h)                # padded steps do not advance state
            c = jnp.where(valid, c_new, c)
            # time-major scratch -> dense [Bb, H] store (no strided vst in the hot loop)
            ho_scr[t] = jnp.where(valid, h_new, 0.0).astype(ho_scr.dtype)
        h_scr[...] = h
        c_scr[...] = c

        # --- deferred output projection: ONE GEMM per time block ---------------------------
        ho = ho_scr[...].reshape(Tb * Bb, H)
        out = jax.lax.dot_general(ho, wproj_ref[...], (((1,), (0,)), ((), ())),
                                  preferred_element_type=jnp.float32)
        out = out.reshape(Tb, Bb, D) + bproj_ref[...]     # (Tb, Bb, D) f32
        if relayout == "loop":
            for t in range(Tb):
                out_ref[:, t, :] = out[t].astype(out_ref.dtype)
        else:
            if relayout == "einshape" and hasattr(pltpu, "einshape"):
                out_b = pltpu.einshape("tbd->btd", out)
            else:
                out_b = jnp.transpose(out, (1, 0, 2))
            out_ref[...] = out_b.astype(out_ref.dtype)

    @pl.when(t0 >= blk_len)
    def _skip():
        # fully-padded time block: pad_packed rows are zero -> projection output = bias only.
        bias = bproj_ref[...].reshape(1, 1, D)
        out_ref[...] = jnp.broadcast_to(bias, out_ref.shape).astype(out_ref.dtype)


@functools.partial(jax.jit, static_argnames=("time_block", "batch_block", "use_bf16_mxu",
                                              "out_dtype", "weight_buffers", "relayout"))
def _rnn_layers_forward(data, non_pad_mask, W_ih, W_hh, b, W_proj, b_proj, *,
                        time_block, batch_block, use_bf16_mxu, out_dtype,
                        weight_buffers, relayout):
    B, T, d_model = data.shape
    d_rnn = W_proj.shape[0]

    # ---- static tiling decisions --------------------------------------------------------
    if batch_block is None:
        # give both v7x TensorCores a batch block when the batch is big enough
        Bb = B // 2 if (B % 2 == 0 and B >= 16) else B
    else:
        Bb = int(batch_block)
    if B % Bb != 0:
        raise ValueError(f"batch_block={Bb} must divide B={B}")
    sub = 16 if use_bf16_mxu else 8                      # bf16 packs 2 rows per sublane
    Tb = _round_up(max(1, int(time_block)), sub)
    T_pad = _round_up(T, Tb)
    H = _round_up(d_rnn, 128)                            # lane-aligned hidden size
    D = _round_up(d_model, 128)                          # lane-dense output width
    n_b, n_t = B // Bb, T_pad // Tb

    w_dtype = jnp.bfloat16 if use_bf16_mxu else jnp.float32

    # ---- one-time parameter prep (tiny, outside the recurrence) -------------------------
    W_ih_p = _prep_gates(W_ih, d_rnn, H).astype(w_dtype)                       # [d_model, 4H]
    W_hh_p = jnp.pad(_prep_gates(W_hh, d_rnn, H),
                     ((0, H - d_rnn), (0, 0))).astype(w_dtype)                 # [H, 4H]
    b_p = _prep_gates(jnp.reshape(b, (1, 4 * d_rnn)), d_rnn, H).astype(jnp.float32)
    W_proj_p = jnp.pad(W_proj, ((0, H - d_rnn), (0, D - d_model))).astype(w_dtype)
    b_proj_p = jnp.pad(jnp.reshape(b_proj, (1, d_model)),
                       ((0, 0), (0, D - d_model))).astype(jnp.float32)

    # lengths = non_pad_mask.squeeze(2).sum(1); boolean compare is robust to non-exact masks
    lengths = jnp.sum(non_pad_mask[..., 0] != 0, axis=1).astype(jnp.int32)     # [B]
    blk_max = jnp.max(lengths.reshape(n_b, Bb), axis=1).astype(jnp.int32)      # [n_b]
    lengths3 = lengths.reshape(B, 1, 1)

    x = data.astype(w_dtype)
    if T_pad != T:
        x = jnp.pad(x, ((0, 0), (0, T_pad - T), (0, 0)))

    wkw = _weight_spec_kwargs(weight_buffers)
    wb = 2 if use_bf16_mxu else 4
    ob = np.dtype(out_dtype).itemsize
    weight_bytes = (d_model * 4 * H + H * 4 * H + H * D) * wb + (4 * H + D) * 4

    # rough VMEM budget: double-buffered x/out blocks + resident weights + scratch
    est = (2 * Bb * Tb * d_model * wb
           + 2 * Bb * Tb * D * ob
           + 2 * Bb * 4
           + weight_buffers * weight_bytes
           + Bb * Tb * 4 * H * 4            # gx scratch (f32)
           + Tb * Bb * H * wb               # ho scratch (MXU dtype)
           + 2 * Bb * H * 4)                # h, c state
    ceiling = min(int(0.85 * _vmem_capacity_bytes()), 110 * 1024 * 1024)
    vmem_limit = int(min(ceiling, max(8 * 1024 * 1024, 2 * est)))

    cost = None
    if hasattr(pl, "CostEstimate"):
        cost = pl.CostEstimate(
            flops=2 * B * T_pad * (d_model * 4 * H + H * 4 * H + H * D),
            transcendentals=5 * B * T_pad * H,
            bytes_accessed=B * T_pad * (d_model * wb + D * ob) + weight_bytes + B * 4)

    kernel = functools.partial(_lstm_block_kernel, relayout=relayout)

    out = pl.pallas_call(
        kernel,
        out_shape=jax.ShapeDtypeStruct((B, T_pad, D), out_dtype),
        grid_spec=pltpu.PrefetchScalarGridSpec(
            num_scalar_prefetch=1,                 # per-batch-block max length -> SMEM
            # Grid order matters: time axis LAST and sequential ("arbitrary") because the
            # LSTM h/c state is carried across time blocks in VMEM scratch.
            grid=(n_b, n_t),
            in_specs=[
                pl.BlockSpec((Bb, Tb, d_model), lambda bb, tt, ml: (bb, tt, 0)),    # x block
                pl.BlockSpec((Bb, 1, 1), lambda bb, tt, ml: (bb, 0, 0)),            # lengths
                pl.BlockSpec((d_model, 4 * H), lambda bb, tt, ml: (0, 0), **wkw),   # W_ih
                pl.BlockSpec((H, 4 * H), lambda bb, tt, ml: (0, 0), **wkw),         # W_hh
                pl.BlockSpec((1, 4 * H), lambda bb, tt, ml: (0, 0), **wkw),         # b
                pl.BlockSpec((H, D), lambda bb, tt, ml: (0, 0), **wkw),             # W_proj
                pl.BlockSpec((1, D), lambda bb, tt, ml: (0, 0), **wkw),             # b_proj
            ],
            out_specs=pl.BlockSpec((Bb, Tb, D), lambda bb, tt, ml: (bb, tt, 0)),
            scratch_shapes=[
                pltpu.VMEM((Bb, Tb, 4 * H), jnp.float32),   # gate pre-activations (f32)
                pltpu.VMEM((Tb, Bb, H), w_dtype),           # time-major masked h outputs
                pltpu.VMEM((Bb, H), jnp.float32),           # h state
                pltpu.VMEM((Bb, H), jnp.float32),           # c state
            ],
        ),
        compiler_params=pltpu.CompilerParams(
            dimension_semantics=("parallel", "arbitrary"),  # batch blocks ||, time sequential
            vmem_limit_bytes=vmem_limit,
        ),
        cost_estimate=cost,
    )(blk_max, x, lengths3, W_ih_p, W_hh_p, b_p, W_proj_p, b_proj_p)

    return out[:, :T, :d_model]


def rnn_layers_forward(data, non_pad_mask, W_ih, W_hh, b, W_proj, b_proj, *,
                       time_block=8, batch_block=None, use_bf16_mxu=False,
                       out_dtype=jnp.float32):
    """data: [B, T, d_model] f32 (batch first), non_pad_mask: [B, T, 1] (1.0/0.0).

    W_ih: [d_model, 4*d_rnn], W_hh: [d_rnn, 4*d_rnn], b: [1, 4*d_rnn] (= b_ih + b_hh),
    W_proj: [d_rnn, d_model], b_proj: [1, d_model].  PyTorch gate order i, f, g, o.
    On v5e, prefer use_bf16_mxu=True (bf16-native MXU) if the caller's tolerance permits.
    """
    last_err = None
    # Preferred (fully optimized) config first; later entries only drop optional features
    # (single-buffered weights / in-kernel einshape relayout) if this jax/Mosaic build
    # rejects them, so the kernel always runs.
    for cfg in (dict(weight_buffers=1, relayout="einshape"),
                dict(weight_buffers=2, relayout="transpose"),
                dict(weight_buffers=2, relayout="loop")):
        try:
            return _rnn_layers_forward(data, non_pad_mask, W_ih, W_hh, b, W_proj, b_proj,
                                       time_block=time_block, batch_block=batch_block,
                                       use_bf16_mxu=use_bf16_mxu, out_dtype=out_dtype, **cfg)
        except Exception as e:   # fall back to a more conservative build
            last_err = e
    raise last_err


def _reference(data, mask, W_ih, W_hh, b, W_proj, b_proj):
    """Pure-JAX reference of the same masked-LSTM + projection (f32, original gate order)."""
    B, T, d_model = data.shape
    d_rnn = W_hh.shape[0]

    def step(carry, inp):
        h, c = carry
        x_t, m_t = inp
        gates = x_t @ W_ih + h @ W_hh + b
        i = jax.nn.sigmoid(gates[:, :d_rnn])
        f = jax.nn.sigmoid(gates[:, d_rnn:2 * d_rnn])
        g = jnp.tanh(gates[:, 2 * d_rnn:3 * d_rnn])
        o = jax.nn.sigmoid(gates[:, 3 * d_rnn:])
        c_new = f * c + i * g
        h_new = o * jnp.tanh(c_new)
        h2 = m_t * h_new + (1.0 - m_t) * h
        c2 = m_t * c_new + (1.0 - m_t) * c
        return (h2, c2), h_new * m_t

    xs = (jnp.transpose(data, (1, 0, 2)), jnp.transpose(mask, (1, 0, 2)))
    init = (jnp.zeros((B, d_rnn), jnp.float32), jnp.zeros((B, d_rnn), jnp.float32))
    _, hs = jax.lax.scan(step, init, xs)
    out = hs @ W_proj + b_proj
    return jnp.transpose(out, (1, 0, 2))


if __name__ == "__main__":
    B, T, d_model, d_rnn = 2, 8, 32, 32

    key = jax.random.PRNGKey(0)
    kx, k1, k2, k3, k4, k5, k6, kx2 = jax.random.split(key, 8)

    kscale = 1.0 / np.sqrt(d_rnn)
    W_ih = jax.random.uniform(k1, (d_model, 4 * d_rnn), jnp.float32, -kscale, kscale)
    W_hh = jax.random.uniform(k2, (d_rnn, 4 * d_rnn), jnp.float32, -kscale, kscale)
    b_ih = jax.random.uniform(k3, (4 * d_rnn,), jnp.float32, -kscale, kscale)
    b_hh = jax.random.uniform(k4, (4 * d_rnn,), jnp.float32, -kscale, kscale)
    b = (b_ih + b_hh).reshape(1, 4 * d_rnn)
    W_proj = jax.random.uniform(k5, (d_rnn, d_model), jnp.float32, -kscale, kscale)
    b_proj = jax.random.uniform(k6, (d_model,), jnp.float32, -kscale, kscale).reshape(1, d_model)

    # ---- test 1: toy shapes, single batch/time block, f32 MXU ---------------------------
    data = jax.random.normal(kx, (B, T, d_model), jnp.float32)
    lengths = jnp.array([T, T - 3], dtype=jnp.int32)                  # max(lengths) == T
    mask = (jnp.arange(T)[None, :] < lengths[:, None]).astype(jnp.float32)[..., None]

    out = jax.block_until_ready(
        rnn_layers_forward(data, mask, W_ih, W_hh, b, W_proj, b_proj, time_block=8))
    ref = _reference(data, mask, W_ih, W_hh, b, W_proj, b_proj)
    np.testing.assert_allclose(np.asarray(out), np.asarray(ref), rtol=1e-4, atol=1e-5)
    assert out.shape == (B, T, d_model)

    # ---- test 2: multiple time/batch blocks, incl. fully-padded (skipped) time blocks ----
    B2, T2 = 4, 24
    data2 = jax.random.normal(kx2, (B2, T2, d_model), jnp.float32)
    lengths2 = jnp.array([T2, 13, 8, 6], dtype=jnp.int32)             # block {2,3}: t>=8 skipped
    mask2 = (jnp.arange(T2)[None, :] < lengths2[:, None]).astype(jnp.float32)[..., None]
    out2 = jax.block_until_ready(
        rnn_layers_forward(data2, mask2, W_ih, W_hh, b, W_proj, b_proj,
                           time_block=8, batch_block=2))
    ref2 = _reference(data2, mask2, W_ih, W_hh, b, W_proj, b_proj)
    np.testing.assert_allclose(np.asarray(out2), np.asarray(ref2), rtol=1e-4, atol=1e-4)

    # ---- test 3: bf16 weights/activations on the MXU (f32 accumulate + f32 state math) ---
    out3 = jax.block_until_ready(
        rnn_layers_forward(data, mask, W_ih, W_hh, b, W_proj, b_proj,
                           time_block=8, use_bf16_mxu=True))
    np.testing.assert_allclose(np.asarray(out3), np.asarray(ref), rtol=5e-2, atol=5e-2)

    print("KERNEL_OK")
</pallas_src>

<mosaic_0001>
module attributes {stable_mosaic.version = 11 : i64} {
  func.func @_lstm_block_kernel(%arg0: i32, %arg1: i32, %arg2: memref<1xi32, #tpu.memory_space<smem>>, %arg3: memref<2x8x32xf32, #tpu.memory_space<vmem>>, %arg4: memref<2x1x1xi32, #tpu.memory_space<vmem>>, %arg5: memref<32x512xf32, #tpu.memory_space<vmem>>, %arg6: memref<128x512xf32, #tpu.memory_space<vmem>>, %arg7: memref<1x512xf32, #tpu.memory_space<vmem>>, %arg8: memref<128x128xf32, #tpu.memory_space<vmem>>, %arg9: memref<1x128xf32, #tpu.memory_space<vmem>>, %arg10: memref<2x8x128xf32, #tpu.memory_space<vmem>>, %arg11: memref<2x8x512xf32, #tpu.memory_space<vmem>>, %arg12: memref<8x2x128xf32, #tpu.memory_space<vmem>>, %arg13: memref<2x128xf32, #tpu.memory_space<vmem>>, %arg14: memref<2x128xf32, #tpu.memory_space<vmem>>) attributes {dimension_semantics = [#tpu.dimension_semantics<parallel>, #tpu.dimension_semantics<arbitrary>], iteration_bounds = array<i64: 1, 1>, scalar_prefetch = 1 : i64, scratch_operands = 4 : i64, tpu.core_type = #tpu.core_type<tc>, window_params = [{transform_indices = @transform_0, window_bounds = array<i64: 2, 8, 32>}, {transform_indices = @transform_1, window_bounds = array<i64: 2, 1, 1>}, {pipeline_mode = #tpu.pipeline_mode<synchronous>, transform_indices = @transform_2, window_bounds = array<i64: 32, 512>}, {pipeline_mode = #tpu.pipeline_mode<synchronous>, transform_indices = @transform_3, window_bounds = array<i64: 128, 512>}, {pipeline_mode = #tpu.pipeline_mode<synchronous>, transform_indices = @transform_4, window_bounds = array<i64: 1, 512>}, {pipeline_mode = #tpu.pipeline_mode<synchronous>, transform_indices = @transform_5, window_bounds = array<i64: 128, 128>}, {pipeline_mode = #tpu.pipeline_mode<synchronous>, transform_indices = @transform_6, window_bounds = array<i64: 1, 128>}, {transform_indices = @transform_7, window_bounds = array<i64: 2, 8, 128>}]} {
    %c8_i32 = arith.constant 8 : i32
    %0 = arith.muli %arg1, %c8_i32 : i32
    %c0_i32 = arith.constant 0 : i32
    %1 = arith.cmpi eq, %arg1, %c0_i32 : i32
    %2 = arith.extui %1 : i1 to i32
    %c0_i32_0 = arith.constant 0 : i32
    %3 = arith.cmpi ne, %2, %c0_i32_0 : i32
    scf.if %3 {
      %cst = arith.constant 0.000000e+00 : f32
      %12 = vector.broadcast %cst : f32 to vector<2x128xf32>
      %c0 = arith.constant 0 : index
      %c0_3 = arith.constant 0 : index
      %13 = vector.load %arg13[%c0, %c0_3] : memref<2x128xf32, #tpu.memory_space<vmem>>, vector<2x128xf32>
      tpu.vector_store %arg13[%c0, %c0_3], %12 {strides = array<i32>} : memref<2x128xf32, #tpu.memory_space<vmem>>, vector<2x128xf32>,
      %cst_4 = arith.constant 0.000000e+00 : f32
      %14 = vector.broadcast %cst_4 : f32 to vector<2x128xf32>
      %c0_5 = arith.constant 0 : index
      %c0_6 = arith.constant 0 : index
      %15 = vector.load %arg14[%c0_5, %c0_6] : memref<2x128xf32, #tpu.memory_space<vmem>>, vector<2x128xf32>
      tpu.vector_store %arg14[%c0_5, %c0_6], %14 {strides = array<i32>} : memref<2x128xf32, #tpu.memory_space<vmem>>, vector<2x128xf32>,
    } else {
    }
    %4 = arith.index_cast %arg0 : i32 to index
    %5 = memref.load %arg2[%4] : memref<1xi32, #tpu.memory_space<smem>>
    %6 = arith.cmpi slt, %0, %5 : i32
    %7 = arith.extui %6 : i1 to i32
    %c0_i32_1 = arith.constant 0 : i32
    %8 = arith.cmpi ne, %7, %c0_i32_1 : i32
    scf.if %8 {
      %c0 = arith.constant 0 : index
      %c0_3 = arith.constant 0 : index
      %c0_4 = arith.constant 0 : index
      %12 = vector.load %arg4[%c0, %c0_3, %c0_4] : memref<2x1x1xi32, #tpu.memory_space<vmem>>, vector<2x1x1xi32>
      %13 = vector.shape_cast %12 : vector<2x1x1xi32> to vector<2x1xi32>
      %c0_5 = arith.constant 0 : index
      %c0_6 = arith.constant 0 : index
      %c0_7 = arith.constant 0 : index
      %14 = vector.load %arg3[%c0_5, %c0_6, %c0_7] : memref<2x8x32xf32, #tpu.memory_space<vmem>>, vector<2x8x32xf32>
      %15 = vector.shape_cast %14 : vector<2x8x32xf32> to vector<16x32xf32>
      %c0_8 = arith.constant 0 : index
      %c0_9 = arith.constant 0 : index
      %16 = vector.load %arg5[%c0_8, %c0_9] : memref<32x512xf32, #tpu.memory_space<vmem>>, vector<32x512xf32>
      %cst = arith.constant dense<0.000000e+00> : vector<16x512xf32>
      %17 = tpu.matmul %15, %16, %cst {dimension_numbers = #tpu.dot_dimension_numbers<[1], [0], [0], [1], [0, 0, 1, 1], [], []>} : vector<16x32xf32>, vector<32x512xf32>, vector<16x512xf32> -> vector<16x512xf32>
      %c0_10 = arith.constant 0 : index
      %c0_11 = arith.constant 0 : index
      %18 = vector.load %arg7[%c0_10, %c0_11] : memref<1x512xf32, #tpu.memory_space<vmem>>, vector<1x512xf32>
      %19 = vector.broadcast %18 : vector<1x512xf32> to vector<16x512xf32>
      %20 = arith.addf %17, %19 : vector<16x512xf32>
      %21 = vector.shape_cast %20 : vector<16x512xf32> to vector<2x8x512xf32>
      %c0_12 = arith.constant 0 : index
      %c0_13 = arith.constant 0 : index
      %c0_14 = arith.constant 0 : index
      %22 = vector.load %arg11[%c0_12, %c0_13, %c0_14] : memref<2x8x512xf32, #tpu.memory_space<vmem>>, vector<2x8x512xf32>
      tpu.vector_store %arg11[%c0_12, %c0_13, %c0_14], %21 {strides = array<i32>} : memref<2x8x512xf32, #tpu.memory_space<vmem>>, vector<2x8x512xf32>,
      %c0_15 = arith.constant 0 : index
      %c0_16 = arith.constant 0 : index
      %23 = vector.load %arg6[%c0_15, %c0_16] : memref<128x512xf32, #tpu.memory_space<vmem>>, vector<128x512xf32>
      %c0_17 = arith.constant 0 : index
      %c0_18 = arith.constant 0 : index
      %24 = vector.load %arg13[%c0_17, %c0_18] : memref<2x128xf32, #tpu.memory_space<vmem>>, vector<2x128xf32>
      %c0_19 = arith.constant 0 : index
      %c0_20 = arith.constant 0 : index
      %25 = vector.load %arg14[%c0_19, %c0_20] : memref<2x128xf32, #tpu.memory_space<vmem>>, vector<2x128xf32>
      %c0_21 = arith.constant 0 : index
      %c0_22 = arith.constant 0 : index
      %c0_23 = arith.constant 0 : index
      %26 = vector.load %arg11[%c0_21, %c0_22, %c0_23] : memref<2x8x512xf32, #tpu.memory_space<vmem>>, vector<2x1x512xf32>
      %27 = vector.shape_cast %26 : vector<2x1x512xf32> to vector<2x512xf32>
      %cst_24 = arith.constant dense<0.000000e+00> : vector<2x512xf32>
      %28 = tpu.matmul %24, %23, %cst_24 {dimension_numbers = #tpu.dot_dimension_numbers<[1], [0], [0], [1], [0, 0, 1, 1], [], []>} : vector<2x128xf32>, vector<128x512xf32>, vector<2x512xf32> -> vector<2x512xf32>
      %29 = arith.addf %27, %28 : vector<2x512xf32>
      %30 = vector.extract_strided_slice %29 {offsets = [0, 0], sizes = [2, 384], strides = [1, 1]} : vector<2x512xf32> to vector<2x384xf32>
      %31 = arith.negf %30 : vector<2x384xf32>
      %32 = math.exp %31 : vector<2x384xf32>
      %cst_25 = arith.constant 1.000000e+00 : f32
      %33 = vector.broadcast %cst_25 : f32 to vector<2x384xf32>
      %34 = arith.addf %33, %32 : vector<2x384xf32>
      %35 = arith.divf %33, %34 : vector<2x384xf32>
      %36 = vector.extract_strided_slice %35 {offsets = [0, 0], sizes = [2, 128], strides = [1, 1]} : vector<2x384xf32> to vector<2x128xf32>
      %37 = vector.extract_strided_slice %35 {offsets = [0, 128], sizes = [2, 128], strides = [1, 1]} : vector<2x384xf32> to vector<2x128xf32>
      %38 = vector.extract_strided_slice %35 {offsets = [0, 256], sizes = [2, 128], strides = [1, 1]} : vector<2x384xf32> to vector<2x128xf32>
      %39 = vector.extract_strided_slice %29 {offsets = [0, 384], sizes = [2, 128], strides = [1, 1]} : vector<2x512xf32> to vector<2x128xf32>
      %40 = math.tanh %39 : vector<2x128xf32>
      %41 = arith.mulf %37, %25 : vector<2x128xf32>
      %42 = arith.mulf %36, %40 : vector<2x128xf32>
      %43 = arith.addf %41, %42 : vector<2x128xf32>
      %44 = math.tanh %43 : vector<2x128xf32>
      %45 = arith.mulf %38, %44 : vector<2x128xf32>
      %c0_i32_26 = arith.constant 0 : i32
      %46 = arith.addi %0, %c0_i32_26 : i32
      %47 = vector.broadcast %46 : i32 to vector<2x1xi32>
      %48 = arith.cmpi slt, %47, %13 : vector<2x1xi32>
      %49 = vector.shape_cast %48 : vector<2x1xi1> to vector<2x1xi1>
      %50 = vector.broadcast %49 : vector<2x1xi1> to vector<2x128xi1>
      %51 = arith.select %50, %45, %24 : vector<2x128xi1>, vector<2x128xf32>
      %52 = vector.shape_cast %48 : vector<2x1xi1> to vector<2x1xi1>
      %53 = vector.broadcast %52 : vector<2x1xi1> to vector<2x128xi1>
      %54 = arith.select %53, %43, %25 : vector<2x128xi1>, vector<2x128xf32>
      %cst_27 = arith.constant 0.000000e+00 : f32
      %55 = vector.shape_cast %48 : vector<2x1xi1> to vector<2x1xi1>
      %56 = vector.broadcast %55 : vector<2x1xi1> to vector<2x128xi1>
      %57 = vector.broadcast %cst_27 : f32 to vector<2x128xf32>
      %58 = arith.select %56, %45, %57 : vector<2x128xi1>, vector<2x128xf32>
      %c0_28 = arith.constant 0 : index
      %c0_29 = arith.constant 0 : index
      %c0_30 = arith.constant 0 : index
      %59 = vector.load %arg12[%c0_28, %c0_29, %c0_30] : memref<8x2x128xf32, #tpu.memory_space<vmem>>, vector<1x2x128xf32>
      %60 = vector.shape_cast %59 : vector<1x2x128xf32> to vector<2x128xf32>
      %61 = vector.shape_cast %58 : vector<2x128xf32> to vector<1x2x128xf32>
      tpu.vector_store %arg12[%c0_28, %c0_29, %c0_30], %61 {strides = array<i32>} : memref<8x2x128xf32, #tpu.memory_space<vmem>>, vector<1x2x128xf32>,
      %c0_31 = arith.constant 0 : index
      %c1 = arith.constant 1 : index
      %c0_32 = arith.constant 0 : index
      %62 = vector.load %arg11[%c0_31, %c1, %c0_32] : memref<2x8x512xf32, #tpu.memory_space<vmem>>, vector<2x1x512xf32>
      %63 = vector.shape_cast %62 : vector<2x1x512xf32> to vector<2x512xf32>
      %cst_33 = arith.constant dense<0.000000e+00> : vector<2x512xf32>
      %64 = tpu.matmul %51, %23, %cst_33 {dimension_numbers = #tpu.dot_dimension_numbers<[1], [0], [0], [1], [0, 0, 1, 1], [], []>} : vector<2x128xf32>, vector<128x512xf32>, vector<2x512xf32> -> vector<2x512xf32>
      %65 = arith.addf %63, %64 : vector<2x512xf32>
      %66 = vector.extract_strided_slice %65 {offsets = [0, 0], sizes = [2, 384], strides = [1, 1]} : vector<2x512xf32> to vector<2x384xf32>
      %67 = arith.negf %66 : vector<2x384xf32>
      %68 = math.exp %67 : vector<2x384xf32>
      %cst_34 = arith.constant 1.000000e+00 : f32
      %69 = vector.broadcast %cst_34 : f32 to vector<2x384xf32>
      %70 = arith.addf %69, %68 : vector<2x384xf32>
      %71 = arith.divf %69, %70 : vector<2x384xf32>
      %72 = vector.extract_strided_slice %71 {offsets = [0, 0], sizes = [2, 128], strides = [1, 1]} : vector<2x384xf32> to vector<2x128xf32>
      %73 = vector.extract_strided_slice %71 {offsets = [0, 128], sizes = [2, 128], strides = [1, 1]} : vector<2x384xf32> to vector<2x128xf32>
      %74 = vector.extract_strided_slice %71 {offsets = [0, 256], sizes = [2, 128], strides = [1, 1]} : vector<2x384xf32> to vector<2x128xf32>
      %75 = vector.extract_strided_slice %65 {offsets = [0, 384], sizes = [2, 128], strides = [1, 1]} : vector<2x512xf32> to vector<2x128xf32>
      %76 = math.tanh %75 : vector<2x128xf32>
      %77 = arith.mulf %73, %54 : vector<2x128xf32>
      %78 = arith.mulf %72, %76 : vector<2x128xf32>
      %79 = arith.addf %77, %78 : vector<2x128xf32>
      %80 = math.tanh %79 : vector<2x128xf32>
      %81 = arith.mulf %74, %80 : vector<2x128xf32>
      %c1_i32 = arith.constant 1 : i32
      %82 = arith.addi %0, %c1_i32 : i32
      %83 = vector.broadcast %82 : i32 to vector<2x1xi32>
      %84 = arith.cmpi slt, %83, %13 : vector<2x1xi32>
      %85 = vector.shape_cast %84 : vector<2x1xi1> to vector<2x1xi1>
      %86 = vector.broadcast %85 : vector<2x1xi1> to vector<2x128xi1>
      %87 = arith.select %86, %81, %51 : vector<2x128xi1>, vector<2x128xf32>
      %88 = vector.shape_cast %84 : vector<2x1xi1> to vector<2x1xi1>
      %89 = vector.broadcast %88 : vector<2x1xi1> to vector<2x128xi1>
      %90 = arith.select %89, %79, %54 : vector<2x128xi1>, vector<2x128xf32>
      %cst_35 = arith.constant 0.000000e+00 : f32
      %91 = vector.shape_cast %84 : vector<2x1xi1> to vector<2x1xi1>
      %92 = vector.broadcast %91 : vector<2x1xi1> to vector<2x128xi1>
      %93 = vector.broadcast %cst_35 : f32 to vector<2x128xf32>
      %94 = arith.select %92, %81, %93 : vector<2x128xi1>, vector<2x128xf32>
      %c1_36 = arith.constant 1 : index
      %c0_37 = arith.constant 0 : index
      %c0_38 = arith.constant 0 : index
      %95 = vector.load %arg12[%c1_36, %c0_37, %c0_38] : memref<8x2x128xf32, #tpu.memory_space<vmem>>, vector<1x2x128xf32>
      %96 = vector.shape_cast %95 : vector<1x2x128xf32> to vector<2x128xf32>
      %97 = vector.shape_cast %94 : vector<2x128xf32> to vector<1x2x128xf32>
      tpu.vector_store %arg12[%c1_36, %c0_37, %c0_38], %97 {strides = array<i32>} : memref<8x2x128xf32, #tpu.memory_space<vmem>>, vector<1x2x128xf32>,
      %c0_39 = arith.constant 0 : index
      %c2 = arith.constant 2 : index
      %c0_40 = arith.constant 0 : index
      %98 = vector.load %arg11[%c0_39, %c2, %c0_40] : memref<2x8x512xf32, #tpu.memory_space<vmem>>, vector<2x1x512xf32>
      %99 = vector.shape_cast %98 : vector<2x1x512xf32> to vector<2x512xf32>
      %cst_41 = arith.constant dense<0.000000e+00> : vector<2x512xf32>
      %100 = tpu.matmul %87, %23, %cst_41 {dimension_numbers = #tpu.dot_dimension_numbers<[1], [0], [0], [1], [0, 0, 1, 1], [], []>} : vector<2x128xf32>, vector<128x512xf32>, vector<2x512xf32> -> vector<2x512xf32>
      %101 = arith.addf %99, %100 : vector<2x512xf32>
      %102 = vector.extract_strided_slice %101 {offsets = [0, 0], sizes = [2, 384], strides = [1, 1]} : vector<2x512xf32> to vector<2x384xf32>
      %103 = arith.negf %102 : vector<2x384xf32>
      %104 = math.exp %103 : vector<2x384xf32>
      %cst_42 = arith.constant 1.000000e+00 : f32
      %105 = vector.broadcast %cst_42 : f32 to vector<2x384xf32>
      %106 = arith.addf %105, %104 : vector<2x384xf32>
      %107 = arith.divf %105, %106 : vector<2x384xf32>
      %108 = vector.extract_strided_slice %107 {offsets = [0, 0], sizes = [2, 128], strides = [1, 1]} : vector<2x384xf32> to vector<2x128xf32>
      %109 = vector.extract_strided_slice %107 {offsets = [0, 128], sizes = [2, 128], strides = [1, 1]} : vector<2x384xf32> to vector<2x128xf32>
      %110 = vector.extract_strided_slice %107 {offsets = [0, 256], sizes = [2, 128], strides = [1, 1]} : vector<2x384xf32> to vector<2x128xf32>
      %111 = vector.extract_strided_slice %101 {offsets = [0, 384], sizes = [2, 128], strides = [1, 1]} : vector<2x512xf32> to vector<2x128xf32>
      %112 = math.tanh %111 : vector<2x128xf32>
      %113 = arith.mulf %109, %90 : vector<2x128xf32>
      %114 = arith.mulf %108, %112 : vector<2x128xf32>
      %115 = arith.addf %113, %114 : vector<2x128xf32>
      %116 = math.tanh %115 : vector<2x128xf32>
      %117 = arith.mulf %110, %116 : vector<2x128xf32>
      %c2_i32 = arith.constant 2 : i32
      %118 = arith.addi %0, %c2_i32 : i32
      %119 = vector.broadcast %118 : i32 to vector<2x1xi32>
      %120 = arith.cmpi slt, %119, %13 : vector<2x1xi32>
      %121 = vector.shape_cast %120 : vector<2x1xi1> to vector<2x1xi1>
      %122 = vector.broadcast %121 : vector<2x1xi1> to vector<2x128xi1>
      %123 = arith.select %122, %117, %87 : vector<2x128xi1>, vector<2x128xf32>
      %124 = vector.shape_cast %120 : vector<2x1xi1> to vector<2x1xi1>
      %125 = vector.broadcast %124 : vector<2x1xi1> to vector<2x128xi1>
      %126 = arith.select %125, %115, %90 : vector<2x128xi1>, vector<2x128xf32>
      %cst_43 = arith.constant 0.000000e+00 : f32
      %127 = vector.shape_cast %120 : vector<2x1xi1> to vector<2x1xi1>
      %128 = vector.broadcast %127 : vector<2x1xi1> to vector<2x128xi1>
      %129 = vector.broadcast %cst_43 : f32 to vector<2x128xf32>
      %130 = arith.select %128, %117, %129 : vector<2x128xi1>, vector<2x128xf32>
      %c2_44 = arith.constant 2 : index
      %c0_45 = arith.constant 0 : index
      %c0_46 = arith.constant 0 : index
      %131 = vector.load %arg12[%c2_44, %c0_45, %c0_46] : memref<8x2x128xf32, #tpu.memory_space<vmem>>, vector<1x2x128xf32>
      %132 = vector.shape_cast %131 : vector<1x2x128xf32> to vector<2x128xf32>
      %133 = vector.shape_cast %130 : vector<2x128xf32> to vector<1x2x128xf32>
      tpu.vector_store %arg12[%c2_44, %c0_45, %c0_46], %133 {strides = array<i32>} : memref<8x2x128xf32, #tpu.memory_space<vmem>>, vector<1x2x128xf32>,
      %c0_47 = arith.constant 0 : index
      %c3 = arith.constant 3 : index
      %c0_48 = arith.constant 0 : index
      %134 = vector.load %arg11[%c0_47, %c3, %c0_48] : memref<2x8x512xf32, #tpu.memory_space<vmem>>, vector<2x1x512xf32>
      %135 = vector.shape_cast %134 : vector<2x1x512xf32> to vector<2x512xf32>
      %cst_49 = arith.constant dense<0.000000e+00> : vector<2x512xf32>
      %136 = tpu.matmul %123, %23, %cst_49 {dimension_numbers = #tpu.dot_dimension_numbers<[1], [0], [0], [1], [0, 0, 1, 1], [], []>} : vector<2x128xf32>, vector<128x512xf32>, vector<2x512xf32> -> vector<2x512xf32>
      %137 = arith.addf %135, %136 : vector<2x512xf32>
      %138 = vector.extract_strided_slice %137 {offsets = [0, 0], sizes = [2, 384], strides = [1, 1]} : vector<2x512xf32> to vector<2x384xf32>
      %139 = arith.negf %138 : vector<2x384xf32>
      %140 = math.exp %139 : vector<2x384xf32>
      %cst_50 = arith.constant 1.000000e+00 : f32
      %141 = vector.broadcast %cst_50 : f32 to vector<2x384xf32>
      %142 = arith.addf %141, %140 : vector<2x384xf32>
      %143 = arith.divf %141, %142 : vector<2x384xf32>
      %144 = vector.extract_strided_slice %143 {offsets = [0, 0], sizes = [2, 128], strides = [1, 1]} : vector<2x384xf32> to vector<2x128xf32>
      %145 = vector.extract_strided_slice %143 {offsets = [0, 128], sizes = [2, 128], strides = [1, 1]} : vector<2x384xf32> to vector<2x128xf32>
      %146 = vector.extract_strided_slice %143 {offsets = [0, 256], sizes = [2, 128], strides = [1, 1]} : vector<2x384xf32> to vector<2x128xf32>
      %147 = vector.extract_strided_slice %137 {offsets = [0, 384], sizes = [2, 128], strides = [1, 1]} : vector<2x512xf32> to vector<2x128xf32>
      %148 = math.tanh %147 : vector<2x128xf32>
      %149 = arith.mulf %145, %126 : vector<2x128xf32>
      %150 = arith.mulf %144, %148 : vector<2x128xf32>
      %151 = arith.addf %149, %150 : vector<2x128xf32>
      %152 = math.tanh %151 : vector<2x128xf32>
      %153 = arith.mulf %146, %152 : vector<2x128xf32>
      %c3_i32 = arith.constant 3 : i32
      %154 = arith.addi %0, %c3_i32 : i32
      %155 = vector.broadcast %154 : i32 to vector<2x1xi32>
      %156 = arith.cmpi slt, %155, %13 : vector<2x1xi32>
      %157 = vector.shape_cast %156 : vector<2x1xi1> to vector<2x1xi1>
      %158 = vector.broadcast %157 : vector<2x1xi1> to vector<2x128xi1>
      %159 = arith.select %158, %153, %123 : vector<2x128xi1>, vector<2x128xf32>
      %160 = vector.shape_cast %156 : vector<2x1xi1> to vector<2x1xi1>
      %161 = vector.broadcast %160 : vector<2x1xi1> to vector<2x128xi1>
      %162 = arith.select %161, %151, %126 : vector<2x128xi1>, vector<2x128xf32>
      %cst_51 = arith.constant 0.000000e+00 : f32
      %163 = vector.shape_cast %156 : vector<2x1xi1> to vector<2x1xi1>
      %164 = vector.broadcast %163 : vector<2x1xi1> to vector<2x128xi1>
      %165 = vector.broadcast %cst_51 : f32 to vector<2x128xf32>
      %166 = arith.select %164, %153, %165 : vector<2x128xi1>, vector<2x128xf32>
      %c3_52 = arith.constant 3 : index
      %c0_53 = arith.constant 0 : index
      %c0_54 = arith.constant 0 : index
      %167 = vector.load %arg12[%c3_52, %c0_53, %c0_54] : memref<8x2x128xf32, #tpu.memory_space<vmem>>, vector<1x2x128xf32>
      %168 = vector.shape_cast %167 : vector<1x2x128xf32> to vector<2x128xf32>
      %169 = vector.shape_cast %166 : vector<2x128xf32> to vector<1x2x128xf32>
      tpu.vector_store %arg12[%c3_52, %c0_53, %c0_54], %169 {strides = array<i32>} : memref<8x2x128xf32, #tpu.memory_space<vmem>>, vector<1x2x128xf32>,
      %c0_55 = arith.constant 0 : index
      %c4 = arith.constant 4 : index
      %c0_56 = arith.constant 0 : index
      %170 = vector.load %arg11[%c0_55, %c4, %c0_56] : memref<2x8x512xf32, #tpu.memory_space<vmem>>, vector<2x1x512xf32>
      %171 = vector.shape_cast %170 : vector<2x1x512xf32> to vector<2x512xf32>
      %cst_57 = arith.constant dense<0.000000e+00> : vector<2x512xf32>
      %172 = tpu.matmul %159, %23, %cst_57 {dimension_numbers = #tpu.dot_dimension_numbers<[1], [0], [0], [1], [0, 0, 1, 1], [], []>} : vector<2x128xf32>, vector<128x512xf32>, vector<2x512xf32> -> vector<2x512xf32>
      %173 = arith.addf %171, %172 : vector<2x512xf32>
      %174 = vector.extract_strided_slice %173 {offsets = [0, 0], sizes = [2, 384], strides = [1, 1]} : vector<2x512xf32> to vector<2x384xf32>
      %175 = arith.negf %174 : vector<2x384xf32>
      %176 = math.exp %175 : vector<2x384xf32>
      %cst_58 = arith.constant 1.000000e+00 : f32
      %177 = vector.broadcast %cst_58 : f32 to vector<2x384xf32>
      %178 = arith.addf %177, %176 : vector<2x384xf32>
      %179 = arith.divf %177, %178 : vector<2x384xf32>
      %180 = vector.extract_strided_slice %179 {offsets = [0, 0], sizes = [2, 128], strides = [1, 1]} : vector<2x384xf32> to vector<2x128xf32>
      %181 = vector.extract_strided_slice %179 {offsets = [0, 128], sizes = [2, 128], strides = [1, 1]} : vector<2x384xf32> to vector<2x128xf32>
      %182 = vector.extract_strided_slice %179 {offsets = [0, 256], sizes = [2, 128], strides = [1, 1]} : vector<2x384xf32> to vector<2x128xf32>
      %183 = vector.extract_strided_slice %173 {offsets = [0, 384], sizes = [2, 128], strides = [1, 1]} : vector<2x512xf32> to vector<2x128xf32>
      %184 = math.tanh %183 : vector<2x128xf32>
      %185 = arith.mulf %181, %162 : vector<2x128xf32>
      %186 = arith.mulf %180, %184 : vector<2x128xf32>
      %187 = arith.addf %185, %186 : vector<2x128xf32>
      %188 = math.tanh %187 : vector<2x128xf32>
      %189 = arith.mulf %182, %188 : vector<2x128xf32>
      %c4_i32 = arith.constant 4 : i32
      %190 = arith.addi %0, %c4_i32 : i32
      %191 = vector.broadcast %190 : i32 to vector<2x1xi32>
      %192 = arith.cmpi slt, %191, %13 : vector<2x1xi32>
      %193 = vector.shape_cast %192 : vector<2x1xi1> to vector<2x1xi1>
      %194 = vector.broadcast %193 : vector<2x1xi1> to vector<2x128xi1>
      %195 = arith.select %194, %189, %159 : vector<2x128xi1>, vector<2x128xf32>
      %196 = vector.shape_cast %192 : vector<2x1xi1> to vector<2x1xi1>
      %197 = vector.broadcast %196 : vector<2x1xi1> to vector<2x128xi1>
      %198 = arith.select %197, %187, %162 : vector<2x128xi1>, vector<2x128xf32>
      %cst_59 = arith.constant 0.000000e+00 : f32
      %199 = vector.shape_cast %192 : vector<2x1xi1> to vector<2x1xi1>
      %200 = vector.broadcast %199 : vector<2x1xi1> to vector<2x128xi1>
      %201 = vector.broadcast %cst_59 : f32 to vector<2x128xf32>
      %202 = arith.select %200, %189, %201 : vector<2x128xi1>, vector<2x128xf32>
      %c4_60 = arith.constant 4 : index
      %c0_61 = arith.constant 0 : index
      %c0_62 = arith.constant 0 : index
      %203 = vector.load %arg12[%c4_60, %c0_61, %c0_62] : memref<8x2x128xf32, #tpu.memory_space<vmem>>, vector<1x2x128xf32>
      %204 = vector.shape_cast %203 : vector<1x2x128xf32> to vector<2x128xf32>
      %205 = vector.shape_cast %202 : vector<2x128xf32> to vector<1x2x128xf32>
      tpu.vector_store %arg12[%c4_60, %c0_61, %c0_62], %205 {strides = array<i32>} : memref<8x2x128xf32, #tpu.memory_space<vmem>>, vector<1x2x128xf32>,
      %c0_63 = arith.constant 0 : index
      %c5 = arith.constant 5 : index
      %c0_64 = arith.constant 0 : index
      %206 = vector.load %arg11[%c0_63, %c5, %c0_64] : memref<2x8x512xf32, #tpu.memory_space<vmem>>, vector<2x1x512xf32>
      %207 = vector.shape_cast %206 : vector<2x1x512xf32> to vector<2x512xf32>
      %cst_65 = arith.constant dense<0.000000e+00> : vector<2x512xf32>
      %208 = tpu.matmul %195, %23, %cst_65 {dimension_numbers = #tpu.dot_dimension_numbers<[1], [0], [0], [1], [0, 0, 1, 1], [], []>} : vector<2x128xf32>, vector<128x512xf32>, vector<2x512xf32> -> vector<2x512xf32>
      %209 = arith.addf %207, %208 : vector<2x512xf32>
      %210 = vector.extract_strided_slice %209 {offsets = [0, 0], sizes = [2, 384], strides = [1, 1]} : vector<2x512xf32> to vector<2x384xf32>
      %211 = arith.negf %210 : vector<2x384xf32>
      %212 = math.exp %211 : vector<2x384xf32>
      %cst_66 = arith.constant 1.000000e+00 : f32
      %213 = vector.broadcast %cst_66 : f32 to vector<2x384xf32>
      %214 = arith.addf %213, %212 : vector<2x384xf32>
      %215 = arith.divf %213, %214 : vector<2x384xf32>
      %216 = vector.extract_strided_slice %215 {offsets = [0, 0], sizes = [2, 128], strides = [1, 1]} : vector<2x384xf32> to vector<2x128xf32>
      %217 = vector.extract_strided_slice %215 {offsets = [0, 128], sizes = [2, 128], strides = [1, 1]} : vector<2x384xf32> to vector<2x128xf32>
      %218 = vector.extract_strided_slice %215 {offsets = [0, 256], sizes = [2, 128], strides = [1, 1]} : vector<2x384xf32> to vector<2x128xf32>
      %219 = vector.extract_strided_slice %209 {offsets = [0, 384], sizes = [2, 128], strides = [1, 1]} : vector<2x512xf32> to vector<2x128xf32>
      %220 = math.tanh %219 : vector<2x128xf32>
      %221 = arith.mulf %217, %198 : vector<2x128xf32>
      %222 = arith.mulf %216, %220 : vector<2x128xf32>
      %223 = arith.addf %221, %222 : vector<2x128xf32>
      %224 = math.tanh %223 : vector<2x128xf32>
      %225 = arith.mulf %218, %224 : vector<2x128xf32>
      %c5_i32 = arith.constant 5 : i32
      %226 = arith.addi %0, %c5_i32 : i32
      %227 = vector.broadcast %226 : i32 to vector<2x1xi32>
      %228 = arith.cmpi slt, %227, %13 : vector<2x1xi32>
      %229 = vector.shape_cast %228 : vector<2x1xi1> to vector<2x1xi1>
      %230 = vector.broadcast %229 : vector<2x1xi1> to vector<2x128xi1>
      %231 = arith.select %230, %225, %195 : vector<2x128xi1>, vector<2x128xf32>
      %232 = vector.shape_cast %228 : vector<2x1xi1> to vector<2x1xi1>
      %233 = vector.broadcast %232 : vector<2x1xi1> to vector<2x128xi1>
      %234 = arith.select %233, %223, %198 : vector<2x128xi1>, vector<2x128xf32>
      %cst_67 = arith.constant 0.000000e+00 : f32
      %235 = vector.shape_cast %228 : vector<2x1xi1> to vector<2x1xi1>
      %236 = vector.broadcast %235 : vector<2x1xi1> to vector<2x128xi1>
      %237 = vector.broadcast %cst_67 : f32 to vector<2x128xf32>
      %238 = arith.select %236, %225, %237 : vector<2x128xi1>, vector<2x128xf32>
      %c5_68 = arith.constant 5 : index
      %c0_69 = arith.constant 0 : index
      %c0_70 = arith.constant 0 : index
      %239 = vector.load %arg12[%c5_68, %c0_69, %c0_70] : memref<8x2x128xf32, #tpu.memory_space<vmem>>, vector<1x2x128xf32>
      %240 = vector.shape_cast %239 : vector<1x2x128xf32> to vector<2x128xf32>
      %241 = vector.shape_cast %238 : vector<2x128xf32> to vector<1x2x128xf32>
      tpu.vector_store %arg12[%c5_68, %c0_69, %c0_70], %241 {strides = array<i32>} : memref<8x2x128xf32, #tpu.memory_space<vmem>>, vector<1x2x128xf32>,
      %c0_71 = arith.constant 0 : index
      %c6 = arith.constant 6 : index
      %c0_72 = arith.constant 0 : index
      %242 = vector.load %arg11[%c0_71, %c6, %c0_72] : memref<2x8x512xf32, #tpu.memory_space<vmem>>, vector<2x1x512xf32>
      %243 = vector.shape_cast %242 : vector<2x1x512xf32> to vector<2x512xf32>
      %cst_73 = arith.constant dense<0.000000e+00> : vector<2x512xf32>
      %244 = tpu.matmul %231, %23, %cst_73 {dimension_numbers = #tpu.dot_dimension_numbers<[1], [0], [0], [1], [0, 0, 1, 1], [], []>} : vector<2x128xf32>, vector<128x512xf32>, vector<2x512xf32> -> vector<2x512xf32>
      %245 = arith.addf %243, %244 : vector<2x512xf32>
      %246 = vector.extract_strided_slice %245 {offsets = [0, 0], sizes = [2, 384], strides = [1, 1]} : vector<2x512xf32> to vector<2x384xf32>
      %247 = arith.negf %246 : vector<2x384xf32>
      %248 = math.exp %247 : vector<2x384xf32>
      %cst_74 = arith.constant 1.000000e+00 : f32
      %249 = vector.broadcast %cst_74 : f32 to vector<2x384xf32>
      %250 = arith.addf %249, %248 : vector<2x384xf32>
      %251 = arith.divf %249, %250 : vector<2x384xf32>
      %252 = vector.extract_strided_slice %251 {offsets = [0, 0], sizes = [2, 128], strides = [1, 1]} : vector<2x384xf32> to vector<2x128xf32>
      %253 = vector.extract_strided_slice %251 {offsets = [0, 128], sizes = [2, 128], strides = [1, 1]} : vector<2x384xf32> to vector<2x128xf32>
      %254 = vector.extract_strided_slice %251 {offsets = [0, 256], sizes = [2, 128], strides = [1, 1]} : vector<2x384xf32> to vector<2x128xf32>
      %255 = vector.extract_strided_slice %245 {offsets = [0, 384], sizes = [2, 128], strides = [1, 1]} : vector<2x512xf32> to vector<2x128xf32>
      %256 = math.tanh %255 : vector<2x128xf32>
      %257 = arith.mulf %253, %234 : vector<2x128xf32>
      %258 = arith.mulf %252, %256 : vector<2x128xf32>
      %259 = arith.addf %257, %258 : vector<2x128xf32>
      %260 = math.tanh %259 : vector<2x128xf32>
      %261 = arith.mulf %254, %260 : vector<2x128xf32>
      %c6_i32 = arith.constant 6 : i32
      %262 = arith.addi %0, %c6_i32 : i32
      %263 = vector.broadcast %262 : i32 to vector<2x1xi32>
      %264 = arith.cmpi slt, %263, %13 : vector<2x1xi32>
      %265 = vector.shape_cast %264 : vector<2x1xi1> to vector<2x1xi1>
      %266 = vector.broadcast %265 : vector<2x1xi1> to vector<2x128xi1>
      %267 = arith.select %266, %261, %231 : vector<2x128xi1>, vector<2x128xf32>
      %268 = vector.shape_cast %264 : vector<2x1xi1> to vector<2x1xi1>
      %269 = vector.broadcast %268 : vector<2x1xi1> to vector<2x128xi1>
      %270 = arith.select %269, %259, %234 : vector<2x128xi1>, vector<2x128xf32>
      %cst_75 = arith.constant 0.000000e+00 : f32
      %271 = vector.shape_cast %264 : vector<2x1xi1> to vector<2x1xi1>
      %272 = vector.broadcast %271 : vector<2x1xi1> to vector<2x128xi1>
      %273 = vector.broadcast %cst_75 : f32 to vector<2x128xf32>
      %274 = arith.select %272, %261, %273 : vector<2x128xi1>, vector<2x128xf32>
      %c6_76 = arith.constant 6 : index
      %c0_77 = arith.constant 0 : index
      %c0_78 = arith.constant 0 : index
      %275 = vector.load %arg12[%c6_76, %c0_77, %c0_78] : memref<8x2x128xf32, #tpu.memory_space<vmem>>, vector<1x2x128xf32>
      %276 = vector.shape_cast %275 : vector<1x2x128xf32> to vector<2x128xf32>
      %277 = vector.shape_cast %274 : vector<2x128xf32> to vector<1x2x128xf32>
      tpu.vector_store %arg12[%c6_76, %c0_77, %c0_78], %277 {strides = array<i32>} : memref<8x2x128xf32, #tpu.memory_space<vmem>>, vector<1x2x128xf32>,
      %c0_79 = arith.constant 0 : index
      %c7 = arith.constant 7 : index
      %c0_80 = arith.constant 0 : index
      %278 = vector.load %arg11[%c0_79, %c7, %c0_80] : memref<2x8x512xf32, #tpu.memory_space<vmem>>, vector<2x1x512xf32>
      %279 = vector.shape_cast %278 : vector<2x1x512xf32> to vector<2x512xf32>
      %cst_81 = arith.constant dense<0.000000e+00> : vector<2x512xf32>
      %280 = tpu.matmul %267, %23, %cst_81 {dimension_numbers = #tpu.dot_dimension_numbers<[1], [0], [0], [1], [0, 0, 1, 1], [], []>} : vector<2x128xf32>, vector<128x512xf32>, vector<2x512xf32> -> vector<2x512xf32>
      %281 = arith.addf %279, %280 : vector<2x512xf32>
      %282 = vector.extract_strided_slice %281 {offsets = [0, 0], sizes = [2, 384], strides = [1, 1]} : vector<2x512xf32> to vector<2x384xf32>
      %283 = arith.negf %282 : vector<2x384xf32>
      %284 = math.exp %283 : vector<2x384xf32>
      %cst_82 = arith.constant 1.000000e+00 : f32
      %285 = vector.broadcast %cst_82 : f32 to vector<2x384xf32>
      %286 = arith.addf %285, %284 : vector<2x384xf32>
      %287 = arith.divf %285, %286 : vector<2x384xf32>
      %288 = vector.extract_strided_slice %287 {offsets = [0, 0], sizes = [2, 128], strides = [1, 1]} : vector<2x384xf32> to vector<2x128xf32>
      %289 = vector.extract_strided_slice %287 {offsets = [0, 128], sizes = [2, 128], strides = [1, 1]} : vector<2x384xf32> to vector<2x128xf32>
      %290 = vector.extract_strided_slice %287 {offsets = [0, 256], sizes = [2, 128], strides = [1, 1]} : vector<2x384xf32> to vector<2x128xf32>
      %291 = vector.extract_strided_slice %281 {offsets = [0, 384], sizes = [2, 128], strides = [1, 1]} : vector<2x512xf32> to vector<2x128xf32>
      %292 = math.tanh %291 : vector<2x128xf32>
      %293 = arith.mulf %289, %270 : vector<2x128xf32>
      %294 = arith.mulf %288, %292 : vector<2x128xf32>
      %295 = arith.addf %293, %294 : vector<2x128xf32>
      %296 = math.tanh %295 : vector<2x128xf32>
      %297 = arith.mulf %290, %296 : vector<2x128xf32>
      %c7_i32 = arith.constant 7 : i32
      %298 = arith.addi %0, %c7_i32 : i32
      %299 = vector.broadcast %298 : i32 to vector<2x1xi32>
      %300 = arith.cmpi slt, %299, %13 : vector<2x1xi32>
      %301 = vector.shape_cast %300 : vector<2x1xi1> to vector<2x1xi1>
      %302 = vector.broadcast %301 : vector<2x1xi1> to vector<2x128xi1>
      %303 = arith.select %302, %297, %267 : vector<2x128xi1>, vector<2x128xf32>
      %304 = vector.shape_cast %300 : vector<2x1xi1> to vector<2x1xi1>
      %305 = vector.broadcast %304 : vector<2x1xi1> to vector<2x128xi1>
      %306 = arith.select %305, %295, %270 : vector<2x128xi1>, vector<2x128xf32>
      %cst_83 = arith.constant 0.000000e+00 : f32
      %307 = vector.shape_cast %300 : vector<2x1xi1> to vector<2x1xi1>
      %308 = vector.broadcast %307 : vector<2x1xi1> to vector<2x128xi1>
      %309 = vector.broadcast %cst_83 : f32 to vector<2x128xf32>
      %310 = arith.select %308, %297, %309 : vector<2x128xi1>, vector<2x128xf32>
      %c7_84 = arith.constant 7 : index
      %c0_85 = arith.constant 0 : index
      %c0_86 = arith.constant 0 : index
      %311 = vector.load %arg12[%c7_84, %c0_85, %c0_86] : memref<8x2x128xf32, #tpu.memory_space<vmem>>, vector<1x2x128xf32>
      %312 = vector.shape_cast %311 : vector<1x2x128xf32> to vector<2x128xf32>
      %313 = vector.shape_cast %310 : vector<2x128xf32> to vector<1x2x128xf32>
      tpu.vector_store %arg12[%c7_84, %c0_85, %c0_86], %313 {strides = array<i32>} : memref<8x2x128xf32, #tpu.memory_space<vmem>>, vector<1x2x128xf32>,
      %c0_87 = arith.constant 0 : index
      %c0_88 = arith.constant 0 : index
      %314 = vector.load %arg13[%c0_87, %c0_88] : memref<2x128xf32, #tpu.memory_space<vmem>>, vector<2x128xf32>
      tpu.vector_store %arg13[%c0_87, %c0_88], %303 {strides = array<i32>} : memref<2x128xf32, #tpu.memory_space<vmem>>, vector<2x128xf32>,
      %c0_89 = arith.constant 0 : index
      %c0_90 = arith.constant 0 : index
      %315 = vector.load %arg14[%c0_89, %c0_90] : memref<2x128xf32, #tpu.memory_space<vmem>>, vector<2x128xf32>
      tpu.vector_store %arg14[%c0_89, %c0_90], %306 {strides = array<i32>} : memref<2x128xf32, #tpu.memory_space<vmem>>, vector<2x128xf32>,
      %c0_91 = arith.constant 0 : index
      %c0_92 = arith.constant 0 : index
      %c0_93 = arith.constant 0 : index
      %316 = vector.load %arg12[%c0_91, %c0_92, %c0_93] : memref<8x2x128xf32, #tpu.memory_space<vmem>>, vector<8x2x128xf32>
      %317 = vector.shape_cast %316 : vector<8x2x128xf32> to vector<16x128xf32>
      %c0_94 = arith.constant 0 : index
      %c0_95 = arith.constant 0 : index
      %318 = vector.load %arg8[%c0_94, %c0_95] : memref<128x128xf32, #tpu.memory_space<vmem>>, vector<128x128xf32>
      %cst_96 = arith.constant dense<0.000000e+00> : vector<16x128xf32>
      %319 = tpu.matmul %317, %318, %cst_96 {dimension_numbers = #tpu.dot_dimension_numbers<[1], [0], [0], [1], [0, 0, 1, 1], [], []>} : vector<16x128xf32>, vector<128x128xf32>, vector<16x128xf32> -> vector<16x128xf32>
      %320 = vector.shape_cast %319 : vector<16x128xf32> to vector<8x2x128xf32>
      %c0_97 = arith.constant 0 : index
      %c0_98 = arith.constant 0 : index
      %321 = vector.load %arg9[%c0_97, %c0_98] : memref<1x128xf32, #tpu.memory_space<vmem>>, vector<1x128xf32>
      %322 = vector.shape_cast %321 : vector<1x128xf32> to vector<1x1x128xf32>
      %323 = vector.broadcast %322 : vector<1x1x128xf32> to vector<8x2x128xf32>
      %324 = arith.addf %320, %323 : vector<8x2x128xf32>
      %325 = tpu.transpose %324, [1, 0, 2] : vector<8x2x128xf32> -> vector<2x8x128xf32>
      %c0_99 = arith.constant 0 : index
      %c0_100 = arith.constant 0 : index
      %c0_101 = arith.constant 0 : index
      %326 = vector.load %arg10[%c0_99, %c0_100, %c0_101] : memref<2x8x128xf32, #tpu.memory_space<vmem>>, vector<2x8x128xf32>
      tpu.vector_store %arg10[%c0_99, %c0_100, %c0_101], %325 {strides = array<i32>} : memref<2x8x128xf32, #tpu.memory_space<vmem>>, vector<2x8x128xf32>,
    } else {
    }
    %9 = arith.cmpi sge, %0, %5 : i32
    %10 = arith.extui %9 : i1 to i32
    %c0_i32_2 = arith.constant 0 : i32
    %11 = arith.cmpi ne, %10, %c0_i32_2 : i32
    scf.if %11 {
      %c0 = arith.constant 0 : index
      %c0_3 = arith.constant 0 : index
      %12 = vector.load %arg9[%c0, %c0_3] : memref<1x128xf32, #tpu.memory_space<vmem>>, vector<1x128xf32>
      %13 = vector.shape_cast %12 : vector<1x128xf32> to vector<1x1x128xf32>
      %14 = vector.shape_cast %13 : vector<1x1x128xf32> to vector<1x1x128xf32>
      %15 = vector.broadcast %14 : vector<1x1x128xf32> to vector<2x8x128xf32>
      %c0_4 = arith.constant 0 : index
      %c0_5 = arith.constant 0 : index
      %c0_6 = arith.constant 0 : index
      %16 = vector.load %arg10[%c0_4, %c0_5, %c0_6] : memref<2x8x128xf32, #tpu.memory_space<vmem>>, vector<2x8x128xf32>
      tpu.vector_store %arg10[%c0_4, %c0_5, %c0_6], %15 {strides = array<i32>} : memref<2x8x128xf32, #tpu.memory_space<vmem>>, vector<2x8x128xf32>,
    } else {
    }
    return
  }
  func.func @transform_0(%arg0: i32, %arg1: i32, %arg2: memref<1xi32, #tpu.memory_space<smem>>) -> (i32, i32, i32) {
    %c0_i32 = arith.constant 0 : i32
    %c0_i32_0 = arith.constant 0 : i32
    return %arg0, %arg1, %c0_i32 : i32, i32, i32
  }
  func.func @transform_1(%arg0: i32, %arg1: i32, %arg2: memref<1xi32, #tpu.memory_space<smem>>) -> (i32, i32, i32) {
    %c0_i32 = arith.constant 0 : i32
    %c0_i32_0 = arith.constant 0 : i32
    %c0_i32_1 = arith.constant 0 : i32
    return %arg0, %c0_i32, %c0_i32_0 : i32, i32, i32
  }
  func.func @transform_2(%arg0: i32, %arg1: i32, %arg2: memref<1xi32, #tpu.memory_space<smem>>) -> (i32, i32) {
    %c0_i32 = arith.constant 0 : i32
    %c0_i32_0 = arith.constant 0 : i32
    %c0_i32_1 = arith.constant 0 : i32
    return %c0_i32, %c0_i32_0 : i32, i32
  }
  func.func @transform_3(%arg0: i32, %arg1: i32, %arg2: memref<1xi32, #tpu.memory_space<smem>>) -> (i32, i32) {
    %c0_i32 = arith.constant 0 : i32
    %c0_i32_0 = arith.constant 0 : i32
    %c0_i32_1 = arith.constant 0 : i32
    return %c0_i32, %c0_i32_0 : i32, i32
  }
  func.func @transform_4(%arg0: i32, %arg1: i32, %arg2: memref<1xi32, #tpu.memory_space<smem>>) -> (i32, i32) {
    %c0_i32 = arith.constant 0 : i32
    %c0_i32_0 = arith.constant 0 : i32
    %c0_i32_1 = arith.constant 0 : i32
    return %c0_i32, %c0_i32_0 : i32, i32
  }
  func.func @transform_5(%arg0: i32, %arg1: i32, %arg2: memref<1xi32, #tpu.memory_space<smem>>) -> (i32, i32) {
    %c0_i32 = arith.constant 0 : i32
    %c0_i32_0 = arith.constant 0 : i32
    %c0_i32_1 = arith.constant 0 : i32
    return %c0_i32, %c0_i32_0 : i32, i32
  }
  func.func @transform_6(%arg0: i32, %arg1: i32, %arg2: memref<1xi32, #tpu.memory_space<smem>>) -> (i32, i32) {
    %c0_i32 = arith.constant 0 : i32
    %c0_i32_0 = arith.constant 0 : i32
    %c0_i32_1 = arith.constant 0 : i32
    return %c0_i32, %c0_i32_0 : i32, i32
  }
  func.func @transform_7(%arg0: i32, %arg1: i32, %arg2: memref<1xi32, #tpu.memory_space<smem>>) -> (i32, i32, i32) {
    %c0_i32 = arith.constant 0 : i32
    %c0_i32_0 = arith.constant 0 : i32
    return %arg0, %arg1, %c0_i32 : i32, i32, i32
  }
}

module attributes {stable_mosaic.version = 11 : i64} {
  func.func @_lstm_block_kernel(%arg0: i32, %arg1: i32, %arg2: memref<1xi32, #tpu.memory_space<smem>>, %arg3: memref<2x8x32xf32, #tpu.memory_space<vmem>>, %arg4: memref<2x1x1xi32, #tpu.memory_space<vmem>>, %arg5: memref<32x512xf32, #tpu.memory_space<vmem>>, %arg6: memref<128x512xf32, #tpu.memory_space<vmem>>, %arg7: memref<1x512xf32, #tpu.memory_space<vmem>>, %arg8: memref<128x128xf32, #tpu.memory_space<vmem>>, %arg9: memref<1x128xf32, #tpu.memory_space<vmem>>, %arg10: memref<2x8x128xf32, #tpu.memory_space<vmem>>, %arg11: memref<2x8x512xf32, #tpu.memory_space<vmem>>, %arg12: memref<8x2x128xf32, #tpu.memory_space<vmem>>, %arg13: memref<2x128xf32, #tpu.memory_space<vmem>>, %arg14: memref<2x128xf32, #tpu.memory_space<vmem>>) attributes {dimension_semantics = [#tpu.dimension_semantics<parallel>, #tpu.dimension_semantics<arbitrary>], iteration_bounds = array<i64: 1, 1>, scalar_prefetch = 1 : i64, scratch_operands = 4 : i64, tpu.core_type = #tpu.core_type<tc>, window_params = [{transform_indices = @transform_0, window_bounds = array<i64: 2, 8, 32>}, {transform_indices = @transform_1, window_bounds = array<i64: 2, 1, 1>}, {pipeline_mode = #tpu.pipeline_mode<synchronous>, transform_indices = @transform_2, window_bounds = array<i64: 32, 512>}, {pipeline_mode = #tpu.pipeline_mode<synchronous>, transform_indices = @transform_3, window_bounds = array<i64: 128, 512>}, {pipeline_mode = #tpu.pipeline_mode<synchronous>, transform_indices = @transform_4, window_bounds = array<i64: 1, 512>}, {pipeline_mode = #tpu.pipeline_mode<synchronous>, transform_indices = @transform_5, window_bounds = array<i64: 128, 128>}, {pipeline_mode = #tpu.pipeline_mode<synchronous>, transform_indices = @transform_6, window_bounds = array<i64: 1, 128>}, {transform_indices = @transform_7, window_bounds = array<i64: 2, 8, 128>}]} {
    %c8_i32 = arith.constant 8 : i32
    %0 = arith.muli %arg1, %c8_i32 : i32
    %c0_i32 = arith.constant 0 : i32
    %1 = arith.cmpi eq, %arg1, %c0_i32 : i32
    %2 = arith.extui %1 : i1 to i32
    %c0_i32_0 = arith.constant 0 : i32
    %3 = arith.cmpi ne, %2, %c0_i32_0 : i32
    scf.if %3 {
      %cst = arith.constant 0.000000e+00 : f32
      %12 = vector.broadcast %cst : f32 to vector<2x128xf32>
      %c0 = arith.constant 0 : index
      %c0_3 = arith.constant 0 : index
      %13 = vector.load %arg13[%c0, %c0_3] : memref<2x128xf32, #tpu.memory_space<vmem>>, vector<2x128xf32>
      tpu.vector_store %arg13[%c0, %c0_3], %12 {strides = array<i32>} : memref<2x128xf32, #tpu.memory_space<vmem>>, vector<2x128xf32>,
      %cst_4 = arith.constant 0.000000e+00 : f32
      %14 = vector.broadcast %cst_4 : f32 to vector<2x128xf32>
      %c0_5 = arith.constant 0 : index
      %c0_6 = arith.constant 0 : index
      %15 = vector.load %arg14[%c0_5, %c0_6] : memref<2x128xf32, #tpu.memory_space<vmem>>, vector<2x128xf32>
      tpu.vector_store %arg14[%c0_5, %c0_6], %14 {strides = array<i32>} : memref<2x128xf32, #tpu.memory_space<vmem>>, vector<2x128xf32>,
    } else {
    }
    %4 = arith.index_cast %arg0 : i32 to index
    %5 = memref.load %arg2[%4] : memref<1xi32, #tpu.memory_space<smem>>
    %6 = arith.cmpi slt, %0, %5 : i32
    %7 = arith.extui %6 : i1 to i32
    %c0_i32_1 = arith.constant 0 : i32
    %8 = arith.cmpi ne, %7, %c0_i32_1 : i32
    scf.if %8 {
      %c0 = arith.constant 0 : index
      %c0_3 = arith.constant 0 : index
      %c0_4 = arith.constant 0 : index
      %12 = vector.load %arg4[%c0, %c0_3, %c0_4] : memref<2x1x1xi32, #tpu.memory_space<vmem>>, vector<2x1x1xi32>
      %13 = vector.shape_cast %12 : vector<2x1x1xi32> to vector<2x1xi32>
      %c0_5 = arith.constant 0 : index
      %c0_6 = arith.constant 0 : index
      %c0_7 = arith.constant 0 : index
      %14 = vector.load %arg3[%c0_5, %c0_6, %c0_7] : memref<2x8x32xf32, #tpu.memory_space<vmem>>, vector<2x8x32xf32>
      %15 = vector.shape_cast %14 : vector<2x8x32xf32> to vector<16x32xf32>
      %c0_8 = arith.constant 0 : index
      %c0_9 = arith.constant 0 : index
      %16 = vector.load %arg5[%c0_8, %c0_9] : memref<32x512xf32, #tpu.memory_space<vmem>>, vector<32x512xf32>
      %cst = arith.constant dense<0.000000e+00> : vector<16x512xf32>
      %17 = tpu.matmul %15, %16, %cst {dimension_numbers = #tpu.dot_dimension_numbers<[1], [0], [0], [1], [0, 0, 1, 1], [], []>} : vector<16x32xf32>, vector<32x512xf32>, vector<16x512xf32> -> vector<16x512xf32>
      %c0_10 = arith.constant 0 : index
      %c0_11 = arith.constant 0 : index
      %18 = vector.load %arg7[%c0_10, %c0_11] : memref<1x512xf32, #tpu.memory_space<vmem>>, vector<1x512xf32>
      %19 = vector.broadcast %18 : vector<1x512xf32> to vector<16x512xf32>
      %20 = arith.addf %17, %19 : vector<16x512xf32>
      %21 = vector.shape_cast %20 : vector<16x512xf32> to vector<2x8x512xf32>
      %c0_12 = arith.constant 0 : index
      %c0_13 = arith.constant 0 : index
      %c0_14 = arith.constant 0 : index
      %22 = vector.load %arg11[%c0_12, %c0_13, %c0_14] : memref<2x8x512xf32, #tpu.memory_space<vmem>>, vector<2x8x512xf32>
      tpu.vector_store %arg11[%c0_12, %c0_13, %c0_14], %21 {strides = array<i32>} : memref<2x8x512xf32, #tpu.memory_space<vmem>>, vector<2x8x512xf32>,
      %c0_15 = arith.constant 0 : index
      %c0_16 = arith.constant 0 : index
      %23 = vector.load %arg6[%c0_15, %c0_16] : memref<128x512xf32, #tpu.memory_space<vmem>>, vector<128x512xf32>
      %c0_17 = arith.constant 0 : index
      %c0_18 = arith.constant 0 : index
      %24 = vector.load %arg13[%c0_17, %c0_18] : memref<2x128xf32, #tpu.memory_space<vmem>>, vector<2x128xf32>
      %c0_19 = arith.constant 0 : index
      %c0_20 = arith.constant 0 : index
      %25 = vector.load %arg14[%c0_19, %c0_20] : memref<2x128xf32, #tpu.memory_space<vmem>>, vector<2x128xf32>
      %c0_21 = arith.constant 0 : index
      %c0_22 = arith.constant 0 : index
      %c0_23 = arith.constant 0 : index
      %26 = vector.load %arg11[%c0_21, %c0_22, %c0_23] : memref<2x8x512xf32, #tpu.memory_space<vmem>>, vector<2x1x512xf32>
      %27 = vector.shape_cast %26 : vector<2x1x512xf32> to vector<2x512xf32>
      %cst_24 = arith.constant dense<0.000000e+00> : vector<2x512xf32>
      %28 = tpu.matmul %24, %23, %cst_24 {dimension_numbers = #tpu.dot_dimension_numbers<[1], [0], [0], [1], [0, 0, 1, 1], [], []>} : vector<2x128xf32>, vector<128x512xf32>, vector<2x512xf32> -> vector<2x512xf32>
      %29 = arith.addf %27, %28 : vector<2x512xf32>
      %30 = vector.extract_strided_slice %29 {offsets = [0, 0], sizes = [2, 384], strides = [1, 1]} : vector<2x512xf32> to vector<2x384xf32>
      %31 = arith.negf %30 : vector<2x384xf32>
      %32 = math.exp %31 : vector<2x384xf32>
      %cst_25 = arith.constant 1.000000e+00 : f32
      %33 = vector.broadcast %cst_25 : f32 to vector<2x384xf32>
      %34 = arith.addf %33, %32 : vector<2x384xf32>
      %35 = arith.divf %33, %34 : vector<2x384xf32>
      %36 = vector.extract_strided_slice %35 {offsets = [0, 0], sizes = [2, 128], strides = [1, 1]} : vector<2x384xf32> to vector<2x128xf32>
      %37 = vector.extract_strided_slice %35 {offsets = [0, 128], sizes = [2, 128], strides = [1, 1]} : vector<2x384xf32> to vector<2x128xf32>
      %38 = vector.extract_strided_slice %35 {offsets = [0, 256], sizes = [2, 128], strides = [1, 1]} : vector<2x384xf32> to vector<2x128xf32>
      %39 = vector.extract_strided_slice %29 {offsets = [0, 384], sizes = [2, 128], strides = [1, 1]} : vector<2x512xf32> to vector<2x128xf32>
      %40 = math.tanh %39 : vector<2x128xf32>
      %41 = arith.mulf %37, %25 : vector<2x128xf32>
      %42 = arith.mulf %36, %40 : vector<2x128xf32>
      %43 = arith.addf %41, %42 : vector<2x128xf32>
      %44 = math.tanh %43 : vector<2x128xf32>
      %45 = arith.mulf %38, %44 : vector<2x128xf32>
      %c0_i32_26 = arith.constant 0 : i32
      %46 = arith.addi %0, %c0_i32_26 : i32
      %47 = vector.broadcast %46 : i32 to vector<2x1xi32>
      %48 = arith.cmpi slt, %47, %13 : vector<2x1xi32>
      %49 = vector.shape_cast %48 : vector<2x1xi1> to vector<2x1xi1>
      %50 = vector.broadcast %49 : vector<2x1xi1> to vector<2x128xi1>
      %51 = arith.select %50, %45, %24 : vector<2x128xi1>, vector<2x128xf32>
      %52 = vector.shape_cast %48 : vector<2x1xi1> to vector<2x1xi1>
      %53 = vector.broadcast %52 : vector<2x1xi1> to vector<2x128xi1>
      %54 = arith.select %53, %43, %25 : vector<2x128xi1>, vector<2x128xf32>
      %cst_27 = arith.constant 0.000000e+00 : f32
      %55 = vector.shape_cast %48 : vector<2x1xi1> to vector<2x1xi1>
      %56 = vector.broadcast %55 : vector<2x1xi1> to vector<2x128xi1>
      %57 = vector.broadcast %cst_27 : f32 to vector<2x128xf32>
      %58 = arith.select %56, %45, %57 : vector<2x128xi1>, vector<2x128xf32>
      %c0_28 = arith.constant 0 : index
      %c0_29 = arith.constant 0 : index
      %c0_30 = arith.constant 0 : index
      %59 = vector.load %arg12[%c0_28, %c0_29, %c0_30] : memref<8x2x128xf32, #tpu.memory_space<vmem>>, vector<1x2x128xf32>
      %60 = vector.shape_cast %59 : vector<1x2x128xf32> to vector<2x128xf32>
      %61 = vector.shape_cast %58 : vector<2x128xf32> to vector<1x2x128xf32>
      tpu.vector_store %arg12[%c0_28, %c0_29, %c0_30], %61 {strides = array<i32>} : memref<8x2x128xf32, #tpu.memory_space<vmem>>, vector<1x2x128xf32>,
      %c0_31 = arith.constant 0 : index
      %c1 = arith.constant 1 : index
      %c0_32 = arith.constant 0 : index
      %62 = vector.load %arg11[%c0_31, %c1, %c0_32] : memref<2x8x512xf32, #tpu.memory_space<vmem>>, vector<2x1x512xf32>
      %63 = vector.shape_cast %62 : vector<2x1x512xf32> to vector<2x512xf32>
      %cst_33 = arith.constant dense<0.000000e+00> : vector<2x512xf32>
      %64 = tpu.matmul %51, %23, %cst_33 {dimension_numbers = #tpu.dot_dimension_numbers<[1], [0], [0], [1], [0, 0, 1, 1], [], []>} : vector<2x128xf32>, vector<128x512xf32>, vector<2x512xf32> -> vector<2x512xf32>
      %65 = arith.addf %63, %64 : vector<2x512xf32>
      %66 = vector.extract_strided_slice %65 {offsets = [0, 0], sizes = [2, 384], strides = [1, 1]} : vector<2x512xf32> to vector<2x384xf32>
      %67 = arith.negf %66 : vector<2x384xf32>
      %68 = math.exp %67 : vector<2x384xf32>
      %cst_34 = arith.constant 1.000000e+00 : f32
      %69 = vector.broadcast %cst_34 : f32 to vector<2x384xf32>
      %70 = arith.addf %69, %68 : vector<2x384xf32>
      %71 = arith.divf %69, %70 : vector<2x384xf32>
      %72 = vector.extract_strided_slice %71 {offsets = [0, 0], sizes = [2, 128], strides = [1, 1]} : vector<2x384xf32> to vector<2x128xf32>
      %73 = vector.extract_strided_slice %71 {offsets = [0, 128], sizes = [2, 128], strides = [1, 1]} : vector<2x384xf32> to vector<2x128xf32>
      %74 = vector.extract_strided_slice %71 {offsets = [0, 256], sizes = [2, 128], strides = [1, 1]} : vector<2x384xf32> to vector<2x128xf32>
      %75 = vector.extract_strided_slice %65 {offsets = [0, 384], sizes = [2, 128], strides = [1, 1]} : vector<2x512xf32> to vector<2x128xf32>
      %76 = math.tanh %75 : vector<2x128xf32>
      %77 = arith.mulf %73, %54 : vector<2x128xf32>
      %78 = arith.mulf %72, %76 : vector<2x128xf32>
      %79 = arith.addf %77, %78 : vector<2x128xf32>
      %80 = math.tanh %79 : vector<2x128xf32>
      %81 = arith.mulf %74, %80 : vector<2x128xf32>
      %c1_i32 = arith.constant 1 : i32
      %82 = arith.addi %0, %c1_i32 : i32
      %83 = vector.broadcast %82 : i32 to vector<2x1xi32>
      %84 = arith.cmpi slt, %83, %13 : vector<2x1xi32>
      %85 = vector.shape_cast %84 : vector<2x1xi1> to vector<2x1xi1>
      %86 = vector.broadcast %85 : vector<2x1xi1> to vector<2x128xi1>
      %87 = arith.select %86, %81, %51 : vector<2x128xi1>, vector<2x128xf32>
      %88 = vector.shape_cast %84 : vector<2x1xi1> to vector<2x1xi1>
      %89 = vector.broadcast %88 : vector<2x1xi1> to vector<2x128xi1>
      %90 = arith.select %89, %79, %54 : vector<2x128xi1>, vector<2x128xf32>
      %cst_35 = arith.constant 0.000000e+00 : f32
      %91 = vector.shape_cast %84 : vector<2x1xi1> to vector<2x1xi1>
      %92 = vector.broadcast %91 : vector<2x1xi1> to vector<2x128xi1>
      %93 = vector.broadcast %cst_35 : f32 to vector<2x128xf32>
      %94 = arith.select %92, %81, %93 : vector<2x128xi1>, vector<2x128xf32>
      %c1_36 = arith.constant 1 : index
      %c0_37 = arith.constant 0 : index
      %c0_38 = arith.constant 0 : index
      %95 = vector.load %arg12[%c1_36, %c0_37, %c0_38] : memref<8x2x128xf32, #tpu.memory_space<vmem>>, vector<1x2x128xf32>
      %96 = vector.shape_cast %95 : vector<1x2x128xf32> to vector<2x128xf32>
      %97 = vector.shape_cast %94 : vector<2x128xf32> to vector<1x2x128xf32>
      tpu.vector_store %arg12[%c1_36, %c0_37, %c0_38], %97 {strides = array<i32>} : memref<8x2x128xf32, #tpu.memory_space<vmem>>, vector<1x2x128xf32>,
      %c0_39 = arith.constant 0 : index
      %c2 = arith.constant 2 : index
      %c0_40 = arith.constant 0 : index
      %98 = vector.load %arg11[%c0_39, %c2, %c0_40] : memref<2x8x512xf32, #tpu.memory_space<vmem>>, vector<2x1x512xf32>
      %99 = vector.shape_cast %98 : vector<2x1x512xf32> to vector<2x512xf32>
      %cst_41 = arith.constant dense<0.000000e+00> : vector<2x512xf32>
      %100 = tpu.matmul %87, %23, %cst_41 {dimension_numbers = #tpu.dot_dimension_numbers<[1], [0], [0], [1], [0, 0, 1, 1], [], []>} : vector<2x128xf32>, vector<128x512xf32>, vector<2x512xf32> -> vector<2x512xf32>
      %101 = arith.addf %99, %100 : vector<2x512xf32>
      %102 = vector.extract_strided_slice %101 {offsets = [0, 0], sizes = [2, 384], strides = [1, 1]} : vector<2x512xf32> to vector<2x384xf32>
      %103 = arith.negf %102 : vector<2x384xf32>
      %104 = math.exp %103 : vector<2x384xf32>
      %cst_42 = arith.constant 1.000000e+00 : f32
      %105 = vector.broadcast %cst_42 : f32 to vector<2x384xf32>
      %106 = arith.addf %105, %104 : vector<2x384xf32>
      %107 = arith.divf %105, %106 : vector<2x384xf32>
      %108 = vector.extract_strided_slice %107 {offsets = [0, 0], sizes = [2, 128], strides = [1, 1]} : vector<2x384xf32> to vector<2x128xf32>
      %109 = vector.extract_strided_slice %107 {offsets = [0, 128], sizes = [2, 128], strides = [1, 1]} : vector<2x384xf32> to vector<2x128xf32>
      %110 = vector.extract_strided_slice %107 {offsets = [0, 256], sizes = [2, 128], strides = [1, 1]} : vector<2x384xf32> to vector<2x128xf32>
      %111 = vector.extract_strided_slice %101 {offsets = [0, 384], sizes = [2, 128], strides = [1, 1]} : vector<2x512xf32> to vector<2x128xf32>
      %112 = math.tanh %111 : vector<2x128xf32>
      %113 = arith.mulf %109, %90 : vector<2x128xf32>
      %114 = arith.mulf %108, %112 : vector<2x128xf32>
      %115 = arith.addf %113, %114 : vector<2x128xf32>
      %116 = math.tanh %115 : vector<2x128xf32>
      %117 = arith.mulf %110, %116 : vector<2x128xf32>
      %c2_i32 = arith.constant 2 : i32
      %118 = arith.addi %0, %c2_i32 : i32
      %119 = vector.broadcast %118 : i32 to vector<2x1xi32>
      %120 = arith.cmpi slt, %119, %13 : vector<2x1xi32>
      %121 = vector.shape_cast %120 : vector<2x1xi1> to vector<2x1xi1>
      %122 = vector.broadcast %121 : vector<2x1xi1> to vector<2x128xi1>
      %123 = arith.select %122, %117, %87 : vector<2x128xi1>, vector<2x128xf32>
      %124 = vector.shape_cast %120 : vector<2x1xi1> to vector<2x1xi1>
      %125 = vector.broadcast %124 : vector<2x1xi1> to vector<2x128xi1>
      %126 = arith.select %125, %115, %90 : vector<2x128xi1>, vector<2x128xf32>
      %cst_43 = arith.constant 0.000000e+00 : f32
      %127 = vector.shape_cast %120 : vector<2x1xi1> to vector<2x1xi1>
      %128 = vector.broadcast %127 : vector<2x1xi1> to vector<2x128xi1>
      %129 = vector.broadcast %cst_43 : f32 to vector<2x128xf32>
      %130 = arith.select %128, %117, %129 : vector<2x128xi1>, vector<2x128xf32>
      %c2_44 = arith.constant 2 : index
      %c0_45 = arith.constant 0 : index
      %c0_46 = arith.constant 0 : index
      %131 = vector.load %arg12[%c2_44, %c0_45, %c0_46] : memref<8x2x128xf32, #tpu.memory_space<vmem>>, vector<1x2x128xf32>
      %132 = vector.shape_cast %131 : vector<1x2x128xf32> to vector<2x128xf32>
      %133 = vector.shape_cast %130 : vector<2x128xf32> to vector<1x2x128xf32>
      tpu.vector_store %arg12[%c2_44, %c0_45, %c0_46], %133 {strides = array<i32>} : memref<8x2x128xf32, #tpu.memory_space<vmem>>, vector<1x2x128xf32>,
      %c0_47 = arith.constant 0 : index
      %c3 = arith.constant 3 : index
      %c0_48 = arith.constant 0 : index
      %134 = vector.load %arg11[%c0_47, %c3, %c0_48] : memref<2x8x512xf32, #tpu.memory_space<vmem>>, vector<2x1x512xf32>
      %135 = vector.shape_cast %134 : vector<2x1x512xf32> to vector<2x512xf32>
      %cst_49 = arith.constant dense<0.000000e+00> : vector<2x512xf32>
      %136 = tpu.matmul %123, %23, %cst_49 {dimension_numbers = #tpu.dot_dimension_numbers<[1], [0], [0], [1], [0, 0, 1, 1], [], []>} : vector<2x128xf32>, vector<128x512xf32>, vector<2x512xf32> -> vector<2x512xf32>
      %137 = arith.addf %135, %136 : vector<2x512xf32>
      %138 = vector.extract_strided_slice %137 {offsets = [0, 0], sizes = [2, 384], strides = [1, 1]} : vector<2x512xf32> to vector<2x384xf32>
      %139 = arith.negf %138 : vector<2x384xf32>
      %140 = math.exp %139 : vector<2x384xf32>
      %cst_50 = arith.constant 1.000000e+00 : f32
      %141 = vector.broadcast %cst_50 : f32 to vector<2x384xf32>
      %142 = arith.addf %141, %140 : vector<2x384xf32>
      %143 = arith.divf %141, %142 : vector<2x384xf32>
      %144 = vector.extract_strided_slice %143 {offsets = [0, 0], sizes = [2, 128], strides = [1, 1]} : vector<2x384xf32> to vector<2x128xf32>
      %145 = vector.extract_strided_slice %143 {offsets = [0, 128], sizes = [2, 128], strides = [1, 1]} : vector<2x384xf32> to vector<2x128xf32>
      %146 = vector.extract_strided_slice %143 {offsets = [0, 256], sizes = [2, 128], strides = [1, 1]} : vector<2x384xf32> to vector<2x128xf32>
      %147 = vector.extract_strided_slice %137 {offsets = [0, 384], sizes = [2, 128], strides = [1, 1]} : vector<2x512xf32> to vector<2x128xf32>
      %148 = math.tanh %147 : vector<2x128xf32>
      %149 = arith.mulf %145, %126 : vector<2x128xf32>
      %150 = arith.mulf %144, %148 : vector<2x128xf32>
      %151 = arith.addf %149, %150 : vector<2x128xf32>
      %152 = math.tanh %151 : vector<2x128xf32>
      %153 = arith.mulf %146, %152 : vector<2x128xf32>
      %c3_i32 = arith.constant 3 : i32
      %154 = arith.addi %0, %c3_i32 : i32
      %155 = vector.broadcast %154 : i32 to vector<2x1xi32>
      %156 = arith.cmpi slt, %155, %13 : vector<2x1xi32>
      %157 = vector.shape_cast %156 : vector<2x1xi1> to vector<2x1xi1>
      %158 = vector.broadcast %157 : vector<2x1xi1> to vector<2x128xi1>
      %159 = arith.select %158, %153, %123 : vector<2x128xi1>, vector<2x128xf32>
      %160 = vector.shape_cast %156 : vector<2x1xi1> to vector<2x1xi1>
      %161 = vector.broadcast %160 : vector<2x1xi1> to vector<2x128xi1>
      %162 = arith.select %161, %151, %126 : vector<2x128xi1>, vector<2x128xf32>
      %cst_51 = arith.constant 0.000000e+00 : f32
      %163 = vector.shape_cast %156 : vector<2x1xi1> to vector<2x1xi1>
      %164 = vector.broadcast %163 : vector<2x1xi1> to vector<2x128xi1>
      %165 = vector.broadcast %cst_51 : f32 to vector<2x128xf32>
      %166 = arith.select %164, %153, %165 : vector<2x128xi1>, vector<2x128xf32>
      %c3_52 = arith.constant 3 : index
      %c0_53 = arith.constant 0 : index
      %c0_54 = arith.constant 0 : index
      %167 = vector.load %arg12[%c3_52, %c0_53, %c0_54] : memref<8x2x128xf32, #tpu.memory_space<vmem>>, vector<1x2x128xf32>
      %168 = vector.shape_cast %167 : vector<1x2x128xf32> to vector<2x128xf32>
      %169 = vector.shape_cast %166 : vector<2x128xf32> to vector<1x2x128xf32>
      tpu.vector_store %arg12[%c3_52, %c0_53, %c0_54], %169 {strides = array<i32>} : memref<8x2x128xf32, #tpu.memory_space<vmem>>, vector<1x2x128xf32>,
      %c0_55 = arith.constant 0 : index
      %c4 = arith.constant 4 : index
      %c0_56 = arith.constant 0 : index
      %170 = vector.load %arg11[%c0_55, %c4, %c0_56] : memref<2x8x512xf32, #tpu.memory_space<vmem>>, vector<2x1x512xf32>
      %171 = vector.shape_cast %170 : vector<2x1x512xf32> to vector<2x512xf32>
      %cst_57 = arith.constant dense<0.000000e+00> : vector<2x512xf32>
      %172 = tpu.matmul %159, %23, %cst_57 {dimension_numbers = #tpu.dot_dimension_numbers<[1], [0], [0], [1], [0, 0, 1, 1], [], []>} : vector<2x128xf32>, vector<128x512xf32>, vector<2x512xf32> -> vector<2x512xf32>
      %173 = arith.addf %171, %172 : vector<2x512xf32>
      %174 = vector.extract_strided_slice %173 {offsets = [0, 0], sizes = [2, 384], strides = [1, 1]} : vector<2x512xf32> to vector<2x384xf32>
      %175 = arith.negf %174 : vector<2x384xf32>
      %176 = math.exp %175 : vector<2x384xf32>
      %cst_58 = arith.constant 1.000000e+00 : f32
      %177 = vector.broadcast %cst_58 : f32 to vector<2x384xf32>
      %178 = arith.addf %177, %176 : vector<2x384xf32>
      %179 = arith.divf %177, %178 : vector<2x384xf32>
      %180 = vector.extract_strided_slice %179 {offsets = [0, 0], sizes = [2, 128], strides = [1, 1]} : vector<2x384xf32> to vector<2x128xf32>
      %181 = vector.extract_strided_slice %179 {offsets = [0, 128], sizes = [2, 128], strides = [1, 1]} : vector<2x384xf32> to vector<2x128xf32>
      %182 = vector.extract_strided_slice %179 {offsets = [0, 256], sizes = [2, 128], strides = [1, 1]} : vector<2x384xf32> to vector<2x128xf32>
      %183 = vector.extract_strided_slice %173 {offsets = [0, 384], sizes = [2, 128], strides = [1, 1]} : vector<2x512xf32> to vector<2x128xf32>
      %184 = math.tanh %183 : vector<2x128xf32>
      %185 = arith.mulf %181, %162 : vector<2x128xf32>
      %186 = arith.mulf %180, %184 : vector<2x128xf32>
      %187 = arith.addf %185, %186 : vector<2x128xf32>
      %188 = math.tanh %187 : vector<2x128xf32>
      %189 = arith.mulf %182, %188 : vector<2x128xf32>
      %c4_i32 = arith.constant 4 : i32
      %190 = arith.addi %0, %c4_i32 : i32
      %191 = vector.broadcast %190 : i32 to vector<2x1xi32>
      %192 = arith.cmpi slt, %191, %13 : vector<2x1xi32>
      %193 = vector.shape_cast %192 : vector<2x1xi1> to vector<2x1xi1>
      %194 = vector.broadcast %193 : vector<2x1xi1> to vector<2x128xi1>
      %195 = arith.select %194, %189, %159 : vector<2x128xi1>, vector<2x128xf32>
      %196 = vector.shape_cast %192 : vector<2x1xi1> to vector<2x1xi1>
      %197 = vector.broadcast %196 : vector<2x1xi1> to vector<2x128xi1>
      %198 = arith.select %197, %187, %162 : vector<2x128xi1>, vector<2x128xf32>
      %cst_59 = arith.constant 0.000000e+00 : f32
      %199 = vector.shape_cast %192 : vector<2x1xi1> to vector<2x1xi1>
      %200 = vector.broadcast %199 : vector<2x1xi1> to vector<2x128xi1>
      %201 = vector.broadcast %cst_59 : f32 to vector<2x128xf32>
      %202 = arith.select %200, %189, %201 : vector<2x128xi1>, vector<2x128xf32>
      %c4_60 = arith.constant 4 : index
      %c0_61 = arith.constant 0 : index
      %c0_62 = arith.constant 0 : index
      %203 = vector.load %arg12[%c4_60, %c0_61, %c0_62] : memref<8x2x128xf32, #tpu.memory_space<vmem>>, vector<1x2x128xf32>
      %204 = vector.shape_cast %203 : vector<1x2x128xf32> to vector<2x128xf32>
      %205 = vector.shape_cast %202 : vector<2x128xf32> to vector<1x2x128xf32>
      tpu.vector_store %arg12[%c4_60, %c0_61, %c0_62], %205 {strides = array<i32>} : memref<8x2x128xf32, #tpu.memory_space<vmem>>, vector<1x2x128xf32>,
      %c0_63 = arith.constant 0 : index
      %c5 = arith.constant 5 : index
      %c0_64 = arith.constant 0 : index
      %206 = vector.load %arg11[%c0_63, %c5, %c0_64] : memref<2x8x512xf32, #tpu.memory_space<vmem>>, vector<2x1x512xf32>
      %207 = vector.shape_cast %206 : vector<2x1x512xf32> to vector<2x512xf32>
      %cst_65 = arith.constant dense<0.000000e+00> : vector<2x512xf32>
      %208 = tpu.matmul %195, %23, %cst_65 {dimension_numbers = #tpu.dot_dimension_numbers<[1], [0], [0], [1], [0, 0, 1, 1], [], []>} : vector<2x128xf32>, vector<128x512xf32>, vector<2x512xf32> -> vector<2x512xf32>
      %209 = arith.addf %207, %208 : vector<2x512xf32>
      %210 = vector.extract_strided_slice %209 {offsets = [0, 0], sizes = [2, 384], strides = [1, 1]} : vector<2x512xf32> to vector<2x384xf32>
      %211 = arith.negf %210 : vector<2x384xf32>
      %212 = math.exp %211 : vector<2x384xf32>
      %cst_66 = arith.constant 1.000000e+00 : f32
      %213 = vector.broadcast %cst_66 : f32 to vector<2x384xf32>
      %214 = arith.addf %213, %212 : vector<2x384xf32>
      %215 = arith.divf %213, %214 : vector<2x384xf32>
      %216 = vector.extract_strided_slice %215 {offsets = [0, 0], sizes = [2, 128], strides = [1, 1]} : vector<2x384xf32> to vector<2x128xf32>
      %217 = vector.extract_strided_slice %215 {offsets = [0, 128], sizes = [2, 128], strides = [1, 1]} : vector<2x384xf32> to vector<2x128xf32>
      %218 = vector.extract_strided_slice %215 {offsets = [0, 256], sizes = [2, 128], strides = [1, 1]} : vector<2x384xf32> to vector<2x128xf32>
      %219 = vector.extract_strided_slice %209 {offsets = [0, 384], sizes = [2, 128], strides = [1, 1]} : vector<2x512xf32> to vector<2x128xf32>
      %220 = math.tanh %219 : vector<2x128xf32>
      %221 = arith.mulf %217, %198 : vector<2x128xf32>
      %222 = arith.mulf %216, %220 : vector<2x128xf32>
      %223 = arith.addf %221, %222 : vector<2x128xf32>
      %224 = math.tanh %223 : vector<2x128xf32>
      %225 = arith.mulf %218, %224 : vector<2x128xf32>
      %c5_i32 = arith.constant 5 : i32
      %226 = arith.addi %0, %c5_i32 : i32
      %227 = vector.broadcast %226 : i32 to vector<2x1xi32>
      %228 = arith.cmpi slt, %227, %13 : vector<2x1xi32>
      %229 = vector.shape_cast %228 : vector<2x1xi1> to vector<2x1xi1>
      %230 = vector.broadcast %229 : vector<2x1xi1> to vector<2x128xi1>
      %231 = arith.select %230, %225, %195 : vector<2x128xi1>, vector<2x128xf32>
      %232 = vector.shape_cast %228 : vector<2x1xi1> to vector<2x1xi1>
      %233 = vector.broadcast %232 : vector<2x1xi1> to vector<2x128xi1>
      %234 = arith.select %233, %223, %198 : vector<2x128xi1>, vector<2x128xf32>
      %cst_67 = arith.constant 0.000000e+00 : f32
      %235 = vector.shape_cast %228 : vector<2x1xi1> to vector<2x1xi1>
      %236 = vector.broadcast %235 : vector<2x1xi1> to vector<2x128xi1>
      %237 = vector.broadcast %cst_67 : f32 to vector<2x128xf32>
      %238 = arith.select %236, %225, %237 : vector<2x128xi1>, vector<2x128xf32>
      %c5_68 = arith.constant 5 : index
      %c0_69 = arith.constant 0 : index
      %c0_70 = arith.constant 0 : index
      %239 = vector.load %arg12[%c5_68, %c0_69, %c0_70] : memref<8x2x128xf32, #tpu.memory_space<vmem>>, vector<1x2x128xf32>
      %240 = vector.shape_cast %239 : vector<1x2x128xf32> to vector<2x128xf32>
      %241 = vector.shape_cast %238 : vector<2x128xf32> to vector<1x2x128xf32>
      tpu.vector_store %arg12[%c5_68, %c0_69, %c0_70], %241 {strides = array<i32>} : memref<8x2x128xf32, #tpu.memory_space<vmem>>, vector<1x2x128xf32>,
      %c0_71 = arith.constant 0 : index
      %c6 = arith.constant 6 : index
      %c0_72 = arith.constant 0 : index
      %242 = vector.load %arg11[%c0_71, %c6, %c0_72] : memref<2x8x512xf32, #tpu.memory_space<vmem>>, vector<2x1x512xf32>
      %243 = vector.shape_cast %242 : vector<2x1x512xf32> to vector<2x512xf32>
      %cst_73 = arith.constant dense<0.000000e+00> : vector<2x512xf32>
      %244 = tpu.matmul %231, %23, %cst_73 {dimension_numbers = #tpu.dot_dimension_numbers<[1], [0], [0], [1], [0, 0, 1, 1], [], []>} : vector<2x128xf32>, vector<128x512xf32>, vector<2x512xf32> -> vector<2x512xf32>
      %245 = arith.addf %243, %244 : vector<2x512xf32>
      %246 = vector.extract_strided_slice %245 {offsets = [0, 0], sizes = [2, 384], strides = [1, 1]} : vector<2x512xf32> to vector<2x384xf32>
      %247 = arith.negf %246 : vector<2x384xf32>
      %248 = math.exp %247 : vector<2x384xf32>
      %cst_74 = arith.constant 1.000000e+00 : f32
      %249 = vector.broadcast %cst_74 : f32 to vector<2x384xf32>
      %250 = arith.addf %249, %248 : vector<2x384xf32>
      %251 = arith.divf %249, %250 : vector<2x384xf32>
      %252 = vector.extract_strided_slice %251 {offsets = [0, 0], sizes = [2, 128], strides = [1, 1]} : vector<2x384xf32> to vector<2x128xf32>
      %253 = vector.extract_strided_slice %251 {offsets = [0, 128], sizes = [2, 128], strides = [1, 1]} : vector<2x384xf32> to vector<2x128xf32>
      %254 = vector.extract_strided_slice %251 {offsets = [0, 256], sizes = [2, 128], strides = [1, 1]} : vector<2x384xf32> to vector<2x128xf32>
      %255 = vector.extract_strided_slice %245 {offsets = [0, 384], sizes = [2, 128], strides = [1, 1]} : vector<2x512xf32> to vector<2x128xf32>
      %256 = math.tanh %255 : vector<2x128xf32>
      %257 = arith.mulf %253, %234 : vector<2x128xf32>
      %258 = arith.mulf %252, %256 : vector<2x128xf32>
      %259 = arith.addf %257, %258 : vector<2x128xf32>
      %260 = math.tanh %259 : vector<2x128xf32>
      %261 = arith.mulf %254, %260 : vector<2x128xf32>
      %c6_i32 = arith.constant 6 : i32
      %262 = arith.addi %0, %c6_i32 : i32
      %263 = vector.broadcast %262 : i32 to vector<2x1xi32>
      %264 = arith.cmpi slt, %263, %13 : vector<2x1xi32>
      %265 = vector.shape_cast %264 : vector<2x1xi1> to vector<2x1xi1>
      %266 = vector.broadcast %265 : vector<2x1xi1> to vector<2x128xi1>
      %267 = arith.select %266, %261, %231 : vector<2x128xi1>, vector<2x128xf32>
      %268 = vector.shape_cast %264 : vector<2x1xi1> to vector<2x1xi1>
      %269 = vector.broadcast %268 : vector<2x1xi1> to vector<2x128xi1>
      %270 = arith.select %269, %259, %234 : vector<2x128xi1>, vector<2x128xf32>
      %cst_75 = arith.constant 0.000000e+00 : f32
      %271 = vector.shape_cast %264 : vector<2x1xi1> to vector<2x1xi1>
      %272 = vector.broadcast %271 : vector<2x1xi1> to vector<2x128xi1>
      %273 = vector.broadcast %cst_75 : f32 to vector<2x128xf32>
      %274 = arith.select %272, %261, %273 : vector<2x128xi1>, vector<2x128xf32>
      %c6_76 = arith.constant 6 : index
      %c0_77 = arith.constant 0 : index
      %c0_78 = arith.constant 0 : index
      %275 = vector.load %arg12[%c6_76, %c0_77, %c0_78] : memref<8x2x128xf32, #tpu.memory_space<vmem>>, vector<1x2x128xf32>
      %276 = vector.shape_cast %275 : vector<1x2x128xf32> to vector<2x128xf32>
      %277 = vector.shape_cast %274 : vector<2x128xf32> to vector<1x2x128xf32>
      tpu.vector_store %arg12[%c6_76, %c0_77, %c0_78], %277 {strides = array<i32>} : memref<8x2x128xf32, #tpu.memory_space<vmem>>, vector<1x2x128xf32>,
      %c0_79 = arith.constant 0 : index
      %c7 = arith.constant 7 : index
      %c0_80 = arith.constant 0 : index
      %278 = vector.load %arg11[%c0_79, %c7, %c0_80] : memref<2x8x512xf32, #tpu.memory_space<vmem>>, vector<2x1x512xf32>
      %279 = vector.shape_cast %278 : vector<2x1x512xf32> to vector<2x512xf32>
      %cst_81 = arith.constant dense<0.000000e+00> : vector<2x512xf32>
      %280 = tpu.matmul %267, %23, %cst_81 {dimension_numbers = #tpu.dot_dimension_numbers<[1], [0], [0], [1], [0, 0, 1, 1], [], []>} : vector<2x128xf32>, vector<128x512xf32>, vector<2x512xf32> -> vector<2x512xf32>
      %281 = arith.addf %279, %280 : vector<2x512xf32>
      %282 = vector.extract_strided_slice %281 {offsets = [0, 0], sizes = [2, 384], strides = [1, 1]} : vector<2x512xf32> to vector<2x384xf32>
      %283 = arith.negf %282 : vector<2x384xf32>
      %284 = math.exp %283 : vector<2x384xf32>
      %cst_82 = arith.constant 1.000000e+00 : f32
      %285 = vector.broadcast %cst_82 : f32 to vector<2x384xf32>
      %286 = arith.addf %285, %284 : vector<2x384xf32>
      %287 = arith.divf %285, %286 : vector<2x384xf32>
      %288 = vector.extract_strided_slice %287 {offsets = [0, 0], sizes = [2, 128], strides = [1, 1]} : vector<2x384xf32> to vector<2x128xf32>
      %289 = vector.extract_strided_slice %287 {offsets = [0, 128], sizes = [2, 128], strides = [1, 1]} : vector<2x384xf32> to vector<2x128xf32>
      %290 = vector.extract_strided_slice %287 {offsets = [0, 256], sizes = [2, 128], strides = [1, 1]} : vector<2x384xf32> to vector<2x128xf32>
      %291 = vector.extract_strided_slice %281 {offsets = [0, 384], sizes = [2, 128], strides = [1, 1]} : vector<2x512xf32> to vector<2x128xf32>
      %292 = math.tanh %291 : vector<2x128xf32>
      %293 = arith.mulf %289, %270 : vector<2x128xf32>
      %294 = arith.mulf %288, %292 : vector<2x128xf32>
      %295 = arith.addf %293, %294 : vector<2x128xf32>
      %296 = math.tanh %295 : vector<2x128xf32>
      %297 = arith.mulf %290, %296 : vector<2x128xf32>
      %c7_i32 = arith.constant 7 : i32
      %298 = arith.addi %0, %c7_i32 : i32
      %299 = vector.broadcast %298 : i32 to vector<2x1xi32>
      %300 = arith.cmpi slt, %299, %13 : vector<2x1xi32>
      %301 = vector.shape_cast %300 : vector<2x1xi1> to vector<2x1xi1>
      %302 = vector.broadcast %301 : vector<2x1xi1> to vector<2x128xi1>
      %303 = arith.select %302, %297, %267 : vector<2x128xi1>, vector<2x128xf32>
      %304 = vector.shape_cast %300 : vector<2x1xi1> to vector<2x1xi1>
      %305 = vector.broadcast %304 : vector<2x1xi1> to vector<2x128xi1>
      %306 = arith.select %305, %295, %270 : vector<2x128xi1>, vector<2x128xf32>
      %cst_83 = arith.constant 0.000000e+00 : f32
      %307 = vector.shape_cast %300 : vector<2x1xi1> to vector<2x1xi1>
      %308 = vector.broadcast %307 : vector<2x1xi1> to vector<2x128xi1>
      %309 = vector.broadcast %cst_83 : f32 to vector<2x128xf32>
      %310 = arith.select %308, %297, %309 : vector<2x128xi1>, vector<2x128xf32>
      %c7_84 = arith.constant 7 : index
      %c0_85 = arith.constant 0 : index
      %c0_86 = arith.constant 0 : index
      %311 = vector.load %arg12[%c7_84, %c0_85, %c0_86] : memref<8x2x128xf32, #tpu.memory_space<vmem>>, vector<1x2x128xf32>
      %312 = vector.shape_cast %311 : vector<1x2x128xf32> to vector<2x128xf32>
      %313 = vector.shape_cast %310 : vector<2x128xf32> to vector<1x2x128xf32>
      tpu.vector_store %arg12[%c7_84, %c0_85, %c0_86], %313 {strides = array<i32>} : memref<8x2x128xf32, #tpu.memory_space<vmem>>, vector<1x2x128xf32>,
      %c0_87 = arith.constant 0 : index
      %c0_88 = arith.constant 0 : index
      %314 = vector.load %arg13[%c0_87, %c0_88] : memref<2x128xf32, #tpu.memory_space<vmem>>, vector<2x128xf32>
      tpu.vector_store %arg13[%c0_87, %c0_88], %303 {strides = array<i32>} : memref<2x128xf32, #tpu.memory_space<vmem>>, vector<2x128xf32>,
      %c0_89 = arith.constant 0 : index
      %c0_90 = arith.constant 0 : index
      %315 = vector.load %arg14[%c0_89, %c0_90] : memref<2x128xf32, #tpu.memory_space<vmem>>, vector<2x128xf32>
      tpu.vector_store %arg14[%c0_89, %c0_90], %306 {strides = array<i32>} : memref<2x128xf32, #tpu.memory_space<vmem>>, vector<2x128xf32>,
      %c0_91 = arith.constant 0 : index
      %c0_92 = arith.constant 0 : index
      %c0_93 = arith.constant 0 : index
      %316 = vector.load %arg12[%c0_91, %c0_92, %c0_93] : memref<8x2x128xf32, #tpu.memory_space<vmem>>, vector<8x2x128xf32>
      %317 = vector.shape_cast %316 : vector<8x2x128xf32> to vector<16x128xf32>
      %c0_94 = arith.constant 0 : index
      %c0_95 = arith.constant 0 : index
      %318 = vector.load %arg8[%c0_94, %c0_95] : memref<128x128xf32, #tpu.memory_space<vmem>>, vector<128x128xf32>
      %cst_96 = arith.constant dense<0.000000e+00> : vector<16x128xf32>
      %319 = tpu.matmul %317, %318, %cst_96 {dimension_numbers = #tpu.dot_dimension_numbers<[1], [0], [0], [1], [0, 0, 1, 1], [], []>} : vector<16x128xf32>, vector<128x128xf32>, vector<16x128xf32> -> vector<16x128xf32>
      %320 = vector.shape_cast %319 : vector<16x128xf32> to vector<8x2x128xf32>
      %c0_97 = arith.constant 0 : index
      %c0_98 = arith.constant 0 : index
      %321 = vector.load %arg9[%c0_97, %c0_98] : memref<1x128xf32, #tpu.memory_space<vmem>>, vector<1x128xf32>
      %322 = vector.shape_cast %321 : vector<1x128xf32> to vector<1x1x128xf32>
      %323 = vector.broadcast %322 : vector<1x1x128xf32> to vector<8x2x128xf32>
      %324 = arith.addf %320, %323 : vector<8x2x128xf32>
      %325 = tpu.transpose %324, [1, 0, 2] : vector<8x2x128xf32> -> vector<2x8x128xf32>
      %c0_99 = arith.constant 0 : index
      %c0_100 = arith.constant 0 : index
      %c0_101 = arith.constant 0 : index
      %326 = vector.load %arg10[%c0_99, %c0_100, %c0_101] : memref<2x8x128xf32, #tpu.memory_space<vmem>>, vector<2x8x128xf32>
      tpu.vector_store %arg10[%c0_99, %c0_100, %c0_101], %325 {strides = array<i32>} : memref<2x8x128xf32, #tpu.memory_space<vmem>>, vector<2x8x128xf32>,
    } else {
    }
    %9 = arith.cmpi sge, %0, %5 : i32
    %10 = arith.extui %9 : i1 to i32
    %c0_i32_2 = arith.constant 0 : i32
    %11 = arith.cmpi ne, %10, %c0_i32_2 : i32
    scf.if %11 {
      %c0 = arith.constant 0 : index
      %c0_3 = arith.constant 0 : index
      %12 = vector.load %arg9[%c0, %c0_3] : memref<1x128xf32, #tpu.memory_space<vmem>>, vector<1x128xf32>
      %13 = vector.shape_cast %12 : vector<1x128xf32> to vector<1x1x128xf32>
      %14 = vector.shape_cast %13 : vector<1x1x128xf32> to vector<1x1x128xf32>
      %15 = vector.broadcast %14 : vector<1x1x128xf32> to vector<2x8x128xf32>
      %c0_4 = arith.constant 0 : index
      %c0_5 = arith.constant 0 : index
      %c0_6 = arith.constant 0 : index
      %16 = vector.load %arg10[%c0_4, %c0_5, %c0_6] : memref<2x8x128xf32, #tpu.memory_space<vmem>>, vector<2x8x128xf32>
      tpu.vector_store %arg10[%c0_4, %c0_5, %c0_6], %15 {strides = array<i32>} : memref<2x8x128xf32, #tpu.memory_space<vmem>>, vector<2x8x128xf32>,
    } else {
    }
    return
  }
  func.func @transform_0(%arg0: i32, %arg1: i32, %arg2: memref<1xi32, #tpu.memory_space<smem>>) -> (i32, i32, i32) {
    %c0_i32 = arith.constant 0 : i32
    %c0_i32_0 = arith.constant 0 : i32
    return %arg0, %arg1, %c0_i32 : i32, i32, i32
  }
  func.func @transform_1(%arg0: i32, %arg1: i32, %arg2: memref<1xi32, #tpu.memory_space<smem>>) -> (i32, i32, i32) {
    %c0_i32 = arith.constant 0 : i32
    %c0_i32_0 = arith.constant 0 : i32
    %c0_i32_1 = arith.constant 0 : i32
    return %arg0, %c0_i32, %c0_i32_0 : i32, i32, i32
  }
  func.func @transform_2(%arg0: i32, %arg1: i32, %arg2: memref<1xi32, #tpu.memory_space<smem>>) -> (i32, i32) {
    %c0_i32 = arith.constant 0 : i32
    %c0_i32_0 = arith.constant 0 : i32
    %c0_i32_1 = arith.constant 0 : i32
    return %c0_i32, %c0_i32_0 : i32, i32
  }
  func.func @transform_3(%arg0: i32, %arg1: i32, %arg2: memref<1xi32, #tpu.memory_space<smem>>) -> (i32, i32) {
    %c0_i32 = arith.constant 0 : i32
    %c0_i32_0 = arith.constant 0 : i32
    %c0_i32_1 = arith.constant 0 : i32
    return %c0_i32, %c0_i32_0 : i32, i32
  }
  func.func @transform_4(%arg0: i32, %arg1: i32, %arg2: memref<1xi32, #tpu.memory_space<smem>>) -> (i32, i32) {
    %c0_i32 = arith.constant 0 : i32
    %c0_i32_0 = arith.constant 0 : i32
    %c0_i32_1 = arith.constant 0 : i32
    return %c0_i32, %c0_i32_0 : i32, i32
  }
  func.func @transform_5(%arg0: i32, %arg1: i32, %arg2: memref<1xi32, #tpu.memory_space<smem>>) -> (i32, i32) {
    %c0_i32 = arith.constant 0 : i32
    %c0_i32_0 = arith.constant 0 : i32
    %c0_i32_1 = arith.constant 0 : i32
    return %c0_i32, %c0_i32_0 : i32, i32
  }
  func.func @transform_6(%arg0: i32, %arg1: i32, %arg2: memref<1xi32, #tpu.memory_space<smem>>) -> (i32, i32) {
    %c0_i32 = arith.constant 0 : i32
    %c0_i32_0 = arith.constant 0 : i32
    %c0_i32_1 = arith.constant 0 : i32
    return %c0_i32, %c0_i32_0 : i32, i32
  }
  func.func @transform_7(%arg0: i32, %arg1: i32, %arg2: memref<1xi32, #tpu.memory_space<smem>>) -> (i32, i32, i32) {
    %c0_i32 = arith.constant 0 : i32
    %c0_i32_0 = arith.constant 0 : i32
    return %arg0, %arg1, %c0_i32 : i32, i32, i32
  }
}

module attributes {stable_mosaic.version = 11 : i64} {
  func.func @_lstm_block_kernel(%arg0: i32, %arg1: i32, %arg2: memref<1xi32, #tpu.memory_space<smem>>, %arg3: memref<2x8x32xf32, #tpu.memory_space<vmem>>, %arg4: memref<2x1x1xi32, #tpu.memory_space<vmem>>, %arg5: memref<32x512xf32, #tpu.memory_space<vmem>>, %arg6: memref<128x512xf32, #tpu.memory_space<vmem>>, %arg7: memref<1x512xf32, #tpu.memory_space<vmem>>, %arg8: memref<128x128xf32, #tpu.memory_space<vmem>>, %arg9: memref<1x128xf32, #tpu.memory_space<vmem>>, %arg10: memref<2x8x128xf32, #tpu.memory_space<vmem>>, %arg11: memref<2x8x512xf32, #tpu.memory_space<vmem>>, %arg12: memref<8x2x128xf32, #tpu.memory_space<vmem>>, %arg13: memref<2x128xf32, #tpu.memory_space<vmem>>, %arg14: memref<2x128xf32, #tpu.memory_space<vmem>>) attributes {dimension_semantics = [#tpu.dimension_semantics<parallel>, #tpu.dimension_semantics<arbitrary>], iteration_bounds = array<i64: 1, 1>, scalar_prefetch = 1 : i64, scratch_operands = 4 : i64, tpu.core_type = #tpu.core_type<tc>, window_params = [{transform_indices = @transform_0, window_bounds = array<i64: 2, 8, 32>}, {transform_indices = @transform_1, window_bounds = array<i64: 2, 1, 1>}, {pipeline_mode = #tpu.pipeline_mode<synchronous>, transform_indices = @transform_2, window_bounds = array<i64: 32, 512>}, {pipeline_mode = #tpu.pipeline_mode<synchronous>, transform_indices = @transform_3, window_bounds = array<i64: 128, 512>}, {pipeline_mode = #tpu.pipeline_mode<synchronous>, transform_indices = @transform_4, window_bounds = array<i64: 1, 512>}, {pipeline_mode = #tpu.pipeline_mode<synchronous>, transform_indices = @transform_5, window_bounds = array<i64: 128, 128>}, {pipeline_mode = #tpu.pipeline_mode<synchronous>, transform_indices = @transform_6, window_bounds = array<i64: 1, 128>}, {transform_indices = @transform_7, window_bounds = array<i64: 2, 8, 128>}]} {
    %c8_i32 = arith.constant 8 : i32
    %0 = arith.muli %arg1, %c8_i32 : i32
    %c0_i32 = arith.constant 0 : i32
    %1 = arith.cmpi eq, %arg1, %c0_i32 : i32
    %2 = arith.extui %1 : i1 to i32
    %c0_i32_0 = arith.constant 0 : i32
    %3 = arith.cmpi ne, %2, %c0_i32_0 : i32
    scf.if %3 {
      %cst = arith.constant 0.000000e+00 : f32
      %12 = vector.broadcast %cst : f32 to vector<2x128xf32>
      %c0 = arith.constant 0 : index
      %c0_3 = arith.constant 0 : index
      %13 = vector.load %arg13[%c0, %c0_3] : memref<2x128xf32, #tpu.memory_space<vmem>>, vector<2x128xf32>
      tpu.vector_store %arg13[%c0, %c0_3], %12 {strides = array<i32>} : memref<2x128xf32, #tpu.memory_space<vmem>>, vector<2x128xf32>,
      %cst_4 = arith.constant 0.000000e+00 : f32
      %14 = vector.broadcast %cst_4 : f32 to vector<2x128xf32>
      %c0_5 = arith.constant 0 : index
      %c0_6 = arith.constant 0 : index
      %15 = vector.load %arg14[%c0_5, %c0_6] : memref<2x128xf32, #tpu.memory_space<vmem>>, vector<2x128xf32>
      tpu.vector_store %arg14[%c0_5, %c0_6], %14 {strides = array<i32>} : memref<2x128xf32, #tpu.memory_space<vmem>>, vector<2x128xf32>,
    } else {
    }
    %4 = arith.index_cast %arg0 : i32 to index
    %5 = memref.load %arg2[%4] : memref<1xi32, #tpu.memory_space<smem>>
    %6 = arith.cmpi slt, %0, %5 : i32
    %7 = arith.extui %6 : i1 to i32
    %c0_i32_1 = arith.constant 0 : i32
    %8 = arith.cmpi ne, %7, %c0_i32_1 : i32
    scf.if %8 {
      %c0 = arith.constant 0 : index
      %c0_3 = arith.constant 0 : index
      %c0_4 = arith.constant 0 : index
      %12 = vector.load %arg4[%c0, %c0_3, %c0_4] : memref<2x1x1xi32, #tpu.memory_space<vmem>>, vector<2x1x1xi32>
      %13 = vector.shape_cast %12 : vector<2x1x1xi32> to vector<2x1xi32>
      %c0_5 = arith.constant 0 : index
      %c0_6 = arith.constant 0 : index
      %c0_7 = arith.constant 0 : index
      %14 = vector.load %arg3[%c0_5, %c0_6, %c0_7] : memref<2x8x32xf32, #tpu.memory_space<vmem>>, vector<2x8x32xf32>
      %15 = vector.shape_cast %14 : vector<2x8x32xf32> to vector<16x32xf32>
      %c0_8 = arith.constant 0 : index
      %c0_9 = arith.constant 0 : index
      %16 = vector.load %arg5[%c0_8, %c0_9] : memref<32x512xf32, #tpu.memory_space<vmem>>, vector<32x512xf32>
      %cst = arith.constant dense<0.000000e+00> : vector<16x512xf32>
      %17 = tpu.matmul %15, %16, %cst {dimension_numbers = #tpu.dot_dimension_numbers<[1], [0], [0], [1], [0, 0, 1, 1], [], []>} : vector<16x32xf32>, vector<32x512xf32>, vector<16x512xf32> -> vector<16x512xf32>
      %c0_10 = arith.constant 0 : index
      %c0_11 = arith.constant 0 : index
      %18 = vector.load %arg7[%c0_10, %c0_11] : memref<1x512xf32, #tpu.memory_space<vmem>>, vector<1x512xf32>
      %19 = vector.broadcast %18 : vector<1x512xf32> to vector<16x512xf32>
      %20 = arith.addf %17, %19 : vector<16x512xf32>
      %21 = vector.shape_cast %20 : vector<16x512xf32> to vector<2x8x512xf32>
      %c0_12 = arith.constant 0 : index
      %c0_13 = arith.constant 0 : index
      %c0_14 = arith.constant 0 : index
      %22 = vector.load %arg11[%c0_12, %c0_13, %c0_14] : memref<2x8x512xf32, #tpu.memory_space<vmem>>, vector<2x8x512xf32>
      tpu.vector_store %arg11[%c0_12, %c0_13, %c0_14], %21 {strides = array<i32>} : memref<2x8x512xf32, #tpu.memory_space<vmem>>, vector<2x8x512xf32>,
      %c0_15 = arith.constant 0 : index
      %c0_16 = arith.constant 0 : index
      %23 = vector.load %arg6[%c0_15, %c0_16] : memref<128x512xf32, #tpu.memory_space<vmem>>, vector<128x512xf32>
      %c0_17 = arith.constant 0 : index
      %c0_18 = arith.constant 0 : index
      %24 = vector.load %arg13[%c0_17, %c0_18] : memref<2x128xf32, #tpu.memory_space<vmem>>, vector<2x128xf32>
      %c0_19 = arith.constant 0 : index
      %c0_20 = arith.constant 0 : index
      %25 = vector.load %arg14[%c0_19, %c0_20] : memref<2x128xf32, #tpu.memory_space<vmem>>, vector<2x128xf32>
      %c0_21 = arith.constant 0 : index
      %c0_22 = arith.constant 0 : index
      %c0_23 = arith.constant 0 : index
      %26 = vector.load %arg11[%c0_21, %c0_22, %c0_23] : memref<2x8x512xf32, #tpu.memory_space<vmem>>, vector<2x1x512xf32>
      %27 = vector.shape_cast %26 : vector<2x1x512xf32> to vector<2x512xf32>
      %cst_24 = arith.constant dense<0.000000e+00> : vector<2x512xf32>
      %28 = tpu.matmul %24, %23, %cst_24 {dimension_numbers = #tpu.dot_dimension_numbers<[1], [0], [0], [1], [0, 0, 1, 1], [], []>} : vector<2x128xf32>, vector<128x512xf32>, vector<2x512xf32> -> vector<2x512xf32>
      %29 = arith.addf %27, %28 : vector<2x512xf32>
      %30 = vector.extract_strided_slice %29 {offsets = [0, 0], sizes = [2, 384], strides = [1, 1]} : vector<2x512xf32> to vector<2x384xf32>
      %31 = arith.negf %30 : vector<2x384xf32>
      %32 = math.exp %31 : vector<2x384xf32>
      %cst_25 = arith.constant 1.000000e+00 : f32
      %33 = vector.broadcast %cst_25 : f32 to vector<2x384xf32>
      %34 = arith.addf %33, %32 : vector<2x384xf32>
      %35 = arith.divf %33, %34 : vector<2x384xf32>
      %36 = vector.extract_strided_slice %35 {offsets = [0, 0], sizes = [2, 128], strides = [1, 1]} : vector<2x384xf32> to vector<2x128xf32>
      %37 = vector.extract_strided_slice %35 {offsets = [0, 128], sizes = [2, 128], strides = [1, 1]} : vector<2x384xf32> to vector<2x128xf32>
      %38 = vector.extract_strided_slice %35 {offsets = [0, 256], sizes = [2, 128], strides = [1, 1]} : vector<2x384xf32> to vector<2x128xf32>
      %39 = vector.extract_strided_slice %29 {offsets = [0, 384], sizes = [2, 128], strides = [1, 1]} : vector<2x512xf32> to vector<2x128xf32>
      %40 = math.tanh %39 : vector<2x128xf32>
      %41 = arith.mulf %37, %25 : vector<2x128xf32>
      %42 = arith.mulf %36, %40 : vector<2x128xf32>
      %43 = arith.addf %41, %42 : vector<2x128xf32>
      %44 = math.tanh %43 : vector<2x128xf32>
      %45 = arith.mulf %38, %44 : vector<2x128xf32>
      %c0_i32_26 = arith.constant 0 : i32
      %46 = arith.addi %0, %c0_i32_26 : i32
      %47 = vector.broadcast %46 : i32 to vector<2x1xi32>
      %48 = arith.cmpi slt, %47, %13 : vector<2x1xi32>
      %49 = vector.shape_cast %48 : vector<2x1xi1> to vector<2x1xi1>
      %50 = vector.broadcast %49 : vector<2x1xi1> to vector<2x128xi1>
      %51 = arith.select %50, %45, %24 : vector<2x128xi1>, vector<2x128xf32>
      %52 = vector.shape_cast %48 : vector<2x1xi1> to vector<2x1xi1>
      %53 = vector.broadcast %52 : vector<2x1xi1> to vector<2x128xi1>
      %54 = arith.select %53, %43, %25 : vector<2x128xi1>, vector<2x128xf32>
      %cst_27 = arith.constant 0.000000e+00 : f32
      %55 = vector.shape_cast %48 : vector<2x1xi1> to vector<2x1xi1>
      %56 = vector.broadcast %55 : vector<2x1xi1> to vector<2x128xi1>
      %57 = vector.broadcast %cst_27 : f32 to vector<2x128xf32>
      %58 = arith.select %56, %45, %57 : vector<2x128xi1>, vector<2x128xf32>
      %c0_28 = arith.constant 0 : index
      %c0_29 = arith.constant 0 : index
      %c0_30 = arith.constant 0 : index
      %59 = vector.load %arg12[%c0_28, %c0_29, %c0_30] : memref<8x2x128xf32, #tpu.memory_space<vmem>>, vector<1x2x128xf32>
      %60 = vector.shape_cast %59 : vector<1x2x128xf32> to vector<2x128xf32>
      %61 = vector.shape_cast %58 : vector<2x128xf32> to vector<1x2x128xf32>
      tpu.vector_store %arg12[%c0_28, %c0_29, %c0_30], %61 {strides = array<i32>} : memref<8x2x128xf32, #tpu.memory_space<vmem>>, vector<1x2x128xf32>,
      %c0_31 = arith.constant 0 : index
      %c1 = arith.constant 1 : index
      %c0_32 = arith.constant 0 : index
      %62 = vector.load %arg11[%c0_31, %c1, %c0_32] : memref<2x8x512xf32, #tpu.memory_space<vmem>>, vector<2x1x512xf32>
      %63 = vector.shape_cast %62 : vector<2x1x512xf32> to vector<2x512xf32>
      %cst_33 = arith.constant dense<0.000000e+00> : vector<2x512xf32>
      %64 = tpu.matmul %51, %23, %cst_33 {dimension_numbers = #tpu.dot_dimension_numbers<[1], [0], [0], [1], [0, 0, 1, 1], [], []>} : vector<2x128xf32>, vector<128x512xf32>, vector<2x512xf32> -> vector<2x512xf32>
      %65 = arith.addf %63, %64 : vector<2x512xf32>
      %66 = vector.extract_strided_slice %65 {offsets = [0, 0], sizes = [2, 384], strides = [1, 1]} : vector<2x512xf32> to vector<2x384xf32>
      %67 = arith.negf %66 : vector<2x384xf32>
      %68 = math.exp %67 : vector<2x384xf32>
      %cst_34 = arith.constant 1.000000e+00 : f32
      %69 = vector.broadcast %cst_34 : f32 to vector<2x384xf32>
      %70 = arith.addf %69, %68 : vector<2x384xf32>
      %71 = arith.divf %69, %70 : vector<2x384xf32>
      %72 = vector.extract_strided_slice %71 {offsets = [0, 0], sizes = [2, 128], strides = [1, 1]} : vector<2x384xf32> to vector<2x128xf32>
      %73 = vector.extract_strided_slice %71 {offsets = [0, 128], sizes = [2, 128], strides = [1, 1]} : vector<2x384xf32> to vector<2x128xf32>
      %74 = vector.extract_strided_slice %71 {offsets = [0, 256], sizes = [2, 128], strides = [1, 1]} : vector<2x384xf32> to vector<2x128xf32>
      %75 = vector.extract_strided_slice %65 {offsets = [0, 384], sizes = [2, 128], strides = [1, 1]} : vector<2x512xf32> to vector<2x128xf32>
      %76 = math.tanh %75 : vector<2x128xf32>
      %77 = arith.mulf %73, %54 : vector<2x128xf32>
      %78 = arith.mulf %72, %76 : vector<2x128xf32>
      %79 = arith.addf %77, %78 : vector<2x128xf32>
      %80 = math.tanh %79 : vector<2x128xf32>
      %81 = arith.mulf %74, %80 : vector<2x128xf32>
      %c1_i32 = arith.constant 1 : i32
      %82 = arith.addi %0, %c1_i32 : i32
      %83 = vector.broadcast %82 : i32 to vector<2x1xi32>
      %84 = arith.cmpi slt, %83, %13 : vector<2x1xi32>
      %85 = vector.shape_cast %84 : vector<2x1xi1> to vector<2x1xi1>
      %86 = vector.broadcast %85 : vector<2x1xi1> to vector<2x128xi1>
      %87 = arith.select %86, %81, %51 : vector<2x128xi1>, vector<2x128xf32>
      %88 = vector.shape_cast %84 : vector<2x1xi1> to vector<2x1xi1>
      %89 = vector.broadcast %88 : vector<2x1xi1> to vector<2x128xi1>
      %90 = arith.select %89, %79, %54 : vector<2x128xi1>, vector<2x128xf32>
      %cst_35 = arith.constant 0.000000e+00 : f32
      %91 = vector.shape_cast %84 : vector<2x1xi1> to vector<2x1xi1>
      %92 = vector.broadcast %91 : vector<2x1xi1> to vector<2x128xi1>
      %93 = vector.broadcast %cst_35 : f32 to vector<2x128xf32>
      %94 = arith.select %92, %81, %93 : vector<2x128xi1>, vector<2x128xf32>
      %c1_36 = arith.constant 1 : index
      %c0_37 = arith.constant 0 : index
      %c0_38 = arith.constant 0 : index
      %95 = vector.load %arg12[%c1_36, %c0_37, %c0_38] : memref<8x2x128xf32, #tpu.memory_space<vmem>>, vector<1x2x128xf32>
      %96 = vector.shape_cast %95 : vector<1x2x128xf32> to vector<2x128xf32>
      %97 = vector.shape_cast %94 : vector<2x128xf32> to vector<1x2x128xf32>
      tpu.vector_store %arg12[%c1_36, %c0_37, %c0_38], %97 {strides = array<i32>} : memref<8x2x128xf32, #tpu.memory_space<vmem>>, vector<1x2x128xf32>,
      %c0_39 = arith.constant 0 : index
      %c2 = arith.constant 2 : index
      %c0_40 = arith.constant 0 : index
      %98 = vector.load %arg11[%c0_39, %c2, %c0_40] : memref<2x8x512xf32, #tpu.memory_space<vmem>>, vector<2x1x512xf32>
      %99 = vector.shape_cast %98 : vector<2x1x512xf32> to vector<2x512xf32>
      %cst_41 = arith.constant dense<0.000000e+00> : vector<2x512xf32>
      %100 = tpu.matmul %87, %23, %cst_41 {dimension_numbers = #tpu.dot_dimension_numbers<[1], [0], [0], [1], [0, 0, 1, 1], [], []>} : vector<2x128xf32>, vector<128x512xf32>, vector<2x512xf32> -> vector<2x512xf32>
      %101 = arith.addf %99, %100 : vector<2x512xf32>
      %102 = vector.extract_strided_slice %101 {offsets = [0, 0], sizes = [2, 384], strides = [1, 1]} : vector<2x512xf32> to vector<2x384xf32>
      %103 = arith.negf %102 : vector<2x384xf32>
      %104 = math.exp %103 : vector<2x384xf32>
      %cst_42 = arith.constant 1.000000e+00 : f32
      %105 = vector.broadcast %cst_42 : f32 to vector<2x384xf32>
      %106 = arith.addf %105, %104 : vector<2x384xf32>
      %107 = arith.divf %105, %106 : vector<2x384xf32>
      %108 = vector.extract_strided_slice %107 {offsets = [0, 0], sizes = [2, 128], strides = [1, 1]} : vector<2x384xf32> to vector<2x128xf32>
      %109 = vector.extract_strided_slice %107 {offsets = [0, 128], sizes = [2, 128], strides = [1, 1]} : vector<2x384xf32> to vector<2x128xf32>
      %110 = vector.extract_strided_slice %107 {offsets = [0, 256], sizes = [2, 128], strides = [1, 1]} : vector<2x384xf32> to vector<2x128xf32>
      %111 = vector.extract_strided_slice %101 {offsets = [0, 384], sizes = [2, 128], strides = [1, 1]} : vector<2x512xf32> to vector<2x128xf32>
      %112 = math.tanh %111 : vector<2x128xf32>
      %113 = arith.mulf %109, %90 : vector<2x128xf32>
      %114 = arith.mulf %108, %112 : vector<2x128xf32>
      %115 = arith.addf %113, %114 : vector<2x128xf32>
      %116 = math.tanh %115 : vector<2x128xf32>
      %117 = arith.mulf %110, %116 : vector<2x128xf32>
      %c2_i32 = arith.constant 2 : i32
      %118 = arith.addi %0, %c2_i32 : i32
      %119 = vector.broadcast %118 : i32 to vector<2x1xi32>
      %120 = arith.cmpi slt, %119, %13 : vector<2x1xi32>
      %121 = vector.shape_cast %120 : vector<2x1xi1> to vector<2x1xi1>
      %122 = vector.broadcast %121 : vector<2x1xi1> to vector<2x128xi1>
      %123 = arith.select %122, %117, %87 : vector<2x128xi1>, vector<2x128xf32>
      %124 = vector.shape_cast %120 : vector<2x1xi1> to vector<2x1xi1>
      %125 = vector.broadcast %124 : vector<2x1xi1> to vector<2x128xi1>
      %126 = arith.select %125, %115, %90 : vector<2x128xi1>, vector<2x128xf32>
      %cst_43 = arith.constant 0.000000e+00 : f32
      %127 = vector.shape_cast %120 : vector<2x1xi1> to vector<2x1xi1>
      %128 = vector.broadcast %127 : vector<2x1xi1> to vector<2x128xi1>
      %129 = vector.broadcast %cst_43 : f32 to vector<2x128xf32>
      %130 = arith.select %128, %117, %129 : vector<2x128xi1>, vector<2x128xf32>
      %c2_44 = arith.constant 2 : index
      %c0_45 = arith.constant 0 : index
      %c0_46 = arith.constant 0 : index
      %131 = vector.load %arg12[%c2_44, %c0_45, %c0_46] : memref<8x2x128xf32, #tpu.memory_space<vmem>>, vector<1x2x128xf32>
      %132 = vector.shape_cast %131 : vector<1x2x128xf32> to vector<2x128xf32>
      %133 = vector.shape_cast %130 : vector<2x128xf32> to vector<1x2x128xf32>
      tpu.vector_store %arg12[%c2_44, %c0_45, %c0_46], %133 {strides = array<i32>} : memref<8x2x128xf32, #tpu.memory_space<vmem>>, vector<1x2x128xf32>,
      %c0_47 = arith.constant 0 : index
      %c3 = arith.constant 3 : index
      %c0_48 = arith.constant 0 : index
      %134 = vector.load %arg11[%c0_47, %c3, %c0_48] : memref<2x8x512xf32, #tpu.memory_space<vmem>>, vector<2x1x512xf32>
      %135 = vector.shape_cast %134 : vector<2x1x512xf32> to vector<2x512xf32>
      %cst_49 = arith.constant dense<0.000000e+00> : vector<2x512xf32>
      %136 = tpu.matmul %123, %23, %cst_49 {dimension_numbers = #tpu.dot_dimension_numbers<[1], [0], [0], [1], [0, 0, 1, 1], [], []>} : vector<2x128xf32>, vector<128x512xf32>, vector<2x512xf32> -> vector<2x512xf32>
      %137 = arith.addf %135, %136 : vector<2x512xf32>
      %138 = vector.extract_strided_slice %137 {offsets = [0, 0], sizes = [2, 384], strides = [1, 1]} : vector<2x512xf32> to vector<2x384xf32>
      %139 = arith.negf %138 : vector<2x384xf32>
      %140 = math.exp %139 : vector<2x384xf32>
      %cst_50 = arith.constant 1.000000e+00 : f32
      %141 = vector.broadcast %cst_50 : f32 to vector<2x384xf32>
      %142 = arith.addf %141, %140 : vector<2x384xf32>
      %143 = arith.divf %141, %142 : vector<2x384xf32>
      %144 = vector.extract_strided_slice %143 {offsets = [0, 0], sizes = [2, 128], strides = [1, 1]} : vector<2x384xf32> to vector<2x128xf32>
      %145 = vector.extract_strided_slice %143 {offsets = [0, 128], sizes = [2, 128], strides = [1, 1]} : vector<2x384xf32> to vector<2x128xf32>
      %146 = vector.extract_strided_slice %143 {offsets = [0, 256], sizes = [2, 128], strides = [1, 1]} : vector<2x384xf32> to vector<2x128xf32>
      %147 = vector.extract_strided_slice %137 {offsets = [0, 384], sizes = [2, 128], strides = [1, 1]} : vector<2x512xf32> to vector<2x128xf32>
      %148 = math.tanh %147 : vector<2x128xf32>
      %149 = arith.mulf %145, %126 : vector<2x128xf32>
      %150 = arith.mulf %144, %148 : vector<2x128xf32>
      %151 = arith.addf %149, %150 : vector<2x128xf32>
      %152 = math.tanh %151 : vector<2x128xf32>
      %153 = arith.mulf %146, %152 : vector<2x128xf32>
      %c3_i32 = arith.constant 3 : i32
      %154 = arith.addi %0, %c3_i32 : i32
      %155 = vector.broadcast %154 : i32 to vector<2x1xi32>
      %156 = arith.cmpi slt, %155, %13 : vector<2x1xi32>
      %157 = vector.shape_cast %156 : vector<2x1xi1> to vector<2x1xi1>
      %158 = vector.broadcast %157 : vector<2x1xi1> to vector<2x128xi1>
      %159 = arith.select %158, %153, %123 : vector<2x128xi1>, vector<2x128xf32>
      %160 = vector.shape_cast %156 : vector<2x1xi1> to vector<2x1xi1>
      %161 = vector.broadcast %160 : vector<2x1xi1> to vector<2x128xi1>
      %162 = arith.select %161, %151, %126 : vector<2x128xi1>, vector<2x128xf32>
      %cst_51 = arith.constant 0.000000e+00 : f32
      %163 = vector.shape_cast %156 : vector<2x1xi1> to vector<2x1xi1>
      %164 = vector.broadcast %163 : vector<2x1xi1> to vector<2x128xi1>
      %165 = vector.broadcast %cst_51 : f32 to vector<2x128xf32>
      %166 = arith.select %164, %153, %165 : vector<2x128xi1>, vector<2x128xf32>
      %c3_52 = arith.constant 3 : index
      %c0_53 = arith.constant 0 : index
      %c0_54 = arith.constant 0 : index
      %167 = vector.load %arg12[%c3_52, %c0_53, %c0_54] : memref<8x2x128xf32, #tpu.memory_space<vmem>>, vector<1x2x128xf32>
      %168 = vector.shape_cast %167 : vector<1x2x128xf32> to vector<2x128xf32>
      %169 = vector.shape_cast %166 : vector<2x128xf32> to vector<1x2x128xf32>
      tpu.vector_store %arg12[%c3_52, %c0_53, %c0_54], %169 {strides = array<i32>} : memref<8x2x128xf32, #tpu.memory_space<vmem>>, vector<1x2x128xf32>,
      %c0_55 = arith.constant 0 : index
      %c4 = arith.constant 4 : index
      %c0_56 = arith.constant 0 : index
      %170 = vector.load %arg11[%c0_55, %c4, %c0_56] : memref<2x8x512xf32, #tpu.memory_space<vmem>>, vector<2x1x512xf32>
      %171 = vector.shape_cast %170 : vector<2x1x512xf32> to vector<2x512xf32>
      %cst_57 = arith.constant dense<0.000000e+00> : vector<2x512xf32>
      %172 = tpu.matmul %159, %23, %cst_57 {dimension_numbers = #tpu.dot_dimension_numbers<[1], [0], [0], [1], [0, 0, 1, 1], [], []>} : vector<2x128xf32>, vector<128x512xf32>, vector<2x512xf32> -> vector<2x512xf32>
      %173 = arith.addf %171, %172 : vector<2x512xf32>
      %174 = vector.extract_strided_slice %173 {offsets = [0, 0], sizes = [2, 384], strides = [1, 1]} : vector<2x512xf32> to vector<2x384xf32>
      %175 = arith.negf %174 : vector<2x384xf32>
      %176 = math.exp %175 : vector<2x384xf32>
      %cst_58 = arith.constant 1.000000e+00 : f32
      %177 = vector.broadcast %cst_58 : f32 to vector<2x384xf32>
      %178 = arith.addf %177, %176 : vector<2x384xf32>
      %179 = arith.divf %177, %178 : vector<2x384xf32>
      %180 = vector.extract_strided_slice %179 {offsets = [0, 0], sizes = [2, 128], strides = [1, 1]} : vector<2x384xf32> to vector<2x128xf32>
      %181 = vector.extract_strided_slice %179 {offsets = [0, 128], sizes = [2, 128], strides = [1, 1]} : vector<2x384xf32> to vector<2x128xf32>
      %182 = vector.extract_strided_slice %179 {offsets = [0, 256], sizes = [2, 128], strides = [1, 1]} : vector<2x384xf32> to vector<2x128xf32>
      %183 = vector.extract_strided_slice %173 {offsets = [0, 384], sizes = [2, 128], strides = [1, 1]} : vector<2x512xf32> to vector<2x128xf32>
      %184 = math.tanh %183 : vector<2x128xf32>
      %185 = arith.mulf %181, %162 : vector<2x128xf32>
      %186 = arith.mulf %180, %184 : vector<2x128xf32>
      %187 = arith.addf %185, %186 : vector<2x128xf32>
      %188 = math.tanh %187 : vector<2x128xf32>
      %189 = arith.mulf %182, %188 : vector<2x128xf32>
      %c4_i32 = arith.constant 4 : i32
      %190 = arith.addi %0, %c4_i32 : i32
      %191 = vector.broadcast %190 : i32 to vector<2x1xi32>
      %192 = arith.cmpi slt, %191, %13 : vector<2x1xi32>
      %193 = vector.shape_cast %192 : vector<2x1xi1> to vector<2x1xi1>
      %194 = vector.broadcast %193 : vector<2x1xi1> to vector<2x128xi1>
      %195 = arith.select %194, %189, %159 : vector<2x128xi1>, vector<2x128xf32>
      %196 = vector.shape_cast %192 : vector<2x1xi1> to vector<2x1xi1>
      %197 = vector.broadcast %196 : vector<2x1xi1> to vector<2x128xi1>
      %198 = arith.select %197, %187, %162 : vector<2x128xi1>, vector<2x128xf32>
      %cst_59 = arith.constant 0.000000e+00 : f32
      %199 = vector.shape_cast %192 : vector<2x1xi1> to vector<2x1xi1>
      %200 = vector.broadcast %199 : vector<2x1xi1> to vector<2x128xi1>
      %201 = vector.broadcast %cst_59 : f32 to vector<2x128xf32>
      %202 = arith.select %200, %189, %201 : vector<2x128xi1>, vector<2x128xf32>
      %c4_60 = arith.constant 4 : index
      %c0_61 = arith.constant 0 : index
      %c0_62 = arith.constant 0 : index
      %203 = vector.load %arg12[%c4_60, %c0_61, %c0_62] : memref<8x2x128xf32, #tpu.memory_space<vmem>>, vector<1x2x128xf32>
      %204 = vector.shape_cast %203 : vector<1x2x128xf32> to vector<2x128xf32>
      %205 = vector.shape_cast %202 : vector<2x128xf32> to vector<1x2x128xf32>
      tpu.vector_store %arg12[%c4_60, %c0_61, %c0_62], %205 {strides = array<i32>} : memref<8x2x128xf32, #tpu.memory_space<vmem>>, vector<1x2x128xf32>,
      %c0_63 = arith.constant 0 : index
      %c5 = arith.constant 5 : index
      %c0_64 = arith.constant 0 : index
      %206 = vector.load %arg11[%c0_63, %c5, %c0_64] : memref<2x8x512xf32, #tpu.memory_space<vmem>>, vector<2x1x512xf32>
      %207 = vector.shape_cast %206 : vector<2x1x512xf32> to vector<2x512xf32>
      %cst_65 = arith.constant dense<0.000000e+00> : vector<2x512xf32>
      %208 = tpu.matmul %195, %23, %cst_65 {dimension_numbers = #tpu.dot_dimension_numbers<[1], [0], [0], [1], [0, 0, 1, 1], [], []>} : vector<2x128xf32>, vector<128x512xf32>, vector<2x512xf32> -> vector<2x512xf32>
      %209 = arith.addf %207, %208 : vector<2x512xf32>
      %210 = vector.extract_strided_slice %209 {offsets = [0, 0], sizes = [2, 384], strides = [1, 1]} : vector<2x512xf32> to vector<2x384xf32>
      %211 = arith.negf %210 : vector<2x384xf32>
      %212 = math.exp %211 : vector<2x384xf32>
      %cst_66 = arith.constant 1.000000e+00 : f32
      %213 = vector.broadcast %cst_66 : f32 to vector<2x384xf32>
      %214 = arith.addf %213, %212 : vector<2x384xf32>
      %215 = arith.divf %213, %214 : vector<2x384xf32>
      %216 = vector.extract_strided_slice %215 {offsets = [0, 0], sizes = [2, 128], strides = [1, 1]} : vector<2x384xf32> to vector<2x128xf32>
      %217 = vector.extract_strided_slice %215 {offsets = [0, 128], sizes = [2, 128], strides = [1, 1]} : vector<2x384xf32> to vector<2x128xf32>
      %218 = vector.extract_strided_slice %215 {offsets = [0, 256], sizes = [2, 128], strides = [1, 1]} : vector<2x384xf32> to vector<2x128xf32>
      %219 = vector.extract_strided_slice %209 {offsets = [0, 384], sizes = [2, 128], strides = [1, 1]} : vector<2x512xf32> to vector<2x128xf32>
      %220 = math.tanh %219 : vector<2x128xf32>
      %221 = arith.mulf %217, %198 : vector<2x128xf32>
      %222 = arith.mulf %216, %220 : vector<2x128xf32>
      %223 = arith.addf %221, %222 : vector<2x128xf32>
      %224 = math.tanh %223 : vector<2x128xf32>
      %225 = arith.mulf %218, %224 : vector<2x128xf32>
      %c5_i32 = arith.constant 5 : i32
      %226 = arith.addi %0, %c5_i32 : i32
      %227 = vector.broadcast %226 : i32 to vector<2x1xi32>
      %228 = arith.cmpi slt, %227, %13 : vector<2x1xi32>
      %229 = vector.shape_cast %228 : vector<2x1xi1> to vector<2x1xi1>
      %230 = vector.broadcast %229 : vector<2x1xi1> to vector<2x128xi1>
      %231 = arith.select %230, %225, %195 : vector<2x128xi1>, vector<2x128xf32>
      %232 = vector.shape_cast %228 : vector<2x1xi1> to vector<2x1xi1>
      %233 = vector.broadcast %232 : vector<2x1xi1> to vector<2x128xi1>
      %234 = arith.select %233, %223, %198 : vector<2x128xi1>, vector<2x128xf32>
      %cst_67 = arith.constant 0.000000e+00 : f32
      %235 = vector.shape_cast %228 : vector<2x1xi1> to vector<2x1xi1>
      %236 = vector.broadcast %235 : vector<2x1xi1> to vector<2x128xi1>
      %237 = vector.broadcast %cst_67 : f32 to vector<2x128xf32>
      %238 = arith.select %236, %225, %237 : vector<2x128xi1>, vector<2x128xf32>
      %c5_68 = arith.constant 5 : index
      %c0_69 = arith.constant 0 : index
      %c0_70 = arith.constant 0 : index
      %239 = vector.load %arg12[%c5_68, %c0_69, %c0_70] : memref<8x2x128xf32, #tpu.memory_space<vmem>>, vector<1x2x128xf32>
      %240 = vector.shape_cast %239 : vector<1x2x128xf32> to vector<2x128xf32>
      %241 = vector.shape_cast %238 : vector<2x128xf32> to vector<1x2x128xf32>
      tpu.vector_store %arg12[%c5_68, %c0_69, %c0_70], %241 {strides = array<i32>} : memref<8x2x128xf32, #tpu.memory_space<vmem>>, vector<1x2x128xf32>,
      %c0_71 = arith.constant 0 : index
      %c6 = arith.constant 6 : index
      %c0_72 = arith.constant 0 : index
      %242 = vector.load %arg11[%c0_71, %c6, %c0_72] : memref<2x8x512xf32, #tpu.memory_space<vmem>>, vector<2x1x512xf32>
      %243 = vector.shape_cast %242 : vector<2x1x512xf32> to vector<2x512xf32>
      %cst_73 = arith.constant dense<0.000000e+00> : vector<2x512xf32>
      %244 = tpu.matmul %231, %23, %cst_73 {dimension_numbers = #tpu.dot_dimension_numbers<[1], [0], [0], [1], [0, 0, 1, 1], [], []>} : vector<2x128xf32>, vector<128x512xf32>, vector<2x512xf32> -> vector<2x512xf32>
      %245 = arith.addf %243, %244 : vector<2x512xf32>
      %246 = vector.extract_strided_slice %245 {offsets = [0, 0], sizes = [2, 384], strides = [1, 1]} : vector<2x512xf32> to vector<2x384xf32>
      %247 = arith.negf %246 : vector<2x384xf32>
      %248 = math.exp %247 : vector<2x384xf32>
      %cst_74 = arith.constant 1.000000e+00 : f32
      %249 = vector.broadcast %cst_74 : f32 to vector<2x384xf32>
      %250 = arith.addf %249, %248 : vector<2x384xf32>
      %251 = arith.divf %249, %250 : vector<2x384xf32>
      %252 = vector.extract_strided_slice %251 {offsets = [0, 0], sizes = [2, 128], strides = [1, 1]} : vector<2x384xf32> to vector<2x128xf32>
      %253 = vector.extract_strided_slice %251 {offsets = [0, 128], sizes = [2, 128], strides = [1, 1]} : vector<2x384xf32> to vector<2x128xf32>
      %254 = vector.extract_strided_slice %251 {offsets = [0, 256], sizes = [2, 128], strides = [1, 1]} : vector<2x384xf32> to vector<2x128xf32>
      %255 = vector.extract_strided_slice %245 {offsets = [0, 384], sizes = [2, 128], strides = [1, 1]} : vector<2x512xf32> to vector<2x128xf32>
      %256 = math.tanh %255 : vector<2x128xf32>
      %257 = arith.mulf %253, %234 : vector<2x128xf32>
      %258 = arith.mulf %252, %256 : vector<2x128xf32>
      %259 = arith.addf %257, %258 : vector<2x128xf32>
      %260 = math.tanh %259 : vector<2x128xf32>
      %261 = arith.mulf %254, %260 : vector<2x128xf32>
      %c6_i32 = arith.constant 6 : i32
      %262 = arith.addi %0, %c6_i32 : i32
      %263 = vector.broadcast %262 : i32 to vector<2x1xi32>
      %264 = arith.cmpi slt, %263, %13 : vector<2x1xi32>
      %265 = vector.shape_cast %264 : vector<2x1xi1> to vector<2x1xi1>
      %266 = vector.broadcast %265 : vector<2x1xi1> to vector<2x128xi1>
      %267 = arith.select %266, %261, %231 : vector<2x128xi1>, vector<2x128xf32>
      %268 = vector.shape_cast %264 : vector<2x1xi1> to vector<2x1xi1>
      %269 = vector.broadcast %268 : vector<2x1xi1> to vector<2x128xi1>
      %270 = arith.select %269, %259, %234 : vector<2x128xi1>, vector<2x128xf32>
      %cst_75 = arith.constant 0.000000e+00 : f32
      %271 = vector.shape_cast %264 : vector<2x1xi1> to vector<2x1xi1>
      %272 = vector.broadcast %271 : vector<2x1xi1> to vector<2x128xi1>
      %273 = vector.broadcast %cst_75 : f32 to vector<2x128xf32>
      %274 = arith.select %272, %261, %273 : vector<2x128xi1>, vector<2x128xf32>
      %c6_76 = arith.constant 6 : index
      %c0_77 = arith.constant 0 : index
      %c0_78 = arith.constant 0 : index
      %275 = vector.load %arg12[%c6_76, %c0_77, %c0_78] : memref<8x2x128xf32, #tpu.memory_space<vmem>>, vector<1x2x128xf32>
      %276 = vector.shape_cast %275 : vector<1x2x128xf32> to vector<2x128xf32>
      %277 = vector.shape_cast %274 : vector<2x128xf32> to vector<1x2x128xf32>
      tpu.vector_store %arg12[%c6_76, %c0_77, %c0_78], %277 {strides = array<i32>} : memref<8x2x128xf32, #tpu.memory_space<vmem>>, vector<1x2x128xf32>,
      %c0_79 = arith.constant 0 : index
      %c7 = arith.constant 7 : index
      %c0_80 = arith.constant 0 : index
      %278 = vector.load %arg11[%c0_79, %c7, %c0_80] : memref<2x8x512xf32, #tpu.memory_space<vmem>>, vector<2x1x512xf32>
      %279 = vector.shape_cast %278 : vector<2x1x512xf32> to vector<2x512xf32>
      %cst_81 = arith.constant dense<0.000000e+00> : vector<2x512xf32>
      %280 = tpu.matmul %267, %23, %cst_81 {dimension_numbers = #tpu.dot_dimension_numbers<[1], [0], [0], [1], [0, 0, 1, 1], [], []>} : vector<2x128xf32>, vector<128x512xf32>, vector<2x512xf32> -> vector<2x512xf32>
      %281 = arith.addf %279, %280 : vector<2x512xf32>
      %282 = vector.extract_strided_slice %281 {offsets = [0, 0], sizes = [2, 384], strides = [1, 1]} : vector<2x512xf32> to vector<2x384xf32>
      %283 = arith.negf %282 : vector<2x384xf32>
      %284 = math.exp %283 : vector<2x384xf32>
      %cst_82 = arith.constant 1.000000e+00 : f32
      %285 = vector.broadcast %cst_82 : f32 to vector<2x384xf32>
      %286 = arith.addf %285, %284 : vector<2x384xf32>
      %287 = arith.divf %285, %286 : vector<2x384xf32>
      %288 = vector.extract_strided_slice %287 {offsets = [0, 0], sizes = [2, 128], strides = [1, 1]} : vector<2x384xf32> to vector<2x128xf32>
      %289 = vector.extract_strided_slice %287 {offsets = [0, 128], sizes = [2, 128], strides = [1, 1]} : vector<2x384xf32> to vector<2x128xf32>
      %290 = vector.extract_strided_slice %287 {offsets = [0, 256], sizes = [2, 128], strides = [1, 1]} : vector<2x384xf32> to vector<2x128xf32>
      %291 = vector.extract_strided_slice %281 {offsets = [0, 384], sizes = [2, 128], strides = [1, 1]} : vector<2x512xf32> to vector<2x128xf32>
      %292 = math.tanh %291 : vector<2x128xf32>
      %293 = arith.mulf %289, %270 : vector<2x128xf32>
      %294 = arith.mulf %288, %292 : vector<2x128xf32>
      %295 = arith.addf %293, %294 : vector<2x128xf32>
      %296 = math.tanh %295 : vector<2x128xf32>
      %297 = arith.mulf %290, %296 : vector<2x128xf32>
      %c7_i32 = arith.constant 7 : i32
      %298 = arith.addi %0, %c7_i32 : i32
      %299 = vector.broadcast %298 : i32 to vector<2x1xi32>
      %300 = arith.cmpi slt, %299, %13 : vector<2x1xi32>
      %301 = vector.shape_cast %300 : vector<2x1xi1> to vector<2x1xi1>
      %302 = vector.broadcast %301 : vector<2x1xi1> to vector<2x128xi1>
      %303 = arith.select %302, %297, %267 : vector<2x128xi1>, vector<2x128xf32>
      %304 = vector.shape_cast %300 : vector<2x1xi1> to vector<2x1xi1>
      %305 = vector.broadcast %304 : vector<2x1xi1> to vector<2x128xi1>
      %306 = arith.select %305, %295, %270 : vector<2x128xi1>, vector<2x128xf32>
      %cst_83 = arith.constant 0.000000e+00 : f32
      %307 = vector.shape_cast %300 : vector<2x1xi1> to vector<2x1xi1>
      %308 = vector.broadcast %307 : vector<2x1xi1> to vector<2x128xi1>
      %309 = vector.broadcast %cst_83 : f32 to vector<2x128xf32>
      %310 = arith.select %308, %297, %309 : vector<2x128xi1>, vector<2x128xf32>
      %c7_84 = arith.constant 7 : index
      %c0_85 = arith.constant 0 : index
      %c0_86 = arith.constant 0 : index
      %311 = vector.load %arg12[%c7_84, %c0_85, %c0_86] : memref<8x2x128xf32, #tpu.memory_space<vmem>>, vector<1x2x128xf32>
      %312 = vector.shape_cast %311 : vector<1x2x128xf32> to vector<2x128xf32>
      %313 = vector.shape_cast %310 : vector<2x128xf32> to vector<1x2x128xf32>
      tpu.vector_store %arg12[%c7_84, %c0_85, %c0_86], %313 {strides = array<i32>} : memref<8x2x128xf32, #tpu.memory_space<vmem>>, vector<1x2x128xf32>,
      %c0_87 = arith.constant 0 : index
      %c0_88 = arith.constant 0 : index
      %314 = vector.load %arg13[%c0_87, %c0_88] : memref<2x128xf32, #tpu.memory_space<vmem>>, vector<2x128xf32>
      tpu.vector_store %arg13[%c0_87, %c0_88], %303 {strides = array<i32>} : memref<2x128xf32, #tpu.memory_space<vmem>>, vector<2x128xf32>,
      %c0_89 = arith.constant 0 : index
      %c0_90 = arith.constant 0 : index
      %315 = vector.load %arg14[%c0_89, %c0_90] : memref<2x128xf32, #tpu.memory_space<vmem>>, vector<2x128xf32>
      tpu.vector_store %arg14[%c0_89, %c0_90], %306 {strides = array<i32>} : memref<2x128xf32, #tpu.memory_space<vmem>>, vector<2x128xf32>,
      %c0_91 = arith.constant 0 : index
      %c0_92 = arith.constant 0 : index
      %c0_93 = arith.constant 0 : index
      %316 = vector.load %arg12[%c0_91, %c0_92, %c0_93] : memref<8x2x128xf32, #tpu.memory_space<vmem>>, vector<8x2x128xf32>
      %317 = vector.shape_cast %316 : vector<8x2x128xf32> to vector<16x128xf32>
      %c0_94 = arith.constant 0 : index
      %c0_95 = arith.constant 0 : index
      %318 = vector.load %arg8[%c0_94, %c0_95] : memref<128x128xf32, #tpu.memory_space<vmem>>, vector<128x128xf32>
      %cst_96 = arith.constant dense<0.000000e+00> : vector<16x128xf32>
      %319 = tpu.matmul %317, %318, %cst_96 {dimension_numbers = #tpu.dot_dimension_numbers<[1], [0], [0], [1], [0, 0, 1, 1], [], []>} : vector<16x128xf32>, vector<128x128xf32>, vector<16x128xf32> -> vector<16x128xf32>
      %320 = vector.shape_cast %319 : vector<16x128xf32> to vector<8x2x128xf32>
      %c0_97 = arith.constant 0 : index
      %c0_98 = arith.constant 0 : index
      %321 = vector.load %arg9[%c0_97, %c0_98] : memref<1x128xf32, #tpu.memory_space<vmem>>, vector<1x128xf32>
      %322 = vector.shape_cast %321 : vector<1x128xf32> to vector<1x1x128xf32>
      %323 = vector.broadcast %322 : vector<1x1x128xf32> to vector<8x2x128xf32>
      %324 = arith.addf %320, %323 : vector<8x2x128xf32>
      %325 = vector.extract_strided_slice %324 {offsets = [0, 0, 0], sizes = [1, 2, 128], strides = [1, 1, 1]} : vector<8x2x128xf32> to vector<1x2x128xf32>
      %326 = vector.shape_cast %325 : vector<1x2x128xf32> to vector<2x128xf32>
      %c0_99 = arith.constant 0 : index
      %c0_100 = arith.constant 0 : index
      %c0_101 = arith.constant 0 : index
      %327 = vector.load %arg10[%c0_99, %c0_100, %c0_101] : memref<2x8x128xf32, #tpu.memory_space<vmem>>, vector<2x1x128xf32>
      %328 = vector.shape_cast %327 : vector<2x1x128xf32> to vector<2x128xf32>
      %329 = vector.shape_cast %326 : vector<2x128xf32> to vector<2x1x128xf32>
      tpu.vector_store %arg10[%c0_99, %c0_100, %c0_101], %329 {strides = array<i32>} : memref<2x8x128xf32, #tpu.memory_space<vmem>>, vector<2x1x128xf32>,
      %330 = vector.extract_strided_slice %324 {offsets = [1, 0, 0], sizes = [1, 2, 128], strides = [1, 1, 1]} : vector<8x2x128xf32> to vector<1x2x128xf32>
      %331 = vector.shape_cast %330 : vector<1x2x128xf32> to vector<2x128xf32>
      %c0_102 = arith.constant 0 : index
      %c1_103 = arith.constant 1 : index
      %c0_104 = arith.constant 0 : index
      %332 = vector.load %arg10[%c0_102, %c1_103, %c0_104] : memref<2x8x128xf32, #tpu.memory_space<vmem>>, vector<2x1x128xf32>
      %333 = vector.shape_cast %332 : vector<2x1x128xf32> to vector<2x128xf32>
      %334 = vector.shape_cast %331 : vector<2x128xf32> to vector<2x1x128xf32>
      tpu.vector_store %arg10[%c0_102, %c1_103, %c0_104], %334 {strides = array<i32>} : memref<2x8x128xf32, #tpu.memory_space<vmem>>, vector<2x1x128xf32>,
      %335 = vector.extract_strided_slice %324 {offsets = [2, 0, 0], sizes = [1, 2, 128], strides = [1, 1, 1]} : vector<8x2x128xf32> to vector<1x2x128xf32>
      %336 = vector.shape_cast %335 : vector<1x2x128xf32> to vector<2x128xf32>
      %c0_105 = arith.constant 0 : index
      %c2_106 = arith.constant 2 : index
      %c0_107 = arith.constant 0 : index
      %337 = vector.load %arg10[%c0_105, %c2_106, %c0_107] : memref<2x8x128xf32, #tpu.memory_space<vmem>>, vector<2x1x128xf32>
      %338 = vector.shape_cast %337 : vector<2x1x128xf32> to vector<2x128xf32>
      %339 = vector.shape_cast %336 : vector<2x128xf32> to vector<2x1x128xf32>
      tpu.vector_store %arg10[%c0_105, %c2_106, %c0_107], %339 {strides = array<i32>} : memref<2x8x128xf32, #tpu.memory_space<vmem>>, vector<2x1x128xf32>,
      %340 = vector.extract_strided_slice %324 {offsets = [3, 0, 0], sizes = [1, 2, 128], strides = [1, 1, 1]} : vector<8x2x128xf32> to vector<1x2x128xf32>
      %341 = vector.shape_cast %340 : vector<1x2x128xf32> to vector<2x128xf32>
      %c0_108 = arith.constant 0 : index
      %c3_109 = arith.constant 3 : index
      %c0_110 = arith.constant 0 : index
      %342 = vector.load %arg10[%c0_108, %c3_109, %c0_110] : memref<2x8x128xf32, #tpu.memory_space<vmem>>, vector<2x1x128xf32>
      %343 = vector.shape_cast %342 : vector<2x1x128xf32> to vector<2x128xf32>
      %344 = vector.shape_cast %341 : vector<2x128xf32> to vector<2x1x128xf32>
      tpu.vector_store %arg10[%c0_108, %c3_109, %c0_110], %344 {strides = array<i32>} : memref<2x8x128xf32, #tpu.memory_space<vmem>>, vector<2x1x128xf32>,
      %345 = vector.extract_strided_slice %324 {offsets = [4, 0, 0], sizes = [1, 2, 128], strides = [1, 1, 1]} : vector<8x2x128xf32> to vector<1x2x128xf32>
      %346 = vector.shape_cast %345 : vector<1x2x128xf32> to vector<2x128xf32>
      %c0_111 = arith.constant 0 : index
      %c4_112 = arith.constant 4 : index
      %c0_113 = arith.constant 0 : index
      %347 = vector.load %arg10[%c0_111, %c4_112, %c0_113] : memref<2x8x128xf32, #tpu.memory_space<vmem>>, vector<2x1x128xf32>
      %348 = vector.shape_cast %347 : vector<2x1x128xf32> to vector<2x128xf32>
      %349 = vector.shape_cast %346 : vector<2x128xf32> to vector<2x1x128xf32>
      tpu.vector_store %arg10[%c0_111, %c4_112, %c0_113], %349 {strides = array<i32>} : memref<2x8x128xf32, #tpu.memory_space<vmem>>, vector<2x1x128xf32>,
      %350 = vector.extract_strided_slice %324 {offsets = [5, 0, 0], sizes = [1, 2, 128], strides = [1, 1, 1]} : vector<8x2x128xf32> to vector<1x2x128xf32>
      %351 = vector.shape_cast %350 : vector<1x2x128xf32> to vector<2x128xf32>
      %c0_114 = arith.constant 0 : index
      %c5_115 = arith.constant 5 : index
      %c0_116 = arith.constant 0 : index
      %352 = vector.load %arg10[%c0_114, %c5_115, %c0_116] : memref<2x8x128xf32, #tpu.memory_space<vmem>>, vector<2x1x128xf32>
      %353 = vector.shape_cast %352 : vector<2x1x128xf32> to vector<2x128xf32>
      %354 = vector.shape_cast %351 : vector<2x128xf32> to vector<2x1x128xf32>
      tpu.vector_store %arg10[%c0_114, %c5_115, %c0_116], %354 {strides = array<i32>} : memref<2x8x128xf32, #tpu.memory_space<vmem>>, vector<2x1x128xf32>,
      %355 = vector.extract_strided_slice %324 {offsets = [6, 0, 0], sizes = [1, 2, 128], strides = [1, 1, 1]} : vector<8x2x128xf32> to vector<1x2x128xf32>
      %356 = vector.shape_cast %355 : vector<1x2x128xf32> to vector<2x128xf32>
      %c0_117 = arith.constant 0 : index
      %c6_118 = arith.constant 6 : index
      %c0_119 = arith.constant 0 : index
      %357 = vector.load %arg10[%c0_117, %c6_118, %c0_119] : memref<2x8x128xf32, #tpu.memory_space<vmem>>, vector<2x1x128xf32>
      %358 = vector.shape_cast %357 : vector<2x1x128xf32> to vector<2x128xf32>
      %359 = vector.shape_cast %356 : vector<2x128xf32> to vector<2x1x128xf32>
      tpu.vector_store %arg10[%c0_117, %c6_118, %c0_119], %359 {strides = array<i32>} : memref<2x8x128xf32, #tpu.memory_space<vmem>>, vector<2x1x128xf32>,
      %360 = vector.extract_strided_slice %324 {offsets = [7, 0, 0], sizes = [1, 2, 128], strides = [1, 1, 1]} : vector<8x2x128xf32> to vector<1x2x128xf32>
      %361 = vector.shape_cast %360 : vector<1x2x128xf32> to vector<2x128xf32>
      %c0_120 = arith.constant 0 : index
      %c7_121 = arith.constant 7 : index
      %c0_122 = arith.constant 0 : index
      %362 = vector.load %arg10[%c0_120, %c7_121, %c0_122] : memref<2x8x128xf32, #tpu.memory_space<vmem>>, vector<2x1x128xf32>
      %363 = vector.shape_cast %362 : vector<2x1x128xf32> to vector<2x128xf32>
      %364 = vector.shape_cast %361 : vector<2x128xf32> to vector<2x1x128xf32>
      tpu.vector_store %arg10[%c0_120, %c7_121, %c0_122], %364 {strides = array<i32>} : memref<2x8x128xf32, #tpu.memory_space<vmem>>, vector<2x1x128xf32>,
    } else {
    }
    %9 = arith.cmpi sge, %0, %5 : i32
    %10 = arith.extui %9 : i1 to i32
    %c0_i32_2 = arith.constant 0 : i32
    %11 = arith.cmpi ne, %10, %c0_i32_2 : i32
    scf.if %11 {
      %c0 = arith.constant 0 : index
      %c0_3 = arith.constant 0 : index
      %12 = vector.load %arg9[%c0, %c0_3] : memref<1x128xf32, #tpu.memory_space<vmem>>, vector<1x128xf32>
      %13 = vector.shape_cast %12 : vector<1x128xf32> to vector<1x1x128xf32>
      %14 = vector.shape_cast %13 : vector<1x1x128xf32> to vector<1x1x128xf32>
      %15 = vector.broadcast %14 : vector<1x1x128xf32> to vector<2x8x128xf32>
      %c0_4 = arith.constant 0 : index
      %c0_5 = arith.constant 0 : index
      %c0_6 = arith.constant 0 : index
      %16 = vector.load %arg10[%c0_4, %c0_5, %c0_6] : memref<2x8x128xf32, #tpu.memory_space<vmem>>, vector<2x8x128xf32>
      tpu.vector_store %arg10[%c0_4, %c0_5, %c0_6], %15 {strides = array<i32>} : memref<2x8x128xf32, #tpu.memory_space<vmem>>, vector<2x8x128xf32>,
    } else {
    }
    return
  }
  func.func @transform_0(%arg0: i32, %arg1: i32, %arg2: memref<1xi32, #tpu.memory_space<smem>>) -> (i32, i32, i32) {
    %c0_i32 = arith.constant 0 : i32
    %c0_i32_0 = arith.constant 0 : i32
    return %arg0, %arg1, %c0_i32 : i32, i32, i32
  }
  func.func @transform_1(%arg0: i32, %arg1: i32, %arg2: memref<1xi32, #tpu.memory_space<smem>>) -> (i32, i32, i32) {
    %c0_i32 = arith.constant 0 : i32
    %c0_i32_0 = arith.constant 0 : i32
    %c0_i32_1 = arith.constant 0 : i32
    return %arg0, %c0_i32, %c0_i32_0 : i32, i32, i32
  }
  func.func @transform_2(%arg0: i32, %arg1: i32, %arg2: memref<1xi32, #tpu.memory_space<smem>>) -> (i32, i32) {
    %c0_i32 = arith.constant 0 : i32
    %c0_i32_0 = arith.constant 0 : i32
    %c0_i32_1 = arith.constant 0 : i32
    return %c0_i32, %c0_i32_0 : i32, i32
  }
  func.func @transform_3(%arg0: i32, %arg1: i32, %arg2: memref<1xi32, #tpu.memory_space<smem>>) -> (i32, i32) {
    %c0_i32 = arith.constant 0 : i32
    %c0_i32_0 = arith.constant 0 : i32
    %c0_i32_1 = arith.constant 0 : i32
    return %c0_i32, %c0_i32_0 : i32, i32
  }
  func.func @transform_4(%arg0: i32, %arg1: i32, %arg2: memref<1xi32, #tpu.memory_space<smem>>) -> (i32, i32) {
    %c0_i32 = arith.constant 0 : i32
    %c0_i32_0 = arith.constant 0 : i32
    %c0_i32_1 = arith.constant 0 : i32
    return %c0_i32, %c0_i32_0 : i32, i32
  }
  func.func @transform_5(%arg0: i32, %arg1: i32, %arg2: memref<1xi32, #tpu.memory_space<smem>>) -> (i32, i32) {
    %c0_i32 = arith.constant 0 : i32
    %c0_i32_0 = arith.constant 0 : i32
    %c0_i32_1 = arith.constant 0 : i32
    return %c0_i32, %c0_i32_0 : i32, i32
  }
  func.func @transform_6(%arg0: i32, %arg1: i32, %arg2: memref<1xi32, #tpu.memory_space<smem>>) -> (i32, i32) {
    %c0_i32 = arith.constant 0 : i32
    %c0_i32_0 = arith.constant 0 : i32
    %c0_i32_1 = arith.constant 0 : i32
    return %c0_i32, %c0_i32_0 : i32, i32
  }
  func.func @transform_7(%arg0: i32, %arg1: i32, %arg2: memref<1xi32, #tpu.memory_space<smem>>) -> (i32, i32, i32) {
    %c0_i32 = arith.constant 0 : i32
    %c0_i32_0 = arith.constant 0 : i32
    return %arg0, %arg1, %c0_i32 : i32, i32, i32
  }
}

</mosaic_0001>

<bundles_post_ra>
// kernel: _rnn_layers_forward.1
= control target key start
LH: loop header
LB: loop body
LE: loop exit
PB: predicated region body
PF: predicated region fallthrough
CT: control target
= control target key end

     0   :  { %14 = vsyncpa [#allocation9], 0  ;;  %v2373_v0 = vmov 0.0   ;;  %s4057_s0 = inlined_call_operand.<no memory space> [shape: s32[1], index: 0, kind: input, shape index: {}]   ;;  %s4058_s1 = inlined_call_operand.vmem [shape: f32[2,8,32], index: 1, kind: input, shape index: {}]   ;;  %s4059_s2 = inlined_call_operand.vmem [shape: s32[2,1,1], index: 2, kind: input, shape index: {}]   ;;  %s4060_s3 = inlined_call_operand.vmem [shape: f32[32,512], index: 3, kind: input, shape index: {}]   ;;  %s4061_s4 = inlined_call_operand.vmem [shape: f32[128,512], index: 4, kind: input, shape index: {}]   ;;  %s4062_s5 = inlined_call_operand.vmem [shape: f32[1,512], index: 5, kind: input, shape index: {}]   ;;  %s4063_s6 = inlined_call_operand.vmem [shape: f32[128,128], index: 6, kind: input, shape index: {}]   ;;  %s4064_s7 = inlined_call_operand.vmem [shape: f32[1,128], index: 7, kind: input, shape index: {}]   ;;  %s4065_s8 = inlined_call_operand.hbm [shape: f32[2,8,128], index: 8, kind: output, shape index: {}]  }
   0x1   :  { %34 = vst [vmem:[#allocation4] sm:$0x3] %v2373_v0  ;;  %p2101_p0 = scmp.le.s32.totalorder %s4057_s0, 0 }
   0x2   :  { %35 = vst [vmem:[#allocation5] sm:$0x3] %v2373_v0 }
   0x3   :  { %40 = sbr.rel (%p2101_p0) target bundleno = 1845 (0x735), region = 37 }
   0x8   :  { %v57_v1 = vld [vmem:[%s4060_s3 + $0x60] sm:$0xff]  ;;  %v59_v2 = vld [vmem:[%s4060_s3 + $0x70] sm:$0xff]  ;;  %v60_v3 = vld [vmem:[%s4060_s3 + $0x78] sm:$0xff]  ;;  %vm71_vm0 = vcmask 261120   ;;  %vm334_vm7 = vcmask 1040384   ;;  %vm340_vm8 = vcmask 1041409  }
   0x9   :  { %90 = vmatpush.msra.mxu1 %v57_v1  ;;  %136 = vmatpush.msra.mxu2 %v59_v2  ;;  %v53_v4 = vld [vmem:[%s4060_s3 + $0x40] sm:$0xff]  ;;  %v55_v5 = vld [vmem:[%s4060_s3 + $0x50] sm:$0xff]  ;;  %v56_v6 = vld [vmem:[%s4060_s3 + $0x58] sm:$0xff]  ;;  %vm336_vm9 = vcmask 1042434   ;;  %vm342_vm10 = vcmask 1043459   ;;  %vm338_vm11 = vcmask 1041408  }
   0xa   :  { %159 = vmatpush.msra.mxu3 %v60_v3  ;;  %v49_v7 = vld [vmem:[%s4060_s3 + $0x20] sm:$0xff]  ;;  %v51_v8 = vld [vmem:[%s4060_s3 + $0x30] sm:$0xff]  ;;  %v52_v9 = vld [vmem:[%s4060_s3 + $0x38] sm:$0xff]  ;;  %vm344_vm12 = vcmask 1042433  }
   0xb   :  { %91 = vmatpush.msra.mxu1 %v53_v4  ;;  %137 = vmatpush.msra.mxu2 %v55_v5  ;;  %v45_v10 = vld [vmem:[%s4060_s3] sm:$0xff]  ;;  %v47_v11 = vld [vmem:[%s4060_s3 + $0x10] sm:$0xff]  ;;  %v48_v13 = vld [vmem:[%s4060_s3 + $0x18] sm:$0xff] }
   0xc   :  { %160 = vmatpush.msra.mxu3 %v56_v6  ;;  %v2463_v12 = vld [vmem:[%s4058_s1] sm:$0xff]  ;;  %v58_v14 = vld [vmem:[%s4060_s3 + $0x68] sm:$0xff]  ;;  %v2474_v15 = vld [vmem:[%s4061_s4 + $0x1f0] sm:$0xff] }
   0xd   :  { %92 = vmatpush.msra.mxu1 %v49_v7  ;;  %138 = vmatpush.msra.mxu2 %v51_v8  ;;  %v2479_v16 = vld [vmem:[%s4061_s4 + $0x1f8] sm:$0xff]  ;;  %v54_v17 = vld [vmem:[%s4060_s3 + $0x48] sm:$0xff]  ;;  %v2489_v18 = vld [vmem:[%s4061_s4 + $0x1d0] sm:$0xff] }
   0xe   :  { %161 = vmatpush.msra.mxu3 %v52_v9  ;;  %v2495_v19 = vld [vmem:[%s4061_s4 + $0x1d8] sm:$0xff]  ;;  %v2500_v20 = vld [vmem:[%s4061_s4 + $0x1e0] sm:$0xff]  ;;  %v50_v21 = vld [vmem:[%s4060_s3 + $0x28] sm:$0xff] }
   0xf   :  { %93 = vmatpush.msra.mxu1 %v45_v10  ;;  %139 = vmatpush.msra.mxu2 %v47_v11  ;;  %v2509_v22 = vld [vmem:[%s4061_s4 + $0x1b0] sm:$0xff]  ;;  %v2516_v23 = vld [vmem:[%s4061_s4 + $0x1b8] sm:$0xff]  ;;  %v2521_v24 = vld [vmem:[%s4061_s4 + $0x1c0] sm:$0xff] }
  0x10   :  { %2102 = vmatmul.msk.f32.vlgmr.msra.gmra.mxu1 %vm71_vm0, %v2463_v12  ;;  %162 = vmatpush.msra.mxu3 %v48_v13  ;;  %v46_v25 = vld [vmem:[%s4060_s3 + $0x8] sm:$0xff]  ;;  %v2530_v26 = vld [vmem:[%s4061_s4 + $0x190] sm:$0xff]  ;;  %v2543_v28 = vld [vmem:[%s4061_s4 + $0x198] sm:$0xff] }
  0x11   :  { %113 = vmatpush.msrb.mxu1 %v58_v14  ;;  %287 = vmatpush.msrb.mxu2 %v2474_v15  ;;  %v2538_v27 = vld [vmem:[%s4061_s4 + $0x1e8] sm:$0xff]  ;;  %v2554_v30 = vld [vmem:[%s4061_s4 + $0x170] sm:$0xff]  ;;  %v2566_v32 = vld [vmem:[%s4061_s4 + $0x178] sm:$0xff] }
  0x12   :  { %307 = vmatpush.msrb.mxu3 %v2479_v16  ;;  %247 = vmatpush.msra.mxu0 %v2500_v20  ;;  %v2549_v29 = vld [vmem:[%s4058_s1 + $0x8] sm:$0xff]  ;;  %v2573_v33 = vld [vmem:[%s4061_s4 + $0x150] sm:$0xff]  ;;  %v2586_v35 = vld [vmem:[%s4061_s4 + $0x158] sm:$0xff] }
  0x13   :  { %114 = vmatpush.msrb.mxu1 %v54_v17  ;;  %288 = vmatpush.msrb.mxu2 %v2489_v18  ;;  %v2561_v31 = vld [vmem:[%s4061_s4 + $0x1c8] sm:$0xff]  ;;  %v2593_v36 = vld [vmem:[%s4061_s4 + $0x1a0] sm:$0xff]  ;;  %v2598_v37 = vld [vmem:[%s4061_s4 + $0x130] sm:$0xff] }
  0x14   :  { %308 = vmatpush.msrb.mxu3 %v2495_v19  ;;  %2106 = vmatmul.msk.f32.vlgmr.msra.gmra.mxu2 %vm71_vm0, %v2463_v12  ;;  %v2581_v34 = vld [vmem:[%s4061_s4 + $0x1a8] sm:$0xff]  ;;  %v2611_v39 = vld [vmem:[%s4061_s4 + $0x138] sm:$0xff]  ;;  %v2618_v40 = vld [vmem:[%s4061_s4 + $0x180] sm:$0xff] }
  0x15   :  { %115 = vmatpush.msrb.mxu1 %v50_v21  ;;  %289 = vmatpush.msrb.mxu2 %v2509_v22  ;;  %v2606_v38 = vld [vmem:[%s4061_s4 + $0x188] sm:$0xff]  ;;  %v2623_v41 = vld [vmem:[%s4061_s4 + $0x110] sm:$0xff]  ;;  %v2635_v43 = vld [vmem:[%s4061_s4 + $0x118] sm:$0xff] }
  0x16   :  { %309 = vmatpush.msrb.mxu3 %v2516_v23  ;;  %248 = vmatpush.msra.mxu0 %v2521_v24  ;;  %v2630_v42 = vld [vmem:[%s4061_s4 + $0x168] sm:$0xff]  ;;  %v2642_v44 = vld [vmem:[%s4061_s4 + $0x160] sm:$0xff]  ;;  %v2654_v46 = vld [vmem:[%s4061_s4 + $0xf0] sm:$0xff] }
  0x17   :  { %116 = vmatpush.msrb.mxu1 %v46_v25  ;;  %290 = vmatpush.msrb.mxu2 %v2530_v26  ;;  %v2649_v45 = vld [vmem:[%s4061_s4 + $0x148] sm:$0xff]  ;;  %v2661_v47 = vld [vmem:[%s4061_s4 + $0xf8] sm:$0xff]  ;;  %v2669_v48 = vld [vmem:[%s4061_s4 + $0x140] sm:$0xff] }
  0x18   :  { %310 = vmatpush.msrb.mxu3 %v2543_v28  ;;  %2103 = vmatmul.msk.f32.gmra.mxu1 %vm71_vm0, %v2549_v29  ;;  %4170 = vst [vmem:[#allocation11_spill] sm:$0xff] %v2661_v47  ;;  %v2676_v49 = vld [vmem:[%s4061_s4 + $0x128] sm:$0xff]  ;;  %v2681_v50 = vld [vmem:[%s4061_s4 + $0xd0] sm:$0xff]  ;;  %v2689_v51 = vld [vmem:[%s4061_s4 + $0xd8] sm:$0xff] }
  0x19   :  { %267 = vmatpush.msra.mxu1 %v2538_v27  ;;  %291 = vmatpush.msrb.mxu2 %v2554_v30  ;;  %4171 = vst [vmem:[#allocation12_spill] sm:$0xff] %v2681_v50  ;;  %v2694_v52 = vld [vmem:[%s4061_s4 + $0x120] sm:$0xff]  ;;  %v2702_v53 = vld [vmem:[%s4061_s4 + $0x108] sm:$0xff]  ;;  %v2707_v54 = vld [vmem:[%s4061_s4 + $0xb0] sm:$0xff] }
  0x1a   :  { %311 = vmatpush.msrb.mxu3 %v2566_v32  ;;  %249 = vmatpush.msra.mxu0 %v2593_v36  ;;  %4172 = vst [vmem:[#allocation13_spill] sm:$0xff] %v2689_v51  ;;  %v2714_v55 = vld [vmem:[%s4061_s4 + $0xb8] sm:$0xff]  ;;  %v2719_v56 = vld [vmem:[%s4061_s4 + $0x100] sm:$0xff]  ;;  %v2726_v57 = vld [vmem:[%s4061_s4 + $0xe8] sm:$0xff] }
  0x1b   :  { %268 = vmatpush.msra.mxu1 %v2561_v31  ;;  %2108 = vmatmul.msk.f32.vlgmr.msra.gmra.mxu3 %vm71_vm0, %v2463_v12  ;;  %4173 = vst [vmem:[#allocation14_spill] sm:$0xff] %v2707_v54  ;;  %v2731_v58 = vld [vmem:[%s4061_s4 + $0x90] sm:$0xff]  ;;  %v2738_v59 = vld [vmem:[%s4061_s4 + $0x98] sm:$0xff]  ;;  %v2745_v60 = vld [vmem:[%s4061_s4 + $0xe0] sm:$0xff] }
  0x1c   :  { %292 = vmatpush.msrb.mxu2 %v2573_v33  ;;  %312 = vmatpush.msrb.mxu3 %v2586_v35  ;;  %4174 = vst [vmem:[#allocation15_spill] sm:$0xff] %v2714_v55  ;;  %v2750_v61 = vld [vmem:[%s4061_s4 + $0xc8] sm:$0xff]  ;;  %v2757_v62 = vld [vmem:[%s4061_s4 + $0x70] sm:$0xff]  ;;  %v2762_v63 = vld [vmem:[%s4061_s4 + $0x78] sm:$0xff] }
  0x1d   :  { %269 = vmatpush.msra.mxu1 %v2581_v34  ;;  %250 = vmatpush.msra.mxu0 %v2618_v40  ;;  %4175 = vst [vmem:[#allocation16_spill] sm:$0xff] %v2731_v58  ;;  %v2770_v0 = vld [vmem:[%s4061_s4 + $0xc0] sm:$0xff]  ;;  %v2775_v1 = vld [vmem:[%s4061_s4 + $0xa8] sm:$0xff]  ;;  %v2782_v2 = vld [vmem:[%s4061_s4 + $0x50] sm:$0xff] }
  0x1e   :  { %293 = vmatpush.msrb.mxu2 %v2598_v37  ;;  %313 = vmatpush.msrb.mxu3 %v2611_v39  ;;  %4176 = vst [vmem:[#allocation17_spill] sm:$0xff] %v2738_v59  ;;  %v2787_v3 = vld [vmem:[%s4061_s4 + $0x58] sm:$0xff]  ;;  %v2794_v4 = vld [vmem:[%s4061_s4 + $0xa0] sm:$0xff]  ;;  %v2799_v5 = vld [vmem:[%s4061_s4 + $0x88] sm:$0xff] }
  0x1f   :  { %270 = vmatpush.msra.mxu1 %v2606_v38  ;;  %251 = vmatpush.msra.mxu0 %v2642_v44  ;;  %4177 = vst [vmem:[#allocation18_spill] sm:$0xff] %v2750_v61  ;;  %v2806_v6 = vld [vmem:[%s4061_s4 + $0x30] sm:$0xff]  ;;  %v2811_v7 = vld [vmem:[%s4061_s4 + $0x38] sm:$0xff]  ;;  %v2818_v8 = vld [vmem:[%s4061_s4 + $0x80] sm:$0xff] }
  0x20   :  { %294 = vmatpush.msrb.mxu2 %v2623_v41  ;;  %314 = vmatpush.msrb.mxu3 %v2635_v43  ;;  %4178 = vst [vmem:[#allocation19_spill] sm:$0xff] %v2757_v62  ;;  %v2823_v9 = vld [vmem:[%s4061_s4 + $0x68] sm:$0xff]  ;;  %v2828_v10 = vld [vmem:[%s4059_s2] sm:$0x1]  ;;  %v2835_v11 = vld [vmem:[%s4061_s4 + $0x10] sm:$0xff] }
  0x21   :  { %271 = vmatpush.msra.mxu1 %v2630_v42  ;;  %2107 = vmatmul.msk.f32.gmra.mxu2 %vm71_vm0, %v2549_v29  ;;  %4179 = vst [vmem:[#allocation20_spill] sm:$0xff] %v2762_v63  ;;  %v2844_v13 = vld [vmem:[#allocation4] sm:$0x3]  ;;  %v2851_v14 = vld [vmem:[%s4061_s4 + $0x60] sm:$0xff]  ;;  %v2856_v17 = vld [vmem:[%s4061_s4 + $0x48] sm:$0xff]  ;;  %vm2112_vm1 = vcmp.gt.s32.totalorder %v2828_v10, 0 }
  0x22   :  { %2104 = vmatmul.msk.f32.vlgmr.msrb.gmra.mxu1 %vm71_vm0, %v2463_v12  ;;  %295 = vmatpush.msrb.mxu2 %v2654_v46  ;;  %4180 = vst [vmem:[#allocation21_spill] sm:$0xff] %v2770_v0  ;;  %v2840_v12 = vld [vmem:[%s4061_s4 + $0x18] sm:$0xff]  ;;  %v2866_v21 = vld [vmem:[%s4061_s4 + $0x40] sm:$0xff]  ;;  %v2871_v25 = vld [vmem:[%s4061_s4 + $0x28] sm:$0xff]  ;;  %vm2124_vm3 = vcmp.gt.s32.totalorder %v2828_v10, 3  ;;  %vm2136_vm5 = vcmp.gt.s32.totalorder %v2828_v10, 6 }
  0x23   :  { %272 = vmatpush.msra.mxu1 %v2649_v45  ;;  %315 = vmatpush.msrb.mxu3 %v2661_v47  ;;  %4181 = vst [vmem:[#allocation22_spill] sm:$0xff] %v2775_v1 }
  0x24   :  { %2109 = vmatmul.msk.f32.gmra.mxu3 %vm71_vm0, %v2549_v29  ;;  %252 = vmatpush.msra.mxu0 %v2669_v48  ;;  %4182 = vst [vmem:[#allocation23_spill] sm:$0xff] %v2782_v2 }
  0x25   :  { %273 = vmatpush.msra.mxu1 %v2676_v49  ;;  %296 = vmatpush.msrb.mxu2 %v2681_v50  ;;  %4183 = vst [vmem:[#allocation24_spill] sm:$0xff] %v2787_v3 }
  0x26   :  { %316 = vmatpush.msrb.mxu3 %v2689_v51  ;;  %253 = vmatpush.msra.mxu0 %v2694_v52  ;;  %4184 = vst [vmem:[#allocation25_spill] sm:$0xff] %v2794_v4 }
  0x27   :  { %274 = vmatpush.msra.mxu1 %v2702_v53  ;;  %297 = vmatpush.msrb.mxu2 %v2707_v54  ;;  %4185 = vst [vmem:[#allocation26_spill] sm:$0xff] %v2799_v5 }
  0x28   :  { %317 = vmatpush.msrb.mxu3 %v2714_v55  ;;  %254 = vmatpush.msra.mxu0 %v2719_v56  ;;  %4186 = vst [vmem:[#allocation27_spill] sm:$0xff] %v2806_v6 }
  0x29   :  { %275 = vmatpush.msra.mxu1 %v2726_v57  ;;  %298 = vmatpush.msrb.mxu2 %v2731_v58  ;;  %4187 = vst [vmem:[#allocation28_spill] sm:$0xff] %v2811_v7 }
  0x2a   :  { %318 = vmatpush.msrb.mxu3 %v2738_v59  ;;  %2105 = vmatmul.msk.f32.gmra.mxu1 %vm71_vm0, %v2549_v29  ;;  %4188 = vst [vmem:[#allocation29_spill] sm:$0xff] %v2818_v8  ;;  %v4080_v29 = vmov 0  }
  0x2b   :  { %255 = vmatpush.msra.mxu0 %v2745_v60  ;;  %276 = vmatpush.msra.mxu1 %v2750_v61  ;;  %4189 = vst [vmem:[#allocation30_spill] sm:$0xff] %v2823_v9 }
  0x2c   :  { %299 = vmatpush.msrb.mxu2 %v2757_v62  ;;  %319 = vmatpush.msrb.mxu3 %v2762_v63  ;;  %4190 = vst [vmem:[#allocation31_spill] sm:$0xff] %v2828_v10 }
  0x2d   :  { %256 = vmatpush.msra.mxu0 %v2770_v0  ;;  %277 = vmatpush.msra.mxu1 %v2775_v1  ;;  %4191 = vst [vmem:[#allocation32_spill] sm:$0xff] %v2835_v11 }
  0x2e   :  { %300 = vmatpush.msrb.mxu2 %v2782_v2  ;;  %320 = vmatpush.msrb.mxu3 %v2787_v3  ;;  %4192 = vst [vmem:[#allocation33_spill] sm:$0xff] %v2840_v12  ;;  %v2898_v3 = vld [vmem:[%s4061_s4] sm:$0xff] }
  0x2f   :  { %257 = vmatpush.msra.mxu0 %v2794_v4  ;;  %278 = vmatpush.msra.mxu1 %v2799_v5  ;;  %4193 = vst [vmem:[#allocation34_spill] sm:$0xff] %v2844_v13  ;;  %v4202_v10 = vld [vmem:[#allocation27_spill] sm:$0xff] }
  0x30   :  { %301 = vmatpush.msrb.mxu2 %v2806_v6  ;;  %321 = vmatpush.msrb.mxu3 %v2811_v7  ;;  %4194 = vst [vmem:[#allocation35_spill] sm:$0xff] %v2851_v14  ;;  %v2884_v7 = vld [vmem:[%s4061_s4 + $0x8] sm:$0xff]  ;;  %v2893_v6 = vld [vmem:[%s4059_s2 + $0x1] sm:$0x1] }
  0x31   :  { %258 = vmatpush.msra.mxu0 %v2818_v8  ;;  %279 = vmatpush.msra.mxu1 %v2823_v9  ;;  %4195 = vst [vmem:[#allocation36_spill] sm:$0xff] %v2856_v17  ;;  %vm2113_vm2 = vcmp.gt.s32.totalorder %v2893_v6, 0  ;;  %vm2129_vm4 = vcmp.gt.s32.totalorder %v2893_v6, 4  ;;  %vm2141_vm6 = vcmp.gt.s32.totalorder %v2893_v6, 7 }
  0x32   :  { %302 = vmatpush.msrb.mxu2 %v2835_v11  ;;  %322 = vmatpush.msrb.mxu3 %v2840_v12  ;;  %4196 = vst [vmem:[#allocation37_spill] sm:$0xff] %v2866_v21  ;;  %v423_v12 = vsel %vm2112_vm1, 1, %v4080_v29  ;;  %v2879_v11 = vld [vmem:[%s4061_s4 + $0x20] sm:$0xff] }
  0x33   :  { %303 = vmatmul.f32.vlgmr.msrb.gmra.mxu2 %v2844_v13  ;;  %323 = vmatmul.f32.vlgmr.msrb.gmra.mxu3 %v2844_v13  ;;  %4197 = vst [vmem:[#allocation38_spill] sm:$0xff] %v2871_v25 }
  0x34   :  { %259 = vmatpush.msra.mxu0 %v2851_v14  ;;  %280 = vmatpush.msra.mxu1 %v2856_v17  ;;  %4198 = vst [vmem:[#allocation39_spill] sm:$0xff] %v2879_v11 }
  0x35   :  { %4199 = vst [vmem:[#allocation40_spill] sm:$0xff] %v2884_v7  ;;  %2150 = vset.pattern.permute.xlu0 %v4080_v29  ;;  %503 = vmatpush.msra.mxu2 %v2474_v15 }
  0x36   :  { %260 = vmatpush.msra.mxu0 %v2866_v21  ;;  %281 = vmatpush.msra.mxu1 %v2871_v25  ;;  %4200 = vst [vmem:[#allocation41_spill] sm:$0xff] %v2898_v3 }
  0x37   :  { %426 = vperm.xlu0 %2150, %v423_v12   ;;  %523 = vmatpush.msra.mxu3 %v2479_v16  ;;  %v424_v12 = vsel %vm2113_vm2, 1, %v4080_v29 }
  0x38   :  { %261 = vmatpush.msra.mxu0 %v2879_v11  ;;  %282 = vmatpush.msra.mxu1 %v2884_v7 }
  0x39   :  { %283 = vmatmul.f32.vlgmr.msra.gmra.mxu1 %v2844_v13  ;;  %504 = vmatpush.msra.mxu2 %v2489_v18 }
  0x3a   :  { %262 = vmatpush.msra.mxu0 %v2898_v3  ;;  %483 = vmatpush.msrb.mxu1 %v2538_v27 }
  0x3b   :  { %263 = vmatmul.f32.vlgmr.msra.gmra.mxu0 %v2844_v13  ;;  %524 = vmatpush.msra.mxu3 %v2495_v19  ;;  %v4201_v13 = vld [vmem:[#allocation24_spill] sm:$0xff] }
  0x3c   :  { %463 = vmatpush.msrb.mxu0 %v2500_v20  ;;  %484 = vmatpush.msrb.mxu1 %v2561_v31 }
  0x3d   :  { %505 = vmatpush.msra.mxu2 %v2509_v22  ;;  %525 = vmatpush.msra.mxu3 %v2516_v23 }
  0x3e   :  { %464 = vmatpush.msrb.mxu0 %v2521_v24  ;;  %485 = vmatpush.msrb.mxu1 %v2581_v34 }
  0x3f   :  { %430 = vperm.xlu0 %2150, %v424_v12   ;;  %506 = vmatpush.msra.mxu2 %v2530_v26  ;;  %v1043_v12 = vsel %vm2124_vm3, 1, %v4080_v29 }
  0x40   :  { %465 = vmatpush.msrb.mxu0 %v2593_v36  ;;  %486 = vmatpush.msrb.mxu1 %v2606_v38 }
  0x41   :  { %526 = vmatpush.msra.mxu3 %v2543_v28  ;;  %507 = vmatpush.msra.mxu2 %v2554_v30 }
  0x42   :  { %466 = vmatpush.msrb.mxu0 %v2618_v40  ;;  %487 = vmatpush.msrb.mxu1 %v2630_v42 }
  0x43   :  { %527 = vmatpush.msra.mxu3 %v2566_v32  ;;  %508 = vmatpush.msra.mxu2 %v2573_v33 }
  0x44   :  { %467 = vmatpush.msrb.mxu0 %v2642_v44  ;;  %488 = vmatpush.msrb.mxu1 %v2649_v45 }
  0x45   :  { %528 = vmatpush.msra.mxu3 %v2586_v35  ;;  %509 = vmatpush.msra.mxu2 %v2598_v37 }
  0x46   :  { %468 = vmatpush.msrb.mxu0 %v2669_v48  ;;  %489 = vmatpush.msrb.mxu1 %v2676_v49 }
  0x47   :  { %1046 = vperm.xlu0 %2150, %v1043_v12   ;;  %529 = vmatpush.msra.mxu3 %v2611_v39  ;;  %v1250_v12 = vsel %vm2129_vm4, 1, %v4080_v29 }
  0x48   :  { %469 = vmatpush.msrb.mxu0 %v2694_v52  ;;  %490 = vmatpush.msrb.mxu1 %v2702_v53 }
  0x49   :  { %510 = vmatpush.msra.mxu2 %v2623_v41  ;;  %530 = vmatpush.msra.mxu3 %v2635_v43 }
  0x4a   :  { %470 = vmatpush.msrb.mxu0 %v2719_v56  ;;  %491 = vmatpush.msrb.mxu1 %v2726_v57 }
  0x4b   :  { %511 = vmatpush.msra.mxu2 %v2654_v46  ;;  %531 = vmatpush.msra.mxu3 %v2661_v47 }
  0x4c   :  { %471 = vmatpush.msrb.mxu0 %v2745_v60  ;;  %492 = vmatpush.msrb.mxu1 %v2750_v61 }
  0x4d   :  { %512 = vmatpush.msra.mxu2 %v2681_v50  ;;  %532 = vmatpush.msra.mxu3 %v2689_v51 }
  0x4e   :  { %472 = vmatpush.msrb.mxu0 %v2770_v0  ;;  %493 = vmatpush.msrb.mxu1 %v2775_v1 }
  0x4f   :  { %1256 = vperm.xlu0 %2150, %v1250_v12   ;;  %513 = vmatpush.msra.mxu2 %v2707_v54  ;;  %v1661_v12 = vsel %vm2136_vm5, 1, %v4080_v29  ;;  %v4203_v29 = vld [vmem:[#allocation28_spill] sm:$0xff] }
  0x50   :  { %473 = vmatpush.msrb.mxu0 %v2794_v4  ;;  %533 = vmatpush.msra.mxu3 %v2714_v55 }
  0x51   :  { %494 = vmatpush.msrb.mxu1 %v2799_v5  ;;  %514 = vmatpush.msra.mxu2 %v2731_v58 }
  0x52   :  { %474 = vmatpush.msrb.mxu0 %v2818_v8  ;;  %534 = vmatpush.msra.mxu3 %v2738_v59 }
  0x53   :  { %495 = vmatpush.msrb.mxu1 %v2823_v9  ;;  %515 = vmatpush.msra.mxu2 %v2757_v62 }
  0x54   :  { %475 = vmatpush.msrb.mxu0 %v2851_v14  ;;  %535 = vmatpush.msra.mxu3 %v2762_v63 }
  0x55   :  { %496 = vmatpush.msrb.mxu1 %v2856_v17  ;;  %516 = vmatpush.msra.mxu2 %v2782_v2  ;;  %v4204_v2 = vld [vmem:[#allocation32_spill] sm:$0xff]  ;;  %v4205_v17 = vld [vmem:[#allocation33_spill] sm:$0xff] }
  0x56   :  { %476 = vmatpush.msrb.mxu0 %v2866_v21  ;;  %536 = vmatpush.msra.mxu3 %v4201_v13  ;;  %v4206_v13 = vmov 0  }
  0x57   :  { %1664 = vperm.xlu0 %2150, %v1661_v12   ;;  %497 = vmatpush.msrb.mxu1 %v2871_v25  ;;  %v1868_v12 = vsel %vm2141_vm6, 1, %v4206_v13 }
  0x58   :  { %477 = vmatpush.msrb.mxu0 %v2879_v11  ;;  %517 = vmatpush.msra.mxu2 %v4202_v10 }
  0x59   :  { %537 = vmatpush.msra.mxu3 %v4203_v29  ;;  %498 = vmatpush.msrb.mxu1 %v2884_v7 }
  0x5a   :  { %478 = vmatpush.msrb.mxu0 %v2898_v3  ;;  %518 = vmatpush.msra.mxu2 %v4204_v2 }
  0x5b   :  { %538 = vmatpush.msra.mxu3 %v4205_v17  ;;  %2151 = vset.pattern.permute.xlu1 %v4206_v13 }
  0x5c   :  { %669 = vmatpush.msra.mxu0 %v2500_v20  ;;  %689 = vmatpush.msra.mxu1 %v2538_v27 }
  0x5d   :  { %709 = vmatpush.msrb.mxu2 %v2474_v15  ;;  %729 = vmatpush.msrb.mxu3 %v2479_v16 }
  0x5e   :  { %670 = vmatpush.msra.mxu0 %v2521_v24  ;;  %690 = vmatpush.msra.mxu1 %v2561_v31 }
  0x5f   :  { %1874 = vperm.xlu0 %2150, %v1868_v12   ;;  %710 = vmatpush.msrb.mxu2 %v2489_v18  ;;  %v4207_v12 = vld [vmem:[#allocation36_spill] sm:$0xff] }
  0x60   :  { %730 = vmatpush.msrb.mxu3 %v2495_v19  ;;  %671 = vmatpush.msra.mxu0 %v2593_v36 }
  0x61   :  { %691 = vmatpush.msra.mxu1 %v2581_v34  ;;  %711 = vmatpush.msrb.mxu2 %v2509_v22 }
  0x62   :  { %731 = vmatpush.msrb.mxu3 %v2516_v23  ;;  %672 = vmatpush.msra.mxu0 %v2618_v40 }
  0x63   :  { %692 = vmatpush.msra.mxu1 %v2606_v38  ;;  %712 = vmatpush.msrb.mxu2 %v2530_v26 }
  0x64   :  { %732 = vmatpush.msrb.mxu3 %v2543_v28  ;;  %673 = vmatpush.msra.mxu0 %v2642_v44 }
  0x65   :  { %693 = vmatpush.msra.mxu1 %v2630_v42  ;;  %713 = vmatpush.msrb.mxu2 %v2554_v30 }
  0x66   :  { %733 = vmatpush.msrb.mxu3 %v2566_v32  ;;  %674 = vmatpush.msra.mxu0 %v2669_v48 }
  0x67   :  { %694 = vmatpush.msra.mxu1 %v2649_v45  ;;  %714 = vmatpush.msrb.mxu2 %v2573_v33 }
  0x68   :  { %734 = vmatpush.msrb.mxu3 %v2586_v35  ;;  %675 = vmatpush.msra.mxu0 %v2694_v52 }
  0x69   :  { %695 = vmatpush.msra.mxu1 %v2676_v49  ;;  %715 = vmatpush.msrb.mxu2 %v2598_v37 }
  0x6a   :  { %735 = vmatpush.msrb.mxu3 %v2611_v39  ;;  %676 = vmatpush.msra.mxu0 %v2719_v56 }
  0x6b   :  { %696 = vmatpush.msra.mxu1 %v2702_v53  ;;  %716 = vmatpush.msrb.mxu2 %v2623_v41 }
  0x6c   :  { %736 = vmatpush.msrb.mxu3 %v2635_v43  ;;  %677 = vmatpush.msra.mxu0 %v2745_v60 }
  0x6d   :  { %697 = vmatpush.msra.mxu1 %v2726_v57  ;;  %717 = vmatpush.msrb.mxu2 %v2654_v46 }
  0x6e   :  { %737 = vmatpush.msrb.mxu3 %v2661_v47  ;;  %678 = vmatpush.msra.mxu0 %v2770_v0 }
  0x6f   :  { %698 = vmatpush.msra.mxu1 %v2750_v61  ;;  %718 = vmatpush.msrb.mxu2 %v2681_v50 }
  0x70   :  { %738 = vmatpush.msrb.mxu3 %v2689_v51  ;;  %679 = vmatpush.msra.mxu0 %v2794_v4  ;;  %v243_v4 = vld [vmem:[#allocation5] sm:$0x3] }
  0x71   :  { %699 = vmatpush.msra.mxu1 %v2775_v1  ;;  %719 = vmatpush.msrb.mxu2 %v2707_v54 }
  0x72   :  { %739 = vmatpush.msrb.mxu3 %v2714_v55  ;;  %680 = vmatpush.msra.mxu0 %v2818_v8  ;;  %v4208_v55 = vld [vmem:[#allocation23_spill] sm:$0xff]  ;;  %v4209_v8 = vld [vmem:[#allocation24_spill] sm:$0xff] }
  0x73   :  { %700 = vmatpush.msra.mxu1 %v2799_v5  ;;  %720 = vmatpush.msrb.mxu2 %v2731_v58 }
  0x74   :  { %740 = vmatpush.msrb.mxu3 %v2738_v59  ;;  %681 = vmatpush.msra.mxu0 %v2851_v14 }
  0x75   :  { %701 = vmatpush.msra.mxu1 %v2823_v9  ;;  %721 = vmatpush.msrb.mxu2 %v2757_v62 }
  0x76   :  { %741 = vmatpush.msrb.mxu3 %v2762_v63  ;;  %682 = vmatpush.msra.mxu0 %v2866_v21 }
  0x77   :  { %702 = vmatpush.msra.mxu1 %v4207_v12  ;;  %722 = vmatpush.msrb.mxu2 %v4208_v55 }
  0x78   :  { %742 = vmatpush.msrb.mxu3 %v4209_v8  ;;  %683 = vmatpush.msra.mxu0 %v2879_v11  ;;  %v61_v11 = vld [vmem:[%s4062_s5] sm:$0xf] }
  0x79   :  { %703 = vmatpush.msra.mxu1 %v2871_v25  ;;  %723 = vmatpush.msrb.mxu2 %v4202_v10  ;;  %v63_v8 = vperm.slane %v61_v11, 0  ;;  %v65_v10 = vperm.slane %v61_v11, 2 }
  0x7a   :  { %743 = vmatpush.msrb.mxu3 %v4203_v29  ;;  %684 = vmatpush.msra.mxu0 %v2898_v3 }
  0x7b   :  { %704 = vmatpush.msra.mxu1 %v2884_v7  ;;  %724 = vmatpush.msrb.mxu2 %v4204_v2  ;;  %v64_v2 = vperm.slane %v61_v11, 1  ;;  %v66_v7 = vperm.slane %v61_v11, 3 }
  0x7c   :  { %744 = vmatpush.msrb.mxu3 %v4205_v17  ;;  %2152 = vset.pattern.permute.xlu2 %v4206_v13 }
  0x8d   :  { %v95_v25 = vpop.f32.mrf.mxu1 }
  0x8e   :  { %v96_v55 = vadd.f32 %v95_v25, %v63_v8 }
  0x90   :  { %170 = vst [vmem:[#allocation2] sm:$0xff] %v96_v55 }
  0x95   :  { %v98_v29 = vpop.f32.mrf.mxu1 }
  0x96   :  { %v99_v12 = vadd.f32 %v98_v29, %v63_v8 }
  0x97   :  { %v141_v3 = vpop.f32.mrf.mxu2 }
  0x98   :  { %v142_v21 = vadd.f32 %v141_v3, %v65_v10  ;;  %174 = vst [vmem:[#allocation2 + $0x20] sm:$0xff] %v99_v12 }
  0x9a   :  { %172 = vst [vmem:[#allocation2 + $0x10] sm:$0xff] %v142_v21 }
  0x9e   :  { %v164_v63 = vpop.f32.mrf.mxu3 }
  0x9f   :  { %v118_v17 = vpop.f32.mrf.mxu1  ;;  %v165_v9 = vadd.f32 %v164_v63, %v66_v7 }
  0xa0   :  { %v119_v62 = vadd.f32 %v118_v17, %v64_v2 }
  0xa1   :  { %173 = vst [vmem:[#allocation2 + $0x18] sm:$0xff] %v165_v9 }
  0xa2   :  { %171 = vst [vmem:[#allocation2 + $0x8] sm:$0xff] %v119_v62 }
  0xa4   :  { %v144_v14 = vpop.f32.mrf.mxu2 }
  0xa5   :  { %v145_v58 = vadd.f32 %v144_v14, %v65_v10 }
  0xa7   :  { %v121_v59 = vpop.f32.mrf.mxu1  ;;  %v167_v25 = vpop.f32.mrf.mxu3  ;;  %176 = vst [vmem:[#allocation2 + $0x30] sm:$0xff] %v145_v58 }
  0xa8   :  { %v122_v55 = vadd.f32 %v121_v59, %v64_v2  ;;  %v168_v5 = vadd.f32 %v167_v25, %v66_v7 }
  0xaa   :  { %175 = vst [vmem:[#allocation2 + $0x28] sm:$0xff] %v122_v55 }
  0xab   :  { %177 = vst [vmem:[#allocation2 + $0x38] sm:$0xff] %v168_v5  ;;  %v244_v5 = vld [vmem:[#allocation2] ss:$8 sm:$0xf] }
  0xb2   :  { %v246_v12 = vld [vmem:[#allocation2 + $0x20] ss:$8 sm:$0xf] }
  0xb6   :  { %v284_v3 = vpop.f32.mrf.mxu1  ;;  %v304_v8 = vpop.f32.mrf.mxu2 }
  0xb7   :  { %v331_v11 = vrot.slane %v284_v3, 7  ;;  %v332_v21 = vrot.slane %v304_v8, 6  ;;  %v324_v29 = vpop.f32.mrf.mxu3 }
  0xb8   :  { %v333_v62 = vrot.slane %v324_v29, 5  ;;  %v264_v63 = vpop.f32.mrf.mxu0 }
  0xb9   :  { %v335_v9 = vsel %vm334_vm7, %v264_v63, %v331_v11  ;;  %v341_v59 = vsel %vm340_vm8, %v264_v63, %v331_v11 }
  0xba   :  { %v337_v58 = vsel %vm336_vm9, %v332_v21, %v333_v62  ;;  %v343_v2 = vsel %vm342_vm10, %v332_v21, %v333_v62  ;;  %v427_v62 = vpop.permute.xlu0 %426 }
  0xbb   :  { %v339_v7 = vsel %vm338_vm11, %v335_v9, %v337_v58  ;;  %v345_v10 = vsel %vm344_vm12, %v341_v59, %v343_v2 }
  0xbc   :  { %v346_v14 = vrot.slane %v345_v10, 1  ;;  %v349_v17 = vadd.f32 %v339_v7, %v244_v5 }
  0xbe   :  { %v350_v25 = vadd.f32 %v346_v14, %v246_v12  ;;  %v2110_v55 = vmul.f32 -1.442695, %v349_v17  ;;  %v391_v58 = vrot.slane %v349_v17, 3 }
  0xc0   :  { %2154 = vpow2.f32 %v2110_v55  ;;  %v2111_v3 = vmul.f32 -1.442695, %v350_v25  ;;  %v392_v7 = vrot.slane %v350_v25, 3  ;;  %v428_v25 = vperm.slane %v427_v62, 0 }
  0xc2   :  { %2156 = vpow2.f32 %v2111_v3  ;;  %vm3053_vm5 = vcmp.eq.s32.totalorder %v428_v25, 1 }
  0xc6   :  { %v2155_v8 = vpop.eup %2154 }
  0xc7   :  { %v357_v29 = vadd.f32 1.0, %v2155_v8 }
  0xc8   :  { %v2157_v11 = vpop.eup %2156 }
  0xc9   :  { %v358_v63 = vadd.f32 1.0, %v2157_v11  ;;  %2158 = vrcp.f32 %v357_v29  ;;  %v370_v5 = vand.u32 2147483648, %v357_v29  ;;  %v368_v14 = vand.u32 2147483647, %v357_v29 }
  0xca   :  { %vm364_vm14 = vweird.f32 %v357_v29 }
  0xcb   :  { %2160 = vrcp.f32 %v358_v63  ;;  %v385_v55 = vand.u32 2147483648, %v358_v63  ;;  %v383_v11 = vand.u32 2147483647, %v358_v63  ;;  %v371_v1 = vor.u32 1.1754944e-38, %v370_v5 }
  0xcc   :  { %2162 = vtanh.f32 %v391_v58  ;;  %vm369_vm1 = vcmp.eq.f32.partialorder %v368_v14, 8.507059e+37  ;;  %vm379_vm2 = vweird.f32 %v358_v63  ;;  %v404_v58 = vrot.slane %v243_v4, 1  ;;  %v4212_v14 = vld [vmem:[#allocation31_spill] sm:$0xff] }
  0xcd   :  { %2164 = vtanh.f32 %v392_v7  ;;  %v386_v51 = vor.u32 1.1754944e-38, %v385_v55  ;;  %vm384_vm4 = vcmp.eq.f32.partialorder %v383_v11, 8.507059e+37  ;;  %vm2116_vm6 = vcmp.gt.s32.totalorder %v4212_v14, 1 }
  0xcf   :  { %v2159_v21 = vpop.eup %2158 }
  0xd0   :  { %v360_v54 = vmul.f32 %v2159_v21, %v357_v29  ;;  %vm365_vm13 = vweird.f32 %v2159_v21 }
  0xd1   :  { %v2161_v9 = vpop.eup %2160  ;;  %vm366_vm0 = vmor %vm364_vm14, %vm365_vm13  ;;  %vm2117_vm14 = vcmp.gt.s32.totalorder %v2893_v6, 1 }
  0xd2   :  { %v361_v59 = vsub.f32 1.0, %v360_v54  ;;  %v375_v2 = vmul.f32 %v2161_v9, %v358_v63  ;;  %vm380_vm15 = vweird.f32 %v2161_v9 }
  0xd3   :  { %vm381_vm3 = vmor %vm379_vm2, %vm380_vm15  ;;  %vm2125_vm15 = vcmp.gt.s32.totalorder %v2893_v6, 3 }
  0xd4   :  { %v362_v10 = vmul.f32 %v2159_v21, %v361_v59  ;;  %v376_v12 = vsub.f32 1.0, %v375_v2 }
  0xd6   :  { %v363_v3 = vadd.f32 %v2159_v21, %v362_v10  ;;  %v377_v8 = vmul.f32 %v2161_v9, %v376_v12  ;;  %v431_v10 = vpop.permute.xlu0 %430  ;;  %v2163_v12 = vpop.eup %2162 }
  0xd7   :  { %v432_v61 = vperm.slane %v431_v10, 0  ;;  %v2165_v47 = vpop.eup %2164 }
  0xd8   :  { %v367_v17 = vsel %vm366_vm0, %v2159_v21, %v363_v3  ;;  %v378_v54 = vadd.f32 %v2161_v9, %v377_v8  ;;  %vm2132_vm0 = vcmp.gt.s32.totalorder %v4212_v14, 5 }
  0xd9   :  { %v372_v59 = vsel %vm369_vm1, %v371_v1, %v367_v17  ;;  %vm3058_vm13 = vcmp.eq.s32.totalorder %v432_v61, 1  ;;  %vm2137_vm1 = vcmp.gt.s32.totalorder %v2893_v6, 6 }
  0xda   :  { %v382_v2 = vsel %vm381_vm3, %v2161_v9, %v378_v54  ;;  %v399_v29 = vrot.slane %v372_v59, 1  ;;  %v408_v0 = vmul.f32 %v2163_v12, %v372_v59  ;;  %v414_v61 = vrot.slane %v372_v59, 2 }
  0xdb   :  { %v387_v50 = vsel %vm384_vm4, %v386_v51, %v382_v2  ;;  %v631_v51 = vsel %vm2116_vm6, 1, %v4206_v13  ;;  %v1044_v59 = vsel %vm2125_vm15, 1, %v4206_v13  ;;  %v1662_v21 = vsel %vm2137_vm1, 1, %v4206_v13 }
  0xdc   :  { %v400_v5 = vrot.slane %v387_v50, 1  ;;  %v406_v7 = vmul.f32 %v399_v29, %v243_v4  ;;  %v409_v1 = vmul.f32 %v2165_v47, %v387_v50  ;;  %634 = vperm.xlu1 %2151, %v631_v51   ;;  %v415_v11 = vrot.slane %v387_v50, 2  ;;  %v4215_v29 = vld [vmem:[#allocation34_spill] sm:$0xff] }
  0xdd   :  { %vm2120_vm1 = vcmp.gt.s32.totalorder %v4212_v14, 2 }
  0xde   :  { %v407_v63 = vmul.f32 %v404_v58, %v400_v5  ;;  %v410_v62 = vadd.f32 %v408_v0, %v406_v7  ;;  %v632_v0 = vsel %vm2117_vm14, 1, %v4206_v13  ;;  %v1455_v5 = vsel %vm2132_vm0, 1, %v4206_v13 }
  0xe0   :  { %v411_v55 = vadd.f32 %v409_v1, %v407_v63  ;;  %2166 = vtanh.f32 %v410_v62  ;;  %v3065_v3 = vsel %vm3053_vm5, %v410_v62, %v243_v4 }
  0xe2   :  { %2168 = vtanh.f32 %v411_v55  ;;  %v3069_v47 = vsel %vm3058_vm13, %v411_v55, %v404_v58  ;;  %v436_v58 = vrot.slane %v4215_v29, 1  ;;  %v453_v55 = vld [vmem:[#allocation2 + $0x1] ss:$8 sm:$0xf] }
  0xe4   :  { %638 = vperm.xlu1 %2151, %v632_v0  }
  0xe6   :  { %v2167_v8 = vpop.eup %2166 }
  0xe7   :  { %v418_v17 = vmul.f32 %v2167_v8, %v414_v61 }
  0xe8   :  { %v2169_v54 = vpop.eup %2168 }
  0xe9   :  { %v419_v25 = vmul.f32 %v2169_v54, %v415_v11  ;;  %v442_v4 = vsel %vm3053_vm5, %v418_v17, 0.0  ;;  %v3084_v50 = vsel %vm3053_vm5, %v418_v17, %v4215_v29  ;;  %v455_v17 = vld [vmem:[#allocation2 + $0x21] ss:$8 sm:$0xf] }
  0xea   :  { %446 = vst [vmem:[#allocation1] ss:$9 sm:$0xff] %v442_v4 }
  0xeb   :  { %v443_v2 = vsel %vm3058_vm13, %v419_v25, 0.0  ;;  %v3088_v12 = vsel %vm3058_vm13, %v419_v25, %v436_v58 }
  0xec   :  { %448 = vst [vmem:[#allocation1 + $0x1] ss:$9 sm:$0xff] %v443_v2  ;;  %1050 = vperm.xlu1 %2151, %v1044_v59  }
  0xf3   :  { %v449_v10 = vld [vmem:[#allocation1] sm:$0xff] }
  0xf4   :  { %458 = vst [vmem:[#allocation1] ss:$9 sm:$0xff] %v3084_v50  ;;  %1458 = vperm.xlu1 %2151, %v1455_v5  }
  0xf5   :  { %460 = vst [vmem:[#allocation1 + $0x1] ss:$9 sm:$0xff] %v3088_v12 }
  0xf6   :  { %451 = vst [vmem:[#allocation3] sm:$0x3] %v449_v10 }
  0xfc   :  { %v461_v7 = vld [vmem:[#allocation1] sm:$0xff]  ;;  %1668 = vperm.xlu1 %2151, %v1662_v21  }
  0xfd   :  { %479 = vmatmul.f32.vlgmr.msrb.gmra.mxu0 %v461_v7  ;;  %499 = vmatmul.f32.vlgmr.msrb.gmra.mxu1 %v461_v7 }
  0xfe   :  { %519 = vmatmul.f32.vlgmr.msra.gmra.mxu2 %v461_v7  ;;  %539 = vmatmul.f32.vlgmr.msra.gmra.mxu3 %v461_v7 }
  0xff   :  { %875 = vmatpush.msrb.mxu0 %v2500_v20  ;;  %895 = vmatpush.msrb.mxu1 %v2538_v27  ;;  %v4220_v20 = vld [vmem:[#allocation13_spill] sm:$0xff] }
 0x100   :  { %915 = vmatpush.msra.mxu2 %v2474_v15  ;;  %935 = vmatpush.msra.mxu3 %v2479_v16  ;;  %v4216_v15 = vld [vmem:[#allocation11_spill] sm:$0xff]  ;;  %v4217_v16 = vld [vmem:[#allocation21_spill] sm:$0xff] }
 0x101   :  { %876 = vmatpush.msrb.mxu0 %v2521_v24  ;;  %896 = vmatpush.msrb.mxu1 %v2561_v31  ;;  %v4223_v24 = vld [vmem:[#allocation14_spill] sm:$0xff]  ;;  %v4225_v27 = vld [vmem:[#allocation29_spill] sm:$0xff] }
 0x102   :  { %916 = vmatpush.msra.mxu2 %v2489_v18  ;;  %936 = vmatpush.msra.mxu3 %v2495_v19  ;;  %v4218_v18 = vld [vmem:[#allocation18_spill] sm:$0xff]  ;;  %v4219_v19 = vld [vmem:[#allocation12_spill] sm:$0xff]  ;;  %v4228_v31 = vld [vmem:[#allocation17_spill] sm:$0xff] }
 0x103   :  { %877 = vmatpush.msrb.mxu0 %v2593_v36  ;;  %897 = vmatpush.msrb.mxu1 %v2581_v34  ;;  %v4231_v34 = vld [vmem:[#allocation19_spill] sm:$0xff]  ;;  %v4233_v36 = vld [vmem:[#allocation37_spill] sm:$0xff] }
 0x104   :  { %917 = vmatpush.msra.mxu2 %v2509_v22  ;;  %937 = vmatpush.msra.mxu3 %v2516_v23  ;;  %v4221_v22 = vld [vmem:[#allocation25_spill] sm:$0xff]  ;;  %v4222_v23 = vld [vmem:[#allocation22_spill] sm:$0xff] }
 0x105   :  { %878 = vmatpush.msrb.mxu0 %v2618_v40  ;;  %898 = vmatpush.msrb.mxu1 %v2606_v38  ;;  %v4235_v38 = vld [vmem:[#allocation23_spill] sm:$0xff] }
 0x106   :  { %918 = vmatpush.msra.mxu2 %v2530_v26  ;;  %938 = vmatpush.msra.mxu3 %v2543_v28  ;;  %v4224_v26 = vld [vmem:[#allocation15_spill] sm:$0xff]  ;;  %v4226_v28 = vld [vmem:[#allocation26_spill] sm:$0xff] }
 0x107   :  { %879 = vmatpush.msrb.mxu0 %v2642_v44  ;;  %899 = vmatpush.msrb.mxu1 %v2630_v42  ;;  %v4237_v40 = vld [vmem:[#allocation39_spill] sm:$0xff]  ;;  %v4241_v44 = vld [vmem:[#allocation41_spill] sm:$0xff] }
 0x108   :  { %919 = vmatpush.msra.mxu2 %v2554_v30  ;;  %939 = vmatpush.msra.mxu3 %v2566_v32  ;;  %v4227_v30 = vld [vmem:[#allocation16_spill] sm:$0xff]  ;;  %v4229_v32 = vld [vmem:[#allocation35_spill] sm:$0xff] }
 0x109   :  { %880 = vmatpush.msrb.mxu0 %v2669_v48  ;;  %900 = vmatpush.msrb.mxu1 %v2649_v45  ;;  %v4239_v42 = vld [vmem:[#allocation27_spill] sm:$0xff]  ;;  %v4242_v45 = vld [vmem:[#allocation40_spill] sm:$0xff]  ;;  %v4244_v48 = vld [vmem:[#allocation33_spill] sm:$0xff] }
 0x10a   :  { %920 = vmatpush.msra.mxu2 %v2573_v33  ;;  %940 = vmatpush.msra.mxu3 %v2586_v35  ;;  %v4230_v33 = vld [vmem:[#allocation30_spill] sm:$0xff]  ;;  %v4232_v35 = vld [vmem:[#allocation20_spill] sm:$0xff] }
 0x10b   :  { %881 = vmatpush.msrb.mxu0 %v2694_v52  ;;  %901 = vmatpush.msrb.mxu1 %v2676_v49 }
 0x10c   :  { %921 = vmatpush.msra.mxu2 %v2598_v37  ;;  %941 = vmatpush.msra.mxu3 %v2611_v39  ;;  %v4234_v37 = vld [vmem:[#allocation36_spill] sm:$0xff] }
 0x10d   :  { %882 = vmatpush.msrb.mxu0 %v2719_v56  ;;  %902 = vmatpush.msrb.mxu1 %v2702_v53  ;;  %v4236_v39 = vld [vmem:[#allocation24_spill] sm:$0xff] }
 0x10e   :  { %922 = vmatpush.msra.mxu2 %v2623_v41  ;;  %942 = vmatpush.msra.mxu3 %v2635_v43  ;;  %v4238_v41 = vld [vmem:[#allocation38_spill] sm:$0xff]  ;;  %v4240_v43 = vld [vmem:[#allocation28_spill] sm:$0xff] }
 0x10f   :  { %883 = vmatpush.msrb.mxu0 %v2745_v60  ;;  %903 = vmatpush.msrb.mxu1 %v2726_v57 }
 0x110   :  { %923 = vmatpush.msra.mxu2 %v2654_v46  ;;  %943 = vmatpush.msra.mxu3 %v4216_v15  ;;  %v4243_v46 = vld [vmem:[#allocation32_spill] sm:$0xff] }
 0x111   :  { %884 = vmatpush.msrb.mxu0 %v4217_v16  ;;  %904 = vmatpush.msrb.mxu1 %v4218_v18 }
 0x112   :  { %924 = vmatpush.msra.mxu2 %v4219_v19  ;;  %944 = vmatpush.msra.mxu3 %v4220_v20 }
 0x113   :  { %885 = vmatpush.msrb.mxu0 %v4221_v22  ;;  %905 = vmatpush.msrb.mxu1 %v4222_v23 }
 0x114   :  { %925 = vmatpush.msra.mxu2 %v4223_v24  ;;  %945 = vmatpush.msra.mxu3 %v4224_v26 }
 0x115   :  { %886 = vmatpush.msrb.mxu0 %v4225_v27  ;;  %906 = vmatpush.msrb.mxu1 %v4226_v28 }
 0x116   :  { %926 = vmatpush.msra.mxu2 %v4227_v30  ;;  %946 = vmatpush.msra.mxu3 %v4228_v31 }
 0x117   :  { %887 = vmatpush.msrb.mxu0 %v4229_v32  ;;  %907 = vmatpush.msrb.mxu1 %v4230_v33 }
 0x118   :  { %927 = vmatpush.msra.mxu2 %v4231_v34  ;;  %947 = vmatpush.msra.mxu3 %v4232_v35 }
 0x119   :  { %888 = vmatpush.msrb.mxu0 %v4233_v36  ;;  %908 = vmatpush.msrb.mxu1 %v4234_v37 }
 0x11a   :  { %928 = vmatpush.msra.mxu2 %v4235_v38  ;;  %948 = vmatpush.msra.mxu3 %v4236_v39 }
 0x11b   :  { %889 = vmatpush.msrb.mxu0 %v4237_v40  ;;  %909 = vmatpush.msrb.mxu1 %v4238_v41 }
 0x11c   :  { %929 = vmatpush.msra.mxu2 %v4239_v42  ;;  %949 = vmatpush.msra.mxu3 %v4240_v43 }
 0x11d   :  { %890 = vmatpush.msrb.mxu0 %v4241_v44  ;;  %910 = vmatpush.msrb.mxu1 %v4242_v45 }
 0x11e   :  { %930 = vmatpush.msra.mxu2 %v4243_v46  ;;  %950 = vmatpush.msra.mxu3 %v4244_v48  ;;  %v3448_v48 = vld [vmem:[%s4061_s4 + $0xd8] sm:$0xff] }
 0x11f   :  { %4253 = vst [vmem:[#allocation18_spill] sm:$0xff] %v3448_v48 }
 0x14e   :  { %v635_v5 = vpop.permute.xlu1 %634 }
 0x14f   :  { %v636_v35 = vperm.slane %v635_v5, 0  ;;  %v3262_v5 = vld [vmem:[%s4061_s4 + $0x1a0] sm:$0xff] }
 0x151   :  { %vm3166_vm0 = vcmp.eq.s32.totalorder %v636_v35, 1  ;;  %v3376_v35 = vld [vmem:[%s4061_s4 + $0x138] sm:$0xff] }
 0x156   :  { %v639_v38 = vpop.permute.xlu1 %638 }
 0x157   :  { %v640_v42 = vperm.slane %v639_v38, 0  ;;  %v3394_v38 = vld [vmem:[%s4061_s4 + $0x110] sm:$0xff] }
 0x17a   :  { %v500_v49 = vpop.f32.mrf.mxu1  ;;  %v480_v63 = vpop.f32.mrf.mxu0 }
 0x17b   :  { %v547_v52 = vrot.slane %v500_v49, 7 }
 0x17d   :  { %v550_v1 = vsel %vm334_vm7, %v480_v63, %v547_v52  ;;  %v553_v62 = vsel %vm340_vm8, %v480_v63, %v547_v52 }
 0x181   :  { %v520_v53 = vpop.f32.mrf.mxu2  ;;  %v540_v56 = vpop.f32.mrf.mxu3 }
 0x182   :  { %v548_v57 = vrot.slane %v520_v53, 6  ;;  %v549_v60 = vrot.slane %v540_v56, 5  ;;  %v3472_v56 = vld [vmem:[%s4061_s4 + $0xb8] sm:$0xff] }
 0x183   :  { %4257 = vst [vmem:[#allocation22_spill] sm:$0xff] %v3472_v56 }
 0x184   :  { %v551_v9 = vsel %vm336_vm9, %v548_v57, %v549_v60  ;;  %v554_v51 = vsel %vm342_vm10, %v548_v57, %v549_v60  ;;  %v837_v57 = vsel %vm2120_vm1, 1, %v4206_v13 }
 0x185   :  { %v552_v61 = vsel %vm338_vm11, %v550_v1, %v551_v9  ;;  %v555_v0 = vsel %vm344_vm12, %v553_v62, %v554_v51  ;;  %840 = vperm.xlu2 %2152, %v837_v57   ;;  %v3478_v57 = vld [vmem:[%s4061_s4 + $0x80] sm:$0xff] }
 0x186   :  { %v556_v8 = vrot.slane %v555_v0, 1  ;;  %v559_v11 = vadd.f32 %v552_v61, %v453_v55  ;;  %4258 = vst [vmem:[#allocation14_spill] sm:$0xff] %v3478_v57 }
 0x188   :  { %v560_v54 = vadd.f32 %v556_v8, %v455_v17  ;;  %v2114_v25 = vmul.f32 -1.442695, %v559_v11  ;;  %v601_v15 = vrot.slane %v559_v11, 3 }
 0x18a   :  { %2170 = vpow2.f32 %v2114_v25  ;;  %v2115_v4 = vmul.f32 -1.442695, %v560_v54  ;;  %v602_v19 = vrot.slane %v560_v54, 3 }
 0x18c   :  { %2172 = vpow2.f32 %v2115_v4 }
 0x190   :  { %v2171_v2 = vpop.eup %2170 }
 0x191   :  { %v567_v59 = vadd.f32 1.0, %v2171_v2  ;;  %v3220_v2 = vld [vmem:[%s4061_s4 + $0x1e8] sm:$0xff] }
 0x192   :  { %v2173_v29 = vpop.eup %2172 }
 0x193   :  { %v568_v58 = vadd.f32 1.0, %v2173_v29  ;;  %2174 = vrcp.f32 %v567_v59  ;;  %v580_v20 = vand.u32 2147483648, %v567_v59  ;;  %v578_v23 = vand.u32 2147483647, %v567_v59  ;;  %v3244_v29 = vld [vmem:[%s4061_s4 + $0x1c8] sm:$0xff] }
 0x194   :  { %vm574_vm3 = vweird.f32 %v567_v59 }
 0x195   :  { %2176 = vrcp.f32 %v568_v58  ;;  %v595_v26 = vand.u32 2147483648, %v568_v58  ;;  %v593_v30 = vand.u32 2147483647, %v568_v58  ;;  %v581_v31 = vor.u32 1.1754944e-38, %v580_v20  ;;  %v3304_v20 = vld [vmem:[%s4061_s4 + $0x198] sm:$0xff] }
 0x196   :  { %2178 = vtanh.f32 %v601_v15  ;;  %vm579_vm6 = vcmp.eq.f32.partialorder %v578_v23, 8.507059e+37  ;;  %vm589_vm13 = vweird.f32 %v568_v58  ;;  %v3280_v15 = vld [vmem:[%s4061_s4 + $0x1b8] sm:$0xff]  ;;  %v3316_v23 = vld [vmem:[%s4061_s4 + $0x168] sm:$0xff] }
 0x197   :  { %2180 = vtanh.f32 %v602_v19  ;;  %v596_v36 = vor.u32 1.1754944e-38, %v595_v26  ;;  %vm594_vm15 = vcmp.eq.f32.partialorder %v593_v30, 8.507059e+37  ;;  %v3298_v19 = vld [vmem:[%s4061_s4 + $0x190] sm:$0xff]  ;;  %v3328_v26 = vld [vmem:[%s4061_s4 + $0x178] sm:$0xff] }
 0x198   :  { %v3346_v30 = vld [vmem:[%s4061_s4 + $0x150] sm:$0xff] }
 0x199   :  { %v2175_v10 = vpop.eup %2174 }
 0x19a   :  { %v570_v7 = vmul.f32 %v2175_v10, %v567_v59  ;;  %vm575_vm2 = vweird.f32 %v2175_v10  ;;  %v3238_v59 = vld [vmem:[%s4061_s4 + $0x1c0] sm:$0xff] }
 0x19b   :  { %v2177_v21 = vpop.eup %2176  ;;  %vm576_vm5 = vmor %vm574_vm3, %vm575_vm2  ;;  %vm3172_vm2 = vcmp.eq.s32.totalorder %v640_v42, 1  ;;  %vm2121_vm3 = vcmp.gt.s32.totalorder %v2893_v6, 2  ;;  %v3418_v42 = vld [vmem:[%s4061_s4 + $0xf0] sm:$0xff] }
 0x19c   :  { %v571_v16 = vsub.f32 1.0, %v570_v7  ;;  %v585_v18 = vmul.f32 %v2177_v21, %v568_v58  ;;  %vm590_vm4 = vweird.f32 %v2177_v21  ;;  %v2179_v40 = vpop.eup %2178  ;;  %v838_v9 = vsel %vm2121_vm3, 1, %v4206_v13  ;;  %v3250_v58 = vld [vmem:[%s4061_s4 + $0x1d0] sm:$0xff]  ;;  %v3268_v7 = vld [vmem:[%s4061_s4 + $0x1a8] sm:$0xff] }
 0x19d   :  { %vm591_vm14 = vmor %vm589_vm13, %vm590_vm4  ;;  %v2181_v46 = vpop.eup %2180  ;;  %844 = vperm.xlu2 %2152, %v838_v9   ;;  %vm2128_vm4 = vcmp.gt.s32.totalorder %v4212_v14, 4  ;;  %v3496_v9 = vld [vmem:[%s4061_s4 + $0x98] sm:$0xff] }
 0x19e   :  { %v572_v22 = vmul.f32 %v2175_v10, %v571_v16  ;;  %v586_v24 = vsub.f32 1.0, %v585_v18  ;;  %v1249_v11 = vsel %vm2128_vm4, 1, %v4206_v13  ;;  %v3286_v16 = vld [vmem:[%s4061_s4 + $0x180] sm:$0xff]  ;;  %v3292_v18 = vld [vmem:[%s4061_s4 + $0x188] sm:$0xff]  ;;  %4261 = vst [vmem:[#allocation26_spill] sm:$0xff] %v3496_v9 }
 0x1a0   :  { %v573_v27 = vadd.f32 %v2175_v10, %v572_v22  ;;  %v587_v28 = vmul.f32 %v2177_v21, %v586_v24  ;;  %v3310_v22 = vld [vmem:[%s4061_s4 + $0x160] sm:$0xff]  ;;  %v3322_v24 = vld [vmem:[%s4061_s4 + $0x170] sm:$0xff] }
 0x1a2   :  { %v577_v32 = vsel %vm576_vm5, %v2175_v10, %v573_v27  ;;  %v588_v33 = vadd.f32 %v2177_v21, %v587_v28  ;;  %vm2133_vm5 = vcmp.gt.s32.totalorder %v2893_v6, 5  ;;  %v3256_v10 = vld [vmem:[%s4061_s4 + $0x1d8] sm:$0xff]  ;;  %v3334_v27 = vld [vmem:[%s4061_s4 + $0x140] sm:$0xff]  ;;  %v3340_v28 = vld [vmem:[%s4061_s4 + $0x148] sm:$0xff] }
 0x1a3   :  { %v582_v34 = vsel %vm579_vm6, %v581_v31, %v577_v32  ;;  %v1456_v4 = vsel %vm2133_vm5, 1, %v4206_v13  ;;  %vm2140_vm6 = vcmp.gt.s32.totalorder %v4212_v14, 7  ;;  %v3232_v14 = vld [vmem:[%s4061_s4 + $0x1f8] sm:$0xff]  ;;  %v3358_v32 = vld [vmem:[%s4061_s4 + $0x120] sm:$0xff] }
 0x1a4   :  { %v609_v37 = vrot.slane %v582_v34, 1  ;;  %v592_v39 = vsel %vm591_vm14, %v2177_v21, %v588_v33  ;;  %v615_v44 = vmul.f32 %v2179_v40, %v582_v34  ;;  %v621_v62 = vrot.slane %v582_v34, 2  ;;  %v3274_v21 = vld [vmem:[%s4061_s4 + $0x1b0] sm:$0xff]  ;;  %v3352_v31 = vld [vmem:[%s4061_s4 + $0x158] sm:$0xff]  ;;  %v3364_v33 = vld [vmem:[%s4061_s4 + $0x128] sm:$0xff] }
 0x1a5   :  { %v597_v41 = vsel %vm594_vm15, %v596_v36, %v592_v39  ;;  %1252 = vperm.xlu2 %2152, %v1249_v11   ;;  %v3370_v34 = vld [vmem:[%s4061_s4 + $0x130] sm:$0xff]  ;;  %v3382_v36 = vld [vmem:[%s4061_s4 + $0x100] sm:$0xff]  ;;  %v3400_v39 = vld [vmem:[%s4061_s4 + $0x118] sm:$0xff] }
 0x1a6   :  { %v613_v43 = vmul.f32 %v609_v37, %v3065_v3  ;;  %v610_v45 = vrot.slane %v597_v41, 1  ;;  %v616_v53 = vmul.f32 %v2181_v46, %v597_v41  ;;  %v622_v61 = vrot.slane %v597_v41, 2  ;;  %v3388_v37 = vld [vmem:[%s4061_s4 + $0x108] sm:$0xff]  ;;  %v3406_v40 = vld [vmem:[%s4061_s4 + $0xe0] sm:$0xff]  ;;  %v3442_v46 = vld [vmem:[%s4061_s4 + $0xd0] sm:$0xff] }
 0x1a7   :  { %v3412_v41 = vld [vmem:[%s4061_s4 + $0xe8] sm:$0xff]  ;;  %4252 = vst [vmem:[#allocation21_spill] sm:$0xff] %v3442_v46  ;;  %v3544_v11 = vld [vmem:[%s4061_s4 + $0x58] sm:$0xff] }
 0x1a8   :  { %v617_v49 = vadd.f32 %v615_v44, %v613_v43  ;;  %v614_v52 = vmul.f32 %v610_v45, %v3069_v47  ;;  %v3424_v43 = vld [vmem:[%s4061_s4 + $0xf8] sm:$0xff]  ;;  %v3430_v44 = vld [vmem:[%s4061_s4 + $0xc0] sm:$0xff]  ;;  %v3436_v45 = vld [vmem:[%s4061_s4 + $0xc8] sm:$0xff]  ;;  %4269 = vst [vmem:[#allocation36_spill] sm:$0xff] %v3544_v11 }
 0x1a9   :  { %4249 = vst [vmem:[#allocation31_spill] sm:$0xff] %v3424_v43 }
 0x1aa   :  { %2182 = vtanh.f32 %v617_v49  ;;  %v3180_v60 = vsel %vm3166_vm0, %v617_v49, %v3065_v3  ;;  %v618_v63 = vadd.f32 %v616_v53, %v614_v52  ;;  %4250 = vst [vmem:[#allocation34_spill] sm:$0xff] %v3430_v44  ;;  %v3454_v49 = vld [vmem:[%s4061_s4 + $0xa0] sm:$0xff]  ;;  %v3460_v52 = vld [vmem:[%s4061_s4 + $0xa8] sm:$0xff]  ;;  %v3466_v53 = vld [vmem:[%s4061_s4 + $0xb0] sm:$0xff] }
 0x1ab   :  { %4251 = vst [vmem:[#allocation11_spill] sm:$0xff] %v3436_v45 }
 0x1ac   :  { %2184 = vtanh.f32 %v618_v63  ;;  %v3185_v1 = vsel %vm3172_vm2, %v618_v63, %v3069_v47  ;;  %4254 = vst [vmem:[#allocation12_spill] sm:$0xff] %v3454_v49  ;;  %v3484_v63 = vld [vmem:[%s4061_s4 + $0x88] sm:$0xff] }
 0x1ad   :  { %1462 = vperm.xlu2 %2152, %v1456_v4   ;;  %4255 = vst [vmem:[#allocation13_spill] sm:$0xff] %v3460_v52  ;;  %v3556_v4 = vld [vmem:[%s4061_s4 + $0x28] sm:$0xff] }
 0x1ae   :  { %4256 = vst [vmem:[#allocation25_spill] sm:$0xff] %v3466_v53 }
 0x1af   :  { %4259 = vst [vmem:[#allocation15_spill] sm:$0xff] %v3484_v63 }
 0x1b0   :  { %v2183_v51 = vpop.eup %2182  ;;  %4271 = vst [vmem:[#allocation24_spill] sm:$0xff] %v3556_v4 }
 0x1b1   :  { %v625_v55 = vmul.f32 %v2183_v51, %v621_v62  ;;  %v3490_v62 = vld [vmem:[%s4061_s4 + $0x90] sm:$0xff]  ;;  %v3502_v51 = vld [vmem:[%s4061_s4 + $0x60] sm:$0xff] }
 0x1b2   :  { %v2185_v0 = vpop.eup %2184  ;;  %4260 = vst [vmem:[#allocation29_spill] sm:$0xff] %v3490_v62 }
 0x1b3   :  { %v647_v3 = vsel %vm3166_vm0, %v625_v55, 0.0  ;;  %v626_v8 = vmul.f32 %v2185_v0, %v622_v61  ;;  %v3199_v17 = vsel %vm3166_vm0, %v625_v55, %v3084_v50  ;;  %v1867_v50 = vsel %vm2140_vm6, 1, %v4206_v13  ;;  %v3226_v13 = vld [vmem:[%s4061_s4 + $0x1f0] sm:$0xff]  ;;  %4262 = vst [vmem:[#allocation16_spill] sm:$0xff] %v3502_v51  ;;  %v3508_v55 = vld [vmem:[%s4061_s4 + $0x68] sm:$0xff]  ;;  %v3520_v0 = vld [vmem:[%s4061_s4 + $0x78] sm:$0xff] }
 0x1b4   :  { %651 = vst [vmem:[#allocation1] ss:$9 sm:$0xff] %v647_v3  ;;  %v3514_v61 = vld [vmem:[%s4061_s4 + $0x70] sm:$0xff]  ;;  %v3526_v3 = vld [vmem:[%s4061_s4 + $0x40] sm:$0xff] }
 0x1b5   :  { %v648_v47 = vsel %vm3172_vm2, %v626_v8, 0.0  ;;  %v3204_v25 = vsel %vm3172_vm2, %v626_v8, %v3088_v12  ;;  %v3214_v12 = vld [vmem:[%s4061_s4 + $0x1e0] sm:$0xff]  ;;  %1870 = vperm.xlu2 %2152, %v1867_v50   ;;  %4263 = vst [vmem:[#allocation17_spill] sm:$0xff] %v3508_v55  ;;  %v3532_v8 = vld [vmem:[%s4061_s4 + $0x48] sm:$0xff]  ;;  %v3568_v50 = vld [vmem:[%s4061_s4 + $0x38] sm:$0xff] }
 0x1b6   :  { %653 = vst [vmem:[#allocation1 + $0x1] ss:$9 sm:$0xff] %v648_v47  ;;  %v3538_v47 = vld [vmem:[%s4061_s4 + $0x50] sm:$0xff] }
 0x1b7   :  { %4264 = vst [vmem:[#allocation35_spill] sm:$0xff] %v3514_v61 }
 0x1b8   :  { %4265 = vst [vmem:[#allocation30_spill] sm:$0xff] %v3520_v0 }
 0x1b9   :  { %4266 = vst [vmem:[#allocation19_spill] sm:$0xff] %v3526_v3 }
 0x1ba   :  { %4267 = vst [vmem:[#allocation20_spill] sm:$0xff] %v3532_v8 }
 0x1bb   :  { %4268 = vst [vmem:[#allocation37_spill] sm:$0xff] %v3538_v47 }
 0x1bc   :  { %4273 = vst [vmem:[#allocation38_spill] sm:$0xff] %v3568_v50 }
 0x1bd   :  { %v654_v54 = vld [vmem:[#allocation1] sm:$0xff] }
 0x1be   :  { %664 = vst [vmem:[#allocation1] ss:$9 sm:$0xff] %v3199_v17 }
 0x1bf   :  { %666 = vst [vmem:[#allocation1 + $0x1] ss:$9 sm:$0xff] %v3204_v25 }
 0x1c0   :  { %657 = vst [vmem:[#allocation3 + $0x2] sm:$0x3] %v654_v54  ;;  %v3550_v54 = vld [vmem:[%s4061_s4 + $0x20] sm:$0xff] }
 0x1c1   :  { %4270 = vst [vmem:[#allocation23_spill] sm:$0xff] %v3550_v54 }
 0x1c6   :  { %v667_v6 = vld [vmem:[#allocation1] sm:$0xff] }
 0x1c7   :  { %685 = vmatmul.f32.vlgmr.msra.gmra.mxu0 %v667_v6  ;;  %705 = vmatmul.f32.vlgmr.msra.gmra.mxu1 %v667_v6 }
 0x1c8   :  { %725 = vmatmul.f32.vlgmr.msrb.gmra.mxu2 %v667_v6  ;;  %745 = vmatmul.f32.vlgmr.msrb.gmra.mxu3 %v667_v6  ;;  %v3562_v6 = vld [vmem:[%s4061_s4 + $0x30] sm:$0xff] }
 0x1c9   :  { %1081 = vmatpush.msra.mxu0 %v3214_v12  ;;  %1101 = vmatpush.msra.mxu1 %v3220_v2  ;;  %4272 = vst [vmem:[#allocation39_spill] sm:$0xff] %v3562_v6 }
 0x1ca   :  { %1121 = vmatpush.msrb.mxu2 %v3226_v13  ;;  %1141 = vmatpush.msrb.mxu3 %v3232_v14 }
 0x1cb   :  { %1082 = vmatpush.msra.mxu0 %v3238_v59  ;;  %1102 = vmatpush.msra.mxu1 %v3244_v29 }
 0x1cc   :  { %1122 = vmatpush.msrb.mxu2 %v3250_v58  ;;  %1142 = vmatpush.msrb.mxu3 %v3256_v10 }
 0x1cd   :  { %1083 = vmatpush.msra.mxu0 %v3262_v5  ;;  %1103 = vmatpush.msra.mxu1 %v3268_v7 }
 0x1ce   :  { %1123 = vmatpush.msrb.mxu2 %v3274_v21  ;;  %1143 = vmatpush.msrb.mxu3 %v3280_v15 }
 0x1cf   :  { %1084 = vmatpush.msra.mxu0 %v3286_v16  ;;  %1104 = vmatpush.msra.mxu1 %v3292_v18 }
 0x1d0   :  { %1124 = vmatpush.msrb.mxu2 %v3298_v19  ;;  %1144 = vmatpush.msrb.mxu3 %v3304_v20 }
 0x1d1   :  { %1085 = vmatpush.msra.mxu0 %v3310_v22  ;;  %1105 = vmatpush.msra.mxu1 %v3316_v23 }
 0x1d2   :  { %1125 = vmatpush.msrb.mxu2 %v3322_v24  ;;  %1145 = vmatpush.msrb.mxu3 %v3328_v26 }
 0x1d3   :  { %1086 = vmatpush.msra.mxu0 %v3334_v27  ;;  %1106 = vmatpush.msra.mxu1 %v3340_v28 }
 0x1d4   :  { %1126 = vmatpush.msrb.mxu2 %v3346_v30  ;;  %1146 = vmatpush.msrb.mxu3 %v3352_v31 }
 0x1d5   :  { %1087 = vmatpush.msra.mxu0 %v3358_v32  ;;  %1107 = vmatpush.msra.mxu1 %v3364_v33 }
 0x1d6   :  { %1127 = vmatpush.msrb.mxu2 %v3370_v34  ;;  %1147 = vmatpush.msrb.mxu3 %v3376_v35 }
 0x1d7   :  { %1088 = vmatpush.msra.mxu0 %v3382_v36  ;;  %1108 = vmatpush.msra.mxu1 %v3388_v37 }
 0x1d8   :  { %1128 = vmatpush.msrb.mxu2 %v3394_v38  ;;  %1148 = vmatpush.msrb.mxu3 %v3400_v39 }
 0x1d9   :  { %1089 = vmatpush.msra.mxu0 %v3406_v40  ;;  %1109 = vmatpush.msra.mxu1 %v3412_v41 }
 0x1da   :  { %1129 = vmatpush.msrb.mxu2 %v3418_v42  ;;  %1149 = vmatpush.msrb.mxu3 %v3424_v43 }
 0x1db   :  { %1090 = vmatpush.msra.mxu0 %v3430_v44  ;;  %1110 = vmatpush.msra.mxu1 %v3436_v45 }
 0x1dc   :  { %1130 = vmatpush.msrb.mxu2 %v3442_v46  ;;  %1150 = vmatpush.msrb.mxu3 %v3448_v48 }
 0x1dd   :  { %1091 = vmatpush.msra.mxu0 %v3454_v49  ;;  %1111 = vmatpush.msra.mxu1 %v3460_v52 }
 0x1de   :  { %1131 = vmatpush.msrb.mxu2 %v3466_v53  ;;  %1151 = vmatpush.msrb.mxu3 %v3472_v56 }
 0x1df   :  { %1092 = vmatpush.msra.mxu0 %v3478_v57  ;;  %1112 = vmatpush.msra.mxu1 %v3484_v63  ;;  %v661_v57 = vld [vmem:[#allocation2 + $0x22] ss:$8 sm:$0xf] }
 0x1e0   :  { %1132 = vmatpush.msrb.mxu2 %v3490_v62  ;;  %1152 = vmatpush.msrb.mxu3 %v3496_v9  ;;  %v659_v9 = vld [vmem:[#allocation2 + $0x2] ss:$8 sm:$0xf] }
 0x1e1   :  { %1093 = vmatpush.msra.mxu0 %v3502_v51  ;;  %1113 = vmatpush.msra.mxu1 %v3508_v55 }
 0x1e2   :  { %1133 = vmatpush.msrb.mxu2 %v3514_v61  ;;  %1153 = vmatpush.msrb.mxu3 %v3520_v0 }
 0x1e3   :  { %1094 = vmatpush.msra.mxu0 %v3526_v3  ;;  %1114 = vmatpush.msra.mxu1 %v3532_v8 }
 0x1e4   :  { %1134 = vmatpush.msrb.mxu2 %v3538_v47  ;;  %1154 = vmatpush.msrb.mxu3 %v3544_v11 }
 0x1e5   :  { %1095 = vmatpush.msra.mxu0 %v3550_v54  ;;  %1115 = vmatpush.msra.mxu1 %v3556_v4  ;;  %v3574_v54 = vld [vmem:[%s4061_s4] sm:$0xff]  ;;  %v3580_v4 = vld [vmem:[%s4061_s4 + $0x8] sm:$0xff] }
 0x1e6   :  { %1135 = vmatpush.msrb.mxu2 %v3562_v6  ;;  %1155 = vmatpush.msrb.mxu3 %v3568_v50  ;;  %4274 = vst [vmem:[#allocation27_spill] sm:$0xff] %v3574_v54  ;;  %v3586_v6 = vld [vmem:[%s4061_s4 + $0x10] sm:$0xff]  ;;  %v3592_v50 = vld [vmem:[%s4061_s4 + $0x18] sm:$0xff] }
 0x1e7   :  { %1096 = vmatpush.msra.mxu0 %v3574_v54  ;;  %4275 = vst [vmem:[#allocation28_spill] sm:$0xff] %v3580_v4  ;;  %1116 = vmatpush.msra.mxu1 %v3580_v4 }
 0x1e8   :  { %4276 = vst [vmem:[#allocation41_spill] sm:$0xff] %v3586_v6  ;;  %1136 = vmatpush.msrb.mxu2 %v3586_v6  ;;  %1156 = vmatpush.msrb.mxu3 %v3592_v50 }
 0x1e9   :  { %4277 = vst [vmem:[#allocation40_spill] sm:$0xff] %v3592_v50 }
 0x244   :  { %v706_v54 = vpop.f32.mrf.mxu1  ;;  %v686_v0 = vpop.f32.mrf.mxu0 }
 0x245   :  { %v753_v11 = vrot.slane %v706_v54, 7 }
 0x247   :  { %v756_v61 = vsel %vm334_vm7, %v686_v0, %v753_v11  ;;  %v759_v55 = vsel %vm340_vm8, %v686_v0, %v753_v11 }
 0x24b   :  { %v726_v47 = vpop.f32.mrf.mxu2  ;;  %v746_v8 = vpop.f32.mrf.mxu3 }
 0x24c   :  { %v754_v3 = vrot.slane %v726_v47, 6  ;;  %v755_v4 = vrot.slane %v746_v8, 5 }
 0x24e   :  { %v757_v6 = vsel %vm336_vm9, %v754_v3, %v755_v4  ;;  %v760_v51 = vsel %vm342_vm10, %v754_v3, %v755_v4  ;;  %v841_v4 = vpop.permute.xlu2 %840 }
 0x24f   :  { %v758_v62 = vsel %vm338_vm11, %v756_v61, %v757_v6  ;;  %v761_v50 = vsel %vm344_vm12, %v759_v55, %v760_v51 }
 0x250   :  { %v762_v63 = vrot.slane %v761_v50, 1  ;;  %v765_v54 = vadd.f32 %v758_v62, %v659_v9 }
 0x252   :  { %v766_v56 = vadd.f32 %v762_v63, %v661_v57  ;;  %v2118_v47 = vmul.f32 -1.442695, %v765_v54  ;;  %v807_v6 = vrot.slane %v765_v54, 3  ;;  %v842_v54 = vperm.slane %v841_v4, 0  ;;  %v4295_v4 = vld [vmem:[#allocation16_spill] sm:$0xff] }
 0x254   :  { %2186 = vpow2.f32 %v2118_v47  ;;  %v2119_v8 = vmul.f32 -1.442695, %v766_v56  ;;  %v808_v62 = vrot.slane %v766_v56, 3  ;;  %vm3602_vm5 = vcmp.eq.s32.totalorder %v842_v54, 1 }
 0x256   :  { %2188 = vpow2.f32 %v2119_v8 }
 0x25a   :  { %v2187_v53 = vpop.eup %2186 }
 0x25b   :  { %v773_v52 = vadd.f32 1.0, %v2187_v53 }
 0x25c   :  { %v2189_v0 = vpop.eup %2188 }
 0x25d   :  { %v774_v11 = vadd.f32 1.0, %v2189_v0  ;;  %2190 = vrcp.f32 %v773_v52  ;;  %v786_v9 = vand.u32 2147483648, %v773_v52  ;;  %v784_v63 = vand.u32 2147483647, %v773_v52 }
 0x25e   :  { %vm780_vm14 = vweird.f32 %v773_v52 }
 0x25f   :  { %2192 = vrcp.f32 %v774_v11  ;;  %v801_v53 = vand.u32 2147483648, %v774_v11  ;;  %v799_v0 = vand.u32 2147483647, %v774_v11  ;;  %v787_v48 = vor.u32 1.1754944e-38, %v786_v9 }
 0x260   :  { %2194 = vtanh.f32 %v807_v6  ;;  %vm785_vm1 = vcmp.eq.f32.partialorder %v784_v63, 8.507059e+37  ;;  %vm795_vm2 = vweird.f32 %v774_v11 }
 0x261   :  { %2196 = vtanh.f32 %v808_v62  ;;  %vm800_vm4 = vcmp.eq.f32.partialorder %v799_v0, 8.507059e+37 }
 0x263   :  { %v2191_v3 = vpop.eup %2190 }
 0x264   :  { %v776_v49 = vmul.f32 %v2191_v3, %v773_v52  ;;  %vm781_vm13 = vweird.f32 %v2191_v3 }
 0x265   :  { %v2193_v61 = vpop.eup %2192  ;;  %vm782_vm0 = vmor %vm780_vm14, %vm781_vm13 }
 0x266   :  { %v777_v51 = vsub.f32 1.0, %v776_v49  ;;  %v791_v55 = vmul.f32 %v2193_v61, %v774_v11  ;;  %vm796_vm15 = vweird.f32 %v2193_v61  ;;  %v2195_v52 = vpop.eup %2194 }
 0x267   :  { %vm797_vm3 = vmor %vm795_vm2, %vm796_vm15  ;;  %v2197_v9 = vpop.eup %2196 }
 0x268   :  { %v778_v57 = vmul.f32 %v2191_v3, %v777_v51  ;;  %v792_v50 = vsub.f32 1.0, %v791_v55  ;;  %v802_v51 = vor.u32 1.1754944e-38, %v801_v53  ;;  %v845_v55 = vpop.permute.xlu2 %844 }
 0x26a   :  { %v779_v47 = vadd.f32 %v2191_v3, %v778_v57  ;;  %v793_v8 = vmul.f32 %v2193_v61, %v792_v50  ;;  %v846_v50 = vperm.slane %v845_v55, 0  ;;  %v4284_v55 = vld [vmem:[#allocation11_spill] sm:$0xff] }
 0x26c   :  { %v783_v46 = vsel %vm782_vm0, %v2191_v3, %v779_v47  ;;  %v794_v49 = vadd.f32 %v2193_v61, %v793_v8  ;;  %vm3607_vm6 = vcmp.eq.s32.totalorder %v846_v50, 1  ;;  %v4288_v50 = vld [vmem:[#allocation13_spill] sm:$0xff]  ;;  %v4291_v3 = vld [vmem:[#allocation14_spill] sm:$0xff] }
 0x26d   :  { %v788_v56 = vsel %vm785_vm1, %v787_v48, %v783_v46 }
 0x26e   :  { %v815_v45 = vrot.slane %v788_v56, 1  ;;  %v798_v6 = vsel %vm797_vm3, %v2193_v61, %v794_v49  ;;  %v821_v62 = vmul.f32 %v2195_v52, %v788_v56  ;;  %v4286_v52 = vld [vmem:[#allocation18_spill] sm:$0xff] }
 0x26f   :  { %v803_v57 = vsel %vm800_vm4, %v802_v51, %v798_v6  ;;  %v4285_v6 = vld [vmem:[#allocation21_spill] sm:$0xff] }
 0x270   :  { %v819_v44 = vmul.f32 %v815_v45, %v3180_v60  ;;  %v816_v43 = vrot.slane %v803_v57, 1  ;;  %v822_v11 = vmul.f32 %v2197_v9, %v803_v57  ;;  %v828_v47 = vrot.slane %v803_v57, 2  ;;  %v4287_v57 = vld [vmem:[#allocation12_spill] sm:$0xff]  ;;  %v4290_v9 = vld [vmem:[#allocation22_spill] sm:$0xff] }
 0x272   :  { %v823_v46 = vadd.f32 %v821_v62, %v819_v44  ;;  %v820_v48 = vmul.f32 %v816_v43, %v3185_v1  ;;  %v827_v44 = vrot.slane %v788_v56, 2  ;;  %v4289_v62 = vld [vmem:[#allocation25_spill] sm:$0xff] }
 0x274   :  { %2198 = vtanh.f32 %v823_v46  ;;  %v3614_v45 = vsel %vm3602_vm5, %v823_v46, %v3180_v60  ;;  %v824_v61 = vadd.f32 %v822_v11, %v820_v48  ;;  %v4292_v46 = vld [vmem:[#allocation15_spill] sm:$0xff]  ;;  %v4293_v48 = vld [vmem:[#allocation29_spill] sm:$0xff]  ;;  %v4294_v11 = vld [vmem:[#allocation26_spill] sm:$0xff] }
 0x276   :  { %2200 = vtanh.f32 %v824_v61  ;;  %v3619_v63 = vsel %vm3607_vm6, %v824_v61, %v3185_v1  ;;  %v4296_v61 = vld [vmem:[#allocation17_spill] sm:$0xff] }
 0x27a   :  { %v2199_v43 = vpop.eup %2198 }
 0x27b   :  { %v831_v53 = vmul.f32 %v2199_v43, %v827_v44  ;;  %v4297_v44 = vld [vmem:[#allocation35_spill] sm:$0xff]  ;;  %v4298_v43 = vld [vmem:[#allocation30_spill] sm:$0xff] }
 0x27c   :  { %v2201_v8 = vpop.eup %2200 }
 0x27d   :  { %v853_v0 = vsel %vm3602_vm5, %v831_v53, 0.0  ;;  %v832_v49 = vmul.f32 %v2201_v8, %v828_v47  ;;  %v3628_v54 = vsel %vm3602_vm5, %v831_v53, %v3199_v17  ;;  %v4282_v17 = vld [vmem:[#allocation31_spill] sm:$0xff]  ;;  %v4300_v47 = vld [vmem:[#allocation20_spill] sm:$0xff]  ;;  %v4301_v8 = vld [vmem:[#allocation37_spill] sm:$0xff] }
 0x27e   :  { %857 = vst [vmem:[#allocation1] ss:$9 sm:$0xff] %v853_v0  ;;  %v4299_v53 = vld [vmem:[#allocation19_spill] sm:$0xff]  ;;  %v4302_v0 = vld [vmem:[#allocation36_spill] sm:$0xff] }
 0x27f   :  { %v854_v60 = vsel %vm3607_vm6, %v832_v49, 0.0  ;;  %v3633_v56 = vsel %vm3607_vm6, %v832_v49, %v3204_v25  ;;  %v4283_v25 = vld [vmem:[#allocation34_spill] sm:$0xff]  ;;  %v4303_v49 = vld [vmem:[#allocation23_spill] sm:$0xff] }
 0x280   :  { %859 = vst [vmem:[#allocation1 + $0x1] ss:$9 sm:$0xff] %v854_v60  ;;  %v4304_v60 = vld [vmem:[#allocation24_spill] sm:$0xff] }
 0x287   :  { %v860_v1 = vld [vmem:[#allocation1] sm:$0xff] }
 0x288   :  { %870 = vst [vmem:[#allocation1] ss:$9 sm:$0xff] %v3628_v54 }
 0x289   :  { %872 = vst [vmem:[#allocation1 + $0x1] ss:$9 sm:$0xff] %v3633_v56 }
 0x28a   :  { %863 = vst [vmem:[#allocation3 + $0x4] sm:$0x3] %v860_v1  ;;  %v4305_v1 = vld [vmem:[#allocation39_spill] sm:$0xff] }
 0x290   :  { %v873_v51 = vld [vmem:[#allocation1] sm:$0xff] }
 0x291   :  { %891 = vmatmul.f32.vlgmr.msrb.gmra.mxu0 %v873_v51  ;;  %911 = vmatmul.f32.vlgmr.msrb.gmra.mxu1 %v873_v51 }
 0x292   :  { %931 = vmatmul.f32.vlgmr.msra.gmra.mxu2 %v873_v51  ;;  %951 = vmatmul.f32.vlgmr.msra.gmra.mxu3 %v873_v51  ;;  %v4306_v51 = vld [vmem:[#allocation38_spill] sm:$0xff] }
 0x293   :  { %1287 = vmatpush.msrb.mxu0 %v3214_v12  ;;  %1307 = vmatpush.msrb.mxu1 %v3220_v2 }
 0x294   :  { %1327 = vmatpush.msra.mxu2 %v3226_v13  ;;  %1347 = vmatpush.msra.mxu3 %v3232_v14 }
 0x295   :  { %1288 = vmatpush.msrb.mxu0 %v3238_v59  ;;  %1308 = vmatpush.msrb.mxu1 %v3244_v29 }
 0x296   :  { %1328 = vmatpush.msra.mxu2 %v3250_v58  ;;  %1348 = vmatpush.msra.mxu3 %v3256_v10 }
 0x297   :  { %1289 = vmatpush.msrb.mxu0 %v3262_v5  ;;  %1309 = vmatpush.msrb.mxu1 %v3268_v7 }
 0x298   :  { %1329 = vmatpush.msra.mxu2 %v3274_v21  ;;  %1349 = vmatpush.msra.mxu3 %v3280_v15 }
 0x299   :  { %1290 = vmatpush.msrb.mxu0 %v3286_v16  ;;  %1310 = vmatpush.msrb.mxu1 %v3292_v18 }
 0x29a   :  { %1330 = vmatpush.msra.mxu2 %v3298_v19  ;;  %1350 = vmatpush.msra.mxu3 %v3304_v20 }
 0x29b   :  { %1291 = vmatpush.msrb.mxu0 %v3310_v22  ;;  %1311 = vmatpush.msrb.mxu1 %v3316_v23 }
 0x29c   :  { %1331 = vmatpush.msra.mxu2 %v3322_v24  ;;  %1351 = vmatpush.msra.mxu3 %v3328_v26 }
 0x29d   :  { %1292 = vmatpush.msrb.mxu0 %v3334_v27  ;;  %1312 = vmatpush.msrb.mxu1 %v3340_v28 }
 0x29e   :  { %1332 = vmatpush.msra.mxu2 %v3346_v30  ;;  %1352 = vmatpush.msra.mxu3 %v3352_v31 }
 0x29f   :  { %1293 = vmatpush.msrb.mxu0 %v3358_v32  ;;  %1313 = vmatpush.msrb.mxu1 %v3364_v33 }
 0x2a0   :  { %1333 = vmatpush.msra.mxu2 %v3370_v34  ;;  %1353 = vmatpush.msra.mxu3 %v3376_v35 }
 0x2a1   :  { %1294 = vmatpush.msrb.mxu0 %v3382_v36  ;;  %1314 = vmatpush.msrb.mxu1 %v3388_v37 }
 0x2a2   :  { %1334 = vmatpush.msra.mxu2 %v3394_v38  ;;  %1354 = vmatpush.msra.mxu3 %v3400_v39 }
 0x2a3   :  { %1295 = vmatpush.msrb.mxu0 %v3406_v40  ;;  %1315 = vmatpush.msrb.mxu1 %v3412_v41 }
 0x2a4   :  { %1335 = vmatpush.msra.mxu2 %v3418_v42  ;;  %1355 = vmatpush.msra.mxu3 %v4282_v17 }
 0x2a5   :  { %1296 = vmatpush.msrb.mxu0 %v4283_v25  ;;  %1316 = vmatpush.msrb.mxu1 %v4284_v55 }
 0x2a6   :  { %1336 = vmatpush.msra.mxu2 %v4285_v6  ;;  %1356 = vmatpush.msra.mxu3 %v4286_v52 }
 0x2a7   :  { %1297 = vmatpush.msrb.mxu0 %v4287_v57  ;;  %1317 = vmatpush.msrb.mxu1 %v4288_v50 }
 0x2a8   :  { %1337 = vmatpush.msra.mxu2 %v4289_v62  ;;  %1357 = vmatpush.msra.mxu3 %v4290_v9 }
 0x2a9   :  { %1298 = vmatpush.msrb.mxu0 %v4291_v3  ;;  %1318 = vmatpush.msrb.mxu1 %v4292_v46  ;;  %v867_v3 = vld [vmem:[#allocation2 + $0x23] ss:$8 sm:$0xf] }
 0x2aa   :  { %1338 = vmatpush.msra.mxu2 %v4293_v48  ;;  %1358 = vmatpush.msra.mxu3 %v4294_v11 }
 0x2ab   :  { %1299 = vmatpush.msrb.mxu0 %v4295_v4  ;;  %1319 = vmatpush.msrb.mxu1 %v4296_v61  ;;  %v4307_v61 = vld [vmem:[#allocation27_spill] sm:$0xff] }
 0x2ac   :  { %1339 = vmatpush.msra.mxu2 %v4297_v44  ;;  %1359 = vmatpush.msra.mxu3 %v4298_v43  ;;  %v4308_v44 = vld [vmem:[#allocation28_spill] sm:$0xff]  ;;  %v4309_v43 = vld [vmem:[#allocation41_spill] sm:$0xff] }
 0x2ad   :  { %1300 = vmatpush.msrb.mxu0 %v4299_v53  ;;  %1320 = vmatpush.msrb.mxu1 %v4300_v47  ;;  %v4310_v53 = vld [vmem:[#allocation40_spill] sm:$0xff] }
 0x2ae   :  { %1340 = vmatpush.msra.mxu2 %v4301_v8  ;;  %1360 = vmatpush.msra.mxu3 %v4302_v0 }
 0x2af   :  { %1301 = vmatpush.msrb.mxu0 %v4303_v49  ;;  %1321 = vmatpush.msrb.mxu1 %v4304_v60 }
 0x2b0   :  { %1341 = vmatpush.msra.mxu2 %v4305_v1  ;;  %1361 = vmatpush.msra.mxu3 %v4306_v51 }
 0x2b1   :  { %1302 = vmatpush.msrb.mxu0 %v4307_v61  ;;  %1322 = vmatpush.msrb.mxu1 %v4308_v44  ;;  %v865_v44 = vld [vmem:[#allocation2 + $0x3] ss:$8 sm:$0xf] }
 0x2b2   :  { %1342 = vmatpush.msra.mxu2 %v4309_v43  ;;  %1362 = vmatpush.msra.mxu3 %v4310_v53 }
 0x30e   :  { %v912_v47 = vpop.f32.mrf.mxu1  ;;  %v892_v48 = vpop.f32.mrf.mxu0 }
 0x30f   :  { %v959_v8 = vrot.slane %v912_v47, 7 }
 0x311   :  { %v962_v60 = vsel %vm334_vm7, %v892_v48, %v959_v8  ;;  %v965_v1 = vsel %vm340_vm8, %v892_v48, %v959_v8 }
 0x315   :  { %v932_v4 = vpop.f32.mrf.mxu2  ;;  %v952_v0 = vpop.f32.mrf.mxu3 }
 0x316   :  { %v960_v11 = vrot.slane %v932_v4, 6  ;;  %v961_v49 = vrot.slane %v952_v0, 5 }
 0x318   :  { %v963_v51 = vsel %vm336_vm9, %v960_v11, %v961_v49  ;;  %v966_v61 = vsel %vm342_vm10, %v960_v11, %v961_v49 }
 0x319   :  { %v964_v43 = vsel %vm338_vm11, %v962_v60, %v963_v51  ;;  %v967_v53 = vsel %vm344_vm12, %v965_v1, %v966_v61 }
 0x31a   :  { %v968_v46 = vrot.slane %v967_v53, 1  ;;  %v971_v47 = vadd.f32 %v964_v43, %v865_v44 }
 0x31c   :  { %v972_v9 = vadd.f32 %v968_v46, %v867_v3  ;;  %v2122_v4 = vmul.f32 -1.442695, %v971_v47  ;;  %v1013_v60 = vrot.slane %v971_v47, 3 }
 0x31e   :  { %2202 = vpow2.f32 %v2122_v4  ;;  %v2123_v0 = vmul.f32 -1.442695, %v972_v9  ;;  %v1014_v44 = vrot.slane %v972_v9, 3 }
 0x320   :  { %2204 = vpow2.f32 %v2123_v0 }
 0x324   :  { %v2203_v62 = vpop.eup %2202 }
 0x325   :  { %v979_v50 = vadd.f32 1.0, %v2203_v62 }
 0x326   :  { %v2205_v48 = vpop.eup %2204 }
 0x327   :  { %v980_v8 = vadd.f32 1.0, %v2205_v48  ;;  %2206 = vrcp.f32 %v979_v50  ;;  %v992_v53 = vand.u32 2147483648, %v979_v50  ;;  %v990_v3 = vand.u32 2147483647, %v979_v50 }
 0x328   :  { %vm986_vm14 = vweird.f32 %v979_v50 }
 0x329   :  { %2208 = vrcp.f32 %v980_v8  ;;  %v1007_v1 = vand.u32 2147483648, %v980_v8  ;;  %v1005_v0 = vand.u32 2147483647, %v980_v8  ;;  %v993_v48 = vor.u32 1.1754944e-38, %v992_v53 }
 0x32a   :  { %2210 = vtanh.f32 %v1013_v60  ;;  %vm991_vm1 = vcmp.eq.f32.partialorder %v990_v3, 8.507059e+37  ;;  %vm1001_vm2 = vweird.f32 %v980_v8 }
 0x32b   :  { %2212 = vtanh.f32 %v1014_v44  ;;  %v1008_v9 = vor.u32 1.1754944e-38, %v1007_v1  ;;  %vm1006_vm4 = vcmp.eq.f32.partialorder %v1005_v0, 8.507059e+37  ;;  %v4325_v1 = vld [vmem:[#allocation16_spill] sm:$0xff] }
 0x32d   :  { %v2207_v11 = vpop.eup %2206 }
 0x32e   :  { %v982_v49 = vmul.f32 %v2207_v11, %v979_v50  ;;  %vm987_vm13 = vweird.f32 %v2207_v11 }
 0x32f   :  { %v2209_v57 = vpop.eup %2208  ;;  %vm988_vm0 = vmor %vm986_vm14, %vm987_vm13 }
 0x330   :  { %v983_v51 = vsub.f32 1.0, %v982_v49  ;;  %v997_v61 = vmul.f32 %v2209_v57, %v980_v8  ;;  %vm1002_vm15 = vweird.f32 %v2209_v57 }
 0x331   :  { %vm1003_vm3 = vmor %vm1001_vm2, %vm1002_vm15 }
 0x332   :  { %v984_v43 = vmul.f32 %v2207_v11, %v983_v51  ;;  %v998_v46 = vsub.f32 1.0, %v997_v61  ;;  %v1047_v51 = vpop.permute.xlu0 %1046  ;;  %v2211_v61 = vpop.eup %2210 }
 0x333   :  { %v1048_v60 = vperm.slane %v1047_v51, 0  ;;  %v2213_v44 = vpop.eup %2212 }
 0x334   :  { %v985_v62 = vadd.f32 %v2207_v11, %v984_v43  ;;  %v999_v4 = vmul.f32 %v2209_v57, %v998_v46  ;;  %v1051_v46 = vpop.permute.xlu1 %1050 }
 0x335   :  { %vm3709_vm5 = vcmp.eq.s32.totalorder %v1048_v60, 1  ;;  %v4316_v60 = vld [vmem:[#allocation18_spill] sm:$0xff] }
 0x336   :  { %v989_v52 = vsel %vm988_vm0, %v2207_v11, %v985_v62  ;;  %v1000_v47 = vadd.f32 %v2209_v57, %v999_v4  ;;  %v1052_v11 = vperm.slane %v1051_v46, 0  ;;  %v4318_v46 = vld [vmem:[#allocation13_spill] sm:$0xff] }
 0x337   :  { %v994_v49 = vsel %vm991_vm1, %v993_v48, %v989_v52 }
 0x338   :  { %v1004_v6 = vsel %vm1003_vm3, %v2209_v57, %v1000_v47  ;;  %v1021_v50 = vrot.slane %v994_v49, 1  ;;  %v1027_v53 = vmul.f32 %v2211_v61, %v994_v49  ;;  %vm1054_vm6 = vcmp.eq.s32.totalorder %v1052_v11, 1  ;;  %v4315_v61 = vld [vmem:[#allocation21_spill] sm:$0xff]  ;;  %v4321_v11 = vld [vmem:[#allocation14_spill] sm:$0xff] }
 0x339   :  { %v1009_v43 = vsel %vm1006_vm4, %v1008_v9, %v1004_v6  ;;  %v1033_v4 = vrot.slane %v994_v49, 2 }
 0x33a   :  { %v1022_v55 = vrot.slane %v1009_v43, 1  ;;  %v1025_v25 = vmul.f32 %v1021_v50, %v3614_v45  ;;  %v1028_v8 = vmul.f32 %v2213_v44, %v1009_v43  ;;  %v1034_v0 = vrot.slane %v1009_v43, 2  ;;  %v4317_v43 = vld [vmem:[#allocation12_spill] sm:$0xff]  ;;  %v4320_v44 = vld [vmem:[#allocation22_spill] sm:$0xff] }
 0x33c   :  { %v1026_v3 = vmul.f32 %v1022_v55, %v3619_v63  ;;  %v1029_v52 = vadd.f32 %v1027_v53, %v1025_v25  ;;  %v4319_v53 = vld [vmem:[#allocation25_spill] sm:$0xff] }
 0x33e   :  { %v1030_v57 = vadd.f32 %v1028_v8, %v1026_v3  ;;  %2214 = vtanh.f32 %v1029_v52  ;;  %v3716_v6 = vsel %vm3709_vm5, %v1029_v52, %v3614_v45  ;;  %v4322_v3 = vld [vmem:[#allocation15_spill] sm:$0xff]  ;;  %v4323_v8 = vld [vmem:[#allocation29_spill] sm:$0xff]  ;;  %v4324_v52 = vld [vmem:[#allocation26_spill] sm:$0xff] }
 0x340   :  { %2216 = vtanh.f32 %v1030_v57  ;;  %v3719_v62 = vsel %vm1054_vm6, %v1030_v57, %v3619_v63  ;;  %v4326_v57 = vld [vmem:[#allocation17_spill] sm:$0xff] }
 0x344   :  { %v2215_v55 = vpop.eup %2214 }
 0x345   :  { %v1037_v25 = vmul.f32 %v2215_v55, %v1033_v4  ;;  %v4327_v4 = vld [vmem:[#allocation35_spill] sm:$0xff]  ;;  %v4328_v55 = vld [vmem:[#allocation30_spill] sm:$0xff] }
 0x346   :  { %v2217_v48 = vpop.eup %2216 }
 0x347   :  { %v1038_v47 = vmul.f32 %v2217_v48, %v1034_v0  ;;  %v1059_v9 = vsel %vm3709_vm5, %v1037_v25, 0.0  ;;  %v3726_v45 = vsel %vm3709_vm5, %v1037_v25, %v3628_v54  ;;  %v4313_v54 = vld [vmem:[#allocation34_spill] sm:$0xff]  ;;  %v4329_v0 = vld [vmem:[#allocation19_spill] sm:$0xff]  ;;  %v4330_v25 = vld [vmem:[#allocation20_spill] sm:$0xff] }
 0x348   :  { %1063 = vst [vmem:[#allocation1] ss:$9 sm:$0xff] %v1059_v9  ;;  %v4331_v48 = vld [vmem:[#allocation37_spill] sm:$0xff]  ;;  %v4333_v9 = vld [vmem:[#allocation23_spill] sm:$0xff] }
 0x349   :  { %v1060_v51 = vsel %vm1054_vm6, %v1038_v47, 0.0  ;;  %v3729_v63 = vsel %vm1054_vm6, %v1038_v47, %v3633_v56  ;;  %v4314_v56 = vld [vmem:[#allocation11_spill] sm:$0xff]  ;;  %v4332_v47 = vld [vmem:[#allocation36_spill] sm:$0xff] }
 0x34a   :  { %1065 = vst [vmem:[#allocation1 + $0x1] ss:$9 sm:$0xff] %v1060_v51  ;;  %v4334_v51 = vld [vmem:[#allocation24_spill] sm:$0xff] }
 0x351   :  { %v1066_v50 = vld [vmem:[#allocation1] sm:$0xff] }
 0x352   :  { %1076 = vst [vmem:[#allocation1] ss:$9 sm:$0xff] %v3726_v45 }
 0x353   :  { %1078 = vst [vmem:[#allocation1 + $0x1] ss:$9 sm:$0xff] %v3729_v63 }
 0x354   :  { %1069 = vst [vmem:[#allocation3 + $0x6] sm:$0x3] %v1066_v50  ;;  %v4335_v50 = vld [vmem:[#allocation39_spill] sm:$0xff] }
 0x35a   :  { %v1079_v49 = vld [vmem:[#allocation1] sm:$0xff] }
 0x35b   :  { %1097 = vmatmul.f32.vlgmr.msra.gmra.mxu0 %v1079_v49  ;;  %1117 = vmatmul.f32.vlgmr.msra.gmra.mxu1 %v1079_v49 }
 0x35c   :  { %1137 = vmatmul.f32.vlgmr.msrb.gmra.mxu2 %v1079_v49  ;;  %1157 = vmatmul.f32.vlgmr.msrb.gmra.mxu3 %v1079_v49  ;;  %v4336_v49 = vld [vmem:[#allocation38_spill] sm:$0xff] }
 0x35d   :  { %1493 = vmatpush.msra.mxu0 %v3214_v12  ;;  %1513 = vmatpush.msra.mxu1 %v3220_v2 }
 0x35e   :  { %1533 = vmatpush.msrb.mxu2 %v3226_v13  ;;  %1553 = vmatpush.msrb.mxu3 %v3232_v14 }
 0x35f   :  { %1494 = vmatpush.msra.mxu0 %v3238_v59  ;;  %1514 = vmatpush.msra.mxu1 %v3244_v29 }
 0x360   :  { %1534 = vmatpush.msrb.mxu2 %v3250_v58  ;;  %1554 = vmatpush.msrb.mxu3 %v3256_v10 }
 0x361   :  { %1495 = vmatpush.msra.mxu0 %v3262_v5  ;;  %1515 = vmatpush.msra.mxu1 %v3268_v7 }
 0x362   :  { %1535 = vmatpush.msrb.mxu2 %v3274_v21  ;;  %1555 = vmatpush.msrb.mxu3 %v3280_v15 }
 0x363   :  { %1496 = vmatpush.msra.mxu0 %v3286_v16  ;;  %1516 = vmatpush.msra.mxu1 %v3292_v18 }
 0x364   :  { %1536 = vmatpush.msrb.mxu2 %v3298_v19  ;;  %1556 = vmatpush.msrb.mxu3 %v3304_v20 }
 0x365   :  { %1497 = vmatpush.msra.mxu0 %v3310_v22  ;;  %1517 = vmatpush.msra.mxu1 %v3316_v23 }
 0x366   :  { %1537 = vmatpush.msrb.mxu2 %v3322_v24  ;;  %1557 = vmatpush.msrb.mxu3 %v3328_v26 }
 0x367   :  { %1498 = vmatpush.msra.mxu0 %v3334_v27  ;;  %1518 = vmatpush.msra.mxu1 %v3340_v28 }
 0x368   :  { %1538 = vmatpush.msrb.mxu2 %v3346_v30  ;;  %1558 = vmatpush.msrb.mxu3 %v3352_v31 }
 0x369   :  { %1499 = vmatpush.msra.mxu0 %v3358_v32  ;;  %1519 = vmatpush.msra.mxu1 %v3364_v33 }
 0x36a   :  { %1539 = vmatpush.msrb.mxu2 %v3370_v34  ;;  %1559 = vmatpush.msrb.mxu3 %v3376_v35 }
 0x36b   :  { %1500 = vmatpush.msra.mxu0 %v3382_v36  ;;  %1520 = vmatpush.msra.mxu1 %v3388_v37 }
 0x36c   :  { %1540 = vmatpush.msrb.mxu2 %v3394_v38  ;;  %1560 = vmatpush.msrb.mxu3 %v3400_v39 }
 0x36d   :  { %1501 = vmatpush.msra.mxu0 %v3406_v40  ;;  %1521 = vmatpush.msra.mxu1 %v3412_v41 }
 0x36e   :  { %1541 = vmatpush.msrb.mxu2 %v3418_v42  ;;  %1561 = vmatpush.msrb.mxu3 %v4282_v17 }
 0x36f   :  { %1502 = vmatpush.msra.mxu0 %v4313_v54  ;;  %1522 = vmatpush.msra.mxu1 %v4314_v56 }
 0x370   :  { %1542 = vmatpush.msrb.mxu2 %v4315_v61  ;;  %1562 = vmatpush.msrb.mxu3 %v4316_v60 }
 0x371   :  { %1503 = vmatpush.msra.mxu0 %v4317_v43  ;;  %1523 = vmatpush.msra.mxu1 %v4318_v46 }
 0x372   :  { %1543 = vmatpush.msrb.mxu2 %v4319_v53  ;;  %1563 = vmatpush.msrb.mxu3 %v4320_v44 }
 0x373   :  { %1504 = vmatpush.msra.mxu0 %v4321_v11  ;;  %1524 = vmatpush.msra.mxu1 %v4322_v3  ;;  %v1073_v11 = vld [vmem:[#allocation2 + $0x24] ss:$8 sm:$0xf] }
 0x374   :  { %1544 = vmatpush.msrb.mxu2 %v4323_v8  ;;  %1564 = vmatpush.msrb.mxu3 %v4324_v52 }
 0x375   :  { %1505 = vmatpush.msra.mxu0 %v4325_v1  ;;  %1525 = vmatpush.msra.mxu1 %v4326_v57  ;;  %v4337_v57 = vld [vmem:[#allocation27_spill] sm:$0xff] }
 0x376   :  { %1545 = vmatpush.msrb.mxu2 %v4327_v4  ;;  %1565 = vmatpush.msrb.mxu3 %v4328_v55  ;;  %v4338_v4 = vld [vmem:[#allocation28_spill] sm:$0xff]  ;;  %v4339_v55 = vld [vmem:[#allocation41_spill] sm:$0xff] }
 0x377   :  { %1506 = vmatpush.msra.mxu0 %v4329_v0  ;;  %1526 = vmatpush.msra.mxu1 %v4330_v25  ;;  %v4340_v0 = vld [vmem:[#allocation40_spill] sm:$0xff] }
 0x378   :  { %1546 = vmatpush.msrb.mxu2 %v4331_v48  ;;  %1566 = vmatpush.msrb.mxu3 %v4332_v47 }
 0x379   :  { %1507 = vmatpush.msra.mxu0 %v4333_v9  ;;  %1527 = vmatpush.msra.mxu1 %v4334_v51 }
 0x37a   :  { %1547 = vmatpush.msrb.mxu2 %v4335_v50  ;;  %1567 = vmatpush.msrb.mxu3 %v4336_v49 }
 0x37b   :  { %1508 = vmatpush.msra.mxu0 %v4337_v57  ;;  %1528 = vmatpush.msra.mxu1 %v4338_v4  ;;  %v1071_v4 = vld [vmem:[#allocation2 + $0x4] ss:$8 sm:$0xf] }
 0x37c   :  { %1548 = vmatpush.msrb.mxu2 %v4339_v55  ;;  %1568 = vmatpush.msrb.mxu3 %v4340_v0 }
 0x3d8   :  { %v1118_v25 = vpop.f32.mrf.mxu1  ;;  %v1098_v8 = vpop.f32.mrf.mxu0 }
 0x3d9   :  { %v1165_v48 = vrot.slane %v1118_v25, 7 }
 0x3db   :  { %v1168_v51 = vsel %vm334_vm7, %v1098_v8, %v1165_v48  ;;  %v1171_v50 = vsel %vm340_vm8, %v1098_v8, %v1165_v48 }
 0x3df   :  { %v1138_v1 = vpop.f32.mrf.mxu2  ;;  %v1158_v47 = vpop.f32.mrf.mxu3 }
 0x3e0   :  { %v1166_v52 = vrot.slane %v1138_v1, 6  ;;  %v1167_v9 = vrot.slane %v1158_v47, 5 }
 0x3e2   :  { %v1169_v49 = vsel %vm336_vm9, %v1166_v52, %v1167_v9  ;;  %v1172_v57 = vsel %vm342_vm10, %v1166_v52, %v1167_v9 }
 0x3e3   :  { %v1170_v55 = vsel %vm338_vm11, %v1168_v51, %v1169_v49  ;;  %v1173_v0 = vsel %vm344_vm12, %v1171_v50, %v1172_v57 }
 0x3e4   :  { %v1174_v3 = vrot.slane %v1173_v0, 1  ;;  %v1177_v25 = vadd.f32 %v1170_v55, %v1071_v4 }
 0x3e6   :  { %v1178_v44 = vadd.f32 %v1174_v3, %v1073_v11  ;;  %v2126_v1 = vmul.f32 -1.442695, %v1177_v25  ;;  %v1219_v51 = vrot.slane %v1177_v25, 3 }
 0x3e8   :  { %2218 = vpow2.f32 %v2126_v1  ;;  %v2127_v47 = vmul.f32 -1.442695, %v1178_v44  ;;  %v1220_v4 = vrot.slane %v1178_v44, 3 }
 0x3ea   :  { %2220 = vpow2.f32 %v2127_v47 }
 0x3ee   :  { %v2219_v53 = vpop.eup %2218 }
 0x3ef   :  { %v1185_v46 = vadd.f32 1.0, %v2219_v53 }
 0x3f0   :  { %v2221_v8 = vpop.eup %2220 }
 0x3f1   :  { %v1186_v48 = vadd.f32 1.0, %v2221_v8  ;;  %2222 = vrcp.f32 %v1185_v46  ;;  %v1198_v0 = vand.u32 2147483648, %v1185_v46  ;;  %v1196_v11 = vand.u32 2147483647, %v1185_v46 }
 0x3f2   :  { %vm1192_vm14 = vweird.f32 %v1185_v46 }
 0x3f3   :  { %2224 = vrcp.f32 %v1186_v48  ;;  %v1213_v50 = vand.u32 2147483648, %v1186_v48  ;;  %v1211_v47 = vand.u32 2147483647, %v1186_v48  ;;  %v1199_v8 = vor.u32 1.1754944e-38, %v1198_v0 }
 0x3f4   :  { %2226 = vtanh.f32 %v1219_v51  ;;  %vm1197_vm1 = vcmp.eq.f32.partialorder %v1196_v11, 8.507059e+37  ;;  %vm1207_vm2 = vweird.f32 %v1186_v48 }
 0x3f5   :  { %2228 = vtanh.f32 %v1220_v4  ;;  %v1214_v44 = vor.u32 1.1754944e-38, %v1213_v50  ;;  %vm1212_vm4 = vcmp.eq.f32.partialorder %v1211_v47, 8.507059e+37 }
 0x3f7   :  { %v2223_v52 = vpop.eup %2222 }
 0x3f8   :  { %v1188_v9 = vmul.f32 %v2223_v52, %v1185_v46  ;;  %vm1193_vm13 = vweird.f32 %v2223_v52 }
 0x3f9   :  { %v2225_v43 = vpop.eup %2224  ;;  %vm1194_vm0 = vmor %vm1192_vm14, %vm1193_vm13 }
 0x3fa   :  { %v1189_v49 = vsub.f32 1.0, %v1188_v9  ;;  %v1203_v57 = vmul.f32 %v2225_v43, %v1186_v48  ;;  %vm1208_vm15 = vweird.f32 %v2225_v43 }
 0x3fb   :  { %vm1209_vm3 = vmor %vm1207_vm2, %vm1208_vm15 }
 0x3fc   :  { %v1190_v55 = vmul.f32 %v2223_v52, %v1189_v49  ;;  %v1204_v3 = vsub.f32 1.0, %v1203_v57  ;;  %v1253_v49 = vpop.permute.xlu2 %1252  ;;  %v2227_v57 = vpop.eup %2226 }
 0x3fd   :  { %v1254_v51 = vperm.slane %v1253_v49, 0  ;;  %v2229_v4 = vpop.eup %2228 }
 0x3fe   :  { %v1191_v53 = vadd.f32 %v2223_v52, %v1190_v55  ;;  %v1205_v1 = vmul.f32 %v2225_v43, %v1204_v3  ;;  %v1257_v3 = vpop.permute.xlu0 %1256 }
 0x3ff   :  { %vm3805_vm5 = vcmp.eq.s32.totalorder %v1254_v51, 1  ;;  %v1277_v51 = vld [vmem:[#allocation2 + $0x5] ss:$8 sm:$0xf] }
 0x400   :  { %v1195_v60 = vsel %vm1194_vm0, %v2223_v52, %v1191_v53  ;;  %v1206_v25 = vadd.f32 %v2225_v43, %v1205_v1  ;;  %v1258_v52 = vperm.slane %v1257_v3, 0 }
 0x401   :  { %v1200_v9 = vsel %vm1197_vm1, %v1199_v8, %v1195_v60 }
 0x402   :  { %v1210_v61 = vsel %vm1209_vm3, %v2225_v43, %v1206_v25  ;;  %v1227_v46 = vrot.slane %v1200_v9, 1  ;;  %v1233_v0 = vmul.f32 %v2227_v57, %v1200_v9  ;;  %vm1260_vm6 = vcmp.eq.s32.totalorder %v1258_v52, 1  ;;  %v1279_v52 = vld [vmem:[#allocation2 + $0x25] ss:$8 sm:$0xf] }
 0x403   :  { %v1215_v55 = vsel %vm1212_vm4, %v1214_v44, %v1210_v61  ;;  %v1239_v1 = vrot.slane %v1200_v9, 2 }
 0x404   :  { %v1228_v56 = vrot.slane %v1215_v55, 1  ;;  %v1231_v54 = vmul.f32 %v1227_v46, %v3716_v6  ;;  %v1234_v48 = vmul.f32 %v2229_v4, %v1215_v55  ;;  %v1240_v47 = vrot.slane %v1215_v55, 2 }
 0x406   :  { %v1232_v11 = vmul.f32 %v1228_v56, %v3719_v62  ;;  %v1235_v60 = vadd.f32 %v1233_v0, %v1231_v54 }
 0x408   :  { %v1236_v43 = vadd.f32 %v1234_v48, %v1232_v11  ;;  %2230 = vtanh.f32 %v1235_v60  ;;  %v3812_v61 = vsel %vm3805_vm5, %v1235_v60, %v3716_v6 }
 0x40a   :  { %2232 = vtanh.f32 %v1236_v43  ;;  %v3815_v53 = vsel %vm1260_vm6, %v1236_v43, %v3719_v62 }
 0x40e   :  { %v2231_v56 = vpop.eup %2230 }
 0x40f   :  { %v1243_v54 = vmul.f32 %v2231_v56, %v1239_v1 }
 0x410   :  { %v2233_v8 = vpop.eup %2232 }
 0x411   :  { %v1244_v25 = vmul.f32 %v2233_v8, %v1240_v47  ;;  %v1265_v44 = vsel %vm3805_vm5, %v1243_v54, 0.0  ;;  %v3822_v6 = vsel %vm3805_vm5, %v1243_v54, %v3726_v45 }
 0x412   :  { %1269 = vst [vmem:[#allocation1] ss:$9 sm:$0xff] %v1265_v44 }
 0x413   :  { %v1266_v49 = vsel %vm1260_vm6, %v1244_v25, 0.0  ;;  %v3825_v62 = vsel %vm1260_vm6, %v1244_v25, %v3729_v63 }
 0x414   :  { %1271 = vst [vmem:[#allocation1 + $0x1] ss:$9 sm:$0xff] %v1266_v49 }
 0x41b   :  { %v1272_v46 = vld [vmem:[#allocation1] sm:$0xff] }
 0x41c   :  { %1282 = vst [vmem:[#allocation1] ss:$9 sm:$0xff] %v3822_v6 }
 0x41d   :  { %1284 = vst [vmem:[#allocation1 + $0x1] ss:$9 sm:$0xff] %v3825_v62 }
 0x41e   :  { %1275 = vst [vmem:[#allocation3 + $0x8] sm:$0x3] %v1272_v46 }
 0x424   :  { %v1285_v9 = vld [vmem:[#allocation1] sm:$0xff] }
 0x425   :  { %1303 = vmatmul.f32.vlgmr.msrb.gmra.mxu0 %v1285_v9  ;;  %1323 = vmatmul.f32.vlgmr.msrb.gmra.mxu1 %v1285_v9 }
 0x426   :  { %1343 = vmatmul.f32.vlgmr.msra.gmra.mxu2 %v1285_v9  ;;  %1363 = vmatmul.f32.vlgmr.msra.gmra.mxu3 %v1285_v9 }
 0x427   :  { %1699 = vmatpush.msrb.mxu0 %v3214_v12  ;;  %1719 = vmatpush.msrb.mxu1 %v3220_v2  ;;  %v4343_v12 = vld [vmem:[#allocation34_spill] sm:$0xff]  ;;  %v4344_v2 = vld [vmem:[#allocation11_spill] sm:$0xff] }
 0x428   :  { %1739 = vmatpush.msra.mxu2 %v3226_v13  ;;  %1759 = vmatpush.msra.mxu3 %v3232_v14  ;;  %v4345_v13 = vld [vmem:[#allocation21_spill] sm:$0xff]  ;;  %v4346_v14 = vld [vmem:[#allocation18_spill] sm:$0xff] }
 0x429   :  { %1700 = vmatpush.msrb.mxu0 %v3238_v59  ;;  %1720 = vmatpush.msrb.mxu1 %v3244_v29  ;;  %v4347_v59 = vld [vmem:[#allocation12_spill] sm:$0xff]  ;;  %v4348_v29 = vld [vmem:[#allocation13_spill] sm:$0xff] }
 0x42a   :  { %1740 = vmatpush.msra.mxu2 %v3250_v58  ;;  %1760 = vmatpush.msra.mxu3 %v3256_v10  ;;  %v4349_v58 = vld [vmem:[#allocation25_spill] sm:$0xff]  ;;  %v4350_v10 = vld [vmem:[#allocation22_spill] sm:$0xff] }
 0x42b   :  { %1701 = vmatpush.msrb.mxu0 %v3262_v5  ;;  %1721 = vmatpush.msrb.mxu1 %v3268_v7  ;;  %v4351_v5 = vld [vmem:[#allocation14_spill] sm:$0xff]  ;;  %v4352_v7 = vld [vmem:[#allocation15_spill] sm:$0xff] }
 0x42c   :  { %1741 = vmatpush.msra.mxu2 %v3274_v21  ;;  %1761 = vmatpush.msra.mxu3 %v3280_v15  ;;  %v4353_v21 = vld [vmem:[#allocation29_spill] sm:$0xff]  ;;  %v4354_v15 = vld [vmem:[#allocation26_spill] sm:$0xff] }
 0x42d   :  { %1702 = vmatpush.msrb.mxu0 %v3286_v16  ;;  %1722 = vmatpush.msrb.mxu1 %v3292_v18  ;;  %v4355_v16 = vld [vmem:[#allocation16_spill] sm:$0xff]  ;;  %v4356_v18 = vld [vmem:[#allocation17_spill] sm:$0xff] }
 0x42e   :  { %1742 = vmatpush.msra.mxu2 %v3298_v19  ;;  %1762 = vmatpush.msra.mxu3 %v3304_v20  ;;  %v4357_v19 = vld [vmem:[#allocation35_spill] sm:$0xff]  ;;  %v4358_v20 = vld [vmem:[#allocation30_spill] sm:$0xff] }
 0x42f   :  { %1703 = vmatpush.msrb.mxu0 %v3310_v22  ;;  %1723 = vmatpush.msrb.mxu1 %v3316_v23  ;;  %v4359_v22 = vld [vmem:[#allocation19_spill] sm:$0xff]  ;;  %v4360_v23 = vld [vmem:[#allocation20_spill] sm:$0xff] }
 0x430   :  { %1743 = vmatpush.msra.mxu2 %v3322_v24  ;;  %1763 = vmatpush.msra.mxu3 %v3328_v26  ;;  %v4361_v24 = vld [vmem:[#allocation37_spill] sm:$0xff]  ;;  %v4362_v26 = vld [vmem:[#allocation36_spill] sm:$0xff] }
 0x431   :  { %1704 = vmatpush.msrb.mxu0 %v3334_v27  ;;  %1724 = vmatpush.msrb.mxu1 %v3340_v28  ;;  %v4363_v27 = vld [vmem:[#allocation23_spill] sm:$0xff]  ;;  %v4364_v28 = vld [vmem:[#allocation24_spill] sm:$0xff] }
 0x432   :  { %1744 = vmatpush.msra.mxu2 %v3346_v30  ;;  %1764 = vmatpush.msra.mxu3 %v3352_v31  ;;  %v4365_v30 = vld [vmem:[#allocation39_spill] sm:$0xff]  ;;  %v4366_v31 = vld [vmem:[#allocation38_spill] sm:$0xff] }
 0x433   :  { %1705 = vmatpush.msrb.mxu0 %v3358_v32  ;;  %1725 = vmatpush.msrb.mxu1 %v3364_v33  ;;  %v4367_v32 = vld [vmem:[#allocation27_spill] sm:$0xff]  ;;  %v4368_v33 = vld [vmem:[#allocation28_spill] sm:$0xff] }
 0x434   :  { %1745 = vmatpush.msra.mxu2 %v3370_v34  ;;  %1765 = vmatpush.msra.mxu3 %v3376_v35  ;;  %v4369_v34 = vld [vmem:[#allocation41_spill] sm:$0xff]  ;;  %v4370_v35 = vld [vmem:[#allocation40_spill] sm:$0xff] }
 0x435   :  { %1706 = vmatpush.msrb.mxu0 %v3382_v36  ;;  %1726 = vmatpush.msrb.mxu1 %v3388_v37 }
 0x436   :  { %1746 = vmatpush.msra.mxu2 %v3394_v38  ;;  %1766 = vmatpush.msra.mxu3 %v3400_v39 }
 0x437   :  { %1707 = vmatpush.msrb.mxu0 %v3406_v40  ;;  %1727 = vmatpush.msrb.mxu1 %v3412_v41 }
 0x438   :  { %1747 = vmatpush.msra.mxu2 %v3418_v42  ;;  %1767 = vmatpush.msra.mxu3 %v4282_v17 }
 0x439   :  { %1708 = vmatpush.msrb.mxu0 %v4343_v12  ;;  %1728 = vmatpush.msrb.mxu1 %v4344_v2 }
 0x43a   :  { %1748 = vmatpush.msra.mxu2 %v4345_v13  ;;  %1768 = vmatpush.msra.mxu3 %v4346_v14 }
 0x43b   :  { %1709 = vmatpush.msrb.mxu0 %v4347_v59  ;;  %1729 = vmatpush.msrb.mxu1 %v4348_v29 }
 0x43c   :  { %1749 = vmatpush.msra.mxu2 %v4349_v58  ;;  %1769 = vmatpush.msra.mxu3 %v4350_v10 }
 0x43d   :  { %1710 = vmatpush.msrb.mxu0 %v4351_v5  ;;  %1730 = vmatpush.msrb.mxu1 %v4352_v7 }
 0x43e   :  { %1750 = vmatpush.msra.mxu2 %v4353_v21  ;;  %1770 = vmatpush.msra.mxu3 %v4354_v15 }
 0x43f   :  { %1711 = vmatpush.msrb.mxu0 %v4355_v16  ;;  %1731 = vmatpush.msrb.mxu1 %v4356_v18  ;;  %v1459_v16 = vpop.permute.xlu1 %1458 }
 0x440   :  { %1751 = vmatpush.msra.mxu2 %v4357_v19  ;;  %1771 = vmatpush.msra.mxu3 %v4358_v20 }
 0x441   :  { %1712 = vmatpush.msrb.mxu0 %v4359_v22  ;;  %1732 = vmatpush.msrb.mxu1 %v4360_v23  ;;  %v1460_v22 = vperm.slane %v1459_v16, 0 }
 0x442   :  { %1752 = vmatpush.msra.mxu2 %v4361_v24  ;;  %1772 = vmatpush.msra.mxu3 %v4362_v26  ;;  %v1463_v24 = vpop.permute.xlu2 %1462 }
 0x443   :  { %1713 = vmatpush.msrb.mxu0 %v4363_v27  ;;  %1733 = vmatpush.msrb.mxu1 %v4364_v28  ;;  %vm3901_vm5 = vcmp.eq.s32.totalorder %v1460_v22, 1 }
 0x444   :  { %1753 = vmatpush.msra.mxu2 %v4365_v30  ;;  %1773 = vmatpush.msra.mxu3 %v4366_v31  ;;  %v1464_v31 = vperm.slane %v1463_v24, 0 }
 0x445   :  { %1714 = vmatpush.msrb.mxu0 %v4367_v32  ;;  %1734 = vmatpush.msrb.mxu1 %v4368_v33 }
 0x446   :  { %1754 = vmatpush.msra.mxu2 %v4369_v34  ;;  %1774 = vmatpush.msra.mxu3 %v4370_v35  ;;  %vm1466_vm6 = vcmp.eq.s32.totalorder %v1464_v31, 1  ;;  %v1665_v31 = vpop.permute.xlu0 %1664 }
 0x4a2   :  { %v1324_v36 = vpop.f32.mrf.mxu1  ;;  %v1304_v42 = vpop.f32.mrf.mxu0 }
 0x4a3   :  { %v1371_v37 = vrot.slane %v1324_v36, 7 }
 0x4a5   :  { %v1374_v17 = vsel %vm334_vm7, %v1304_v42, %v1371_v37  ;;  %v1377_v45 = vsel %vm340_vm8, %v1304_v42, %v1371_v37 }
 0x4a9   :  { %v1344_v38 = vpop.f32.mrf.mxu2  ;;  %v1364_v39 = vpop.f32.mrf.mxu3 }
 0x4aa   :  { %v1372_v40 = vrot.slane %v1344_v38, 6  ;;  %v1373_v41 = vrot.slane %v1364_v39, 5 }
 0x4ac   :  { %v1375_v63 = vsel %vm336_vm9, %v1372_v40, %v1373_v41  ;;  %v1378_v57 = vsel %vm342_vm10, %v1372_v40, %v1373_v41 }
 0x4ad   :  { %v1376_v55 = vsel %vm338_vm11, %v1374_v17, %v1375_v63  ;;  %v1379_v3 = vsel %vm344_vm12, %v1377_v45, %v1378_v57 }
 0x4ae   :  { %v1380_v0 = vrot.slane %v1379_v3, 1  ;;  %v1383_v4 = vadd.f32 %v1376_v55, %v1277_v51 }
 0x4b0   :  { %v1384_v11 = vadd.f32 %v1380_v0, %v1279_v52  ;;  %v2130_v48 = vmul.f32 -1.442695, %v1383_v4  ;;  %v1425_v25 = vrot.slane %v1383_v4, 3 }
 0x4b2   :  { %2234 = vpow2.f32 %v2130_v48  ;;  %v2131_v60 = vmul.f32 -1.442695, %v1384_v11  ;;  %v1426_v9 = vrot.slane %v1384_v11, 3 }
 0x4b4   :  { %2236 = vpow2.f32 %v2131_v60 }
 0x4b8   :  { %v2235_v50 = vpop.eup %2234 }
 0x4b9   :  { %v1391_v43 = vadd.f32 1.0, %v2235_v50 }
 0x4ba   :  { %v2237_v1 = vpop.eup %2236 }
 0x4bb   :  { %v1392_v56 = vadd.f32 1.0, %v2237_v1  ;;  %2238 = vrcp.f32 %v1391_v43  ;;  %v1404_v46 = vand.u32 2147483648, %v1391_v43  ;;  %v1402_v2 = vand.u32 2147483647, %v1391_v43 }
 0x4bc   :  { %vm1398_vm14 = vweird.f32 %v1391_v43  ;;  %v1483_v1 = vld [vmem:[#allocation2 + $0x6] ss:$8 sm:$0xf] }
 0x4bd   :  { %2240 = vrcp.f32 %v1392_v56  ;;  %v1419_v14 = vand.u32 2147483648, %v1392_v56  ;;  %v1417_v58 = vand.u32 2147483647, %v1392_v56  ;;  %v1405_v10 = vor.u32 1.1754944e-38, %v1404_v46 }
 0x4be   :  { %2242 = vtanh.f32 %v1425_v25  ;;  %vm1403_vm1 = vcmp.eq.f32.partialorder %v1402_v2, 8.507059e+37  ;;  %vm1413_vm2 = vweird.f32 %v1392_v56  ;;  %v1485_v25 = vld [vmem:[#allocation2 + $0x26] ss:$8 sm:$0xf] }
 0x4bf   :  { %2244 = vtanh.f32 %v1426_v9  ;;  %v1420_v15 = vor.u32 1.1754944e-38, %v1419_v14  ;;  %vm1418_vm4 = vcmp.eq.f32.partialorder %v1417_v58, 8.507059e+37 }
 0x4c1   :  { %v2239_v47 = vpop.eup %2238 }
 0x4c2   :  { %v1394_v54 = vmul.f32 %v2239_v47, %v1391_v43  ;;  %vm1399_vm13 = vweird.f32 %v2239_v47 }
 0x4c3   :  { %v2241_v8 = vpop.eup %2240  ;;  %vm1400_vm0 = vmor %vm1398_vm14, %vm1399_vm13 }
 0x4c4   :  { %v1395_v44 = vsub.f32 1.0, %v1394_v54  ;;  %v1409_v49 = vmul.f32 %v2241_v8, %v1392_v56  ;;  %vm1414_vm15 = vweird.f32 %v2241_v8  ;;  %v2243_v20 = vpop.eup %2242 }
 0x4c5   :  { %vm1415_vm3 = vmor %vm1413_vm2, %vm1414_vm15  ;;  %v2245_v30 = vpop.eup %2244 }
 0x4c6   :  { %v1396_v12 = vmul.f32 %v2239_v47, %v1395_v44  ;;  %v1410_v13 = vsub.f32 1.0, %v1409_v49 }
 0x4c8   :  { %v1397_v59 = vadd.f32 %v2239_v47, %v1396_v12  ;;  %v1411_v29 = vmul.f32 %v2241_v8, %v1410_v13 }
 0x4ca   :  { %v1401_v5 = vsel %vm1400_vm0, %v2239_v47, %v1397_v59  ;;  %v1412_v7 = vadd.f32 %v2241_v8, %v1411_v29 }
 0x4cb   :  { %v1406_v21 = vsel %vm1403_vm1, %v1405_v10, %v1401_v5 }
 0x4cc   :  { %v1416_v18 = vsel %vm1415_vm3, %v2241_v8, %v1412_v7  ;;  %v1433_v19 = vrot.slane %v1406_v21, 1  ;;  %v1439_v28 = vmul.f32 %v2243_v20, %v1406_v21  ;;  %v1445_v39 = vrot.slane %v1406_v21, 2 }
 0x4cd   :  { %v1421_v23 = vsel %vm1418_vm4, %v1420_v15, %v1416_v18 }
 0x4ce   :  { %v1434_v26 = vrot.slane %v1421_v23, 1  ;;  %v1437_v27 = vmul.f32 %v1433_v19, %v3812_v61  ;;  %v1440_v33 = vmul.f32 %v2245_v30, %v1421_v23  ;;  %v1446_v41 = vrot.slane %v1421_v23, 2 }
 0x4d0   :  { %v1438_v32 = vmul.f32 %v1434_v26, %v3815_v53  ;;  %v1441_v34 = vadd.f32 %v1439_v28, %v1437_v27 }
 0x4d2   :  { %v1442_v36 = vadd.f32 %v1440_v33, %v1438_v32  ;;  %2246 = vtanh.f32 %v1441_v34  ;;  %v3908_v37 = vsel %vm3901_vm5, %v1441_v34, %v3812_v61  ;;  %v1669_v32 = vpop.permute.xlu1 %1668 }
 0x4d4   :  { %2248 = vtanh.f32 %v1442_v36  ;;  %v3911_v38 = vsel %vm1466_vm6, %v1442_v36, %v3815_v53  ;;  %v1666_v36 = vperm.slane %v1665_v31, 0 }
 0x4d8   :  { %v2247_v40 = vpop.eup %2246 }
 0x4d9   :  { %v1449_v42 = vmul.f32 %v2247_v40, %v1445_v39 }
 0x4da   :  { %v2249_v17 = vpop.eup %2248 }
 0x4db   :  { %v1450_v45 = vmul.f32 %v2249_v17, %v1446_v41  ;;  %v1471_v63 = vsel %vm3901_vm5, %v1449_v42, 0.0  ;;  %v3918_v61 = vsel %vm3901_vm5, %v1449_v42, %v3822_v6  ;;  %vm3933_vm5 = vcmp.eq.s32.totalorder %v1666_v36, 1 }
 0x4dc   :  { %1475 = vst [vmem:[#allocation1] ss:$9 sm:$0xff] %v1471_v63 }
 0x4dd   :  { %v1472_v57 = vsel %vm1466_vm6, %v1450_v45, 0.0  ;;  %v3921_v53 = vsel %vm1466_vm6, %v1450_v45, %v3825_v62  ;;  %v1670_v45 = vperm.slane %v1669_v32, 0  ;;  %v1931_v32 = vld [vmem:[%s4063_s6 + $0x68] sm:$0xff] }
 0x4de   :  { %1477 = vst [vmem:[#allocation1 + $0x1] ss:$9 sm:$0xff] %v1472_v57 }
 0x4df   :  { %vm1672_vm6 = vcmp.eq.s32.totalorder %v1670_v45, 1  ;;  %v1929_v45 = vld [vmem:[%s4063_s6 + $0x58] sm:$0xff] }
 0x4e5   :  { %v1478_v51 = vld [vmem:[#allocation1] sm:$0xff] }
 0x4e6   :  { %1488 = vst [vmem:[#allocation1] ss:$9 sm:$0xff] %v3918_v61 }
 0x4e7   :  { %1490 = vst [vmem:[#allocation1 + $0x1] ss:$9 sm:$0xff] %v3921_v53 }
 0x4e8   :  { %1481 = vst [vmem:[#allocation3 + $0xa] sm:$0x3] %v1478_v51 }
 0x4ee   :  { %v1491_v55 = vld [vmem:[#allocation1] sm:$0xff] }
 0x4ef   :  { %1509 = vmatmul.f32.vlgmr.msra.gmra.mxu0 %v1491_v55  ;;  %1529 = vmatmul.f32.vlgmr.msra.gmra.mxu1 %v1491_v55 }
 0x4f0   :  { %1549 = vmatmul.f32.vlgmr.msrb.gmra.mxu2 %v1491_v55  ;;  %1569 = vmatmul.f32.vlgmr.msrb.gmra.mxu3 %v1491_v55 }
 0x56c   :  { %v1530_v3 = vpop.f32.mrf.mxu1  ;;  %v1510_v48 = vpop.f32.mrf.mxu0 }
 0x56d   :  { %v1577_v0 = vrot.slane %v1530_v3, 7 }
 0x56f   :  { %v1580_v62 = vsel %vm334_vm7, %v1510_v48, %v1577_v0  ;;  %v1583_v60 = vsel %vm340_vm8, %v1510_v48, %v1577_v0 }
 0x573   :  { %v1550_v4 = vpop.f32.mrf.mxu2  ;;  %v1570_v52 = vpop.f32.mrf.mxu3 }
 0x574   :  { %v1578_v6 = vrot.slane %v1550_v4, 6  ;;  %v1579_v11 = vrot.slane %v1570_v52, 5 }
 0x576   :  { %v1581_v50 = vsel %vm336_vm9, %v1578_v6, %v1579_v11  ;;  %v1584_v43 = vsel %vm342_vm10, %v1578_v6, %v1579_v11 }
 0x577   :  { %v1582_v56 = vsel %vm338_vm11, %v1580_v62, %v1581_v50  ;;  %v1585_v47 = vsel %vm344_vm12, %v1583_v60, %v1584_v43 }
 0x578   :  { %v1586_v54 = vrot.slane %v1585_v47, 1  ;;  %v1589_v8 = vadd.f32 %v1582_v56, %v1483_v1 }
 0x57a   :  { %v1590_v44 = vadd.f32 %v1586_v54, %v1485_v25  ;;  %v2134_v49 = vmul.f32 -1.442695, %v1589_v8  ;;  %v1631_v58 = vrot.slane %v1589_v8, 3 }
 0x57c   :  { %2250 = vpow2.f32 %v2134_v49  ;;  %v2135_v46 = vmul.f32 -1.442695, %v1590_v44  ;;  %v1632_v21 = vrot.slane %v1590_v44, 3 }
 0x57e   :  { %2252 = vpow2.f32 %v2135_v46 }
 0x582   :  { %v2251_v9 = vpop.eup %2250 }
 0x583   :  { %v1597_v12 = vadd.f32 1.0, %v2251_v9 }
 0x584   :  { %v2253_v2 = vpop.eup %2252 }
 0x585   :  { %v1598_v13 = vadd.f32 1.0, %v2253_v2  ;;  %2254 = vrcp.f32 %v1597_v12  ;;  %v1610_v7 = vand.u32 2147483648, %v1597_v12  ;;  %v1608_v16 = vand.u32 2147483647, %v1597_v12 }
 0x586   :  { %vm1604_vm14 = vweird.f32 %v1597_v12  ;;  %v1689_v2 = vld [vmem:[#allocation2 + $0x7] ss:$8 sm:$0xf] }
 0x587   :  { %2256 = vrcp.f32 %v1598_v13  ;;  %v1625_v19 = vand.u32 2147483648, %v1598_v13  ;;  %v1623_v23 = vand.u32 2147483647, %v1598_v13  ;;  %v1611_v24 = vor.u32 1.1754944e-38, %v1610_v7 }
 0x588   :  { %2258 = vtanh.f32 %v1631_v58  ;;  %vm1609_vm1 = vcmp.eq.f32.partialorder %v1608_v16, 8.507059e+37  ;;  %vm1619_vm2 = vweird.f32 %v1598_v13  ;;  %v1691_v58 = vld [vmem:[#allocation2 + $0x27] ss:$8 sm:$0xf] }
 0x589   :  { %2260 = vtanh.f32 %v1632_v21  ;;  %v1626_v30 = vor.u32 1.1754944e-38, %v1625_v19  ;;  %vm1624_vm4 = vcmp.eq.f32.partialorder %v1623_v23, 8.507059e+37 }
 0x58b   :  { %v2255_v14 = vpop.eup %2254 }
 0x58c   :  { %v1600_v59 = vmul.f32 %v2255_v14, %v1597_v12  ;;  %vm1605_vm13 = vweird.f32 %v2255_v14 }
 0x58d   :  { %v2257_v29 = vpop.eup %2256  ;;  %vm1606_vm0 = vmor %vm1604_vm14, %vm1605_vm13 }
 0x58e   :  { %v1601_v10 = vsub.f32 1.0, %v1600_v59  ;;  %v1615_v5 = vmul.f32 %v2257_v29, %v1598_v13  ;;  %vm1620_vm15 = vweird.f32 %v2257_v29  ;;  %v2259_v35 = vpop.eup %2258 }
 0x58f   :  { %vm1621_vm3 = vmor %vm1619_vm2, %vm1620_vm15  ;;  %v2261_v17 = vpop.eup %2260 }
 0x590   :  { %v1602_v15 = vmul.f32 %v2255_v14, %v1601_v10  ;;  %v1616_v18 = vsub.f32 1.0, %v1615_v5 }
 0x592   :  { %v1603_v20 = vadd.f32 %v2255_v14, %v1602_v15  ;;  %v1617_v22 = vmul.f32 %v2257_v29, %v1616_v18 }
 0x594   :  { %v1607_v26 = vsel %vm1606_vm0, %v2255_v14, %v1603_v20  ;;  %v1618_v27 = vadd.f32 %v2257_v29, %v1617_v22  ;;  %v1933_v20 = vld [vmem:[%s4063_s6 + $0x78] sm:$0xff] }
 0x595   :  { %v1612_v28 = vsel %vm1609_vm1, %v1611_v24, %v1607_v26  ;;  %1961 = vmatpush.msra.mxu0 %v1933_v20  ;;  %v1932_v26 = vld [vmem:[%s4063_s6 + $0x70] sm:$0xff]  ;;  %v1918_v20 = vld [vmem:[%s4063_s6] sm:$0xff]  ;;  %vm2011_vm1 = vcmask 1047556  }
 0x596   :  { %v1622_v33 = vsel %vm1621_vm3, %v2257_v29, %v1618_v27  ;;  %v1639_v34 = vrot.slane %v1612_v28, 1  ;;  %v1645_v42 = vmul.f32 %v2259_v35, %v1612_v28  ;;  %v1651_v52 = vrot.slane %v1612_v28, 2 }
 0x597   :  { %v1627_v39 = vsel %vm1624_vm4, %v1626_v30, %v1622_v33  ;;  %1962 = vmatpush.msra.mxu0 %v1932_v26 }
 0x598   :  { %v1640_v40 = vrot.slane %v1627_v39, 1  ;;  %v1643_v41 = vmul.f32 %v1639_v34, %v3908_v37  ;;  %v1646_v57 = vmul.f32 %v2261_v17, %v1627_v39  ;;  %v1652_v11 = vrot.slane %v1627_v39, 2  ;;  %v1930_v39 = vld [vmem:[%s4063_s6 + $0x60] sm:$0xff] }
 0x599   :  { %1963 = vmatpush.msra.mxu0 %v1931_v32 }
 0x59a   :  { %v1644_v63 = vmul.f32 %v1640_v40, %v3911_v38  ;;  %v1647_v51 = vadd.f32 %v1645_v42, %v1643_v41 }
 0x59b   :  { %1964 = vmatpush.msra.mxu0 %v1930_v39 }
 0x59c   :  { %v1648_v3 = vadd.f32 %v1646_v57, %v1644_v63  ;;  %2262 = vtanh.f32 %v1647_v51  ;;  %v3940_v0 = vsel %vm3933_vm5, %v1647_v51, %v3908_v37 }
 0x59d   :  { %1965 = vmatpush.msra.mxu0 %v1929_v45 }
 0x59e   :  { %2264 = vtanh.f32 %v1648_v3  ;;  %v3943_v4 = vsel %vm1672_vm6, %v1648_v3, %v3911_v38  ;;  %v1928_v3 = vld [vmem:[%s4063_s6 + $0x50] sm:$0xff] }
 0x59f   :  { %1966 = vmatpush.msra.mxu0 %v1928_v3 }
 0x5a2   :  { %v2263_v6 = vpop.eup %2262 }
 0x5a3   :  { %v1655_v48 = vmul.f32 %v2263_v6, %v1651_v52 }
 0x5a4   :  { %v2265_v62 = vpop.eup %2264 }
 0x5a5   :  { %v1656_v60 = vmul.f32 %v2265_v62, %v1652_v11  ;;  %v1677_v50 = vsel %vm3933_vm5, %v1655_v48, 0.0  ;;  %v3950_v37 = vsel %vm3933_vm5, %v1655_v48, %v3918_v61  ;;  %v1927_v62 = vld [vmem:[%s4063_s6 + $0x48] sm:$0xff] }
 0x5a6   :  { %1681 = vst [vmem:[#allocation1] ss:$9 sm:$0xff] %v1677_v50  ;;  %1967 = vmatpush.msra.mxu0 %v1927_v62 }
 0x5a7   :  { %v1678_v43 = vsel %vm1672_vm6, %v1656_v60, 0.0  ;;  %v3953_v38 = vsel %vm1672_vm6, %v1656_v60, %v3921_v53 }
 0x5a8   :  { %1683 = vst [vmem:[#allocation1 + $0x1] ss:$9 sm:$0xff] %v1678_v43 }
 0x5af   :  { %v1684_v1 = vld [vmem:[#allocation1] sm:$0xff] }
 0x5b0   :  { %1694 = vst [vmem:[#allocation1] ss:$9 sm:$0xff] %v3950_v37 }
 0x5b1   :  { %1696 = vst [vmem:[#allocation1 + $0x1] ss:$9 sm:$0xff] %v3953_v38 }
 0x5b2   :  { %1687 = vst [vmem:[#allocation3 + $0xc] sm:$0x3] %v1684_v1 }
 0x5b8   :  { %v1697_v56 = vld [vmem:[#allocation1] sm:$0xff] }
 0x5b9   :  { %1715 = vmatmul.f32.vlgmr.msrb.gmra.mxu0 %v1697_v56  ;;  %1735 = vmatmul.f32.vlgmr.msrb.gmra.mxu1 %v1697_v56 }
 0x5ba   :  { %1755 = vmatmul.f32.vlgmr.msra.gmra.mxu2 %v1697_v56  ;;  %1775 = vmatmul.f32.vlgmr.msra.gmra.mxu3 %v1697_v56  ;;  %v1926_v56 = vld [vmem:[%s4063_s6 + $0x40] sm:$0xff] }
 0x5bb   :  { %1968 = vmatpush.msra.mxu0 %v1926_v56 }
 0x636   :  { %v1736_v47 = vpop.f32.mrf.mxu1  ;;  %v1716_v49 = vpop.f32.mrf.mxu0 }
 0x637   :  { %v1783_v54 = vrot.slane %v1736_v47, 7 }
 0x639   :  { %v1786_v53 = vsel %vm334_vm7, %v1716_v49, %v1783_v54  ;;  %v1789_v46 = vsel %vm340_vm8, %v1716_v49, %v1783_v54  ;;  %v1924_v49 = vld [vmem:[%s4063_s6 + $0x30] sm:$0xff] }
 0x63d   :  { %v1756_v8 = vpop.f32.mrf.mxu2  ;;  %v1776_v25 = vpop.f32.mrf.mxu3 }
 0x63e   :  { %v1784_v61 = vrot.slane %v1756_v8, 6  ;;  %v1785_v44 = vrot.slane %v1776_v25, 5  ;;  %v1925_v25 = vld [vmem:[%s4063_s6 + $0x38] sm:$0xff] }
 0x63f   :  { %1969 = vmatpush.msra.mxu0 %v1925_v25 }
 0x640   :  { %v1787_v9 = vsel %vm336_vm9, %v1784_v61, %v1785_v44  ;;  %v1790_v12 = vsel %vm342_vm10, %v1784_v61, %v1785_v44  ;;  %v1871_v44 = vpop.permute.xlu2 %1870 }
 0x641   :  { %v1788_v13 = vsel %vm338_vm11, %v1786_v53, %v1787_v9  ;;  %v1791_v14 = vsel %vm344_vm12, %v1789_v46, %v1790_v12  ;;  %1970 = vmatpush.msra.mxu0 %v1924_v49  ;;  %v1875_v53 = vpop.permute.xlu0 %1874  ;;  %v1923_v46 = vld [vmem:[%s4063_s6 + $0x28] sm:$0xff]  ;;  %v1872_v9 = vperm.slane %v1871_v44, 0 }
 0x642   :  { %v1792_v59 = vrot.slane %v1791_v14, 1  ;;  %v1795_v29 = vadd.f32 %v1788_v13, %v1689_v2  ;;  %v1922_v2 = vld [vmem:[%s4063_s6 + $0x20] sm:$0xff]  ;;  %v1876_v14 = vperm.slane %v1875_v53, 0 }
 0x643   :  { %1971 = vmatpush.msra.mxu0 %v1923_v46  ;;  %vm4007_vm15 = vcmp.eq.s32.totalorder %v1872_v9, 1 }
 0x644   :  { %v1796_v10 = vadd.f32 %v1792_v59, %v1691_v58  ;;  %v2138_v5 = vmul.f32 -1.442695, %v1795_v29  ;;  %v1837_v24 = vrot.slane %v1795_v29, 3  ;;  %v1921_v58 = vld [vmem:[%s4063_s6 + $0x18] sm:$0xff]  ;;  %vm4016_vm0 = vcmp.eq.s32.totalorder %v1876_v14, 1 }
 0x645   :  { %1972 = vmatpush.msra.mxu0 %v1922_v2 }
 0x646   :  { %2266 = vpow2.f32 %v2138_v5  ;;  %v2139_v7 = vmul.f32 -1.442695, %v1796_v10  ;;  %v1838_v31 = vrot.slane %v1796_v10, 3  ;;  %v1920_v10 = vld [vmem:[%s4063_s6 + $0x10] sm:$0xff] }
 0x647   :  { %1973 = vmatpush.msra.mxu0 %v1921_v58 }
 0x648   :  { %2268 = vpow2.f32 %v2139_v7 }
 0x649   :  { %1974 = vmatpush.msra.mxu0 %v1920_v10 }
 0x64c   :  { %v2267_v21 = vpop.eup %2266 }
 0x64d   :  { %v1803_v15 = vadd.f32 1.0, %v2267_v21 }
 0x64e   :  { %v2269_v16 = vpop.eup %2268 }
 0x64f   :  { %v1804_v18 = vadd.f32 1.0, %v2269_v16  ;;  %2270 = vrcp.f32 %v1803_v15  ;;  %v1816_v30 = vand.u32 2147483648, %v1803_v15  ;;  %v1814_v34 = vand.u32 2147483647, %v1803_v15  ;;  %v1919_v16 = vld [vmem:[%s4063_s6 + $0x8] sm:$0xff] }
 0x650   :  { %vm1810_vm8 = vweird.f32 %v1803_v15  ;;  %1975 = vmatpush.msra.mxu0 %v1919_v16 }
 0x651   :  { %2272 = vrcp.f32 %v1804_v18  ;;  %v1831_v36 = vand.u32 2147483648, %v1804_v18  ;;  %v1829_v42 = vand.u32 2147483647, %v1804_v18  ;;  %v1817_v17 = vor.u32 1.1754944e-38, %v1816_v30  ;;  %v1915_v30 = vld [vmem:[#allocation3 + $0xa] sm:$0x3] }
 0x652   :  { %2274 = vtanh.f32 %v1837_v24  ;;  %vm1815_vm11 = vcmp.eq.f32.partialorder %v1814_v34, 8.507059e+37  ;;  %vm1825_vm12 = vweird.f32 %v1804_v18  ;;  %1976 = vmatpush.msra.mxu0 %v1918_v20  ;;  %v1911_v34 = vld [vmem:[#allocation3 + $0x2] sm:$0x3] }
 0x653   :  { %2276 = vtanh.f32 %v1838_v31  ;;  %v1832_v55 = vor.u32 1.1754944e-38, %v1831_v36  ;;  %vm1830_vm14 = vcmp.eq.f32.partialorder %v1829_v42, 8.507059e+37 }
 0x655   :  { %v2271_v19 = vpop.eup %2270 }
 0x656   :  { %v1806_v22 = vmul.f32 %v2271_v19, %v1803_v15  ;;  %vm1811_vm7 = vweird.f32 %v2271_v19 }
 0x657   :  { %v2273_v23 = vpop.eup %2272  ;;  %vm1812_vm10 = vmor %vm1810_vm8, %vm1811_vm7 }
 0x658   :  { %v1807_v27 = vsub.f32 1.0, %v1806_v22  ;;  %v1821_v28 = vmul.f32 %v2273_v23, %v1804_v18  ;;  %vm1826_vm9 = vweird.f32 %v2273_v23  ;;  %v2275_v11 = vpop.eup %2274 }
 0x659   :  { %vm1827_vm13 = vmor %vm1825_vm12, %vm1826_vm9  ;;  %v2277_v1 = vpop.eup %2276 }
 0x65a   :  { %v1808_v33 = vmul.f32 %v2271_v19, %v1807_v27  ;;  %v1822_v35 = vsub.f32 1.0, %v1821_v28 }
 0x65c   :  { %v1809_v40 = vadd.f32 %v2271_v19, %v1808_v33  ;;  %v1823_v41 = vmul.f32 %v2273_v23, %v1822_v35  ;;  %v1910_v33 = vld [vmem:[#allocation3] sm:$0x3]  ;;  %v1913_v35 = vld [vmem:[#allocation3 + $0x6] sm:$0x3] }
 0x65e   :  { %v1813_v63 = vsel %vm1812_vm10, %v2271_v19, %v1809_v40  ;;  %v1824_v57 = vadd.f32 %v2273_v23, %v1823_v41  ;;  %v2375_v40 = vmov 1934713408  }
 0x65f   :  { %v1818_v51 = vsel %vm1815_vm11, %v1817_v17, %v1813_v63  ;;  %v2014_v41 = vunpack.c.l.s4 %v2375_v40  ;;  %v2153_v63 = vld [vmem:[%s4064_s7] ss:$0 sm:$0xff] }
 0x660   :  { %v1828_v52 = vsel %vm1827_vm13, %v2273_v23, %v1824_v57  ;;  %v1845_v6 = vrot.slane %v1818_v51, 1  ;;  %v1851_v43 = vmul.f32 %v2275_v11, %v1818_v51  ;;  %v1857_v12 = vrot.slane %v1818_v51, 2 }
 0x661   :  { %v1833_v48 = vsel %vm1830_vm14, %v1832_v55, %v1828_v52  ;;  %v2015_v55 = vunpack.c.0.s8 %v2014_v41 }
 0x662   :  { %v1846_v60 = vrot.slane %v1833_v48, 1  ;;  %v1849_v50 = vmul.f32 %v1845_v6, %v3940_v0  ;;  %v1852_v54 = vmul.f32 %v2277_v1, %v1833_v48  ;;  %v1858_v59 = vrot.slane %v1833_v48, 2 }
 0x664   :  { %v1850_v47 = vmul.f32 %v1846_v60, %v3943_v4  ;;  %v1853_v8 = vadd.f32 %v1851_v43, %v1849_v50 }
 0x666   :  { %v1854_v61 = vadd.f32 %v1852_v54, %v1850_v47  ;;  %2278 = vtanh.f32 %v1853_v8  ;;  %v1881_v27 = vsel %vm4007_vm15, %v1853_v8, %v3940_v0  ;;  %v1912_v0 = vld [vmem:[#allocation3 + $0x4] sm:$0x3] }
 0x668   :  { %2280 = vtanh.f32 %v1854_v61  ;;  %v1882_v28 = vsel %vm4016_vm0, %v1854_v61, %v3943_v4 }
 0x66c   :  { %v2279_v13 = vpop.eup %2278 }
 0x66d   :  { %v1861_v29 = vmul.f32 %v2279_v13, %v1857_v12 }
 0x66e   :  { %v2281_v5 = vpop.eup %2280 }
 0x66f   :  { %v1862_v21 = vmul.f32 %v2281_v5, %v1858_v59  ;;  %v1883_v15 = vsel %vm4007_vm15, %v1861_v29, 0.0  ;;  %v1879_v22 = vsel %vm4007_vm15, %v1861_v29, %v3950_v37  ;;  %v1914_v37 = vld [vmem:[#allocation3 + $0x8] sm:$0x3] }
 0x670   :  { %1887 = vst [vmem:[#allocation1] ss:$9 sm:$0xff] %v1883_v15 }
 0x671   :  { %v1884_v19 = vsel %vm4016_vm0, %v1862_v21, 0.0  ;;  %v1880_v24 = vsel %vm4016_vm0, %v1862_v21, %v3953_v38  ;;  %v1916_v38 = vld [vmem:[#allocation3 + $0xc] sm:$0x3] }
 0x672   :  { %1889 = vst [vmem:[#allocation1 + $0x1] ss:$9 sm:$0xff] %v1884_v19 }
 0x679   :  { %v1890_v23 = vld [vmem:[#allocation1] sm:$0xff] }
 0x67a   :  { %1896 = vst [vmem:[#allocation1] ss:$9 sm:$0xff] %v1879_v22 }
 0x67b   :  { %1898 = vst [vmem:[#allocation1 + $0x1] ss:$9 sm:$0xff] %v1880_v24 }
 0x67c   :  { %1893 = vst [vmem:[#allocation3 + $0xe] sm:$0x3] %v1890_v23 }
 0x682   :  { %v1899_v26 = vld [vmem:[#allocation1] sm:$0xff] }
 0x683   :  { %1901 = vst [vmem:[#allocation4] sm:$0x3] %v1899_v26  ;;  %v1917_v31 = vld [vmem:[#allocation3 + $0xe] sm:$0x3] }
 0x684   :  { %1904 = vst [vmem:[#allocation1] ss:$9 sm:$0xff] %v1881_v27 }
 0x685   :  { %1906 = vst [vmem:[#allocation1 + $0x1] ss:$9 sm:$0xff] %v1882_v28 }
 0x686   :  { %1950 = vst [vmem:[#allocation1 + $0x20] ss:$4 sm:$0xff] %v1914_v37 }
 0x687   :  { %1952 = vst [vmem:[#allocation1 + $0x21] ss:$4 sm:$0xff] %v1915_v30 }
 0x688   :  { %1954 = vst [vmem:[#allocation1 + $0x22] ss:$4 sm:$0xff] %v1916_v38 }
 0x689   :  { %1956 = vst [vmem:[#allocation1 + $0x23] ss:$4 sm:$0xff] %v1917_v31 }
 0x68c   :  { %v1907_v32 = vld [vmem:[#allocation1] sm:$0xff] }
 0x68d   :  { %1909 = vst [vmem:[#allocation5] sm:$0x3] %v1907_v32 }
 0x68e   :  { %1942 = vst [vmem:[#allocation1] ss:$4 sm:$0xff] %v1910_v33 }
 0x68f   :  { %1944 = vst [vmem:[#allocation1 + $0x1] ss:$4 sm:$0xff] %v1911_v34 }
 0x690   :  { %1946 = vst [vmem:[#allocation1 + $0x2] ss:$4 sm:$0xff] %v1912_v0  ;;  %v1958_v36 = vld.sshfl [vmem:[#allocation1 + $0x20] sm:$0xff pattern:$0x73625140] }
 0x691   :  { %1948 = vst [vmem:[#allocation1 + $0x3] ss:$4 sm:$0xff] %v1913_v35 }
 0x698   :  { %v1957_v4 = vld.sshfl [vmem:[#allocation1] sm:$0xff pattern:$0x73625140] }
 0x699   :  { %1977 = vmatmul.f32.vlgmr.msra.gmra.mxu0 %v1957_v4 }
 0x6a1   :  { %1980 = vmatmul.f32.gmra.mxu0 %v1958_v36 }
 0x716   :  { %v1978_v39 = vpop.f32.mrf.mxu0 }
 0x717   :  { %v1986_v42 = vrot.slane %v1978_v39, 2  ;;  %v1987_v17 = vrot.slane %v1978_v39, 4  ;;  %v1988_v45 = vrot.slane %v1978_v39, 6  ;;  %v2002_v3 = vadd.f32 %v2153_v63, %v1978_v39 }
 0x719   :  { %v2003_v57 = vadd.f32 %v2153_v63, %v1986_v42  ;;  %v2005_v51 = vadd.f32 %v2153_v63, %v1988_v45  ;;  %v2004_v52 = vadd.f32 %v2153_v63, %v1987_v17 }
 0x71b   :  { %v2010_v6 = vrot.slane %v2003_v57, 4  ;;  %v2019_v11 = vrot.slane %v2005_v51, 4 }
 0x71d   :  { %v2012_v48 = vsel %vm2011_vm1, %v2010_v6, %v2002_v3  ;;  %v2020_v62 = vsel %vm2011_vm1, %v2019_v11, %v2004_v52 }
 0x71e   :  { %v2016_v60 = vperm.slane %v2012_v48, %v2015_v55  ;;  %v2024_v50 = vperm.slane %v2020_v62, %v2015_v55  ;;  %v1981_v43 = vpop.f32.mrf.mxu0 }
 0x71f   :  { %v1989_v1 = vrot.slane %v1981_v43, 2  ;;  %v1990_v56 = vrot.slane %v1981_v43, 4  ;;  %v1991_v47 = vrot.slane %v1981_v43, 6  ;;  %v2006_v53 = vadd.f32 %v2153_v63, %v1981_v43 }
 0x720   :  { %v2017_v54 = vrot.slane %v2016_v60, 4  ;;  %v2025_v8 = vrot.slane %v2024_v50, 4  ;;  %2051 = vst [vmem:[#allocation1] ss:$4 sm:$0xff] %v2016_v60 }
 0x721   :  { %2053 = vst [vmem:[#allocation1 + $0x1] ss:$4 sm:$0xff] %v2024_v50  ;;  %v2007_v25 = vadd.f32 %v2153_v63, %v1989_v1  ;;  %v2009_v61 = vadd.f32 %v2153_v63, %v1991_v47  ;;  %v2008_v46 = vadd.f32 %v2153_v63, %v1990_v56 }
 0x722   :  { %v2018_v44 = vsel %vm2011_vm1, 0.0, %v2017_v54  ;;  %v2026_v49 = vsel %vm2011_vm1, 0.0, %v2025_v8 }
 0x723   :  { %2060 = vst [vmem:[#allocation1 + $0x20] ss:$4 sm:$0xff] %v2018_v44  ;;  %v2027_v9 = vrot.slane %v2007_v25, 4  ;;  %v2035_v12 = vrot.slane %v2009_v61, 4 }
 0x724   :  { %2062 = vst [vmem:[#allocation1 + $0x21] ss:$4 sm:$0xff] %v2026_v49 }
 0x725   :  { %v2028_v2 = vsel %vm2011_vm1, %v2027_v9, %v2006_v53  ;;  %v2036_v13 = vsel %vm2011_vm1, %v2035_v12, %v2008_v46 }
 0x726   :  { %v2032_v14 = vperm.slane %v2028_v2, %v2015_v55  ;;  %v2040_v59 = vperm.slane %v2036_v13, %v2015_v55 }
 0x728   :  { %v2033_v29 = vrot.slane %v2032_v14, 4  ;;  %v2041_v58 = vrot.slane %v2040_v59, 4  ;;  %2055 = vst [vmem:[#allocation1 + $0x2] ss:$4 sm:$0xff] %v2032_v14 }
 0x729   :  { %2057 = vst [vmem:[#allocation1 + $0x3] ss:$4 sm:$0xff] %v2040_v59 }
 0x72a   :  { %v2034_v10 = vsel %vm2011_vm1, 0.0, %v2033_v29  ;;  %v2042_v5 = vsel %vm2011_vm1, 0.0, %v2041_v58 }
 0x72b   :  { %2064 = vst [vmem:[#allocation1 + $0x22] ss:$4 sm:$0xff] %v2034_v10 }
 0x72c   :  { %2066 = vst [vmem:[#allocation1 + $0x23] ss:$4 sm:$0xff] %v2042_v5 }
 0x730   :  { %v2058_v7 = vld.sshfl [vmem:[#allocation1] sm:$0xff pattern:$0x73625140] }
 0x731   :  { %2070 = vst [vmem:[#allocation8] sm:$0xff] %v2058_v7 }
 0x733   :  { %v2067_v21 = vld.sshfl [vmem:[#allocation1 + $0x20] sm:$0xff pattern:$0x73625140] }
 0x734   :  { %2071 = vst [vmem:[#allocation8 + $0x8] sm:$0xff] %v2067_v21 }
 0x735 PF:  { %p2143_p1 = scmp.gt.s32.totalorder %s4057_s0, 0 }
 0x737   :  { %2075 = sbr.rel (%p2143_p1) target bundleno = 1855 (0x73f), region = 41 }
 0x73c   :  { %v2346_v15 = vld [vmem:[%s4064_s7] ss:$0 sm:$0xff] }
 0x73d   :  { %2080 = vst [vmem:[#allocation8] sm:$0xff] %v2346_v15 }
 0x73e   :  { %2081 = vst [vmem:[#allocation8 + $0x8] sm:$0xff] %v2346_v15 }
 0x73f PF:  { %s2088_s19 = sshll.u32 %s4065_s8, 4  ;;  %s2376_s20 = smov [#allocation8]   ;;  %s2089_s19 = int_to_ptr.hbm [resolvable:$true] %s2088_s19 }
 0x740   :  { %s2086_s21 = sshll.u32 %s2376_s20, 4  ;;  %s2377_s22 = smov 128   ;;  %s2087_s21 = int_to_ptr.vmem [resolvable:$true] %s2086_s21 }
 0x741   :  { %s2378_s23 = smov 8  }
 0x742   :  { %2094 = dma.vmem_to_hbm [thread:$0]  %s2087_s21, 256, %s2089_s19, [#allocation9], %s2377_s22, %s2377_s22, %s2378_s23  }
 0x743   :  { %2371 = dma.done.wait [#allocation9], 256  }
 0x744   :  { %2372 = vsyncadd [#allocation9], 4294967040 }
 0x745   :  { %2099 = vsyncpa [#allocation9], 1 }

// kernel: _rnn_layers_forward.1
= control target key start
LH: loop header
LB: loop body
LE: loop exit
PB: predicated region body
PF: predicated region fallthrough
CT: control target
= control target key end

     0   :  { %14 = vsyncpa [#allocation9], 0  ;;  %v2373_v0 = vmov 0.0   ;;  %s4057_s0 = inlined_call_operand.<no memory space> [shape: s32[1], index: 0, kind: input, shape index: {}]   ;;  %s4058_s1 = inlined_call_operand.vmem [shape: f32[2,8,32], index: 1, kind: input, shape index: {}]   ;;  %s4059_s2 = inlined_call_operand.vmem [shape: s32[2,1,1], index: 2, kind: input, shape index: {}]   ;;  %s4060_s3 = inlined_call_operand.vmem [shape: f32[32,512], index: 3, kind: input, shape index: {}]   ;;  %s4061_s4 = inlined_call_operand.vmem [shape: f32[128,512], index: 4, kind: input, shape index: {}]   ;;  %s4062_s5 = inlined_call_operand.vmem [shape: f32[1,512], index: 5, kind: input, shape index: {}]   ;;  %s4063_s6 = inlined_call_operand.vmem [shape: f32[128,128], index: 6, kind: input, shape index: {}]   ;;  %s4064_s7 = inlined_call_operand.vmem [shape: f32[1,128], index: 7, kind: input, shape index: {}]   ;;  %s4065_s8 = inlined_call_operand.hbm [shape: f32[2,8,128], index: 8, kind: output, shape index: {}]  }
   0x1   :  { %34 = vst [vmem:[#allocation4] sm:$0x3] %v2373_v0  ;;  %p2101_p0 = scmp.le.s32.totalorder %s4057_s0, 0 }
   0x2   :  { %35 = vst [vmem:[#allocation5] sm:$0x3] %v2373_v0 }
   0x3   :  { %40 = sbr.rel (%p2101_p0) target bundleno = 1845 (0x735), region = 37 }
   0x8   :  { %v57_v1 = vld [vmem:[%s4060_s3 + $0x60] sm:$0xff]  ;;  %v59_v2 = vld [vmem:[%s4060_s3 + $0x70] sm:$0xff]  ;;  %v60_v3 = vld [vmem:[%s4060_s3 + $0x78] sm:$0xff]  ;;  %vm71_vm0 = vcmask 261120   ;;  %vm334_vm7 = vcmask 1040384   ;;  %vm340_vm8 = vcmask 1041409  }
   0x9   :  { %90 = vmatpush.msra.mxu1 %v57_v1  ;;  %136 = vmatpush.msra.mxu2 %v59_v2  ;;  %v53_v4 = vld [vmem:[%s4060_s3 + $0x40] sm:$0xff]  ;;  %v55_v5 = vld [vmem:[%s4060_s3 + $0x50] sm:$0xff]  ;;  %v56_v6 = vld [vmem:[%s4060_s3 + $0x58] sm:$0xff]  ;;  %vm336_vm9 = vcmask 1042434   ;;  %vm342_vm10 = vcmask 1043459   ;;  %vm338_vm11 = vcmask 1041408  }
   0xa   :  { %159 = vmatpush.msra.mxu3 %v60_v3  ;;  %v49_v7 = vld [vmem:[%s4060_s3 + $0x20] sm:$0xff]  ;;  %v51_v8 = vld [vmem:[%s4060_s3 + $0x30] sm:$0xff]  ;;  %v52_v9 = vld [vmem:[%s4060_s3 + $0x38] sm:$0xff]  ;;  %vm344_vm12 = vcmask 1042433  }
   0xb   :  { %91 = vmatpush.msra.mxu1 %v53_v4  ;;  %137 = vmatpush.msra.mxu2 %v55_v5  ;;  %v45_v10 = vld [vmem:[%s4060_s3] sm:$0xff]  ;;  %v47_v11 = vld [vmem:[%s4060_s3 + $0x10] sm:$0xff]  ;;  %v48_v13 = vld [vmem:[%s4060_s3 + $0x18] sm:$0xff] }
   0xc   :  { %160 = vmatpush.msra.mxu3 %v56_v6  ;;  %v2463_v12 = vld [vmem:[%s4058_s1] sm:$0xff]  ;;  %v58_v14 = vld [vmem:[%s4060_s3 + $0x68] sm:$0xff]  ;;  %v2474_v15 = vld [vmem:[%s4061_s4 + $0x1f0] sm:$0xff] }
   0xd   :  { %92 = vmatpush.msra.mxu1 %v49_v7  ;;  %138 = vmatpush.msra.mxu2 %v51_v8  ;;  %v2479_v16 = vld [vmem:[%s4061_s4 + $0x1f8] sm:$0xff]  ;;  %v54_v17 = vld [vmem:[%s4060_s3 + $0x48] sm:$0xff]  ;;  %v2489_v18 = vld [vmem:[%s4061_s4 + $0x1d0] sm:$0xff] }
   0xe   :  { %161 = vmatpush.msra.mxu3 %v52_v9  ;;  %v2495_v19 = vld [vmem:[%s4061_s4 + $0x1d8] sm:$0xff]  ;;  %v2500_v20 = vld [vmem:[%s4061_s4 + $0x1e0] sm:$0xff]  ;;  %v50_v21 = vld [vmem:[%s4060_s3 + $0x28] sm:$0xff] }
   0xf   :  { %93 = vmatpush.msra.mxu1 %v45_v10  ;;  %139 = vmatpush.msra.mxu2 %v47_v11  ;;  %v2509_v22 = vld [vmem:[%s4061_s4 + $0x1b0] sm:$0xff]  ;;  %v2516_v23 = vld [vmem:[%s4061_s4 + $0x1b8] sm:$0xff]  ;;  %v2521_v24 = vld [vmem:[%s4061_s4 + $0x1c0] sm:$0xff] }
  0x10   :  { %2102 = vmatmul.msk.f32.vlgmr.msra.gmra.mxu1 %vm71_vm0, %v2463_v12  ;;  %162 = vmatpush.msra.mxu3 %v48_v13  ;;  %v46_v25 = vld [vmem:[%s4060_s3 + $0x8] sm:$0xff]  ;;  %v2530_v26 = vld [vmem:[%s4061_s4 + $0x190] sm:$0xff]  ;;  %v2543_v28 = vld [vmem:[%s4061_s4 + $0x198] sm:$0xff] }
  0x11   :  { %113 = vmatpush.msrb.mxu1 %v58_v14  ;;  %287 = vmatpush.msrb.mxu2 %v2474_v15  ;;  %v2538_v27 = vld [vmem:[%s4061_s4 + $0x1e8] sm:$0xff]  ;;  %v2554_v30 = vld [vmem:[%s4061_s4 + $0x170] sm:$0xff]  ;;  %v2566_v32 = vld [vmem:[%s4061_s4 + $0x178] sm:$0xff] }
  0x12   :  { %307 = vmatpush.msrb.mxu3 %v2479_v16  ;;  %247 = vmatpush.msra.mxu0 %v2500_v20  ;;  %v2549_v29 = vld [vmem:[%s4058_s1 + $0x8] sm:$0xff]  ;;  %v2573_v33 = vld [vmem:[%s4061_s4 + $0x150] sm:$0xff]  ;;  %v2586_v35 = vld [vmem:[%s4061_s4 + $0x158] sm:$0xff] }
  0x13   :  { %114 = vmatpush.msrb.mxu1 %v54_v17  ;;  %288 = vmatpush.msrb.mxu2 %v2489_v18  ;;  %v2561_v31 = vld [vmem:[%s4061_s4 + $0x1c8] sm:$0xff]  ;;  %v2593_v36 = vld [vmem:[%s4061_s4 + $0x1a0] sm:$0xff]  ;;  %v2598_v37 = vld [vmem:[%s4061_s4 + $0x130] sm:$0xff] }
  0x14   :  { %308 = vmatpush.msrb.mxu3 %v2495_v19  ;;  %2106 = vmatmul.msk.f32.vlgmr.msra.gmra.mxu2 %vm71_vm0, %v2463_v12  ;;  %v2581_v34 = vld [vmem:[%s4061_s4 + $0x1a8] sm:$0xff]  ;;  %v2611_v39 = vld [vmem:[%s4061_s4 + $0x138] sm:$0xff]  ;;  %v2618_v40 = vld [vmem:[%s4061_s4 + $0x180] sm:$0xff] }
  0x15   :  { %115 = vmatpush.msrb.mxu1 %v50_v21  ;;  %289 = vmatpush.msrb.mxu2 %v2509_v22  ;;  %v2606_v38 = vld [vmem:[%s4061_s4 + $0x188] sm:$0xff]  ;;  %v2623_v41 = vld [vmem:[%s4061_s4 + $0x110] sm:$0xff]  ;;  %v2635_v43 = vld [vmem:[%s4061_s4 + $0x118] sm:$0xff] }
  0x16   :  { %309 = vmatpush.msrb.mxu3 %v2516_v23  ;;  %248 = vmatpush.msra.mxu0 %v2521_v24  ;;  %v2630_v42 = vld [vmem:[%s4061_s4 + $0x168] sm:$0xff]  ;;  %v2642_v44 = vld [vmem:[%s4061_s4 + $0x160] sm:$0xff]  ;;  %v2654_v46 = vld [vmem:[%s4061_s4 + $0xf0] sm:$0xff] }
  0x17   :  { %116 = vmatpush.msrb.mxu1 %v46_v25  ;;  %290 = vmatpush.msrb.mxu2 %v2530_v26  ;;  %v2649_v45 = vld [vmem:[%s4061_s4 + $0x148] sm:$0xff]  ;;  %v2661_v47 = vld [vmem:[%s4061_s4 + $0xf8] sm:$0xff]  ;;  %v2669_v48 = vld [vmem:[%s4061_s4 + $0x140] sm:$0xff] }
  0x18   :  { %310 = vmatpush.msrb.mxu3 %v2543_v28  ;;  %2103 = vmatmul.msk.f32.gmra.mxu1 %vm71_vm0, %v2549_v29  ;;  %4170 = vst [vmem:[#allocation11_spill] sm:$0xff] %v2661_v47  ;;  %v2676_v49 = vld [vmem:[%s4061_s4 + $0x128] sm:$0xff]  ;;  %v2681_v50 = vld [vmem:[%s4061_s4 + $0xd0] sm:$0xff]  ;;  %v2689_v51 = vld [vmem:[%s4061_s4 + $0xd8] sm:$0xff] }
  0x19   :  { %267 = vmatpush.msra.mxu1 %v2538_v27  ;;  %291 = vmatpush.msrb.mxu2 %v2554_v30  ;;  %4171 = vst [vmem:[#allocation12_spill] sm:$0xff] %v2681_v50  ;;  %v2694_v52 = vld [vmem:[%s4061_s4 + $0x120] sm:$0xff]  ;;  %v2702_v53 = vld [vmem:[%s4061_s4 + $0x108] sm:$0xff]  ;;  %v2707_v54 = vld [vmem:[%s4061_s4 + $0xb0] sm:$0xff] }
  0x1a   :  { %311 = vmatpush.msrb.mxu3 %v2566_v32  ;;  %249 = vmatpush.msra.mxu0 %v2593_v36  ;;  %4172 = vst [vmem:[#allocation13_spill] sm:$0xff] %v2689_v51  ;;  %v2714_v55 = vld [vmem:[%s4061_s4 + $0xb8] sm:$0xff]  ;;  %v2719_v56 = vld [vmem:[%s4061_s4 + $0x100] sm:$0xff]  ;;  %v2726_v57 = vld [vmem:[%s4061_s4 + $0xe8] sm:$0xff] }
  0x1b   :  { %268 = vmatpush.msra.mxu1 %v2561_v31  ;;  %2108 = vmatmul.msk.f32.vlgmr.msra.gmra.mxu3 %vm71_vm0, %v2463_v12  ;;  %4173 = vst [vmem:[#allocation14_spill] sm:$0xff] %v2707_v54  ;;  %v2731_v58 = vld [vmem:[%s4061_s4 + $0x90] sm:$0xff]  ;;  %v2738_v59 = vld [vmem:[%s4061_s4 + $0x98] sm:$0xff]  ;;  %v2745_v60 = vld [vmem:[%s4061_s4 + $0xe0] sm:$0xff] }
  0x1c   :  { %292 = vmatpush.msrb.mxu2 %v2573_v33  ;;  %312 = vmatpush.msrb.mxu3 %v2586_v35  ;;  %4174 = vst [vmem:[#allocation15_spill] sm:$0xff] %v2714_v55  ;;  %v2750_v61 = vld [vmem:[%s4061_s4 + $0xc8] sm:$0xff]  ;;  %v2757_v62 = vld [vmem:[%s4061_s4 + $0x70] sm:$0xff]  ;;  %v2762_v63 = vld [vmem:[%s4061_s4 + $0x78] sm:$0xff] }
  0x1d   :  { %269 = vmatpush.msra.mxu1 %v2581_v34  ;;  %250 = vmatpush.msra.mxu0 %v2618_v40  ;;  %4175 = vst [vmem:[#allocation16_spill] sm:$0xff] %v2731_v58  ;;  %v2770_v0 = vld [vmem:[%s4061_s4 + $0xc0] sm:$0xff]  ;;  %v2775_v1 = vld [vmem:[%s4061_s4 + $0xa8] sm:$0xff]  ;;  %v2782_v2 = vld [vmem:[%s4061_s4 + $0x50] sm:$0xff] }
  0x1e   :  { %293 = vmatpush.msrb.mxu2 %v2598_v37  ;;  %313 = vmatpush.msrb.mxu3 %v2611_v39  ;;  %4176 = vst [vmem:[#allocation17_spill] sm:$0xff] %v2738_v59  ;;  %v2787_v3 = vld [vmem:[%s4061_s4 + $0x58] sm:$0xff]  ;;  %v2794_v4 = vld [vmem:[%s4061_s4 + $0xa0] sm:$0xff]  ;;  %v2799_v5 = vld [vmem:[%s4061_s4 + $0x88] sm:$0xff] }
  0x1f   :  { %270 = vmatpush.msra.mxu1 %v2606_v38  ;;  %251 = vmatpush.msra.mxu0 %v2642_v44  ;;  %4177 = vst [vmem:[#allocation18_spill] sm:$0xff] %v2750_v61  ;;  %v2806_v6 = vld [vmem:[%s4061_s4 + $0x30] sm:$0xff]  ;;  %v2811_v7 = vld [vmem:[%s4061_s4 + $0x38] sm:$0xff]  ;;  %v2818_v8 = vld [vmem:[%s4061_s4 + $0x80] sm:$0xff] }
  0x20   :  { %294 = vmatpush.msrb.mxu2 %v2623_v41  ;;  %314 = vmatpush.msrb.mxu3 %v2635_v43  ;;  %4178 = vst [vmem:[#allocation19_spill] sm:$0xff] %v2757_v62  ;;  %v2823_v9 = vld [vmem:[%s4061_s4 + $0x68] sm:$0xff]  ;;  %v2828_v10 = vld [vmem:[%s4059_s2] sm:$0x1]  ;;  %v2835_v11 = vld [vmem:[%s4061_s4 + $0x10] sm:$0xff] }
  0x21   :  { %271 = vmatpush.msra.mxu1 %v2630_v42  ;;  %2107 = vmatmul.msk.f32.gmra.mxu2 %vm71_vm0, %v2549_v29  ;;  %4179 = vst [vmem:[#allocation20_spill] sm:$0xff] %v2762_v63  ;;  %v2844_v13 = vld [vmem:[#allocation4] sm:$0x3]  ;;  %v2851_v14 = vld [vmem:[%s4061_s4 + $0x60] sm:$0xff]  ;;  %v2856_v17 = vld [vmem:[%s4061_s4 + $0x48] sm:$0xff]  ;;  %vm2112_vm1 = vcmp.gt.s32.totalorder %v2828_v10, 0 }
  0x22   :  { %2104 = vmatmul.msk.f32.vlgmr.msrb.gmra.mxu1 %vm71_vm0, %v2463_v12  ;;  %295 = vmatpush.msrb.mxu2 %v2654_v46  ;;  %4180 = vst [vmem:[#allocation21_spill] sm:$0xff] %v2770_v0  ;;  %v2840_v12 = vld [vmem:[%s4061_s4 + $0x18] sm:$0xff]  ;;  %v2866_v21 = vld [vmem:[%s4061_s4 + $0x40] sm:$0xff]  ;;  %v2871_v25 = vld [vmem:[%s4061_s4 + $0x28] sm:$0xff]  ;;  %vm2124_vm3 = vcmp.gt.s32.totalorder %v2828_v10, 3  ;;  %vm2136_vm5 = vcmp.gt.s32.totalorder %v2828_v10, 6 }
  0x23   :  { %272 = vmatpush.msra.mxu1 %v2649_v45  ;;  %315 = vmatpush.msrb.mxu3 %v2661_v47  ;;  %4181 = vst [vmem:[#allocation22_spill] sm:$0xff] %v2775_v1 }
  0x24   :  { %2109 = vmatmul.msk.f32.gmra.mxu3 %vm71_vm0, %v2549_v29  ;;  %252 = vmatpush.msra.mxu0 %v2669_v48  ;;  %4182 = vst [vmem:[#allocation23_spill] sm:$0xff] %v2782_v2 }
  0x25   :  { %273 = vmatpush.msra.mxu1 %v2676_v49  ;;  %296 = vmatpush.msrb.mxu2 %v2681_v50  ;;  %4183 = vst [vmem:[#allocation24_spill] sm:$0xff] %v2787_v3 }
  0x26   :  { %316 = vmatpush.msrb.mxu3 %v2689_v51  ;;  %253 = vmatpush.msra.mxu0 %v2694_v52  ;;  %4184 = vst [vmem:[#allocation25_spill] sm:$0xff] %v2794_v4 }
  0x27   :  { %274 = vmatpush.msra.mxu1 %v2702_v53  ;;  %297 = vmatpush.msrb.mxu2 %v2707_v54  ;;  %4185 = vst [vmem:[#allocation26_spill] sm:$0xff] %v2799_v5 }
  0x28   :  { %317 = vmatpush.msrb.mxu3 %v2714_v55  ;;  %254 = vmatpush.msra.mxu0 %v2719_v56  ;;  %4186 = vst [vmem:[#allocation27_spill] sm:$0xff] %v2806_v6 }
  0x29   :  { %275 = vmatpush.msra.mxu1 %v2726_v57  ;;  %298 = vmatpush.msrb.mxu2 %v2731_v58  ;;  %4187 = vst [vmem:[#allocation28_spill] sm:$0xff] %v2811_v7 }
  0x2a   :  { %318 = vmatpush.msrb.mxu3 %v2738_v59  ;;  %2105 = vmatmul.msk.f32.gmra.mxu1 %vm71_vm0, %v2549_v29  ;;  %4188 = vst [vmem:[#allocation29_spill] sm:$0xff] %v2818_v8  ;;  %v4080_v29 = vmov 0  }
  0x2b   :  { %255 = vmatpush.msra.mxu0 %v2745_v60  ;;  %276 = vmatpush.msra.mxu1 %v2750_v61  ;;  %4189 = vst [vmem:[#allocation30_spill] sm:$0xff] %v2823_v9 }
  0x2c   :  { %299 = vmatpush.msrb.mxu2 %v2757_v62  ;;  %319 = vmatpush.msrb.mxu3 %v2762_v63  ;;  %4190 = vst [vmem:[#allocation31_spill] sm:$0xff] %v2828_v10 }
  0x2d   :  { %256 = vmatpush.msra.mxu0 %v2770_v0  ;;  %277 = vmatpush.msra.mxu1 %v2775_v1  ;;  %4191 = vst [vmem:[#allocation32_spill] sm:$0xff] %v2835_v11 }
  0x2e   :  { %300 = vmatpush.msrb.mxu2 %v2782_v2  ;;  %320 = vmatpush.msrb.mxu3 %v2787_v3  ;;  %4192 = vst [vmem:[#allocation33_spill] sm:$0xff] %v2840_v12  ;;  %v2898_v3 = vld [vmem:[%s4061_s4] sm:$0xff] }
  0x2f   :  { %257 = vmatpush.msra.mxu0 %v2794_v4  ;;  %278 = vmatpush.msra.mxu1 %v2799_v5  ;;  %4193 = vst [vmem:[#allocation34_spill] sm:$0xff] %v2844_v13  ;;  %v4202_v10 = vld [vmem:[#allocation27_spill] sm:$0xff] }
  0x30   :  { %301 = vmatpush.msrb.mxu2 %v2806_v6  ;;  %321 = vmatpush.msrb.mxu3 %v2811_v7  ;;  %4194 = vst [vmem:[#allocation35_spill] sm:$0xff] %v2851_v14  ;;  %v2884_v7 = vld [vmem:[%s4061_s4 + $0x8] sm:$0xff]  ;;  %v2893_v6 = vld [vmem:[%s4059_s2 + $0x1] sm:$0x1] }
  0x31   :  { %258 = vmatpush.msra.mxu0 %v2818_v8  ;;  %279 = vmatpush.msra.mxu1 %v2823_v9  ;;  %4195 = vst [vmem:[#allocation36_spill] sm:$0xff] %v2856_v17  ;;  %vm2113_vm2 = vcmp.gt.s32.totalorder %v2893_v6, 0  ;;  %vm2129_vm4 = vcmp.gt.s32.totalorder %v2893_v6, 4  ;;  %vm2141_vm6 = vcmp.gt.s32.totalorder %v2893_v6, 7 }
  0x32   :  { %302 = vmatpush.msrb.mxu2 %v2835_v11  ;;  %322 = vmatpush.msrb.mxu3 %v2840_v12  ;;  %4196 = vst [vmem:[#allocation37_spill] sm:$0xff] %v2866_v21  ;;  %v423_v12 = vsel %vm2112_vm1, 1, %v4080_v29  ;;  %v2879_v11 = vld [vmem:[%s4061_s4 + $0x20] sm:$0xff] }
  0x33   :  { %303 = vmatmul.f32.vlgmr.msrb.gmra.mxu2 %v2844_v13  ;;  %323 = vmatmul.f32.vlgmr.msrb.gmra.mxu3 %v2844_v13  ;;  %4197 = vst [vmem:[#allocation38_spill] sm:$0xff] %v2871_v25 }
  0x34   :  { %259 = vmatpush.msra.mxu0 %v2851_v14  ;;  %280 = vmatpush.msra.mxu1 %v2856_v17  ;;  %4198 = vst [vmem:[#allocation39_spill] sm:$0xff] %v2879_v11 }
  0x35   :  { %4199 = vst [vmem:[#allocation40_spill] sm:$0xff] %v2884_v7  ;;  %2150 = vset.pattern.permute.xlu0 %v4080_v29  ;;  %503 = vmatpush.msra.mxu2 %v2474_v15 }
  0x36   :  { %260 = vmatpush.msra.mxu0 %v2866_v21  ;;  %281 = vmatpush.msra.mxu1 %v2871_v25  ;;  %4200 = vst [vmem:[#allocation41_spill] sm:$0xff] %v2898_v3 }
  0x37   :  { %426 = vperm.xlu0 %2150, %v423_v12   ;;  %523 = vmatpush.msra.mxu3 %v2479_v16  ;;  %v424_v12 = vsel %vm2113_vm2, 1, %v4080_v29 }
  0x38   :  { %261 = vmatpush.msra.mxu0 %v2879_v11  ;;  %282 = vmatpush.msra.mxu1 %v2884_v7 }
  0x39   :  { %283 = vmatmul.f32.vlgmr.msra.gmra.mxu1 %v2844_v13  ;;  %504 = vmatpush.msra.mxu2 %v2489_v18 }
  0x3a   :  { %262 = vmatpush.msra.mxu0 %v2898_v3  ;;  %483 = vmatpush.msrb.mxu1 %v2538_v27 }
  0x3b   :  { %263 = vmatmul.f32.vlgmr.msra.gmra.mxu0 %v2844_v13  ;;  %524 = vmatpush.msra.mxu3 %v2495_v19  ;;  %v4201_v13 = vld [vmem:[#allocation24_spill] sm:$0xff] }
  0x3c   :  { %463 = vmatpush.msrb.mxu0 %v2500_v20  ;;  %484 = vmatpush.msrb.mxu1 %v2561_v31 }
  0x3d   :  { %505 = vmatpush.msra.mxu2 %v2509_v22  ;;  %525 = vmatpush.msra.mxu3 %v2516_v23 }
  0x3e   :  { %464 = vmatpush.msrb.mxu0 %v2521_v24  ;;  %485 = vmatpush.msrb.mxu1 %v2581_v34 }
  0x3f   :  { %430 = vperm.xlu0 %2150, %v424_v12   ;;  %506 = vmatpush.msra.mxu2 %v2530_v26  ;;  %v1043_v12 = vsel %vm2124_vm3, 1, %v4080_v29 }
  0x40   :  { %465 = vmatpush.msrb.mxu0 %v2593_v36  ;;  %486 = vmatpush.msrb.mxu1 %v2606_v38 }
  0x41   :  { %526 = vmatpush.msra.mxu3 %v2543_v28  ;;  %507 = vmatpush.msra.mxu2 %v2554_v30 }
  0x42   :  { %466 = vmatpush.msrb.mxu0 %v2618_v40  ;;  %487 = vmatpush.msrb.mxu1 %v2630_v42 }
  0x43   :  { %527 = vmatpush.msra.mxu3 %v2566_v32  ;;  %508 = vmatpush.msra.mxu2 %v2573_v33 }
  0x44   :  { %467 = vmatpush.msrb.mxu0 %v2642_v44  ;;  %488 = vmatpush.msrb.mxu1 %v2649_v45 }
  0x45   :  { %528 = vmatpush.msra.mxu3 %v2586_v35  ;;  %509 = vmatpush.msra.mxu2 %v2598_v37 }
  0x46   :  { %468 = vmatpush.msrb.mxu0 %v2669_v48  ;;  %489 = vmatpush.msrb.mxu1 %v2676_v49 }
  0x47   :  { %1046 = vperm.xlu0 %2150, %v1043_v12   ;;  %529 = vmatpush.msra.mxu3 %v2611_v39  ;;  %v1250_v12 = vsel %vm2129_vm4, 1, %v4080_v29 }
  0x48   :  { %469 = vmatpush.msrb.mxu0 %v2694_v52  ;;  %490 = vmatpush.msrb.mxu1 %v2702_v53 }
  0x49   :  { %510 = vmatpush.msra.mxu2 %v2623_v41  ;;  %530 = vmatpush.msra.mxu3 %v2635_v43 }
  0x4a   :  { %470 = vmatpush.msrb.mxu0 %v2719_v56  ;;  %491 = vmatpush.msrb.mxu1 %v2726_v57 }
  0x4b   :  { %511 = vmatpush.msra.mxu2 %v2654_v46  ;;  %531 = vmatpush.msra.mxu3 %v2661_v47 }
  0x4c   :  { %471 = vmatpush.msrb.mxu0 %v2745_v60  ;;  %492 = vmatpush.msrb.mxu1 %v2750_v61 }
  0x4d   :  { %512 = vmatpush.msra.mxu2 %v2681_v50  ;;  %532 = vmatpush.msra.mxu3 %v2689_v51 }
  0x4e   :  { %472 = vmatpush.msrb.mxu0 %v2770_v0  ;;  %493 = vmatpush.msrb.mxu1 %v2775_v1 }
  0x4f   :  { %1256 = vperm.xlu0 %2150, %v1250_v12   ;;  %513 = vmatpush.msra.mxu2 %v2707_v54  ;;  %v1661_v12 = vsel %vm2136_vm5, 1, %v4080_v29  ;;  %v4203_v29 = vld [vmem:[#allocation28_spill] sm:$0xff] }
  0x50   :  { %473 = vmatpush.msrb.mxu0 %v2794_v4  ;;  %533 = vmatpush.msra.mxu3 %v2714_v55 }
  0x51   :  { %494 = vmatpush.msrb.mxu1 %v2799_v5  ;;  %514 = vmatpush.msra.mxu2 %v2731_v58 }
  0x52   :  { %474 = vmatpush.msrb.mxu0 %v2818_v8  ;;  %534 = vmatpush.msra.mxu3 %v2738_v59 }
  0x53   :  { %495 = vmatpush.msrb.mxu1 %v2823_v9  ;;  %515 = vmatpush.msra.mxu2 %v2757_v62 }
  0x54   :  { %475 = vmatpush.msrb.mxu0 %v2851_v14  ;;  %535 = vmatpush.msra.mxu3 %v2762_v63 }
  0x55   :  { %496 = vmatpush.msrb.mxu1 %v2856_v17  ;;  %516 = vmatpush.msra.mxu2 %v2782_v2  ;;  %v4204_v2 = vld [vmem:[#allocation32_spill] sm:$0xff]  ;;  %v4205_v17 = vld [vmem:[#allocation33_spill] sm:$0xff] }
  0x56   :  { %476 = vmatpush.msrb.mxu0 %v2866_v21  ;;  %536 = vmatpush.msra.mxu3 %v4201_v13  ;;  %v4206_v13 = vmov 0  }
  0x57   :  { %1664 = vperm.xlu0 %2150, %v1661_v12   ;;  %497 = vmatpush.msrb.mxu1 %v2871_v25  ;;  %v1868_v12 = vsel %vm2141_vm6, 1, %v4206_v13 }
  0x58   :  { %477 = vmatpush.msrb.mxu0 %v2879_v11  ;;  %517 = vmatpush.msra.mxu2 %v4202_v10 }
  0x59   :  { %537 = vmatpush.msra.mxu3 %v4203_v29  ;;  %498 = vmatpush.msrb.mxu1 %v2884_v7 }
  0x5a   :  { %478 = vmatpush.msrb.mxu0 %v2898_v3  ;;  %518 = vmatpush.msra.mxu2 %v4204_v2 }
  0x5b   :  { %538 = vmatpush.msra.mxu3 %v4205_v17  ;;  %2151 = vset.pattern.permute.xlu1 %v4206_v13 }
  0x5c   :  { %669 = vmatpush.msra.mxu0 %v2500_v20  ;;  %689 = vmatpush.msra.mxu1 %v2538_v27 }
  0x5d   :  { %709 = vmatpush.msrb.mxu2 %v2474_v15  ;;  %729 = vmatpush.msrb.mxu3 %v2479_v16 }
  0x5e   :  { %670 = vmatpush.msra.mxu0 %v2521_v24  ;;  %690 = vmatpush.msra.mxu1 %v2561_v31 }
  0x5f   :  { %1874 = vperm.xlu0 %2150, %v1868_v12   ;;  %710 = vmatpush.msrb.mxu2 %v2489_v18  ;;  %v4207_v12 = vld [vmem:[#allocation36_spill] sm:$0xff] }
  0x60   :  { %730 = vmatpush.msrb.mxu3 %v2495_v19  ;;  %671 = vmatpush.msra.mxu0 %v2593_v36 }
  0x61   :  { %691 = vmatpush.msra.mxu1 %v2581_v34  ;;  %711 = vmatpush.msrb.mxu2 %v2509_v22 }
  0x62   :  { %731 = vmatpush.msrb.mxu3 %v2516_v23  ;;  %672 = vmatpush.msra.mxu0 %v2618_v40 }
  0x63   :  { %692 = vmatpush.msra.mxu1 %v2606_v38  ;;  %712 = vmatpush.msrb.mxu2 %v2530_v26 }
  0x64   :  { %732 = vmatpush.msrb.mxu3 %v2543_v28  ;;  %673 = vmatpush.msra.mxu0 %v2642_v44 }
  0x65   :  { %693 = vmatpush.msra.mxu1 %v2630_v42  ;;  %713 = vmatpush.msrb.mxu2 %v2554_v30 }
  0x66   :  { %733 = vmatpush.msrb.mxu3 %v2566_v32  ;;  %674 = vmatpush.msra.mxu0 %v2669_v48 }
  0x67   :  { %694 = vmatpush.msra.mxu1 %v2649_v45  ;;  %714 = vmatpush.msrb.mxu2 %v2573_v33 }
  0x68   :  { %734 = vmatpush.msrb.mxu3 %v2586_v35  ;;  %675 = vmatpush.msra.mxu0 %v2694_v52 }
  0x69   :  { %695 = vmatpush.msra.mxu1 %v2676_v49  ;;  %715 = vmatpush.msrb.mxu2 %v2598_v37 }
  0x6a   :  { %735 = vmatpush.msrb.mxu3 %v2611_v39  ;;  %676 = vmatpush.msra.mxu0 %v2719_v56 }
  0x6b   :  { %696 = vmatpush.msra.mxu1 %v2702_v53  ;;  %716 = vmatpush.msrb.mxu2 %v2623_v41 }
  0x6c   :  { %736 = vmatpush.msrb.mxu3 %v2635_v43  ;;  %677 = vmatpush.msra.mxu0 %v2745_v60 }
  0x6d   :  { %697 = vmatpush.msra.mxu1 %v2726_v57  ;;  %717 = vmatpush.msrb.mxu2 %v2654_v46 }
  0x6e   :  { %737 = vmatpush.msrb.mxu3 %v2661_v47  ;;  %678 = vmatpush.msra.mxu0 %v2770_v0 }
  0x6f   :  { %698 = vmatpush.msra.mxu1 %v2750_v61  ;;  %718 = vmatpush.msrb.mxu2 %v2681_v50 }
  0x70   :  { %738 = vmatpush.msrb.mxu3 %v2689_v51  ;;  %679 = vmatpush.msra.mxu0 %v2794_v4  ;;  %v243_v4 = vld [vmem:[#allocation5] sm:$0x3] }
  0x71   :  { %699 = vmatpush.msra.mxu1 %v2775_v1  ;;  %719 = vmatpush.msrb.mxu2 %v2707_v54 }
  0x72   :  { %739 = vmatpush.msrb.mxu3 %v2714_v55  ;;  %680 = vmatpush.msra.mxu0 %v2818_v8  ;;  %v4208_v55 = vld [vmem:[#allocation23_spill] sm:$0xff]  ;;  %v4209_v8 = vld [vmem:[#allocation24_spill] sm:$0xff] }
  0x73   :  { %700 = vmatpush.msra.mxu1 %v2799_v5  ;;  %720 = vmatpush.msrb.mxu2 %v2731_v58 }
  0x74   :  { %740 = vmatpush.msrb.mxu3 %v2738_v59  ;;  %681 = vmatpush.msra.mxu0 %v2851_v14 }
  0x75   :  { %701 = vmatpush.msra.mxu1 %v2823_v9  ;;  %721 = vmatpush.msrb.mxu2 %v2757_v62 }
  0x76   :  { %741 = vmatpush.msrb.mxu3 %v2762_v63  ;;  %682 = vmatpush.msra.mxu0 %v2866_v21 }
  0x77   :  { %702 = vmatpush.msra.mxu1 %v4207_v12  ;;  %722 = vmatpush.msrb.mxu2 %v4208_v55 }
  0x78   :  { %742 = vmatpush.msrb.mxu3 %v4209_v8  ;;  %683 = vmatpush.msra.mxu0 %v2879_v11  ;;  %v61_v11 = vld [vmem:[%s4062_s5] sm:$0xf] }
  0x79   :  { %703 = vmatpush.msra.mxu1 %v2871_v25  ;;  %723 = vmatpush.msrb.mxu2 %v4202_v10  ;;  %v63_v8 = vperm.slane %v61_v11, 0  ;;  %v65_v10 = vperm.slane %v61_v11, 2 }
  0x7a   :  { %743 = vmatpush.msrb.mxu3 %v4203_v29  ;;  %684 = vmatpush.msra.mxu0 %v2898_v3 }
  0x7b   :  { %704 = vmatpush.msra.mxu1 %v2884_v7  ;;  %724 = vmatpush.msrb.mxu2 %v4204_v2  ;;  %v64_v2 = vperm.slane %v61_v11, 1  ;;  %v66_v7 = vperm.slane %v61_v11, 3 }
  0x7c   :  { %744 = vmatpush.msrb.mxu3 %v4205_v17  ;;  %2152 = vset.pattern.permute.xlu2 %v4206_v13 }
  0x8d   :  { %v95_v25 = vpop.f32.mrf.mxu1 }
  0x8e   :  { %v96_v55 = vadd.f32 %v95_v25, %v63_v8 }
  0x90   :  { %170 = vst [vmem:[#allocation2] sm:$0xff] %v96_v55 }
  0x95   :  { %v98_v29 = vpop.f32.mrf.mxu1 }
  0x96   :  { %v99_v12 = vadd.f32 %v98_v29, %v63_v8 }
  0x97   :  { %v141_v3 = vpop.f32.mrf.mxu2 }
  0x98   :  { %v142_v21 = vadd.f32 %v141_v3, %v65_v10  ;;  %174 = vst [vmem:[#allocation2 + $0x20] sm:$0xff] %v99_v12 }
  0x9a   :  { %172 = vst [vmem:[#allocation2 + $0x10] sm:$0xff] %v142_v21 }
  0x9e   :  { %v164_v63 = vpop.f32.mrf.mxu3 }
  0x9f   :  { %v118_v17 = vpop.f32.mrf.mxu1  ;;  %v165_v9 = vadd.f32 %v164_v63, %v66_v7 }
  0xa0   :  { %v119_v62 = vadd.f32 %v118_v17, %v64_v2 }
  0xa1   :  { %173 = vst [vmem:[#allocation2 + $0x18] sm:$0xff] %v165_v9 }
  0xa2   :  { %171 = vst [vmem:[#allocation2 + $0x8] sm:$0xff] %v119_v62 }
  0xa4   :  { %v144_v14 = vpop.f32.mrf.mxu2 }
  0xa5   :  { %v145_v58 = vadd.f32 %v144_v14, %v65_v10 }
  0xa7   :  { %v121_v59 = vpop.f32.mrf.mxu1  ;;  %v167_v25 = vpop.f32.mrf.mxu3  ;;  %176 = vst [vmem:[#allocation2 + $0x30] sm:$0xff] %v145_v58 }
  0xa8   :  { %v122_v55 = vadd.f32 %v121_v59, %v64_v2  ;;  %v168_v5 = vadd.f32 %v167_v25, %v66_v7 }
  0xaa   :  { %175 = vst [vmem:[#allocation2 + $0x28] sm:$0xff] %v122_v55 }
  0xab   :  { %177 = vst [vmem:[#allocation2 + $0x38] sm:$0xff] %v168_v5  ;;  %v244_v5 = vld [vmem:[#allocation2] ss:$8 sm:$0xf] }
  0xb2   :  { %v246_v12 = vld [vmem:[#allocation2 + $0x20] ss:$8 sm:$0xf] }
  0xb6   :  { %v284_v3 = vpop.f32.mrf.mxu1  ;;  %v304_v8 = vpop.f32.mrf.mxu2 }
  0xb7   :  { %v331_v11 = vrot.slane %v284_v3, 7  ;;  %v332_v21 = vrot.slane %v304_v8, 6  ;;  %v324_v29 = vpop.f32.mrf.mxu3 }
  0xb8   :  { %v333_v62 = vrot.slane %v324_v29, 5  ;;  %v264_v63 = vpop.f32.mrf.mxu0 }
  0xb9   :  { %v335_v9 = vsel %vm334_vm7, %v264_v63, %v331_v11  ;;  %v341_v59 = vsel %vm340_vm8, %v264_v63, %v331_v11 }
  0xba   :  { %v337_v58 = vsel %vm336_vm9, %v332_v21, %v333_v62  ;;  %v343_v2 = vsel %vm342_vm10, %v332_v21, %v333_v62  ;;  %v427_v62 = vpop.permute.xlu0 %426 }
  0xbb   :  { %v339_v7 = vsel %vm338_vm11, %v335_v9, %v337_v58  ;;  %v345_v10 = vsel %vm344_vm12, %v341_v59, %v343_v2 }
  0xbc   :  { %v346_v14 = vrot.slane %v345_v10, 1  ;;  %v349_v17 = vadd.f32 %v339_v7, %v244_v5 }
  0xbe   :  { %v350_v25 = vadd.f32 %v346_v14, %v246_v12  ;;  %v2110_v55 = vmul.f32 -1.442695, %v349_v17  ;;  %v391_v58 = vrot.slane %v349_v17, 3 }
  0xc0   :  { %2154 = vpow2.f32 %v2110_v55  ;;  %v2111_v3 = vmul.f32 -1.442695, %v350_v25  ;;  %v392_v7 = vrot.slane %v350_v25, 3  ;;  %v428_v25 = vperm.slane %v427_v62, 0 }
  0xc2   :  { %2156 = vpow2.f32 %v2111_v3  ;;  %vm3053_vm5 = vcmp.eq.s32.totalorder %v428_v25, 1 }
  0xc6   :  { %v2155_v8 = vpop.eup %2154 }
  0xc7   :  { %v357_v29 = vadd.f32 1.0, %v2155_v8 }
  0xc8   :  { %v2157_v11 = vpop.eup %2156 }
  0xc9   :  { %v358_v63 = vadd.f32 1.0, %v2157_v11  ;;  %2158 = vrcp.f32 %v357_v29  ;;  %v370_v5 = vand.u32 2147483648, %v357_v29  ;;  %v368_v14 = vand.u32 2147483647, %v357_v29 }
  0xca   :  { %vm364_vm14 = vweird.f32 %v357_v29 }
  0xcb   :  { %2160 = vrcp.f32 %v358_v63  ;;  %v385_v55 = vand.u32 2147483648, %v358_v63  ;;  %v383_v11 = vand.u32 2147483647, %v358_v63  ;;  %v371_v1 = vor.u32 1.1754944e-38, %v370_v5 }
  0xcc   :  { %2162 = vtanh.f32 %v391_v58  ;;  %vm369_vm1 = vcmp.eq.f32.partialorder %v368_v14, 8.507059e+37  ;;  %vm379_vm2 = vweird.f32 %v358_v63  ;;  %v404_v58 = vrot.slane %v243_v4, 1  ;;  %v4212_v14 = vld [vmem:[#allocation31_spill] sm:$0xff] }
  0xcd   :  { %2164 = vtanh.f32 %v392_v7  ;;  %v386_v51 = vor.u32 1.1754944e-38, %v385_v55  ;;  %vm384_vm4 = vcmp.eq.f32.partialorder %v383_v11, 8.507059e+37  ;;  %vm2116_vm6 = vcmp.gt.s32.totalorder %v4212_v14, 1 }
  0xcf   :  { %v2159_v21 = vpop.eup %2158 }
  0xd0   :  { %v360_v54 = vmul.f32 %v2159_v21, %v357_v29  ;;  %vm365_vm13 = vweird.f32 %v2159_v21 }
  0xd1   :  { %v2161_v9 = vpop.eup %2160  ;;  %vm366_vm0 = vmor %vm364_vm14, %vm365_vm13  ;;  %vm2117_vm14 = vcmp.gt.s32.totalorder %v2893_v6, 1 }
  0xd2   :  { %v361_v59 = vsub.f32 1.0, %v360_v54  ;;  %v375_v2 = vmul.f32 %v2161_v9, %v358_v63  ;;  %vm380_vm15 = vweird.f32 %v2161_v9 }
  0xd3   :  { %vm381_vm3 = vmor %vm379_vm2, %vm380_vm15  ;;  %vm2125_vm15 = vcmp.gt.s32.totalorder %v2893_v6, 3 }
  0xd4   :  { %v362_v10 = vmul.f32 %v2159_v21, %v361_v59  ;;  %v376_v12 = vsub.f32 1.0, %v375_v2 }
  0xd6   :  { %v363_v3 = vadd.f32 %v2159_v21, %v362_v10  ;;  %v377_v8 = vmul.f32 %v2161_v9, %v376_v12  ;;  %v431_v10 = vpop.permute.xlu0 %430  ;;  %v2163_v12 = vpop.eup %2162 }
  0xd7   :  { %v432_v61 = vperm.slane %v431_v10, 0  ;;  %v2165_v47 = vpop.eup %2164 }
  0xd8   :  { %v367_v17 = vsel %vm366_vm0, %v2159_v21, %v363_v3  ;;  %v378_v54 = vadd.f32 %v2161_v9, %v377_v8  ;;  %vm2132_vm0 = vcmp.gt.s32.totalorder %v4212_v14, 5 }
  0xd9   :  { %v372_v59 = vsel %vm369_vm1, %v371_v1, %v367_v17  ;;  %vm3058_vm13 = vcmp.eq.s32.totalorder %v432_v61, 1  ;;  %vm2137_vm1 = vcmp.gt.s32.totalorder %v2893_v6, 6 }
  0xda   :  { %v382_v2 = vsel %vm381_vm3, %v2161_v9, %v378_v54  ;;  %v399_v29 = vrot.slane %v372_v59, 1  ;;  %v408_v0 = vmul.f32 %v2163_v12, %v372_v59  ;;  %v414_v61 = vrot.slane %v372_v59, 2 }
  0xdb   :  { %v387_v50 = vsel %vm384_vm4, %v386_v51, %v382_v2  ;;  %v631_v51 = vsel %vm2116_vm6, 1, %v4206_v13  ;;  %v1044_v59 = vsel %vm2125_vm15, 1, %v4206_v13  ;;  %v1662_v21 = vsel %vm2137_vm1, 1, %v4206_v13 }
  0xdc   :  { %v400_v5 = vrot.slane %v387_v50, 1  ;;  %v406_v7 = vmul.f32 %v399_v29, %v243_v4  ;;  %v409_v1 = vmul.f32 %v2165_v47, %v387_v50  ;;  %634 = vperm.xlu1 %2151, %v631_v51   ;;  %v415_v11 = vrot.slane %v387_v50, 2  ;;  %v4215_v29 = vld [vmem:[#allocation34_spill] sm:$0xff] }
  0xdd   :  { %vm2120_vm1 = vcmp.gt.s32.totalorder %v4212_v14, 2 }
  0xde   :  { %v407_v63 = vmul.f32 %v404_v58, %v400_v5  ;;  %v410_v62 = vadd.f32 %v408_v0, %v406_v7  ;;  %v632_v0 = vsel %vm2117_vm14, 1, %v4206_v13  ;;  %v1455_v5 = vsel %vm2132_vm0, 1, %v4206_v13 }
  0xe0   :  { %v411_v55 = vadd.f32 %v409_v1, %v407_v63  ;;  %2166 = vtanh.f32 %v410_v62  ;;  %v3065_v3 = vsel %vm3053_vm5, %v410_v62, %v243_v4 }
  0xe2   :  { %2168 = vtanh.f32 %v411_v55  ;;  %v3069_v47 = vsel %vm3058_vm13, %v411_v55, %v404_v58  ;;  %v436_v58 = vrot.slane %v4215_v29, 1  ;;  %v453_v55 = vld [vmem:[#allocation2 + $0x1] ss:$8 sm:$0xf] }
  0xe4   :  { %638 = vperm.xlu1 %2151, %v632_v0  }
  0xe6   :  { %v2167_v8 = vpop.eup %2166 }
  0xe7   :  { %v418_v17 = vmul.f32 %v2167_v8, %v414_v61 }
  0xe8   :  { %v2169_v54 = vpop.eup %2168 }
  0xe9   :  { %v419_v25 = vmul.f32 %v2169_v54, %v415_v11  ;;  %v442_v4 = vsel %vm3053_vm5, %v418_v17, 0.0  ;;  %v3084_v50 = vsel %vm3053_vm5, %v418_v17, %v4215_v29  ;;  %v455_v17 = vld [vmem:[#allocation2 + $0x21] ss:$8 sm:$0xf] }
  0xea   :  { %446 = vst [vmem:[#allocation1] ss:$9 sm:$0xff] %v442_v4 }
  0xeb   :  { %v443_v2 = vsel %vm3058_vm13, %v419_v25, 0.0  ;;  %v3088_v12 = vsel %vm3058_vm13, %v419_v25, %v436_v58 }
  0xec   :  { %448 = vst [vmem:[#allocation1 + $0x1] ss:$9 sm:$0xff] %v443_v2  ;;  %1050 = vperm.xlu1 %2151, %v1044_v59  }
  0xf3   :  { %v449_v10 = vld [vmem:[#allocation1] sm:$0xff] }
  0xf4   :  { %458 = vst [vmem:[#allocation1] ss:$9 sm:$0xff] %v3084_v50  ;;  %1458 = vperm.xlu1 %2151, %v1455_v5  }
  0xf5   :  { %460 = vst [vmem:[#allocation1 + $0x1] ss:$9 sm:$0xff] %v3088_v12 }
  0xf6   :  { %451 = vst [vmem:[#allocation3] sm:$0x3] %v449_v10 }
  0xfc   :  { %v461_v7 = vld [vmem:[#allocation1] sm:$0xff]  ;;  %1668 = vperm.xlu1 %2151, %v1662_v21  }
  0xfd   :  { %479 = vmatmul.f32.vlgmr.msrb.gmra.mxu0 %v461_v7  ;;  %499 = vmatmul.f32.vlgmr.msrb.gmra.mxu1 %v461_v7 }
  0xfe   :  { %519 = vmatmul.f32.vlgmr.msra.gmra.mxu2 %v461_v7  ;;  %539 = vmatmul.f32.vlgmr.msra.gmra.mxu3 %v461_v7 }
  0xff   :  { %875 = vmatpush.msrb.mxu0 %v2500_v20  ;;  %895 = vmatpush.msrb.mxu1 %v2538_v27  ;;  %v4220_v20 = vld [vmem:[#allocation13_spill] sm:$0xff] }
 0x100   :  { %915 = vmatpush.msra.mxu2 %v2474_v15  ;;  %935 = vmatpush.msra.mxu3 %v2479_v16  ;;  %v4216_v15 = vld [vmem:[#allocation11_spill] sm:$0xff]  ;;  %v4217_v16 = vld [vmem:[#allocation21_spill] sm:$0xff] }
 0x101   :  { %876 = vmatpush.msrb.mxu0 %v2521_v24  ;;  %896 = vmatpush.msrb.mxu1 %v2561_v31  ;;  %v4223_v24 = vld [vmem:[#allocation14_spill] sm:$0xff]  ;;  %v4225_v27 = vld [vmem:[#allocation29_spill] sm:$0xff] }
 0x102   :  { %916 = vmatpush.msra.mxu2 %v2489_v18  ;;  %936 = vmatpush.msra.mxu3 %v2495_v19  ;;  %v4218_v18 = vld [vmem:[#allocation18_spill] sm:$0xff]  ;;  %v4219_v19 = vld [vmem:[#allocation12_spill] sm:$0xff]  ;;  %v4228_v31 = vld [vmem:[#allocation17_spill] sm:$0xff] }
 0x103   :  { %877 = vmatpush.msrb.mxu0 %v2593_v36  ;;  %897 = vmatpush.msrb.mxu1 %v2581_v34  ;;  %v4231_v34 = vld [vmem:[#allocation19_spill] sm:$0xff]  ;;  %v4233_v36 = vld [vmem:[#allocation37_spill] sm:$0xff] }
 0x104   :  { %917 = vmatpush.msra.mxu2 %v2509_v22  ;;  %937 = vmatpush.msra.mxu3 %v2516_v23  ;;  %v4221_v22 = vld [vmem:[#allocation25_spill] sm:$0xff]  ;;  %v4222_v23 = vld [vmem:[#allocation22_spill] sm:$0xff] }
 0x105   :  { %878 = vmatpush.msrb.mxu0 %v2618_v40  ;;  %898 = vmatpush.msrb.mxu1 %v2606_v38  ;;  %v4235_v38 = vld [vmem:[#allocation23_spill] sm:$0xff] }
 0x106   :  { %918 = vmatpush.msra.mxu2 %v2530_v26  ;;  %938 = vmatpush.msra.mxu3 %v2543_v28  ;;  %v4224_v26 = vld [vmem:[#allocation15_spill] sm:$0xff]  ;;  %v4226_v28 = vld [vmem:[#allocation26_spill] sm:$0xff] }
 0x107   :  { %879 = vmatpush.msrb.mxu0 %v2642_v44  ;;  %899 = vmatpush.msrb.mxu1 %v2630_v42  ;;  %v4237_v40 = vld [vmem:[#allocation39_spill] sm:$0xff]  ;;  %v4241_v44 = vld [vmem:[#allocation41_spill] sm:$0xff] }
 0x108   :  { %919 = vmatpush.msra.mxu2 %v2554_v30  ;;  %939 = vmatpush.msra.mxu3 %v2566_v32  ;;  %v4227_v30 = vld [vmem:[#allocation16_spill] sm:$0xff]  ;;  %v4229_v32 = vld [vmem:[#allocation35_spill] sm:$0xff] }
 0x109   :  { %880 = vmatpush.msrb.mxu0 %v2669_v48  ;;  %900 = vmatpush.msrb.mxu1 %v2649_v45  ;;  %v4239_v42 = vld [vmem:[#allocation27_spill] sm:$0xff]  ;;  %v4242_v45 = vld [vmem:[#allocation40_spill] sm:$0xff]  ;;  %v4244_v48 = vld [vmem:[#allocation33_spill] sm:$0xff] }
 0x10a   :  { %920 = vmatpush.msra.mxu2 %v2573_v33  ;;  %940 = vmatpush.msra.mxu3 %v2586_v35  ;;  %v4230_v33 = vld [vmem:[#allocation30_spill] sm:$0xff]  ;;  %v4232_v35 = vld [vmem:[#allocation20_spill] sm:$0xff] }
 0x10b   :  { %881 = vmatpush.msrb.mxu0 %v2694_v52  ;;  %901 = vmatpush.msrb.mxu1 %v2676_v49 }
 0x10c   :  { %921 = vmatpush.msra.mxu2 %v2598_v37  ;;  %941 = vmatpush.msra.mxu3 %v2611_v39  ;;  %v4234_v37 = vld [vmem:[#allocation36_spill] sm:$0xff] }
 0x10d   :  { %882 = vmatpush.msrb.mxu0 %v2719_v56  ;;  %902 = vmatpush.msrb.mxu1 %v2702_v53  ;;  %v4236_v39 = vld [vmem:[#allocation24_spill] sm:$0xff] }
 0x10e   :  { %922 = vmatpush.msra.mxu2 %v2623_v41  ;;  %942 = vmatpush.msra.mxu3 %v2635_v43  ;;  %v4238_v41 = vld [vmem:[#allocation38_spill] sm:$0xff]  ;;  %v4240_v43 = vld [vmem:[#allocation28_spill] sm:$0xff] }
 0x10f   :  { %883 = vmatpush.msrb.mxu0 %v2745_v60  ;;  %903 = vmatpush.msrb.mxu1 %v2726_v57 }
 0x110   :  { %923 = vmatpush.msra.mxu2 %v2654_v46  ;;  %943 = vmatpush.msra.mxu3 %v4216_v15  ;;  %v4243_v46 = vld [vmem:[#allocation32_spill] sm:$0xff] }
 0x111   :  { %884 = vmatpush.msrb.mxu0 %v4217_v16  ;;  %904 = vmatpush.msrb.mxu1 %v4218_v18 }
 0x112   :  { %924 = vmatpush.msra.mxu2 %v4219_v19  ;;  %944 = vmatpush.msra.mxu3 %v4220_v20 }
 0x113   :  { %885 = vmatpush.msrb.mxu0 %v4221_v22  ;;  %905 = vmatpush.msrb.mxu1 %v4222_v23 }
 0x114   :  { %925 = vmatpush.msra.mxu2 %v4223_v24  ;;  %945 = vmatpush.msra.mxu3 %v4224_v26 }
 0x115   :  { %886 = vmatpush.msrb.mxu0 %v4225_v27  ;;  %906 = vmatpush.msrb.mxu1 %v4226_v28 }
 0x116   :  { %926 = vmatpush.msra.mxu2 %v4227_v30  ;;  %946 = vmatpush.msra.mxu3 %v4228_v31 }
 0x117   :  { %887 = vmatpush.msrb.mxu0 %v4229_v32  ;;  %907 = vmatpush.msrb.mxu1 %v4230_v33 }
 0x118   :  { %927 = vmatpush.msra.mxu2 %v4231_v34  ;;  %947 = vmatpush.msra.mxu3 %v4232_v35 }
 0x119   :  { %888 = vmatpush.msrb.mxu0 %v4233_v36  ;;  %908 = vmatpush.msrb.mxu1 %v4234_v37 }
 0x11a   :  { %928 = vmatpush.msra.mxu2 %v4235_v38  ;;  %948 = vmatpush.msra.mxu3 %v4236_v39 }
 0x11b   :  { %889 = vmatpush.msrb.mxu0 %v4237_v40  ;;  %909 = vmatpush.msrb.mxu1 %v4238_v41 }
 0x11c   :  { %929 = vmatpush.msra.mxu2 %v4239_v42  ;;  %949 = vmatpush.msra.mxu3 %v4240_v43 }
 0x11d   :  { %890 = vmatpush.msrb.mxu0 %v4241_v44  ;;  %910 = vmatpush.msrb.mxu1 %v4242_v45 }
 0x11e   :  { %930 = vmatpush.msra.mxu2 %v4243_v46  ;;  %950 = vmatpush.msra.mxu3 %v4244_v48  ;;  %v3448_v48 = vld [vmem:[%s4061_s4 + $0xd8] sm:$0xff] }
 0x11f   :  { %4253 = vst [vmem:[#allocation18_spill] sm:$0xff] %v3448_v48 }
 0x14e   :  { %v635_v5 = vpop.permute.xlu1 %634 }
 0x14f   :  { %v636_v35 = vperm.slane %v635_v5, 0  ;;  %v3262_v5 = vld [vmem:[%s4061_s4 + $0x1a0] sm:$0xff] }
 0x151   :  { %vm3166_vm0 = vcmp.eq.s32.totalorder %v636_v35, 1  ;;  %v3376_v35 = vld [vmem:[%s4061_s4 + $0x138] sm:$0xff] }
 0x156   :  { %v639_v38 = vpop.permute.xlu1 %638 }
 0x157   :  { %v640_v42 = vperm.slane %v639_v38, 0  ;;  %v3394_v38 = vld [vmem:[%s4061_s4 + $0x110] sm:$0xff] }
 0x17a   :  { %v500_v49 = vpop.f32.mrf.mxu1  ;;  %v480_v63 = vpop.f32.mrf.mxu0 }
 0x17b   :  { %v547_v52 = vrot.slane %v500_v49, 7 }
 0x17d   :  { %v550_v1 = vsel %vm334_vm7, %v480_v63, %v547_v52  ;;  %v553_v62 = vsel %vm340_vm8, %v480_v63, %v547_v52 }
 0x181   :  { %v520_v53 = vpop.f32.mrf.mxu2  ;;  %v540_v56 = vpop.f32.mrf.mxu3 }
 0x182   :  { %v548_v57 = vrot.slane %v520_v53, 6  ;;  %v549_v60 = vrot.slane %v540_v56, 5  ;;  %v3472_v56 = vld [vmem:[%s4061_s4 + $0xb8] sm:$0xff] }
 0x183   :  { %4257 = vst [vmem:[#allocation22_spill] sm:$0xff] %v3472_v56 }
 0x184   :  { %v551_v9 = vsel %vm336_vm9, %v548_v57, %v549_v60  ;;  %v554_v51 = vsel %vm342_vm10, %v548_v57, %v549_v60  ;;  %v837_v57 = vsel %vm2120_vm1, 1, %v4206_v13 }
 0x185   :  { %v552_v61 = vsel %vm338_vm11, %v550_v1, %v551_v9  ;;  %v555_v0 = vsel %vm344_vm12, %v553_v62, %v554_v51  ;;  %840 = vperm.xlu2 %2152, %v837_v57   ;;  %v3478_v57 = vld [vmem:[%s4061_s4 + $0x80] sm:$0xff] }
 0x186   :  { %v556_v8 = vrot.slane %v555_v0, 1  ;;  %v559_v11 = vadd.f32 %v552_v61, %v453_v55  ;;  %4258 = vst [vmem:[#allocation14_spill] sm:$0xff] %v3478_v57 }
 0x188   :  { %v560_v54 = vadd.f32 %v556_v8, %v455_v17  ;;  %v2114_v25 = vmul.f32 -1.442695, %v559_v11  ;;  %v601_v15 = vrot.slane %v559_v11, 3 }
 0x18a   :  { %2170 = vpow2.f32 %v2114_v25  ;;  %v2115_v4 = vmul.f32 -1.442695, %v560_v54  ;;  %v602_v19 = vrot.slane %v560_v54, 3 }
 0x18c   :  { %2172 = vpow2.f32 %v2115_v4 }
 0x190   :  { %v2171_v2 = vpop.eup %2170 }
 0x191   :  { %v567_v59 = vadd.f32 1.0, %v2171_v2  ;;  %v3220_v2 = vld [vmem:[%s4061_s4 + $0x1e8] sm:$0xff] }
 0x192   :  { %v2173_v29 = vpop.eup %2172 }
 0x193   :  { %v568_v58 = vadd.f32 1.0, %v2173_v29  ;;  %2174 = vrcp.f32 %v567_v59  ;;  %v580_v20 = vand.u32 2147483648, %v567_v59  ;;  %v578_v23 = vand.u32 2147483647, %v567_v59  ;;  %v3244_v29 = vld [vmem:[%s4061_s4 + $0x1c8] sm:$0xff] }
 0x194   :  { %vm574_vm3 = vweird.f32 %v567_v59 }
 0x195   :  { %2176 = vrcp.f32 %v568_v58  ;;  %v595_v26 = vand.u32 2147483648, %v568_v58  ;;  %v593_v30 = vand.u32 2147483647, %v568_v58  ;;  %v581_v31 = vor.u32 1.1754944e-38, %v580_v20  ;;  %v3304_v20 = vld [vmem:[%s4061_s4 + $0x198] sm:$0xff] }
 0x196   :  { %2178 = vtanh.f32 %v601_v15  ;;  %vm579_vm6 = vcmp.eq.f32.partialorder %v578_v23, 8.507059e+37  ;;  %vm589_vm13 = vweird.f32 %v568_v58  ;;  %v3280_v15 = vld [vmem:[%s4061_s4 + $0x1b8] sm:$0xff]  ;;  %v3316_v23 = vld [vmem:[%s4061_s4 + $0x168] sm:$0xff] }
 0x197   :  { %2180 = vtanh.f32 %v602_v19  ;;  %v596_v36 = vor.u32 1.1754944e-38, %v595_v26  ;;  %vm594_vm15 = vcmp.eq.f32.partialorder %v593_v30, 8.507059e+37  ;;  %v3298_v19 = vld [vmem:[%s4061_s4 + $0x190] sm:$0xff]  ;;  %v3328_v26 = vld [vmem:[%s4061_s4 + $0x178] sm:$0xff] }
 0x198   :  { %v3346_v30 = vld [vmem:[%s4061_s4 + $0x150] sm:$0xff] }
 0x199   :  { %v2175_v10 = vpop.eup %2174 }
 0x19a   :  { %v570_v7 = vmul.f32 %v2175_v10, %v567_v59  ;;  %vm575_vm2 = vweird.f32 %v2175_v10  ;;  %v3238_v59 = vld [vmem:[%s4061_s4 + $0x1c0] sm:$0xff] }
 0x19b   :  { %v2177_v21 = vpop.eup %2176  ;;  %vm576_vm5 = vmor %vm574_vm3, %vm575_vm2  ;;  %vm3172_vm2 = vcmp.eq.s32.totalorder %v640_v42, 1  ;;  %vm2121_vm3 = vcmp.gt.s32.totalorder %v2893_v6, 2  ;;  %v3418_v42 = vld [vmem:[%s4061_s4 + $0xf0] sm:$0xff] }
 0x19c   :  { %v571_v16 = vsub.f32 1.0, %v570_v7  ;;  %v585_v18 = vmul.f32 %v2177_v21, %v568_v58  ;;  %vm590_vm4 = vweird.f32 %v2177_v21  ;;  %v2179_v40 = vpop.eup %2178  ;;  %v838_v9 = vsel %vm2121_vm3, 1, %v4206_v13  ;;  %v3250_v58 = vld [vmem:[%s4061_s4 + $0x1d0] sm:$0xff]  ;;  %v3268_v7 = vld [vmem:[%s4061_s4 + $0x1a8] sm:$0xff] }
 0x19d   :  { %vm591_vm14 = vmor %vm589_vm13, %vm590_vm4  ;;  %v2181_v46 = vpop.eup %2180  ;;  %844 = vperm.xlu2 %2152, %v838_v9   ;;  %vm2128_vm4 = vcmp.gt.s32.totalorder %v4212_v14, 4  ;;  %v3496_v9 = vld [vmem:[%s4061_s4 + $0x98] sm:$0xff] }
 0x19e   :  { %v572_v22 = vmul.f32 %v2175_v10, %v571_v16  ;;  %v586_v24 = vsub.f32 1.0, %v585_v18  ;;  %v1249_v11 = vsel %vm2128_vm4, 1, %v4206_v13  ;;  %v3286_v16 = vld [vmem:[%s4061_s4 + $0x180] sm:$0xff]  ;;  %v3292_v18 = vld [vmem:[%s4061_s4 + $0x188] sm:$0xff]  ;;  %4261 = vst [vmem:[#allocation26_spill] sm:$0xff] %v3496_v9 }
 0x1a0   :  { %v573_v27 = vadd.f32 %v2175_v10, %v572_v22  ;;  %v587_v28 = vmul.f32 %v2177_v21, %v586_v24  ;;  %v3310_v22 = vld [vmem:[%s4061_s4 + $0x160] sm:$0xff]  ;;  %v3322_v24 = vld [vmem:[%s4061_s4 + $0x170] sm:$0xff] }
 0x1a2   :  { %v577_v32 = vsel %vm576_vm5, %v2175_v10, %v573_v27  ;;  %v588_v33 = vadd.f32 %v2177_v21, %v587_v28  ;;  %vm2133_vm5 = vcmp.gt.s32.totalorder %v2893_v6, 5  ;;  %v3256_v10 = vld [vmem:[%s4061_s4 + $0x1d8] sm:$0xff]  ;;  %v3334_v27 = vld [vmem:[%s4061_s4 + $0x140] sm:$0xff]  ;;  %v3340_v28 = vld [vmem:[%s4061_s4 + $0x148] sm:$0xff] }
 0x1a3   :  { %v582_v34 = vsel %vm579_vm6, %v581_v31, %v577_v32  ;;  %v1456_v4 = vsel %vm2133_vm5, 1, %v4206_v13  ;;  %vm2140_vm6 = vcmp.gt.s32.totalorder %v4212_v14, 7  ;;  %v3232_v14 = vld [vmem:[%s4061_s4 + $0x1f8] sm:$0xff]  ;;  %v3358_v32 = vld [vmem:[%s4061_s4 + $0x120] sm:$0xff] }
 0x1a4   :  { %v609_v37 = vrot.slane %v582_v34, 1  ;;  %v592_v39 = vsel %vm591_vm14, %v2177_v21, %v588_v33  ;;  %v615_v44 = vmul.f32 %v2179_v40, %v582_v34  ;;  %v621_v62 = vrot.slane %v582_v34, 2  ;;  %v3274_v21 = vld [vmem:[%s4061_s4 + $0x1b0] sm:$0xff]  ;;  %v3352_v31 = vld [vmem:[%s4061_s4 + $0x158] sm:$0xff]  ;;  %v3364_v33 = vld [vmem:[%s4061_s4 + $0x128] sm:$0xff] }
 0x1a5   :  { %v597_v41 = vsel %vm594_vm15, %v596_v36, %v592_v39  ;;  %1252 = vperm.xlu2 %2152, %v1249_v11   ;;  %v3370_v34 = vld [vmem:[%s4061_s4 + $0x130] sm:$0xff]  ;;  %v3382_v36 = vld [vmem:[%s4061_s4 + $0x100] sm:$0xff]  ;;  %v3400_v39 = vld [vmem:[%s4061_s4 + $0x118] sm:$0xff] }
 0x1a6   :  { %v613_v43 = vmul.f32 %v609_v37, %v3065_v3  ;;  %v610_v45 = vrot.slane %v597_v41, 1  ;;  %v616_v53 = vmul.f32 %v2181_v46, %v597_v41  ;;  %v622_v61 = vrot.slane %v597_v41, 2  ;;  %v3388_v37 = vld [vmem:[%s4061_s4 + $0x108] sm:$0xff]  ;;  %v3406_v40 = vld [vmem:[%s4061_s4 + $0xe0] sm:$0xff]  ;;  %v3442_v46 = vld [vmem:[%s4061_s4 + $0xd0] sm:$0xff] }
 0x1a7   :  { %v3412_v41 = vld [vmem:[%s4061_s4 + $0xe8] sm:$0xff]  ;;  %4252 = vst [vmem:[#allocation21_spill] sm:$0xff] %v3442_v46  ;;  %v3544_v11 = vld [vmem:[%s4061_s4 + $0x58] sm:$0xff] }
 0x1a8   :  { %v617_v49 = vadd.f32 %v615_v44, %v613_v43  ;;  %v614_v52 = vmul.f32 %v610_v45, %v3069_v47  ;;  %v3424_v43 = vld [vmem:[%s4061_s4 + $0xf8] sm:$0xff]  ;;  %v3430_v44 = vld [vmem:[%s4061_s4 + $0xc0] sm:$0xff]  ;;  %v3436_v45 = vld [vmem:[%s4061_s4 + $0xc8] sm:$0xff]  ;;  %4269 = vst [vmem:[#allocation36_spill] sm:$0xff] %v3544_v11 }
 0x1a9   :  { %4249 = vst [vmem:[#allocation31_spill] sm:$0xff] %v3424_v43 }
 0x1aa   :  { %2182 = vtanh.f32 %v617_v49  ;;  %v3180_v60 = vsel %vm3166_vm0, %v617_v49, %v3065_v3  ;;  %v618_v63 = vadd.f32 %v616_v53, %v614_v52  ;;  %4250 = vst [vmem:[#allocation34_spill] sm:$0xff] %v3430_v44  ;;  %v3454_v49 = vld [vmem:[%s4061_s4 + $0xa0] sm:$0xff]  ;;  %v3460_v52 = vld [vmem:[%s4061_s4 + $0xa8] sm:$0xff]  ;;  %v3466_v53 = vld [vmem:[%s4061_s4 + $0xb0] sm:$0xff] }
 0x1ab   :  { %4251 = vst [vmem:[#allocation11_spill] sm:$0xff] %v3436_v45 }
 0x1ac   :  { %2184 = vtanh.f32 %v618_v63  ;;  %v3185_v1 = vsel %vm3172_vm2, %v618_v63, %v3069_v47  ;;  %4254 = vst [vmem:[#allocation12_spill] sm:$0xff] %v3454_v49  ;;  %v3484_v63 = vld [vmem:[%s4061_s4 + $0x88] sm:$0xff] }
 0x1ad   :  { %1462 = vperm.xlu2 %2152, %v1456_v4   ;;  %4255 = vst [vmem:[#allocation13_spill] sm:$0xff] %v3460_v52  ;;  %v3556_v4 = vld [vmem:[%s4061_s4 + $0x28] sm:$0xff] }
 0x1ae   :  { %4256 = vst [vmem:[#allocation25_spill] sm:$0xff] %v3466_v53 }
 0x1af   :  { %4259 = vst [vmem:[#allocation15_spill] sm:$0xff] %v3484_v63 }
 0x1b0   :  { %v2183_v51 = vpop.eup %2182  ;;  %4271 = vst [vmem:[#allocation24_spill] sm:$0xff] %v3556_v4 }
 0x1b1   :  { %v625_v55 = vmul.f32 %v2183_v51, %v621_v62  ;;  %v3490_v62 = vld [vmem:[%s4061_s4 + $0x90] sm:$0xff]  ;;  %v3502_v51 = vld [vmem:[%s4061_s4 + $0x60] sm:$0xff] }
 0x1b2   :  { %v2185_v0 = vpop.eup %2184  ;;  %4260 = vst [vmem:[#allocation29_spill] sm:$0xff] %v3490_v62 }
 0x1b3   :  { %v647_v3 = vsel %vm3166_vm0, %v625_v55, 0.0  ;;  %v626_v8 = vmul.f32 %v2185_v0, %v622_v61  ;;  %v3199_v17 = vsel %vm3166_vm0, %v625_v55, %v3084_v50  ;;  %v1867_v50 = vsel %vm2140_vm6, 1, %v4206_v13  ;;  %v3226_v13 = vld [vmem:[%s4061_s4 + $0x1f0] sm:$0xff]  ;;  %4262 = vst [vmem:[#allocation16_spill] sm:$0xff] %v3502_v51  ;;  %v3508_v55 = vld [vmem:[%s4061_s4 + $0x68] sm:$0xff]  ;;  %v3520_v0 = vld [vmem:[%s4061_s4 + $0x78] sm:$0xff] }
 0x1b4   :  { %651 = vst [vmem:[#allocation1] ss:$9 sm:$0xff] %v647_v3  ;;  %v3514_v61 = vld [vmem:[%s4061_s4 + $0x70] sm:$0xff]  ;;  %v3526_v3 = vld [vmem:[%s4061_s4 + $0x40] sm:$0xff] }
 0x1b5   :  { %v648_v47 = vsel %vm3172_vm2, %v626_v8, 0.0  ;;  %v3204_v25 = vsel %vm3172_vm2, %v626_v8, %v3088_v12  ;;  %v3214_v12 = vld [vmem:[%s4061_s4 + $0x1e0] sm:$0xff]  ;;  %1870 = vperm.xlu2 %2152, %v1867_v50   ;;  %4263 = vst [vmem:[#allocation17_spill] sm:$0xff] %v3508_v55  ;;  %v3532_v8 = vld [vmem:[%s4061_s4 + $0x48] sm:$0xff]  ;;  %v3568_v50 = vld [vmem:[%s4061_s4 + $0x38] sm:$0xff] }
 0x1b6   :  { %653 = vst [vmem:[#allocation1 + $0x1] ss:$9 sm:$0xff] %v648_v47  ;;  %v3538_v47 = vld [vmem:[%s4061_s4 + $0x50] sm:$0xff] }
 0x1b7   :  { %4264 = vst [vmem:[#allocation35_spill] sm:$0xff] %v3514_v61 }
 0x1b8   :  { %4265 = vst [vmem:[#allocation30_spill] sm:$0xff] %v3520_v0 }
 0x1b9   :  { %4266 = vst [vmem:[#allocation19_spill] sm:$0xff] %v3526_v3 }
 0x1ba   :  { %4267 = vst [vmem:[#allocation20_spill] sm:$0xff] %v3532_v8 }
 0x1bb   :  { %4268 = vst [vmem:[#allocation37_spill] sm:$0xff] %v3538_v47 }
 0x1bc   :  { %4273 = vst [vmem:[#allocation38_spill] sm:$0xff] %v3568_v50 }
 0x1bd   :  { %v654_v54 = vld [vmem:[#allocation1] sm:$0xff] }
 0x1be   :  { %664 = vst [vmem:[#allocation1] ss:$9 sm:$0xff] %v3199_v17 }
 0x1bf   :  { %666 = vst [vmem:[#allocation1 + $0x1] ss:$9 sm:$0xff] %v3204_v25 }
 0x1c0   :  { %657 = vst [vmem:[#allocation3 + $0x2] sm:$0x3] %v654_v54  ;;  %v3550_v54 = vld [vmem:[%s4061_s4 + $0x20] sm:$0xff] }
 0x1c1   :  { %4270 = vst [vmem:[#allocation23_spill] sm:$0xff] %v3550_v54 }
 0x1c6   :  { %v667_v6 = vld [vmem:[#allocation1] sm:$0xff] }
 0x1c7   :  { %685 = vmatmul.f32.vlgmr.msra.gmra.mxu0 %v667_v6  ;;  %705 = vmatmul.f32.vlgmr.msra.gmra.mxu1 %v667_v6 }
 0x1c8   :  { %725 = vmatmul.f32.vlgmr.msrb.gmra.mxu2 %v667_v6  ;;  %745 = vmatmul.f32.vlgmr.msrb.gmra.mxu3 %v667_v6  ;;  %v3562_v6 = vld [vmem:[%s4061_s4 + $0x30] sm:$0xff] }
 0x1c9   :  { %1081 = vmatpush.msra.mxu0 %v3214_v12  ;;  %1101 = vmatpush.msra.mxu1 %v3220_v2  ;;  %4272 = vst [vmem:[#allocation39_spill] sm:$0xff] %v3562_v6 }
 0x1ca   :  { %1121 = vmatpush.msrb.mxu2 %v3226_v13  ;;  %1141 = vmatpush.msrb.mxu3 %v3232_v14 }
 0x1cb   :  { %1082 = vmatpush.msra.mxu0 %v3238_v59  ;;  %1102 = vmatpush.msra.mxu1 %v3244_v29 }
 0x1cc   :  { %1122 = vmatpush.msrb.mxu2 %v3250_v58  ;;  %1142 = vmatpush.msrb.mxu3 %v3256_v10 }
 0x1cd   :  { %1083 = vmatpush.msra.mxu0 %v3262_v5  ;;  %1103 = vmatpush.msra.mxu1 %v3268_v7 }
 0x1ce   :  { %1123 = vmatpush.msrb.mxu2 %v3274_v21  ;;  %1143 = vmatpush.msrb.mxu3 %v3280_v15 }
 0x1cf   :  { %1084 = vmatpush.msra.mxu0 %v3286_v16  ;;  %1104 = vmatpush.msra.mxu1 %v3292_v18 }
 0x1d0   :  { %1124 = vmatpush.msrb.mxu2 %v3298_v19  ;;  %1144 = vmatpush.msrb.mxu3 %v3304_v20 }
 0x1d1   :  { %1085 = vmatpush.msra.mxu0 %v3310_v22  ;;  %1105 = vmatpush.msra.mxu1 %v3316_v23 }
 0x1d2   :  { %1125 = vmatpush.msrb.mxu2 %v3322_v24  ;;  %1145 = vmatpush.msrb.mxu3 %v3328_v26 }
 0x1d3   :  { %1086 = vmatpush.msra.mxu0 %v3334_v27  ;;  %1106 = vmatpush.msra.mxu1 %v3340_v28 }
 0x1d4   :  { %1126 = vmatpush.msrb.mxu2 %v3346_v30  ;;  %1146 = vmatpush.msrb.mxu3 %v3352_v31 }
 0x1d5   :  { %1087 = vmatpush.msra.mxu0 %v3358_v32  ;;  %1107 = vmatpush.msra.mxu1 %v3364_v33 }
 0x1d6   :  { %1127 = vmatpush.msrb.mxu2 %v3370_v34  ;;  %1147 = vmatpush.msrb.mxu3 %v3376_v35 }
 0x1d7   :  { %1088 = vmatpush.msra.mxu0 %v3382_v36  ;;  %1108 = vmatpush.msra.mxu1 %v3388_v37 }
 0x1d8   :  { %1128 = vmatpush.msrb.mxu2 %v3394_v38  ;;  %1148 = vmatpush.msrb.mxu3 %v3400_v39 }
 0x1d9   :  { %1089 = vmatpush.msra.mxu0 %v3406_v40  ;;  %1109 = vmatpush.msra.mxu1 %v3412_v41 }
 0x1da   :  { %1129 = vmatpush.msrb.mxu2 %v3418_v42  ;;  %1149 = vmatpush.msrb.mxu3 %v3424_v43 }
 0x1db   :  { %1090 = vmatpush.msra.mxu0 %v3430_v44  ;;  %1110 = vmatpush.msra.mxu1 %v3436_v45 }
 0x1dc   :  { %1130 = vmatpush.msrb.mxu2 %v3442_v46  ;;  %1150 = vmatpush.msrb.mxu3 %v3448_v48 }
 0x1dd   :  { %1091 = vmatpush.msra.mxu0 %v3454_v49  ;;  %1111 = vmatpush.msra.mxu1 %v3460_v52 }
 0x1de   :  { %1131 = vmatpush.msrb.mxu2 %v3466_v53  ;;  %1151 = vmatpush.msrb.mxu3 %v3472_v56 }
 0x1df   :  { %1092 = vmatpush.msra.mxu0 %v3478_v57  ;;  %1112 = vmatpush.msra.mxu1 %v3484_v63  ;;  %v661_v57 = vld [vmem:[#allocation2 + $0x22] ss:$8 sm:$0xf] }
 0x1e0   :  { %1132 = vmatpush.msrb.mxu2 %v3490_v62  ;;  %1152 = vmatpush.msrb.mxu3 %v3496_v9  ;;  %v659_v9 = vld [vmem:[#allocation2 + $0x2] ss:$8 sm:$0xf] }
 0x1e1   :  { %1093 = vmatpush.msra.mxu0 %v3502_v51  ;;  %1113 = vmatpush.msra.mxu1 %v3508_v55 }
 0x1e2   :  { %1133 = vmatpush.msrb.mxu2 %v3514_v61  ;;  %1153 = vmatpush.msrb.mxu3 %v3520_v0 }
 0x1e3   :  { %1094 = vmatpush.msra.mxu0 %v3526_v3  ;;  %1114 = vmatpush.msra.mxu1 %v3532_v8 }
 0x1e4   :  { %1134 = vmatpush.msrb.mxu2 %v3538_v47  ;;  %1154 = vmatpush.msrb.mxu3 %v3544_v11 }
 0x1e5   :  { %1095 = vmatpush.msra.mxu0 %v3550_v54  ;;  %1115 = vmatpush.msra.mxu1 %v3556_v4  ;;  %v3574_v54 = vld [vmem:[%s4061_s4] sm:$0xff]  ;;  %v3580_v4 = vld [vmem:[%s4061_s4 + $0x8] sm:$0xff] }
 0x1e6   :  { %1135 = vmatpush.msrb.mxu2 %v3562_v6  ;;  %1155 = vmatpush.msrb.mxu3 %v3568_v50  ;;  %4274 = vst [vmem:[#allocation27_spill] sm:$0xff] %v3574_v54  ;;  %v3586_v6 = vld [vmem:[%s4061_s4 + $0x10] sm:$0xff]  ;;  %v3592_v50 = vld [vmem:[%s4061_s4 + $0x18] sm:$0xff] }
 0x1e7   :  { %1096 = vmatpush.msra.mxu0 %v3574_v54  ;;  %4275 = vst [vmem:[#allocation28_spill] sm:$0xff] %v3580_v4  ;;  %1116 = vmatpush.msra.mxu1 %v3580_v4 }
 0x1e8   :  { %4276 = vst [vmem:[#allocation41_spill] sm:$0xff] %v3586_v6  ;;  %1136 = vmatpush.msrb.mxu2 %v3586_v6  ;;  %1156 = vmatpush.msrb.mxu3 %v3592_v50 }
 0x1e9   :  { %4277 = vst [vmem:[#allocation40_spill] sm:$0xff] %v3592_v50 }
 0x244   :  { %v706_v54 = vpop.f32.mrf.mxu1  ;;  %v686_v0 = vpop.f32.mrf.mxu0 }
 0x245   :  { %v753_v11 = vrot.slane %v706_v54, 7 }
 0x247   :  { %v756_v61 = vsel %vm334_vm7, %v686_v0, %v753_v11  ;;  %v759_v55 = vsel %vm340_vm8, %v686_v0, %v753_v11 }
 0x24b   :  { %v726_v47 = vpop.f32.mrf.mxu2  ;;  %v746_v8 = vpop.f32.mrf.mxu3 }
 0x24c   :  { %v754_v3 = vrot.slane %v726_v47, 6  ;;  %v755_v4 = vrot.slane %v746_v8, 5 }
 0x24e   :  { %v757_v6 = vsel %vm336_vm9, %v754_v3, %v755_v4  ;;  %v760_v51 = vsel %vm342_vm10, %v754_v3, %v755_v4  ;;  %v841_v4 = vpop.permute.xlu2 %840 }
 0x24f   :  { %v758_v62 = vsel %vm338_vm11, %v756_v61, %v757_v6  ;;  %v761_v50 = vsel %vm344_vm12, %v759_v55, %v760_v51 }
 0x250   :  { %v762_v63 = vrot.slane %v761_v50, 1  ;;  %v765_v54 = vadd.f32 %v758_v62, %v659_v9 }
 0x252   :  { %v766_v56 = vadd.f32 %v762_v63, %v661_v57  ;;  %v2118_v47 = vmul.f32 -1.442695, %v765_v54  ;;  %v807_v6 = vrot.slane %v765_v54, 3  ;;  %v842_v54 = vperm.slane %v841_v4, 0  ;;  %v4295_v4 = vld [vmem:[#allocation16_spill] sm:$0xff] }
 0x254   :  { %2186 = vpow2.f32 %v2118_v47  ;;  %v2119_v8 = vmul.f32 -1.442695, %v766_v56  ;;  %v808_v62 = vrot.slane %v766_v56, 3  ;;  %vm3602_vm5 = vcmp.eq.s32.totalorder %v842_v54, 1 }
 0x256   :  { %2188 = vpow2.f32 %v2119_v8 }
 0x25a   :  { %v2187_v53 = vpop.eup %2186 }
 0x25b   :  { %v773_v52 = vadd.f32 1.0, %v2187_v53 }
 0x25c   :  { %v2189_v0 = vpop.eup %2188 }
 0x25d   :  { %v774_v11 = vadd.f32 1.0, %v2189_v0  ;;  %2190 = vrcp.f32 %v773_v52  ;;  %v786_v9 = vand.u32 2147483648, %v773_v52  ;;  %v784_v63 = vand.u32 2147483647, %v773_v52 }
 0x25e   :  { %vm780_vm14 = vweird.f32 %v773_v52 }
 0x25f   :  { %2192 = vrcp.f32 %v774_v11  ;;  %v801_v53 = vand.u32 2147483648, %v774_v11  ;;  %v799_v0 = vand.u32 2147483647, %v774_v11  ;;  %v787_v48 = vor.u32 1.1754944e-38, %v786_v9 }
 0x260   :  { %2194 = vtanh.f32 %v807_v6  ;;  %vm785_vm1 = vcmp.eq.f32.partialorder %v784_v63, 8.507059e+37  ;;  %vm795_vm2 = vweird.f32 %v774_v11 }
 0x261   :  { %2196 = vtanh.f32 %v808_v62  ;;  %vm800_vm4 = vcmp.eq.f32.partialorder %v799_v0, 8.507059e+37 }
 0x263   :  { %v2191_v3 = vpop.eup %2190 }
 0x264   :  { %v776_v49 = vmul.f32 %v2191_v3, %v773_v52  ;;  %vm781_vm13 = vweird.f32 %v2191_v3 }
 0x265   :  { %v2193_v61 = vpop.eup %2192  ;;  %vm782_vm0 = vmor %vm780_vm14, %vm781_vm13 }
 0x266   :  { %v777_v51 = vsub.f32 1.0, %v776_v49  ;;  %v791_v55 = vmul.f32 %v2193_v61, %v774_v11  ;;  %vm796_vm15 = vweird.f32 %v2193_v61  ;;  %v2195_v52 = vpop.eup %2194 }
 0x267   :  { %vm797_vm3 = vmor %vm795_vm2, %vm796_vm15  ;;  %v2197_v9 = vpop.eup %2196 }
 0x268   :  { %v778_v57 = vmul.f32 %v2191_v3, %v777_v51  ;;  %v792_v50 = vsub.f32 1.0, %v791_v55  ;;  %v802_v51 = vor.u32 1.1754944e-38, %v801_v53  ;;  %v845_v55 = vpop.permute.xlu2 %844 }
 0x26a   :  { %v779_v47 = vadd.f32 %v2191_v3, %v778_v57  ;;  %v793_v8 = vmul.f32 %v2193_v61, %v792_v50  ;;  %v846_v50 = vperm.slane %v845_v55, 0  ;;  %v4284_v55 = vld [vmem:[#allocation11_spill] sm:$0xff] }
 0x26c   :  { %v783_v46 = vsel %vm782_vm0, %v2191_v3, %v779_v47  ;;  %v794_v49 = vadd.f32 %v2193_v61, %v793_v8  ;;  %vm3607_vm6 = vcmp.eq.s32.totalorder %v846_v50, 1  ;;  %v4288_v50 = vld [vmem:[#allocation13_spill] sm:$0xff]  ;;  %v4291_v3 = vld [vmem:[#allocation14_spill] sm:$0xff] }
 0x26d   :  { %v788_v56 = vsel %vm785_vm1, %v787_v48, %v783_v46 }
 0x26e   :  { %v815_v45 = vrot.slane %v788_v56, 1  ;;  %v798_v6 = vsel %vm797_vm3, %v2193_v61, %v794_v49  ;;  %v821_v62 = vmul.f32 %v2195_v52, %v788_v56  ;;  %v4286_v52 = vld [vmem:[#allocation18_spill] sm:$0xff] }
 0x26f   :  { %v803_v57 = vsel %vm800_vm4, %v802_v51, %v798_v6  ;;  %v4285_v6 = vld [vmem:[#allocation21_spill] sm:$0xff] }
 0x270   :  { %v819_v44 = vmul.f32 %v815_v45, %v3180_v60  ;;  %v816_v43 = vrot.slane %v803_v57, 1  ;;  %v822_v11 = vmul.f32 %v2197_v9, %v803_v57  ;;  %v828_v47 = vrot.slane %v803_v57, 2  ;;  %v4287_v57 = vld [vmem:[#allocation12_spill] sm:$0xff]  ;;  %v4290_v9 = vld [vmem:[#allocation22_spill] sm:$0xff] }
 0x272   :  { %v823_v46 = vadd.f32 %v821_v62, %v819_v44  ;;  %v820_v48 = vmul.f32 %v816_v43, %v3185_v1  ;;  %v827_v44 = vrot.slane %v788_v56, 2  ;;  %v4289_v62 = vld [vmem:[#allocation25_spill] sm:$0xff] }
 0x274   :  { %2198 = vtanh.f32 %v823_v46  ;;  %v3614_v45 = vsel %vm3602_vm5, %v823_v46, %v3180_v60  ;;  %v824_v61 = vadd.f32 %v822_v11, %v820_v48  ;;  %v4292_v46 = vld [vmem:[#allocation15_spill] sm:$0xff]  ;;  %v4293_v48 = vld [vmem:[#allocation29_spill] sm:$0xff]  ;;  %v4294_v11 = vld [vmem:[#allocation26_spill] sm:$0xff] }
 0x276   :  { %2200 = vtanh.f32 %v824_v61  ;;  %v3619_v63 = vsel %vm3607_vm6, %v824_v61, %v3185_v1  ;;  %v4296_v61 = vld [vmem:[#allocation17_spill] sm:$0xff] }
 0x27a   :  { %v2199_v43 = vpop.eup %2198 }
 0x27b   :  { %v831_v53 = vmul.f32 %v2199_v43, %v827_v44  ;;  %v4297_v44 = vld [vmem:[#allocation35_spill] sm:$0xff]  ;;  %v4298_v43 = vld [vmem:[#allocation30_spill] sm:$0xff] }
 0x27c   :  { %v2201_v8 = vpop.eup %2200 }
 0x27d   :  { %v853_v0 = vsel %vm3602_vm5, %v831_v53, 0.0  ;;  %v832_v49 = vmul.f32 %v2201_v8, %v828_v47  ;;  %v3628_v54 = vsel %vm3602_vm5, %v831_v53, %v3199_v17  ;;  %v4282_v17 = vld [vmem:[#allocation31_spill] sm:$0xff]  ;;  %v4300_v47 = vld [vmem:[#allocation20_spill] sm:$0xff]  ;;  %v4301_v8 = vld [vmem:[#allocation37_spill] sm:$0xff] }
 0x27e   :  { %857 = vst [vmem:[#allocation1] ss:$9 sm:$0xff] %v853_v0  ;;  %v4299_v53 = vld [vmem:[#allocation19_spill] sm:$0xff]  ;;  %v4302_v0 = vld [vmem:[#allocation36_spill] sm:$0xff] }
 0x27f   :  { %v854_v60 = vsel %vm3607_vm6, %v832_v49, 0.0  ;;  %v3633_v56 = vsel %vm3607_vm6, %v832_v49, %v3204_v25  ;;  %v4283_v25 = vld [vmem:[#allocation34_spill] sm:$0xff]  ;;  %v4303_v49 = vld [vmem:[#allocation23_spill] sm:$0xff] }
 0x280   :  { %859 = vst [vmem:[#allocation1 + $0x1] ss:$9 sm:$0xff] %v854_v60  ;;  %v4304_v60 = vld [vmem:[#allocation24_spill] sm:$0xff] }
 0x287   :  { %v860_v1 = vld [vmem:[#allocation1] sm:$0xff] }
 0x288   :  { %870 = vst [vmem:[#allocation1] ss:$9 sm:$0xff] %v3628_v54 }
 0x289   :  { %872 = vst [vmem:[#allocation1 + $0x1] ss:$9 sm:$0xff] %v3633_v56 }
 0x28a   :  { %863 = vst [vmem:[#allocation3 + $0x4] sm:$0x3] %v860_v1  ;;  %v4305_v1 = vld [vmem:[#allocation39_spill] sm:$0xff] }
 0x290   :  { %v873_v51 = vld [vmem:[#allocation1] sm:$0xff] }
 0x291   :  { %891 = vmatmul.f32.vlgmr.msrb.gmra.mxu0 %v873_v51  ;;  %911 = vmatmul.f32.vlgmr.msrb.gmra.mxu1 %v873_v51 }
 0x292   :  { %931 = vmatmul.f32.vlgmr.msra.gmra.mxu2 %v873_v51  ;;  %951 = vmatmul.f32.vlgmr.msra.gmra.mxu3 %v873_v51  ;;  %v4306_v51 = vld [vmem:[#allocation38_spill] sm:$0xff] }
 0x293   :  { %1287 = vmatpush.msrb.mxu0 %v3214_v12  ;;  %1307 = vmatpush.msrb.mxu1 %v3220_v2 }
 0x294   :  { %1327 = vmatpush.msra.mxu2 %v3226_v13  ;;  %1347 = vmatpush.msra.mxu3 %v3232_v14 }
 0x295   :  { %1288 = vmatpush.msrb.mxu0 %v3238_v59  ;;  %1308 = vmatpush.msrb.mxu1 %v3244_v29 }
 0x296   :  { %1328 = vmatpush.msra.mxu2 %v3250_v58  ;;  %1348 = vmatpush.msra.mxu3 %v3256_v10 }
 0x297   :  { %1289 = vmatpush.msrb.mxu0 %v3262_v5  ;;  %1309 = vmatpush.msrb.mxu1 %v3268_v7 }
 0x298   :  { %1329 = vmatpush.msra.mxu2 %v3274_v21  ;;  %1349 = vmatpush.msra.mxu3 %v3280_v15 }
 0x299   :  { %1290 = vmatpush.msrb.mxu0 %v3286_v16  ;;  %1310 = vmatpush.msrb.mxu1 %v3292_v18 }
 0x29a   :  { %1330 = vmatpush.msra.mxu2 %v3298_v19  ;;  %1350 = vmatpush.msra.mxu3 %v3304_v20 }
 0x29b   :  { %1291 = vmatpush.msrb.mxu0 %v3310_v22  ;;  %1311 = vmatpush.msrb.mxu1 %v3316_v23 }
 0x29c   :  { %1331 = vmatpush.msra.mxu2 %v3322_v24  ;;  %1351 = vmatpush.msra.mxu3 %v3328_v26 }
 0x29d   :  { %1292 = vmatpush.msrb.mxu0 %v3334_v27  ;;  %1312 = vmatpush.msrb.mxu1 %v3340_v28 }
 0x29e   :  { %1332 = vmatpush.msra.mxu2 %v3346_v30  ;;  %1352 = vmatpush.msra.mxu3 %v3352_v31 }
 0x29f   :  { %1293 = vmatpush.msrb.mxu0 %v3358_v32  ;;  %1313 = vmatpush.msrb.mxu1 %v3364_v33 }
 0x2a0   :  { %1333 = vmatpush.msra.mxu2 %v3370_v34  ;;  %1353 = vmatpush.msra.mxu3 %v3376_v35 }
 0x2a1   :  { %1294 = vmatpush.msrb.mxu0 %v3382_v36  ;;  %1314 = vmatpush.msrb.mxu1 %v3388_v37 }
 0x2a2   :  { %1334 = vmatpush.msra.mxu2 %v3394_v38  ;;  %1354 = vmatpush.msra.mxu3 %v3400_v39 }
 0x2a3   :  { %1295 = vmatpush.msrb.mxu0 %v3406_v40  ;;  %1315 = vmatpush.msrb.mxu1 %v3412_v41 }
 0x2a4   :  { %1335 = vmatpush.msra.mxu2 %v3418_v42  ;;  %1355 = vmatpush.msra.mxu3 %v4282_v17 }
 0x2a5   :  { %1296 = vmatpush.msrb.mxu0 %v4283_v25  ;;  %1316 = vmatpush.msrb.mxu1 %v4284_v55 }
 0x2a6   :  { %1336 = vmatpush.msra.mxu2 %v4285_v6  ;;  %1356 = vmatpush.msra.mxu3 %v4286_v52 }
 0x2a7   :  { %1297 = vmatpush.msrb.mxu0 %v4287_v57  ;;  %1317 = vmatpush.msrb.mxu1 %v4288_v50 }
 0x2a8   :  { %1337 = vmatpush.msra.mxu2 %v4289_v62  ;;  %1357 = vmatpush.msra.mxu3 %v4290_v9 }
 0x2a9   :  { %1298 = vmatpush.msrb.mxu0 %v4291_v3  ;;  %1318 = vmatpush.msrb.mxu1 %v4292_v46  ;;  %v867_v3 = vld [vmem:[#allocation2 + $0x23] ss:$8 sm:$0xf] }
 0x2aa   :  { %1338 = vmatpush.msra.mxu2 %v4293_v48  ;;  %1358 = vmatpush.msra.mxu3 %v4294_v11 }
 0x2ab   :  { %1299 = vmatpush.msrb.mxu0 %v4295_v4  ;;  %1319 = vmatpush.msrb.mxu1 %v4296_v61  ;;  %v4307_v61 = vld [vmem:[#allocation27_spill] sm:$0xff] }
 0x2ac   :  { %1339 = vmatpush.msra.mxu2 %v4297_v44  ;;  %1359 = vmatpush.msra.mxu3 %v4298_v43  ;;  %v4308_v44 = vld [vmem:[#allocation28_spill] sm:$0xff]  ;;  %v4309_v43 = vld [vmem:[#allocation41_spill] sm:$0xff] }
 0x2ad   :  { %1300 = vmatpush.msrb.mxu0 %v4299_v53  ;;  %1320 = vmatpush.msrb.mxu1 %v4300_v47  ;;  %v4310_v53 = vld [vmem:[#allocation40_spill] sm:$0xff] }
 0x2ae   :  { %1340 = vmatpush.msra.mxu2 %v4301_v8  ;;  %1360 = vmatpush.msra.mxu3 %v4302_v0 }
 0x2af   :  { %1301 = vmatpush.msrb.mxu0 %v4303_v49  ;;  %1321 = vmatpush.msrb.mxu1 %v4304_v60 }
 0x2b0   :  { %1341 = vmatpush.msra.mxu2 %v4305_v1  ;;  %1361 = vmatpush.msra.mxu3 %v4306_v51 }
 0x2b1   :  { %1302 = vmatpush.msrb.mxu0 %v4307_v61  ;;  %1322 = vmatpush.msrb.mxu1 %v4308_v44  ;;  %v865_v44 = vld [vmem:[#allocation2 + $0x3] ss:$8 sm:$0xf] }
 0x2b2   :  { %1342 = vmatpush.msra.mxu2 %v4309_v43  ;;  %1362 = vmatpush.msra.mxu3 %v4310_v53 }
 0x30e   :  { %v912_v47 = vpop.f32.mrf.mxu1  ;;  %v892_v48 = vpop.f32.mrf.mxu0 }
 0x30f   :  { %v959_v8 = vrot.slane %v912_v47, 7 }
 0x311   :  { %v962_v60 = vsel %vm334_vm7, %v892_v48, %v959_v8  ;;  %v965_v1 = vsel %vm340_vm8, %v892_v48, %v959_v8 }
 0x315   :  { %v932_v4 = vpop.f32.mrf.mxu2  ;;  %v952_v0 = vpop.f32.mrf.mxu3 }
 0x316   :  { %v960_v11 = vrot.slane %v932_v4, 6  ;;  %v961_v49 = vrot.slane %v952_v0, 5 }
 0x318   :  { %v963_v51 = vsel %vm336_vm9, %v960_v11, %v961_v49  ;;  %v966_v61 = vsel %vm342_vm10, %v960_v11, %v961_v49 }
 0x319   :  { %v964_v43 = vsel %vm338_vm11, %v962_v60, %v963_v51  ;;  %v967_v53 = vsel %vm344_vm12, %v965_v1, %v966_v61 }
 0x31a   :  { %v968_v46 = vrot.slane %v967_v53, 1  ;;  %v971_v47 = vadd.f32 %v964_v43, %v865_v44 }
 0x31c   :  { %v972_v9 = vadd.f32 %v968_v46, %v867_v3  ;;  %v2122_v4 = vmul.f32 -1.442695, %v971_v47  ;;  %v1013_v60 = vrot.slane %v971_v47, 3 }
 0x31e   :  { %2202 = vpow2.f32 %v2122_v4  ;;  %v2123_v0 = vmul.f32 -1.442695, %v972_v9  ;;  %v1014_v44 = vrot.slane %v972_v9, 3 }
 0x320   :  { %2204 = vpow2.f32 %v2123_v0 }
 0x324   :  { %v2203_v62 = vpop.eup %2202 }
 0x325   :  { %v979_v50 = vadd.f32 1.0, %v2203_v62 }
 0x326   :  { %v2205_v48 = vpop.eup %2204 }
 0x327   :  { %v980_v8 = vadd.f32 1.0, %v2205_v48  ;;  %2206 = vrcp.f32 %v979_v50  ;;  %v992_v53 = vand.u32 2147483648, %v979_v50  ;;  %v990_v3 = vand.u32 2147483647, %v979_v50 }
 0x328   :  { %vm986_vm14 = vweird.f32 %v979_v50 }
 0x329   :  { %2208 = vrcp.f32 %v980_v8  ;;  %v1007_v1 = vand.u32 2147483648, %v980_v8  ;;  %v1005_v0 = vand.u32 2147483647, %v980_v8  ;;  %v993_v48 = vor.u32 1.1754944e-38, %v992_v53 }
 0x32a   :  { %2210 = vtanh.f32 %v1013_v60  ;;  %vm991_vm1 = vcmp.eq.f32.partialorder %v990_v3, 8.507059e+37  ;;  %vm1001_vm2 = vweird.f32 %v980_v8 }
 0x32b   :  { %2212 = vtanh.f32 %v1014_v44  ;;  %v1008_v9 = vor.u32 1.1754944e-38, %v1007_v1  ;;  %vm1006_vm4 = vcmp.eq.f32.partialorder %v1005_v0, 8.507059e+37  ;;  %v4325_v1 = vld [vmem:[#allocation16_spill] sm:$0xff] }
 0x32d   :  { %v2207_v11 = vpop.eup %2206 }
 0x32e   :  { %v982_v49 = vmul.f32 %v2207_v11, %v979_v50  ;;  %vm987_vm13 = vweird.f32 %v2207_v11 }
 0x32f   :  { %v2209_v57 = vpop.eup %2208  ;;  %vm988_vm0 = vmor %vm986_vm14, %vm987_vm13 }
 0x330   :  { %v983_v51 = vsub.f32 1.0, %v982_v49  ;;  %v997_v61 = vmul.f32 %v2209_v57, %v980_v8  ;;  %vm1002_vm15 = vweird.f32 %v2209_v57 }
 0x331   :  { %vm1003_vm3 = vmor %vm1001_vm2, %vm1002_vm15 }
 0x332   :  { %v984_v43 = vmul.f32 %v2207_v11, %v983_v51  ;;  %v998_v46 = vsub.f32 1.0, %v997_v61  ;;  %v1047_v51 = vpop.permute.xlu0 %1046  ;;  %v2211_v61 = vpop.eup %2210 }
 0x333   :  { %v1048_v60 = vperm.slane %v1047_v51, 0  ;;  %v2213_v44 = vpop.eup %2212 }
 0x334   :  { %v985_v62 = vadd.f32 %v2207_v11, %v984_v43  ;;  %v999_v4 = vmul.f32 %v2209_v57, %v998_v46  ;;  %v1051_v46 = vpop.permute.xlu1 %1050 }
 0x335   :  { %vm3709_vm5 = vcmp.eq.s32.totalorder %v1048_v60, 1  ;;  %v4316_v60 = vld [vmem:[#allocation18_spill] sm:$0xff] }
 0x336   :  { %v989_v52 = vsel %vm988_vm0, %v2207_v11, %v985_v62  ;;  %v1000_v47 = vadd.f32 %v2209_v57, %v999_v4  ;;  %v1052_v11 = vperm.slane %v1051_v46, 0  ;;  %v4318_v46 = vld [vmem:[#allocation13_spill] sm:$0xff] }
 0x337   :  { %v994_v49 = vsel %vm991_vm1, %v993_v48, %v989_v52 }
 0x338   :  { %v1004_v6 = vsel %vm1003_vm3, %v2209_v57, %v1000_v47  ;;  %v1021_v50 = vrot.slane %v994_v49, 1  ;;  %v1027_v53 = vmul.f32 %v2211_v61, %v994_v49  ;;  %vm1054_vm6 = vcmp.eq.s32.totalorder %v1052_v11, 1  ;;  %v4315_v61 = vld [vmem:[#allocation21_spill] sm:$0xff]  ;;  %v4321_v11 = vld [vmem:[#allocation14_spill] sm:$0xff] }
 0x339   :  { %v1009_v43 = vsel %vm1006_vm4, %v1008_v9, %v1004_v6  ;;  %v1033_v4 = vrot.slane %v994_v49, 2 }
 0x33a   :  { %v1022_v55 = vrot.slane %v1009_v43, 1  ;;  %v1025_v25 = vmul.f32 %v1021_v50, %v3614_v45  ;;  %v1028_v8 = vmul.f32 %v2213_v44, %v1009_v43  ;;  %v1034_v0 = vrot.slane %v1009_v43, 2  ;;  %v4317_v43 = vld [vmem:[#allocation12_spill] sm:$0xff]  ;;  %v4320_v44 = vld [vmem:[#allocation22_spill] sm:$0xff] }
 0x33c   :  { %v1026_v3 = vmul.f32 %v1022_v55, %v3619_v63  ;;  %v1029_v52 = vadd.f32 %v1027_v53, %v1025_v25  ;;  %v4319_v53 = vld [vmem:[#allocation25_spill] sm:$0xff] }
 0x33e   :  { %v1030_v57 = vadd.f32 %v1028_v8, %v1026_v3  ;;  %2214 = vtanh.f32 %v1029_v52  ;;  %v3716_v6 = vsel %vm3709_vm5, %v1029_v52, %v3614_v45  ;;  %v4322_v3 = vld [vmem:[#allocation15_spill] sm:$0xff]  ;;  %v4323_v8 = vld [vmem:[#allocation29_spill] sm:$0xff]  ;;  %v4324_v52 = vld [vmem:[#allocation26_spill] sm:$0xff] }
 0x340   :  { %2216 = vtanh.f32 %v1030_v57  ;;  %v3719_v62 = vsel %vm1054_vm6, %v1030_v57, %v3619_v63  ;;  %v4326_v57 = vld [vmem:[#allocation17_spill] sm:$0xff] }
 0x344   :  { %v2215_v55 = vpop.eup %2214 }
 0x345   :  { %v1037_v25 = vmul.f32 %v2215_v55, %v1033_v4  ;;  %v4327_v4 = vld [vmem:[#allocation35_spill] sm:$0xff]  ;;  %v4328_v55 = vld [vmem:[#allocation30_spill] sm:$0xff] }
 0x346   :  { %v2217_v48 = vpop.eup %2216 }
 0x347   :  { %v1038_v47 = vmul.f32 %v2217_v48, %v1034_v0  ;;  %v1059_v9 = vsel %vm3709_vm5, %v1037_v25, 0.0  ;;  %v3726_v45 = vsel %vm3709_vm5, %v1037_v25, %v3628_v54  ;;  %v4313_v54 = vld [vmem:[#allocation34_spill] sm:$0xff]  ;;  %v4329_v0 = vld [vmem:[#allocation19_spill] sm:$0xff]  ;;  %v4330_v25 = vld [vmem:[#allocation20_spill] sm:$0xff] }
 0x348   :  { %1063 = vst [vmem:[#allocation1] ss:$9 sm:$0xff] %v1059_v9  ;;  %v4331_v48 = vld [vmem:[#allocation37_spill] sm:$0xff]  ;;  %v4333_v9 = vld [vmem:[#allocation23_spill] sm:$0xff] }
 0x349   :  { %v1060_v51 = vsel %vm1054_vm6, %v1038_v47, 0.0  ;;  %v3729_v63 = vsel %vm1054_vm6, %v1038_v47, %v3633_v56  ;;  %v4314_v56 = vld [vmem:[#allocation11_spill] sm:$0xff]  ;;  %v4332_v47 = vld [vmem:[#allocation36_spill] sm:$0xff] }
 0x34a   :  { %1065 = vst [vmem:[#allocation1 + $0x1] ss:$9 sm:$0xff] %v1060_v51  ;;  %v4334_v51 = vld [vmem:[#allocation24_spill] sm:$0xff] }
 0x351   :  { %v1066_v50 = vld [vmem:[#allocation1] sm:$0xff] }
 0x352   :  { %1076 = vst [vmem:[#allocation1] ss:$9 sm:$0xff] %v3726_v45 }
 0x353   :  { %1078 = vst [vmem:[#allocation1 + $0x1] ss:$9 sm:$0xff] %v3729_v63 }
 0x354   :  { %1069 = vst [vmem:[#allocation3 + $0x6] sm:$0x3] %v1066_v50  ;;  %v4335_v50 = vld [vmem:[#allocation39_spill] sm:$0xff] }
 0x35a   :  { %v1079_v49 = vld [vmem:[#allocation1] sm:$0xff] }
 0x35b   :  { %1097 = vmatmul.f32.vlgmr.msra.gmra.mxu0 %v1079_v49  ;;  %1117 = vmatmul.f32.vlgmr.msra.gmra.mxu1 %v1079_v49 }
 0x35c   :  { %1137 = vmatmul.f32.vlgmr.msrb.gmra.mxu2 %v1079_v49  ;;  %1157 = vmatmul.f32.vlgmr.msrb.gmra.mxu3 %v1079_v49  ;;  %v4336_v49 = vld [vmem:[#allocation38_spill] sm:$0xff] }
 0x35d   :  { %1493 = vmatpush.msra.mxu0 %v3214_v12  ;;  %1513 = vmatpush.msra.mxu1 %v3220_v2 }
 0x35e   :  { %1533 = vmatpush.msrb.mxu2 %v3226_v13  ;;  %1553 = vmatpush.msrb.mxu3 %v3232_v14 }
 0x35f   :  { %1494 = vmatpush.msra.mxu0 %v3238_v59  ;;  %1514 = vmatpush.msra.mxu1 %v3244_v29 }
 0x360   :  { %1534 = vmatpush.msrb.mxu2 %v3250_v58  ;;  %1554 = vmatpush.msrb.mxu3 %v3256_v10 }
 0x361   :  { %1495 = vmatpush.msra.mxu0 %v3262_v5  ;;  %1515 = vmatpush.msra.mxu1 %v3268_v7 }
 0x362   :  { %1535 = vmatpush.msrb.mxu2 %v3274_v21  ;;  %1555 = vmatpush.msrb.mxu3 %v3280_v15 }
 0x363   :  { %1496 = vmatpush.msra.mxu0 %v3286_v16  ;;  %1516 = vmatpush.msra.mxu1 %v3292_v18 }
 0x364   :  { %1536 = vmatpush.msrb.mxu2 %v3298_v19  ;;  %1556 = vmatpush.msrb.mxu3 %v3304_v20 }
 0x365   :  { %1497 = vmatpush.msra.mxu0 %v3310_v22  ;;  %1517 = vmatpush.msra.mxu1 %v3316_v23 }
 0x366   :  { %1537 = vmatpush.msrb.mxu2 %v3322_v24  ;;  %1557 = vmatpush.msrb.mxu3 %v3328_v26 }
 0x367   :  { %1498 = vmatpush.msra.mxu0 %v3334_v27  ;;  %1518 = vmatpush.msra.mxu1 %v3340_v28 }
 0x368   :  { %1538 = vmatpush.msrb.mxu2 %v3346_v30  ;;  %1558 = vmatpush.msrb.mxu3 %v3352_v31 }
 0x369   :  { %1499 = vmatpush.msra.mxu0 %v3358_v32  ;;  %1519 = vmatpush.msra.mxu1 %v3364_v33 }
 0x36a   :  { %1539 = vmatpush.msrb.mxu2 %v3370_v34  ;;  %1559 = vmatpush.msrb.mxu3 %v3376_v35 }
 0x36b   :  { %1500 = vmatpush.msra.mxu0 %v3382_v36  ;;  %1520 = vmatpush.msra.mxu1 %v3388_v37 }
 0x36c   :  { %1540 = vmatpush.msrb.mxu2 %v3394_v38  ;;  %1560 = vmatpush.msrb.mxu3 %v3400_v39 }
 0x36d   :  { %1501 = vmatpush.msra.mxu0 %v3406_v40  ;;  %1521 = vmatpush.msra.mxu1 %v3412_v41 }
 0x36e   :  { %1541 = vmatpush.msrb.mxu2 %v3418_v42  ;;  %1561 = vmatpush.msrb.mxu3 %v4282_v17 }
 0x36f   :  { %1502 = vmatpush.msra.mxu0 %v4313_v54  ;;  %1522 = vmatpush.msra.mxu1 %v4314_v56 }
 0x370   :  { %1542 = vmatpush.msrb.mxu2 %v4315_v61  ;;  %1562 = vmatpush.msrb.mxu3 %v4316_v60 }
 0x371   :  { %1503 = vmatpush.msra.mxu0 %v4317_v43  ;;  %1523 = vmatpush.msra.mxu1 %v4318_v46 }
 0x372   :  { %1543 = vmatpush.msrb.mxu2 %v4319_v53  ;;  %1563 = vmatpush.msrb.mxu3 %v4320_v44 }
 0x373   :  { %1504 = vmatpush.msra.mxu0 %v4321_v11  ;;  %1524 = vmatpush.msra.mxu1 %v4322_v3  ;;  %v1073_v11 = vld [vmem:[#allocation2 + $0x24] ss:$8 sm:$0xf] }
 0x374   :  { %1544 = vmatpush.msrb.mxu2 %v4323_v8  ;;  %1564 = vmatpush.msrb.mxu3 %v4324_v52 }
 0x375   :  { %1505 = vmatpush.msra.mxu0 %v4325_v1  ;;  %1525 = vmatpush.msra.mxu1 %v4326_v57  ;;  %v4337_v57 = vld [vmem:[#allocation27_spill] sm:$0xff] }
 0x376   :  { %1545 = vmatpush.msrb.mxu2 %v4327_v4  ;;  %1565 = vmatpush.msrb.mxu3 %v4328_v55  ;;  %v4338_v4 = vld [vmem:[#allocation28_spill] sm:$0xff]  ;;  %v4339_v55 = vld [vmem:[#allocation41_spill] sm:$0xff] }
 0x377   :  { %1506 = vmatpush.msra.mxu0 %v4329_v0  ;;  %1526 = vmatpush.msra.mxu1 %v4330_v25  ;;  %v4340_v0 = vld [vmem:[#allocation40_spill] sm:$0xff] }
 0x378   :  { %1546 = vmatpush.msrb.mxu2 %v4331_v48  ;;  %1566 = vmatpush.msrb.mxu3 %v4332_v47 }
 0x379   :  { %1507 = vmatpush.msra.mxu0 %v4333_v9  ;;  %1527 = vmatpush.msra.mxu1 %v4334_v51 }
 0x37a   :  { %1547 = vmatpush.msrb.mxu2 %v4335_v50  ;;  %1567 = vmatpush.msrb.mxu3 %v4336_v49 }
 0x37b   :  { %1508 = vmatpush.msra.mxu0 %v4337_v57  ;;  %1528 = vmatpush.msra.mxu1 %v4338_v4  ;;  %v1071_v4 = vld [vmem:[#allocation2 + $0x4] ss:$8 sm:$0xf] }
 0x37c   :  { %1548 = vmatpush.msrb.mxu2 %v4339_v55  ;;  %1568 = vmatpush.msrb.mxu3 %v4340_v0 }
 0x3d8   :  { %v1118_v25 = vpop.f32.mrf.mxu1  ;;  %v1098_v8 = vpop.f32.mrf.mxu0 }
 0x3d9   :  { %v1165_v48 = vrot.slane %v1118_v25, 7 }
 0x3db   :  { %v1168_v51 = vsel %vm334_vm7, %v1098_v8, %v1165_v48  ;;  %v1171_v50 = vsel %vm340_vm8, %v1098_v8, %v1165_v48 }
 0x3df   :  { %v1138_v1 = vpop.f32.mrf.mxu2  ;;  %v1158_v47 = vpop.f32.mrf.mxu3 }
 0x3e0   :  { %v1166_v52 = vrot.slane %v1138_v1, 6  ;;  %v1167_v9 = vrot.slane %v1158_v47, 5 }
 0x3e2   :  { %v1169_v49 = vsel %vm336_vm9, %v1166_v52, %v1167_v9  ;;  %v1172_v57 = vsel %vm342_vm10, %v1166_v52, %v1167_v9 }
 0x3e3   :  { %v1170_v55 = vsel %vm338_vm11, %v1168_v51, %v1169_v49  ;;  %v1173_v0 = vsel %vm344_vm12, %v1171_v50, %v1172_v57 }
 0x3e4   :  { %v1174_v3 = vrot.slane %v1173_v0, 1  ;;  %v1177_v25 = vadd.f32 %v1170_v55, %v1071_v4 }
 0x3e6   :  { %v1178_v44 = vadd.f32 %v1174_v3, %v1073_v11  ;;  %v2126_v1 = vmul.f32 -1.442695, %v1177_v25  ;;  %v1219_v51 = vrot.slane %v1177_v25, 3 }
 0x3e8   :  { %2218 = vpow2.f32 %v2126_v1  ;;  %v2127_v47 = vmul.f32 -1.442695, %v1178_v44  ;;  %v1220_v4 = vrot.slane %v1178_v44, 3 }
 0x3ea   :  { %2220 = vpow2.f32 %v2127_v47 }
 0x3ee   :  { %v2219_v53 = vpop.eup %2218 }
 0x3ef   :  { %v1185_v46 = vadd.f32 1.0, %v2219_v53 }
 0x3f0   :  { %v2221_v8 = vpop.eup %2220 }
 0x3f1   :  { %v1186_v48 = vadd.f32 1.0, %v2221_v8  ;;  %2222 = vrcp.f32 %v1185_v46  ;;  %v1198_v0 = vand.u32 2147483648, %v1185_v46  ;;  %v1196_v11 = vand.u32 2147483647, %v1185_v46 }
 0x3f2   :  { %vm1192_vm14 = vweird.f32 %v1185_v46 }
 0x3f3   :  { %2224 = vrcp.f32 %v1186_v48  ;;  %v1213_v50 = vand.u32 2147483648, %v1186_v48  ;;  %v1211_v47 = vand.u32 2147483647, %v1186_v48  ;;  %v1199_v8 = vor.u32 1.1754944e-38, %v1198_v0 }
 0x3f4   :  { %2226 = vtanh.f32 %v1219_v51  ;;  %vm1197_vm1 = vcmp.eq.f32.partialorder %v1196_v11, 8.507059e+37  ;;  %vm1207_vm2 = vweird.f32 %v1186_v48 }
 0x3f5   :  { %2228 = vtanh.f32 %v1220_v4  ;;  %v1214_v44 = vor.u32 1.1754944e-38, %v1213_v50  ;;  %vm1212_vm4 = vcmp.eq.f32.partialorder %v1211_v47, 8.507059e+37 }
 0x3f7   :  { %v2223_v52 = vpop.eup %2222 }
 0x3f8   :  { %v1188_v9 = vmul.f32 %v2223_v52, %v1185_v46  ;;  %vm1193_vm13 = vweird.f32 %v2223_v52 }
 0x3f9   :  { %v2225_v43 = vpop.eup %2224  ;;  %vm1194_vm0 = vmor %vm1192_vm14, %vm1193_vm13 }
 0x3fa   :  { %v1189_v49 = vsub.f32 1.0, %v1188_v9  ;;  %v1203_v57 = vmul.f32 %v2225_v43, %v1186_v48  ;;  %vm1208_vm15 = vweird.f32 %v2225_v43 }
 0x3fb   :  { %vm1209_vm3 = vmor %vm1207_vm2, %vm1208_vm15 }
 0x3fc   :  { %v1190_v55 = vmul.f32 %v2223_v52, %v1189_v49  ;;  %v1204_v3 = vsub.f32 1.0, %v1203_v57  ;;  %v1253_v49 = vpop.permute.xlu2 %1252  ;;  %v2227_v57 = vpop.eup %2226 }
 0x3fd   :  { %v1254_v51 = vperm.slane %v1253_v49, 0  ;;  %v2229_v4 = vpop.eup %2228 }
 0x3fe   :  { %v1191_v53 = vadd.f32 %v2223_v52, %v1190_v55  ;;  %v1205_v1 = vmul.f32 %v2225_v43, %v1204_v3  ;;  %v1257_v3 = vpop.permute.xlu0 %1256 }
 0x3ff   :  { %vm3805_vm5 = vcmp.eq.s32.totalorder %v1254_v51, 1  ;;  %v1277_v51 = vld [vmem:[#allocation2 + $0x5] ss:$8 sm:$0xf] }
 0x400   :  { %v1195_v60 = vsel %vm1194_vm0, %v2223_v52, %v1191_v53  ;;  %v1206_v25 = vadd.f32 %v2225_v43, %v1205_v1  ;;  %v1258_v52 = vperm.slane %v1257_v3, 0 }
 0x401   :  { %v1200_v9 = vsel %vm1197_vm1, %v1199_v8, %v1195_v60 }
 0x402   :  { %v1210_v61 = vsel %vm1209_vm3, %v2225_v43, %v1206_v25  ;;  %v1227_v46 = vrot.slane %v1200_v9, 1  ;;  %v1233_v0 = vmul.f32 %v2227_v57, %v1200_v9  ;;  %vm1260_vm6 = vcmp.eq.s32.totalorder %v1258_v52, 1  ;;  %v1279_v52 = vld [vmem:[#allocation2 + $0x25] ss:$8 sm:$0xf] }
 0x403   :  { %v1215_v55 = vsel %vm1212_vm4, %v1214_v44, %v1210_v61  ;;  %v1239_v1 = vrot.slane %v1200_v9, 2 }
 0x404   :  { %v1228_v56 = vrot.slane %v1215_v55, 1  ;;  %v1231_v54 = vmul.f32 %v1227_v46, %v3716_v6  ;;  %v1234_v48 = vmul.f32 %v2229_v4, %v1215_v55  ;;  %v1240_v47 = vrot.slane %v1215_v55, 2 }
 0x406   :  { %v1232_v11 = vmul.f32 %v1228_v56, %v3719_v62  ;;  %v1235_v60 = vadd.f32 %v1233_v0, %v1231_v54 }
 0x408   :  { %v1236_v43 = vadd.f32 %v1234_v48, %v1232_v11  ;;  %2230 = vtanh.f32 %v1235_v60  ;;  %v3812_v61 = vsel %vm3805_vm5, %v1235_v60, %v3716_v6 }
 0x40a   :  { %2232 = vtanh.f32 %v1236_v43  ;;  %v3815_v53 = vsel %vm1260_vm6, %v1236_v43, %v3719_v62 }
 0x40e   :  { %v2231_v56 = vpop.eup %2230 }
 0x40f   :  { %v1243_v54 = vmul.f32 %v2231_v56, %v1239_v1 }
 0x410   :  { %v2233_v8 = vpop.eup %2232 }
 0x411   :  { %v1244_v25 = vmul.f32 %v2233_v8, %v1240_v47  ;;  %v1265_v44 = vsel %vm3805_vm5, %v1243_v54, 0.0  ;;  %v3822_v6 = vsel %vm3805_vm5, %v1243_v54, %v3726_v45 }
 0x412   :  { %1269 = vst [vmem:[#allocation1] ss:$9 sm:$0xff] %v1265_v44 }
 0x413   :  { %v1266_v49 = vsel %vm1260_vm6, %v1244_v25, 0.0  ;;  %v3825_v62 = vsel %vm1260_vm6, %v1244_v25, %v3729_v63 }
 0x414   :  { %1271 = vst [vmem:[#allocation1 + $0x1] ss:$9 sm:$0xff] %v1266_v49 }
 0x41b   :  { %v1272_v46 = vld [vmem:[#allocation1] sm:$0xff] }
 0x41c   :  { %1282 = vst [vmem:[#allocation1] ss:$9 sm:$0xff] %v3822_v6 }
 0x41d   :  { %1284 = vst [vmem:[#allocation1 + $0x1] ss:$9 sm:$0xff] %v3825_v62 }
 0x41e   :  { %1275 = vst [vmem:[#allocation3 + $0x8] sm:$0x3] %v1272_v46 }
 0x424   :  { %v1285_v9 = vld [vmem:[#allocation1] sm:$0xff] }
 0x425   :  { %1303 = vmatmul.f32.vlgmr.msrb.gmra.mxu0 %v1285_v9  ;;  %1323 = vmatmul.f32.vlgmr.msrb.gmra.mxu1 %v1285_v9 }
 0x426   :  { %1343 = vmatmul.f32.vlgmr.msra.gmra.mxu2 %v1285_v9  ;;  %1363 = vmatmul.f32.vlgmr.msra.gmra.mxu3 %v1285_v9 }
 0x427   :  { %1699 = vmatpush.msrb.mxu0 %v3214_v12  ;;  %1719 = vmatpush.msrb.mxu1 %v3220_v2  ;;  %v4343_v12 = vld [vmem:[#allocation34_spill] sm:$0xff]  ;;  %v4344_v2 = vld [vmem:[#allocation11_spill] sm:$0xff] }
 0x428   :  { %1739 = vmatpush.msra.mxu2 %v3226_v13  ;;  %1759 = vmatpush.msra.mxu3 %v3232_v14  ;;  %v4345_v13 = vld [vmem:[#allocation21_spill] sm:$0xff]  ;;  %v4346_v14 = vld [vmem:[#allocation18_spill] sm:$0xff] }
 0x429   :  { %1700 = vmatpush.msrb.mxu0 %v3238_v59  ;;  %1720 = vmatpush.msrb.mxu1 %v3244_v29  ;;  %v4347_v59 = vld [vmem:[#allocation12_spill] sm:$0xff]  ;;  %v4348_v29 = vld [vmem:[#allocation13_spill] sm:$0xff] }
 0x42a   :  { %1740 = vmatpush.msra.mxu2 %v3250_v58  ;;  %1760 = vmatpush.msra.mxu3 %v3256_v10  ;;  %v4349_v58 = vld [vmem:[#allocation25_spill] sm:$0xff]  ;;  %v4350_v10 = vld [vmem:[#allocation22_spill] sm:$0xff] }
 0x42b   :  { %1701 = vmatpush.msrb.mxu0 %v3262_v5  ;;  %1721 = vmatpush.msrb.mxu1 %v3268_v7  ;;  %v4351_v5 = vld [vmem:[#allocation14_spill] sm:$0xff]  ;;  %v4352_v7 = vld [vmem:[#allocation15_spill] sm:$0xff] }
 0x42c   :  { %1741 = vmatpush.msra.mxu2 %v3274_v21  ;;  %1761 = vmatpush.msra.mxu3 %v3280_v15  ;;  %v4353_v21 = vld [vmem:[#allocation29_spill] sm:$0xff]  ;;  %v4354_v15 = vld [vmem:[#allocation26_spill] sm:$0xff] }
 0x42d   :  { %1702 = vmatpush.msrb.mxu0 %v3286_v16  ;;  %1722 = vmatpush.msrb.mxu1 %v3292_v18  ;;  %v4355_v16 = vld [vmem:[#allocation16_spill] sm:$0xff]  ;;  %v4356_v18 = vld [vmem:[#allocation17_spill] sm:$0xff] }
 0x42e   :  { %1742 = vmatpush.msra.mxu2 %v3298_v19  ;;  %1762 = vmatpush.msra.mxu3 %v3304_v20  ;;  %v4357_v19 = vld [vmem:[#allocation35_spill] sm:$0xff]  ;;  %v4358_v20 = vld [vmem:[#allocation30_spill] sm:$0xff] }
 0x42f   :  { %1703 = vmatpush.msrb.mxu0 %v3310_v22  ;;  %1723 = vmatpush.msrb.mxu1 %v3316_v23  ;;  %v4359_v22 = vld [vmem:[#allocation19_spill] sm:$0xff]  ;;  %v4360_v23 = vld [vmem:[#allocation20_spill] sm:$0xff] }
 0x430   :  { %1743 = vmatpush.msra.mxu2 %v3322_v24  ;;  %1763 = vmatpush.msra.mxu3 %v3328_v26  ;;  %v4361_v24 = vld [vmem:[#allocation37_spill] sm:$0xff]  ;;  %v4362_v26 = vld [vmem:[#allocation36_spill] sm:$0xff] }
 0x431   :  { %1704 = vmatpush.msrb.mxu0 %v3334_v27  ;;  %1724 = vmatpush.msrb.mxu1 %v3340_v28  ;;  %v4363_v27 = vld [vmem:[#allocation23_spill] sm:$0xff]  ;;  %v4364_v28 = vld [vmem:[#allocation24_spill] sm:$0xff] }
 0x432   :  { %1744 = vmatpush.msra.mxu2 %v3346_v30  ;;  %1764 = vmatpush.msra.mxu3 %v3352_v31  ;;  %v4365_v30 = vld [vmem:[#allocation39_spill] sm:$0xff]  ;;  %v4366_v31 = vld [vmem:[#allocation38_spill] sm:$0xff] }
 0x433   :  { %1705 = vmatpush.msrb.mxu0 %v3358_v32  ;;  %1725 = vmatpush.msrb.mxu1 %v3364_v33  ;;  %v4367_v32 = vld [vmem:[#allocation27_spill] sm:$0xff]  ;;  %v4368_v33 = vld [vmem:[#allocation28_spill] sm:$0xff] }
 0x434   :  { %1745 = vmatpush.msra.mxu2 %v3370_v34  ;;  %1765 = vmatpush.msra.mxu3 %v3376_v35  ;;  %v4369_v34 = vld [vmem:[#allocation41_spill] sm:$0xff]  ;;  %v4370_v35 = vld [vmem:[#allocation40_spill] sm:$0xff] }
 0x435   :  { %1706 = vmatpush.msrb.mxu0 %v3382_v36  ;;  %1726 = vmatpush.msrb.mxu1 %v3388_v37 }
 0x436   :  { %1746 = vmatpush.msra.mxu2 %v3394_v38  ;;  %1766 = vmatpush.msra.mxu3 %v3400_v39 }
 0x437   :  { %1707 = vmatpush.msrb.mxu0 %v3406_v40  ;;  %1727 = vmatpush.msrb.mxu1 %v3412_v41 }
 0x438   :  { %1747 = vmatpush.msra.mxu2 %v3418_v42  ;;  %1767 = vmatpush.msra.mxu3 %v4282_v17 }
 0x439   :  { %1708 = vmatpush.msrb.mxu0 %v4343_v12  ;;  %1728 = vmatpush.msrb.mxu1 %v4344_v2 }
 0x43a   :  { %1748 = vmatpush.msra.mxu2 %v4345_v13  ;;  %1768 = vmatpush.msra.mxu3 %v4346_v14 }
 0x43b   :  { %1709 = vmatpush.msrb.mxu0 %v4347_v59  ;;  %1729 = vmatpush.msrb.mxu1 %v4348_v29 }
 0x43c   :  { %1749 = vmatpush.msra.mxu2 %v4349_v58  ;;  %1769 = vmatpush.msra.mxu3 %v4350_v10 }
 0x43d   :  { %1710 = vmatpush.msrb.mxu0 %v4351_v5  ;;  %1730 = vmatpush.msrb.mxu1 %v4352_v7 }
 0x43e   :  { %1750 = vmatpush.msra.mxu2 %v4353_v21  ;;  %1770 = vmatpush.msra.mxu3 %v4354_v15 }
 0x43f   :  { %1711 = vmatpush.msrb.mxu0 %v4355_v16  ;;  %1731 = vmatpush.msrb.mxu1 %v4356_v18  ;;  %v1459_v16 = vpop.permute.xlu1 %1458 }
 0x440   :  { %1751 = vmatpush.msra.mxu2 %v4357_v19  ;;  %1771 = vmatpush.msra.mxu3 %v4358_v20 }
 0x441   :  { %1712 = vmatpush.msrb.mxu0 %v4359_v22  ;;  %1732 = vmatpush.msrb.mxu1 %v4360_v23  ;;  %v1460_v22 = vperm.slane %v1459_v16, 0 }
 0x442   :  { %1752 = vmatpush.msra.mxu2 %v4361_v24  ;;  %1772 = vmatpush.msra.mxu3 %v4362_v26  ;;  %v1463_v24 = vpop.permute.xlu2 %1462 }
 0x443   :  { %1713 = vmatpush.msrb.mxu0 %v4363_v27  ;;  %1733 = vmatpush.msrb.mxu1 %v4364_v28  ;;  %vm3901_vm5 = vcmp.eq.s32.totalorder %v1460_v22, 1 }
 0x444   :  { %1753 = vmatpush.msra.mxu2 %v4365_v30  ;;  %1773 = vmatpush.msra.mxu3 %v4366_v31  ;;  %v1464_v31 = vperm.slane %v1463_v24, 0 }
 0x445   :  { %1714 = vmatpush.msrb.mxu0 %v4367_v32  ;;  %1734 = vmatpush.msrb.mxu1 %v4368_v33 }
 0x446   :  { %1754 = vmatpush.msra.mxu2 %v4369_v34  ;;  %1774 = vmatpush.msra.mxu3 %v4370_v35  ;;  %vm1466_vm6 = vcmp.eq.s32.totalorder %v1464_v31, 1  ;;  %v1665_v31 = vpop.permute.xlu0 %1664 }
 0x4a2   :  { %v1324_v36 = vpop.f32.mrf.mxu1  ;;  %v1304_v42 = vpop.f32.mrf.mxu0 }
 0x4a3   :  { %v1371_v37 = vrot.slane %v1324_v36, 7 }
 0x4a5   :  { %v1374_v17 = vsel %vm334_vm7, %v1304_v42, %v1371_v37  ;;  %v1377_v45 = vsel %vm340_vm8, %v1304_v42, %v1371_v37 }
 0x4a9   :  { %v1344_v38 = vpop.f32.mrf.mxu2  ;;  %v1364_v39 = vpop.f32.mrf.mxu3 }
 0x4aa   :  { %v1372_v40 = vrot.slane %v1344_v38, 6  ;;  %v1373_v41 = vrot.slane %v1364_v39, 5 }
 0x4ac   :  { %v1375_v63 = vsel %vm336_vm9, %v1372_v40, %v1373_v41  ;;  %v1378_v57 = vsel %vm342_vm10, %v1372_v40, %v1373_v41 }
 0x4ad   :  { %v1376_v55 = vsel %vm338_vm11, %v1374_v17, %v1375_v63  ;;  %v1379_v3 = vsel %vm344_vm12, %v1377_v45, %v1378_v57 }
 0x4ae   :  { %v1380_v0 = vrot.slane %v1379_v3, 1  ;;  %v1383_v4 = vadd.f32 %v1376_v55, %v1277_v51 }
 0x4b0   :  { %v1384_v11 = vadd.f32 %v1380_v0, %v1279_v52  ;;  %v2130_v48 = vmul.f32 -1.442695, %v1383_v4  ;;  %v1425_v25 = vrot.slane %v1383_v4, 3 }
 0x4b2   :  { %2234 = vpow2.f32 %v2130_v48  ;;  %v2131_v60 = vmul.f32 -1.442695, %v1384_v11  ;;  %v1426_v9 = vrot.slane %v1384_v11, 3 }
 0x4b4   :  { %2236 = vpow2.f32 %v2131_v60 }
 0x4b8   :  { %v2235_v50 = vpop.eup %2234 }
 0x4b9   :  { %v1391_v43 = vadd.f32 1.0, %v2235_v50 }
 0x4ba   :  { %v2237_v1 = vpop.eup %2236 }
 0x4bb   :  { %v1392_v56 = vadd.f32 1.0, %v2237_v1  ;;  %2238 = vrcp.f32 %v1391_v43  ;;  %v1404_v46 = vand.u32 2147483648, %v1391_v43  ;;  %v1402_v2 = vand.u32 2147483647, %v1391_v43 }
 0x4bc   :  { %vm1398_vm14 = vweird.f32 %v1391_v43  ;;  %v1483_v1 = vld [vmem:[#allocation2 + $0x6] ss:$8 sm:$0xf] }
 0x4bd   :  { %2240 = vrcp.f32 %v1392_v56  ;;  %v1419_v14 = vand.u32 2147483648, %v1392_v56  ;;  %v1417_v58 = vand.u32 2147483647, %v1392_v56  ;;  %v1405_v10 = vor.u32 1.1754944e-38, %v1404_v46 }
 0x4be   :  { %2242 = vtanh.f32 %v1425_v25  ;;  %vm1403_vm1 = vcmp.eq.f32.partialorder %v1402_v2, 8.507059e+37  ;;  %vm1413_vm2 = vweird.f32 %v1392_v56  ;;  %v1485_v25 = vld [vmem:[#allocation2 + $0x26] ss:$8 sm:$0xf] }
 0x4bf   :  { %2244 = vtanh.f32 %v1426_v9  ;;  %v1420_v15 = vor.u32 1.1754944e-38, %v1419_v14  ;;  %vm1418_vm4 = vcmp.eq.f32.partialorder %v1417_v58, 8.507059e+37 }
 0x4c1   :  { %v2239_v47 = vpop.eup %2238 }
 0x4c2   :  { %v1394_v54 = vmul.f32 %v2239_v47, %v1391_v43  ;;  %vm1399_vm13 = vweird.f32 %v2239_v47 }
 0x4c3   :  { %v2241_v8 = vpop.eup %2240  ;;  %vm1400_vm0 = vmor %vm1398_vm14, %vm1399_vm13 }
 0x4c4   :  { %v1395_v44 = vsub.f32 1.0, %v1394_v54  ;;  %v1409_v49 = vmul.f32 %v2241_v8, %v1392_v56  ;;  %vm1414_vm15 = vweird.f32 %v2241_v8  ;;  %v2243_v20 = vpop.eup %2242 }
 0x4c5   :  { %vm1415_vm3 = vmor %vm1413_vm2, %vm1414_vm15  ;;  %v2245_v30 = vpop.eup %2244 }
 0x4c6   :  { %v1396_v12 = vmul.f32 %v2239_v47, %v1395_v44  ;;  %v1410_v13 = vsub.f32 1.0, %v1409_v49 }
 0x4c8   :  { %v1397_v59 = vadd.f32 %v2239_v47, %v1396_v12  ;;  %v1411_v29 = vmul.f32 %v2241_v8, %v1410_v13 }
 0x4ca   :  { %v1401_v5 = vsel %vm1400_vm0, %v2239_v47, %v1397_v59  ;;  %v1412_v7 = vadd.f32 %v2241_v8, %v1411_v29 }
 0x4cb   :  { %v1406_v21 = vsel %vm1403_vm1, %v1405_v10, %v1401_v5 }
 0x4cc   :  { %v1416_v18 = vsel %vm1415_vm3, %v2241_v8, %v1412_v7  ;;  %v1433_v19 = vrot.slane %v1406_v21, 1  ;;  %v1439_v28 = vmul.f32 %v2243_v20, %v1406_v21  ;;  %v1445_v39 = vrot.slane %v1406_v21, 2 }
 0x4cd   :  { %v1421_v23 = vsel %vm1418_vm4, %v1420_v15, %v1416_v18 }
 0x4ce   :  { %v1434_v26 = vrot.slane %v1421_v23, 1  ;;  %v1437_v27 = vmul.f32 %v1433_v19, %v3812_v61  ;;  %v1440_v33 = vmul.f32 %v2245_v30, %v1421_v23  ;;  %v1446_v41 = vrot.slane %v1421_v23, 2 }
 0x4d0   :  { %v1438_v32 = vmul.f32 %v1434_v26, %v3815_v53  ;;  %v1441_v34 = vadd.f32 %v1439_v28, %v1437_v27 }
 0x4d2   :  { %v1442_v36 = vadd.f32 %v1440_v33, %v1438_v32  ;;  %2246 = vtanh.f32 %v1441_v34  ;;  %v3908_v37 = vsel %vm3901_vm5, %v1441_v34, %v3812_v61  ;;  %v1669_v32 = vpop.permute.xlu1 %1668 }
 0x4d4   :  { %2248 = vtanh.f32 %v1442_v36  ;;  %v3911_v38 = vsel %vm1466_vm6, %v1442_v36, %v3815_v53  ;;  %v1666_v36 = vperm.slane %v1665_v31, 0 }
 0x4d8   :  { %v2247_v40 = vpop.eup %2246 }
 0x4d9   :  { %v1449_v42 = vmul.f32 %v2247_v40, %v1445_v39 }
 0x4da   :  { %v2249_v17 = vpop.eup %2248 }
 0x4db   :  { %v1450_v45 = vmul.f32 %v2249_v17, %v1446_v41  ;;  %v1471_v63 = vsel %vm3901_vm5, %v1449_v42, 0.0  ;;  %v3918_v61 = vsel %vm3901_vm5, %v1449_v42, %v3822_v6  ;;  %vm3933_vm5 = vcmp.eq.s32.totalorder %v1666_v36, 1 }
 0x4dc   :  { %1475 = vst [vmem:[#allocation1] ss:$9 sm:$0xff] %v1471_v63 }
 0x4dd   :  { %v1472_v57 = vsel %vm1466_vm6, %v1450_v45, 0.0  ;;  %v3921_v53 = vsel %vm1466_vm6, %v1450_v45, %v3825_v62  ;;  %v1670_v45 = vperm.slane %v1669_v32, 0  ;;  %v1931_v32 = vld [vmem:[%s4063_s6 + $0x68] sm:$0xff] }
 0x4de   :  { %1477 = vst [vmem:[#allocation1 + $0x1] ss:$9 sm:$0xff] %v1472_v57 }
 0x4df   :  { %vm1672_vm6 = vcmp.eq.s32.totalorder %v1670_v45, 1  ;;  %v1929_v45 = vld [vmem:[%s4063_s6 + $0x58] sm:$0xff] }
 0x4e5   :  { %v1478_v51 = vld [vmem:[#allocation1] sm:$0xff] }
 0x4e6   :  { %1488 = vst [vmem:[#allocation1] ss:$9 sm:$0xff] %v3918_v61 }
 0x4e7   :  { %1490 = vst [vmem:[#allocation1 + $0x1] ss:$9 sm:$0xff] %v3921_v53 }
 0x4e8   :  { %1481 = vst [vmem:[#allocation3 + $0xa] sm:$0x3] %v1478_v51 }
 0x4ee   :  { %v1491_v55 = vld [vmem:[#allocation1] sm:$0xff] }
 0x4ef   :  { %1509 = vmatmul.f32.vlgmr.msra.gmra.mxu0 %v1491_v55  ;;  %1529 = vmatmul.f32.vlgmr.msra.gmra.mxu1 %v1491_v55 }
 0x4f0   :  { %1549 = vmatmul.f32.vlgmr.msrb.gmra.mxu2 %v1491_v55  ;;  %1569 = vmatmul.f32.vlgmr.msrb.gmra.mxu3 %v1491_v55 }
 0x56c   :  { %v1530_v3 = vpop.f32.mrf.mxu1  ;;  %v1510_v48 = vpop.f32.mrf.mxu0 }
 0x56d   :  { %v1577_v0 = vrot.slane %v1530_v3, 7 }
 0x56f   :  { %v1580_v62 = vsel %vm334_vm7, %v1510_v48, %v1577_v0  ;;  %v1583_v60 = vsel %vm340_vm8, %v1510_v48, %v1577_v0 }
 0x573   :  { %v1550_v4 = vpop.f32.mrf.mxu2  ;;  %v1570_v52 = vpop.f32.mrf.mxu3 }
 0x574   :  { %v1578_v6 = vrot.slane %v1550_v4, 6  ;;  %v1579_v11 = vrot.slane %v1570_v52, 5 }
 0x576   :  { %v1581_v50 = vsel %vm336_vm9, %v1578_v6, %v1579_v11  ;;  %v1584_v43 = vsel %vm342_vm10, %v1578_v6, %v1579_v11 }
 0x577   :  { %v1582_v56 = vsel %vm338_vm11, %v1580_v62, %v1581_v50  ;;  %v1585_v47 = vsel %vm344_vm12, %v1583_v60, %v1584_v43 }
 0x578   :  { %v1586_v54 = vrot.slane %v1585_v47, 1  ;;  %v1589_v8 = vadd.f32 %v1582_v56, %v1483_v1 }
 0x57a   :  { %v1590_v44 = vadd.f32 %v1586_v54, %v1485_v25  ;;  %v2134_v49 = vmul.f32 -1.442695, %v1589_v8  ;;  %v1631_v58 = vrot.slane %v1589_v8, 3 }
 0x57c   :  { %2250 = vpow2.f32 %v2134_v49  ;;  %v2135_v46 = vmul.f32 -1.442695, %v1590_v44  ;;  %v1632_v21 = vrot.slane %v1590_v44, 3 }
 0x57e   :  { %2252 = vpow2.f32 %v2135_v46 }
 0x582   :  { %v2251_v9 = vpop.eup %2250 }
 0x583   :  { %v1597_v12 = vadd.f32 1.0, %v2251_v9 }
 0x584   :  { %v2253_v2 = vpop.eup %2252 }
 0x585   :  { %v1598_v13 = vadd.f32 1.0, %v2253_v2  ;;  %2254 = vrcp.f32 %v1597_v12  ;;  %v1610_v7 = vand.u32 2147483648, %v1597_v12  ;;  %v1608_v16 = vand.u32 2147483647, %v1597_v12 }
 0x586   :  { %vm1604_vm14 = vweird.f32 %v1597_v12  ;;  %v1689_v2 = vld [vmem:[#allocation2 + $0x7] ss:$8 sm:$0xf] }
 0x587   :  { %2256 = vrcp.f32 %v1598_v13  ;;  %v1625_v19 = vand.u32 2147483648, %v1598_v13  ;;  %v1623_v23 = vand.u32 2147483647, %v1598_v13  ;;  %v1611_v24 = vor.u32 1.1754944e-38, %v1610_v7 }
 0x588   :  { %2258 = vtanh.f32 %v1631_v58  ;;  %vm1609_vm1 = vcmp.eq.f32.partialorder %v1608_v16, 8.507059e+37  ;;  %vm1619_vm2 = vweird.f32 %v1598_v13  ;;  %v1691_v58 = vld [vmem:[#allocation2 + $0x27] ss:$8 sm:$0xf] }
 0x589   :  { %2260 = vtanh.f32 %v1632_v21  ;;  %v1626_v30 = vor.u32 1.1754944e-38, %v1625_v19  ;;  %vm1624_vm4 = vcmp.eq.f32.partialorder %v1623_v23, 8.507059e+37 }
 0x58b   :  { %v2255_v14 = vpop.eup %2254 }
 0x58c   :  { %v1600_v59 = vmul.f32 %v2255_v14, %v1597_v12  ;;  %vm1605_vm13 = vweird.f32 %v2255_v14 }
 0x58d   :  { %v2257_v29 = vpop.eup %2256  ;;  %vm1606_vm0 = vmor %vm1604_vm14, %vm1605_vm13 }
 0x58e   :  { %v1601_v10 = vsub.f32 1.0, %v1600_v59  ;;  %v1615_v5 = vmul.f32 %v2257_v29, %v1598_v13  ;;  %vm1620_vm15 = vweird.f32 %v2257_v29  ;;  %v2259_v35 = vpop.eup %2258 }
 0x58f   :  { %vm1621_vm3 = vmor %vm1619_vm2, %vm1620_vm15  ;;  %v2261_v17 = vpop.eup %2260 }
 0x590   :  { %v1602_v15 = vmul.f32 %v2255_v14, %v1601_v10  ;;  %v1616_v18 = vsub.f32 1.0, %v1615_v5 }
 0x592   :  { %v1603_v20 = vadd.f32 %v2255_v14, %v1602_v15  ;;  %v1617_v22 = vmul.f32 %v2257_v29, %v1616_v18 }
 0x594   :  { %v1607_v26 = vsel %vm1606_vm0, %v2255_v14, %v1603_v20  ;;  %v1618_v27 = vadd.f32 %v2257_v29, %v1617_v22  ;;  %v1933_v20 = vld [vmem:[%s4063_s6 + $0x78] sm:$0xff] }
 0x595   :  { %v1612_v28 = vsel %vm1609_vm1, %v1611_v24, %v1607_v26  ;;  %1961 = vmatpush.msra.mxu0 %v1933_v20  ;;  %v1932_v26 = vld [vmem:[%s4063_s6 + $0x70] sm:$0xff]  ;;  %v1918_v20 = vld [vmem:[%s4063_s6] sm:$0xff]  ;;  %vm2011_vm1 = vcmask 1047556  }
 0x596   :  { %v1622_v33 = vsel %vm1621_vm3, %v2257_v29, %v1618_v27  ;;  %v1639_v34 = vrot.slane %v1612_v28, 1  ;;  %v1645_v42 = vmul.f32 %v2259_v35, %v1612_v28  ;;  %v1651_v52 = vrot.slane %v1612_v28, 2 }
 0x597   :  { %v1627_v39 = vsel %vm1624_vm4, %v1626_v30, %v1622_v33  ;;  %1962 = vmatpush.msra.mxu0 %v1932_v26 }
 0x598   :  { %v1640_v40 = vrot.slane %v1627_v39, 1  ;;  %v1643_v41 = vmul.f32 %v1639_v34, %v3908_v37  ;;  %v1646_v57 = vmul.f32 %v2261_v17, %v1627_v39  ;;  %v1652_v11 = vrot.slane %v1627_v39, 2  ;;  %v1930_v39 = vld [vmem:[%s4063_s6 + $0x60] sm:$0xff] }
 0x599   :  { %1963 = vmatpush.msra.mxu0 %v1931_v32 }
 0x59a   :  { %v1644_v63 = vmul.f32 %v1640_v40, %v3911_v38  ;;  %v1647_v51 = vadd.f32 %v1645_v42, %v1643_v41 }
 0x59b   :  { %1964 = vmatpush.msra.mxu0 %v1930_v39 }
 0x59c   :  { %v1648_v3 = vadd.f32 %v1646_v57, %v1644_v63  ;;  %2262 = vtanh.f32 %v1647_v51  ;;  %v3940_v0 = vsel %vm3933_vm5, %v1647_v51, %v3908_v37 }
 0x59d   :  { %1965 = vmatpush.msra.mxu0 %v1929_v45 }
 0x59e   :  { %2264 = vtanh.f32 %v1648_v3  ;;  %v3943_v4 = vsel %vm1672_vm6, %v1648_v3, %v3911_v38  ;;  %v1928_v3 = vld [vmem:[%s4063_s6 + $0x50] sm:$0xff] }
 0x59f   :  { %1966 = vmatpush.msra.mxu0 %v1928_v3 }
 0x5a2   :  { %v2263_v6 = vpop.eup %2262 }
 0x5a3   :  { %v1655_v48 = vmul.f32 %v2263_v6, %v1651_v52 }
 0x5a4   :  { %v2265_v62 = vpop.eup %2264 }
 0x5a5   :  { %v1656_v60 = vmul.f32 %v2265_v62, %v1652_v11  ;;  %v1677_v50 = vsel %vm3933_vm5, %v1655_v48, 0.0  ;;  %v3950_v37 = vsel %vm3933_vm5, %v1655_v48, %v3918_v61  ;;  %v1927_v62 = vld [vmem:[%s4063_s6 + $0x48] sm:$0xff] }
 0x5a6   :  { %1681 = vst [vmem:[#allocation1] ss:$9 sm:$0xff] %v1677_v50  ;;  %1967 = vmatpush.msra.mxu0 %v1927_v62 }
 0x5a7   :  { %v1678_v43 = vsel %vm1672_vm6, %v1656_v60, 0.0  ;;  %v3953_v38 = vsel %vm1672_vm6, %v1656_v60, %v3921_v53 }
 0x5a8   :  { %1683 = vst [vmem:[#allocation1 + $0x1] ss:$9 sm:$0xff] %v1678_v43 }
 0x5af   :  { %v1684_v1 = vld [vmem:[#allocation1] sm:$0xff] }
 0x5b0   :  { %1694 = vst [vmem:[#allocation1] ss:$9 sm:$0xff] %v3950_v37 }
 0x5b1   :  { %1696 = vst [vmem:[#allocation1 + $0x1] ss:$9 sm:$0xff] %v3953_v38 }
 0x5b2   :  { %1687 = vst [vmem:[#allocation3 + $0xc] sm:$0x3] %v1684_v1 }
 0x5b8   :  { %v1697_v56 = vld [vmem:[#allocation1] sm:$0xff] }
 0x5b9   :  { %1715 = vmatmul.f32.vlgmr.msrb.gmra.mxu0 %v1697_v56  ;;  %1735 = vmatmul.f32.vlgmr.msrb.gmra.mxu1 %v1697_v56 }
 0x5ba   :  { %1755 = vmatmul.f32.vlgmr.msra.gmra.mxu2 %v1697_v56  ;;  %1775 = vmatmul.f32.vlgmr.msra.gmra.mxu3 %v1697_v56  ;;  %v1926_v56 = vld [vmem:[%s4063_s6 + $0x40] sm:$0xff] }
 0x5bb   :  { %1968 = vmatpush.msra.mxu0 %v1926_v56 }
 0x636   :  { %v1736_v47 = vpop.f32.mrf.mxu1  ;;  %v1716_v49 = vpop.f32.mrf.mxu0 }
 0x637   :  { %v1783_v54 = vrot.slane %v1736_v47, 7 }
 0x639   :  { %v1786_v53 = vsel %vm334_vm7, %v1716_v49, %v1783_v54  ;;  %v1789_v46 = vsel %vm340_vm8, %v1716_v49, %v1783_v54  ;;  %v1924_v49 = vld [vmem:[%s4063_s6 + $0x30] sm:$0xff] }
 0x63d   :  { %v1756_v8 = vpop.f32.mrf.mxu2  ;;  %v1776_v25 = vpop.f32.mrf.mxu3 }
 0x63e   :  { %v1784_v61 = vrot.slane %v1756_v8, 6  ;;  %v1785_v44 = vrot.slane %v1776_v25, 5  ;;  %v1925_v25 = vld [vmem:[%s4063_s6 + $0x38] sm:$0xff] }
 0x63f   :  { %1969 = vmatpush.msra.mxu0 %v1925_v25 }
 0x640   :  { %v1787_v9 = vsel %vm336_vm9, %v1784_v61, %v1785_v44  ;;  %v1790_v12 = vsel %vm342_vm10, %v1784_v61, %v1785_v44  ;;  %v1871_v44 = vpop.permute.xlu2 %1870 }
 0x641   :  { %v1788_v13 = vsel %vm338_vm11, %v1786_v53, %v1787_v9  ;;  %v1791_v14 = vsel %vm344_vm12, %v1789_v46, %v1790_v12  ;;  %1970 = vmatpush.msra.mxu0 %v1924_v49  ;;  %v1875_v53 = vpop.permute.xlu0 %1874  ;;  %v1923_v46 = vld [vmem:[%s4063_s6 + $0x28] sm:$0xff]  ;;  %v1872_v9 = vperm.slane %v1871_v44, 0 }
 0x642   :  { %v1792_v59 = vrot.slane %v1791_v14, 1  ;;  %v1795_v29 = vadd.f32 %v1788_v13, %v1689_v2  ;;  %v1922_v2 = vld [vmem:[%s4063_s6 + $0x20] sm:$0xff]  ;;  %v1876_v14 = vperm.slane %v1875_v53, 0 }
 0x643   :  { %1971 = vmatpush.msra.mxu0 %v1923_v46  ;;  %vm4007_vm15 = vcmp.eq.s32.totalorder %v1872_v9, 1 }
 0x644   :  { %v1796_v10 = vadd.f32 %v1792_v59, %v1691_v58  ;;  %v2138_v5 = vmul.f32 -1.442695, %v1795_v29  ;;  %v1837_v24 = vrot.slane %v1795_v29, 3  ;;  %v1921_v58 = vld [vmem:[%s4063_s6 + $0x18] sm:$0xff]  ;;  %vm4016_vm0 = vcmp.eq.s32.totalorder %v1876_v14, 1 }
 0x645   :  { %1972 = vmatpush.msra.mxu0 %v1922_v2 }
 0x646   :  { %2266 = vpow2.f32 %v2138_v5  ;;  %v2139_v7 = vmul.f32 -1.442695, %v1796_v10  ;;  %v1838_v31 = vrot.slane %v1796_v10, 3  ;;  %v1920_v10 = vld [vmem:[%s4063_s6 + $0x10] sm:$0xff] }
 0x647   :  { %1973 = vmatpush.msra.mxu0 %v1921_v58 }
 0x648   :  { %2268 = vpow2.f32 %v2139_v7 }
 0x649   :  { %1974 = vmatpush.msra.mxu0 %v1920_v10 }
 0x64c   :  { %v2267_v21 = vpop.eup %2266 }
 0x64d   :  { %v1803_v15 = vadd.f32 1.0, %v2267_v21 }
 0x64e   :  { %v2269_v16 = vpop.eup %2268 }
 0x64f   :  { %v1804_v18 = vadd.f32 1.0, %v2269_v16  ;;  %2270 = vrcp.f32 %v1803_v15  ;;  %v1816_v30 = vand.u32 2147483648, %v1803_v15  ;;  %v1814_v34 = vand.u32 2147483647, %v1803_v15  ;;  %v1919_v16 = vld [vmem:[%s4063_s6 + $0x8] sm:$0xff] }
 0x650   :  { %vm1810_vm8 = vweird.f32 %v1803_v15  ;;  %1975 = vmatpush.msra.mxu0 %v1919_v16 }
 0x651   :  { %2272 = vrcp.f32 %v1804_v18  ;;  %v1831_v36 = vand.u32 2147483648, %v1804_v18  ;;  %v1829_v42 = vand.u32 2147483647, %v1804_v18  ;;  %v1817_v17 = vor.u32 1.1754944e-38, %v1816_v30  ;;  %v1915_v30 = vld [vmem:[#allocation3 + $0xa] sm:$0x3] }
 0x652   :  { %2274 = vtanh.f32 %v1837_v24  ;;  %vm1815_vm11 = vcmp.eq.f32.partialorder %v1814_v34, 8.507059e+37  ;;  %vm1825_vm12 = vweird.f32 %v1804_v18  ;;  %1976 = vmatpush.msra.mxu0 %v1918_v20  ;;  %v1911_v34 = vld [vmem:[#allocation3 + $0x2] sm:$0x3] }
 0x653   :  { %2276 = vtanh.f32 %v1838_v31  ;;  %v1832_v55 = vor.u32 1.1754944e-38, %v1831_v36  ;;  %vm1830_vm14 = vcmp.eq.f32.partialorder %v1829_v42, 8.507059e+37 }
 0x655   :  { %v2271_v19 = vpop.eup %2270 }
 0x656   :  { %v1806_v22 = vmul.f32 %v2271_v19, %v1803_v15  ;;  %vm1811_vm7 = vweird.f32 %v2271_v19 }
 0x657   :  { %v2273_v23 = vpop.eup %2272  ;;  %vm1812_vm10 = vmor %vm1810_vm8, %vm1811_vm7 }
 0x658   :  { %v1807_v27 = vsub.f32 1.0, %v1806_v22  ;;  %v1821_v28 = vmul.f32 %v2273_v23, %v1804_v18  ;;  %vm1826_vm9 = vweird.f32 %v2273_v23  ;;  %v2275_v11 = vpop.eup %2274 }
 0x659   :  { %vm1827_vm13 = vmor %vm1825_vm12, %vm1826_vm9  ;;  %v2277_v1 = vpop.eup %2276 }
 0x65a   :  { %v1808_v33 = vmul.f32 %v2271_v19, %v1807_v27  ;;  %v1822_v35 = vsub.f32 1.0, %v1821_v28 }
 0x65c   :  { %v1809_v40 = vadd.f32 %v2271_v19, %v1808_v33  ;;  %v1823_v41 = vmul.f32 %v2273_v23, %v1822_v35  ;;  %v1910_v33 = vld [vmem:[#allocation3] sm:$0x3]  ;;  %v1913_v35 = vld [vmem:[#allocation3 + $0x6] sm:$0x3] }
 0x65e   :  { %v1813_v63 = vsel %vm1812_vm10, %v2271_v19, %v1809_v40  ;;  %v1824_v57 = vadd.f32 %v2273_v23, %v1823_v41  ;;  %v2375_v40 = vmov 1934713408  }
 0x65f   :  { %v1818_v51 = vsel %vm1815_vm11, %v1817_v17, %v1813_v63  ;;  %v2014_v41 = vunpack.c.l.s4 %v2375_v40  ;;  %v2153_v63 = vld [vmem:[%s4064_s7] ss:$0 sm:$0xff] }
 0x660   :  { %v1828_v52 = vsel %vm1827_vm13, %v2273_v23, %v1824_v57  ;;  %v1845_v6 = vrot.slane %v1818_v51, 1  ;;  %v1851_v43 = vmul.f32 %v2275_v11, %v1818_v51  ;;  %v1857_v12 = vrot.slane %v1818_v51, 2 }
 0x661   :  { %v1833_v48 = vsel %vm1830_vm14, %v1832_v55, %v1828_v52  ;;  %v2015_v55 = vunpack.c.0.s8 %v2014_v41 }
 0x662   :  { %v1846_v60 = vrot.slane %v1833_v48, 1  ;;  %v1849_v50 = vmul.f32 %v1845_v6, %v3940_v0  ;;  %v1852_v54 = vmul.f32 %v2277_v1, %v1833_v48  ;;  %v1858_v59 = vrot.slane %v1833_v48, 2 }
 0x664   :  { %v1850_v47 = vmul.f32 %v1846_v60, %v3943_v4  ;;  %v1853_v8 = vadd.f32 %v1851_v43, %v1849_v50 }
 0x666   :  { %v1854_v61 = vadd.f32 %v1852_v54, %v1850_v47  ;;  %2278 = vtanh.f32 %v1853_v8  ;;  %v1881_v27 = vsel %vm4007_vm15, %v1853_v8, %v3940_v0  ;;  %v1912_v0 = vld [vmem:[#allocation3 + $0x4] sm:$0x3] }
 0x668   :  { %2280 = vtanh.f32 %v1854_v61  ;;  %v1882_v28 = vsel %vm4016_vm0, %v1854_v61, %v3943_v4 }
 0x66c   :  { %v2279_v13 = vpop.eup %2278 }
 0x66d   :  { %v1861_v29 = vmul.f32 %v2279_v13, %v1857_v12 }
 0x66e   :  { %v2281_v5 = vpop.eup %2280 }
 0x66f   :  { %v1862_v21 = vmul.f32 %v2281_v5, %v1858_v59  ;;  %v1883_v15 = vsel %vm4007_vm15, %v1861_v29, 0.0  ;;  %v1879_v22 = vsel %vm4007_vm15, %v1861_v29, %v3950_v37  ;;  %v1914_v37 = vld [vmem:[#allocation3 + $0x8] sm:$0x3] }
 0x670   :  { %1887 = vst [vmem:[#allocation1] ss:$9 sm:$0xff] %v1883_v15 }
 0x671   :  { %v1884_v19 = vsel %vm4016_vm0, %v1862_v21, 0.0  ;;  %v1880_v24 = vsel %vm4016_vm0, %v1862_v21, %v3953_v38  ;;  %v1916_v38 = vld [vmem:[#allocation3 + $0xc] sm:$0x3] }
 0x672   :  { %1889 = vst [vmem:[#allocation1 + $0x1] ss:$9 sm:$0xff] %v1884_v19 }
 0x679   :  { %v1890_v23 = vld [vmem:[#allocation1] sm:$0xff] }
 0x67a   :  { %1896 = vst [vmem:[#allocation1] ss:$9 sm:$0xff] %v1879_v22 }
 0x67b   :  { %1898 = vst [vmem:[#allocation1 + $0x1] ss:$9 sm:$0xff] %v1880_v24 }
 0x67c   :  { %1893 = vst [vmem:[#allocation3 + $0xe] sm:$0x3] %v1890_v23 }
 0x682   :  { %v1899_v26 = vld [vmem:[#allocation1] sm:$0xff] }
 0x683   :  { %1901 = vst [vmem:[#allocation4] sm:$0x3] %v1899_v26  ;;  %v1917_v31 = vld [vmem:[#allocation3 + $0xe] sm:$0x3] }
 0x684   :  { %1904 = vst [vmem:[#allocation1] ss:$9 sm:$0xff] %v1881_v27 }
 0x685   :  { %1906 = vst [vmem:[#allocation1 + $0x1] ss:$9 sm:$0xff] %v1882_v28 }
 0x686   :  { %1950 = vst [vmem:[#allocation1 + $0x20] ss:$4 sm:$0xff] %v1914_v37 }
 0x687   :  { %1952 = vst [vmem:[#allocation1 + $0x21] ss:$4 sm:$0xff] %v1915_v30 }
 0x688   :  { %1954 = vst [vmem:[#allocation1 + $0x22] ss:$4 sm:$0xff] %v1916_v38 }
 0x689   :  { %1956 = vst [vmem:[#allocation1 + $0x23] ss:$4 sm:$0xff] %v1917_v31 }
 0x68c   :  { %v1907_v32 = vld [vmem:[#allocation1] sm:$0xff] }
 0x68d   :  { %1909 = vst [vmem:[#allocation5] sm:$0x3] %v1907_v32 }
 0x68e   :  { %1942 = vst [vmem:[#allocation1] ss:$4 sm:$0xff] %v1910_v33 }
 0x68f   :  { %1944 = vst [vmem:[#allocation1 + $0x1] ss:$4 sm:$0xff] %v1911_v34 }
 0x690   :  { %1946 = vst [vmem:[#allocation1 + $0x2] ss:$4 sm:$0xff] %v1912_v0  ;;  %v1958_v36 = vld.sshfl [vmem:[#allocation1 + $0x20] sm:$0xff pattern:$0x73625140] }
 0x691   :  { %1948 = vst [vmem:[#allocation1 + $0x3] ss:$4 sm:$0xff] %v1913_v35 }
 0x698   :  { %v1957_v4 = vld.sshfl [vmem:[#allocation1] sm:$0xff pattern:$0x73625140] }
 0x699   :  { %1977 = vmatmul.f32.vlgmr.msra.gmra.mxu0 %v1957_v4 }
 0x6a1   :  { %1980 = vmatmul.f32.gmra.mxu0 %v1958_v36 }
 0x716   :  { %v1978_v39 = vpop.f32.mrf.mxu0 }
 0x717   :  { %v1986_v42 = vrot.slane %v1978_v39, 2  ;;  %v1987_v17 = vrot.slane %v1978_v39, 4  ;;  %v1988_v45 = vrot.slane %v1978_v39, 6  ;;  %v2002_v3 = vadd.f32 %v2153_v63, %v1978_v39 }
 0x719   :  { %v2003_v57 = vadd.f32 %v2153_v63, %v1986_v42  ;;  %v2005_v51 = vadd.f32 %v2153_v63, %v1988_v45  ;;  %v2004_v52 = vadd.f32 %v2153_v63, %v1987_v17 }
 0x71b   :  { %v2010_v6 = vrot.slane %v2003_v57, 4  ;;  %v2019_v11 = vrot.slane %v2005_v51, 4 }
 0x71d   :  { %v2012_v48 = vsel %vm2011_vm1, %v2010_v6, %v2002_v3  ;;  %v2020_v62 = vsel %vm2011_vm1, %v2019_v11, %v2004_v52 }
 0x71e   :  { %v2016_v60 = vperm.slane %v2012_v48, %v2015_v55  ;;  %v2024_v50 = vperm.slane %v2020_v62, %v2015_v55  ;;  %v1981_v43 = vpop.f32.mrf.mxu0 }
 0x71f   :  { %v1989_v1 = vrot.slane %v1981_v43, 2  ;;  %v1990_v56 = vrot.slane %v1981_v43, 4  ;;  %v1991_v47 = vrot.slane %v1981_v43, 6  ;;  %v2006_v53 = vadd.f32 %v2153_v63, %v1981_v43 }
 0x720   :  { %v2017_v54 = vrot.slane %v2016_v60, 4  ;;  %v2025_v8 = vrot.slane %v2024_v50, 4  ;;  %2051 = vst [vmem:[#allocation1] ss:$4 sm:$0xff] %v2016_v60 }
 0x721   :  { %2053 = vst [vmem:[#allocation1 + $0x1] ss:$4 sm:$0xff] %v2024_v50  ;;  %v2007_v25 = vadd.f32 %v2153_v63, %v1989_v1  ;;  %v2009_v61 = vadd.f32 %v2153_v63, %v1991_v47  ;;  %v2008_v46 = vadd.f32 %v2153_v63, %v1990_v56 }
 0x722   :  { %v2018_v44 = vsel %vm2011_vm1, 0.0, %v2017_v54  ;;  %v2026_v49 = vsel %vm2011_vm1, 0.0, %v2025_v8 }
 0x723   :  { %2060 = vst [vmem:[#allocation1 + $0x20] ss:$4 sm:$0xff] %v2018_v44  ;;  %v2027_v9 = vrot.slane %v2007_v25, 4  ;;  %v2035_v12 = vrot.slane %v2009_v61, 4 }
 0x724   :  { %2062 = vst [vmem:[#allocation1 + $0x21] ss:$4 sm:$0xff] %v2026_v49 }
 0x725   :  { %v2028_v2 = vsel %vm2011_vm1, %v2027_v9, %v2006_v53  ;;  %v2036_v13 = vsel %vm2011_vm1, %v2035_v12, %v2008_v46 }
 0x726   :  { %v2032_v14 = vperm.slane %v2028_v2, %v2015_v55  ;;  %v2040_v59 = vperm.slane %v2036_v13, %v2015_v55 }
 0x728   :  { %v2033_v29 = vrot.slane %v2032_v14, 4  ;;  %v2041_v58 = vrot.slane %v2040_v59, 4  ;;  %2055 = vst [vmem:[#allocation1 + $0x2] ss:$4 sm:$0xff] %v2032_v14 }
 0x729   :  { %2057 = vst [vmem:[#allocation1 + $0x3] ss:$4 sm:$0xff] %v2040_v59 }
 0x72a   :  { %v2034_v10 = vsel %vm2011_vm1, 0.0, %v2033_v29  ;;  %v2042_v5 = vsel %vm2011_vm1, 0.0, %v2041_v58 }
 0x72b   :  { %2064 = vst [vmem:[#allocation1 + $0x22] ss:$4 sm:$0xff] %v2034_v10 }
 0x72c   :  { %2066 = vst [vmem:[#allocation1 + $0x23] ss:$4 sm:$0xff] %v2042_v5 }
 0x730   :  { %v2058_v7 = vld.sshfl [vmem:[#allocation1] sm:$0xff pattern:$0x73625140] }
 0x731   :  { %2070 = vst [vmem:[#allocation8] sm:$0xff] %v2058_v7 }
 0x733   :  { %v2067_v21 = vld.sshfl [vmem:[#allocation1 + $0x20] sm:$0xff pattern:$0x73625140] }
 0x734   :  { %2071 = vst [vmem:[#allocation8 + $0x8] sm:$0xff] %v2067_v21 }
 0x735 PF:  { %p2143_p1 = scmp.gt.s32.totalorder %s4057_s0, 0 }
 0x737   :  { %2075 = sbr.rel (%p2143_p1) target bundleno = 1855 (0x73f), region = 41 }
 0x73c   :  { %v2346_v15 = vld [vmem:[%s4064_s7] ss:$0 sm:$0xff] }
 0x73d   :  { %2080 = vst [vmem:[#allocation8] sm:$0xff] %v2346_v15 }
 0x73e   :  { %2081 = vst [vmem:[#allocation8 + $0x8] sm:$0xff] %v2346_v15 }
 0x73f PF:  { %s2088_s19 = sshll.u32 %s4065_s8, 4  ;;  %s2376_s20 = smov [#allocation8]   ;;  %s2089_s19 = int_to_ptr.hbm [resolvable:$true] %s2088_s19 }
 0x740   :  { %s2086_s21 = sshll.u32 %s2376_s20, 4  ;;  %s2377_s22 = smov 128   ;;  %s2087_s21 = int_to_ptr.vmem [resolvable:$true] %s2086_s21 }
 0x741   :  { %s2378_s23 = smov 8  }
 0x742   :  { %2094 = dma.vmem_to_hbm [thread:$0]  %s2087_s21, 256, %s2089_s19, [#allocation9], %s2377_s22, %s2377_s22, %s2378_s23  }
 0x743   :  { %2371 = dma.done.wait [#allocation9], 256  }
 0x744   :  { %2372 = vsyncadd [#allocation9], 4294967040 }
 0x745   :  { %2099 = vsyncpa [#allocation9], 1 }

// kernel: _rnn_layers_forward.1
= control target key start
LH: loop header
LB: loop body
LE: loop exit
PB: predicated region body
PF: predicated region fallthrough
CT: control target
= control target key end

     0   :  { %14 = vsyncpa [#allocation9], 0  ;;  %v2430_v0 = vmov 0.0   ;;  %s4173_s0 = inlined_call_operand.<no memory space> [shape: s32[1], index: 0, kind: input, shape index: {}]   ;;  %s4174_s1 = inlined_call_operand.vmem [shape: f32[2,8,32], index: 1, kind: input, shape index: {}]   ;;  %s4175_s2 = inlined_call_operand.vmem [shape: s32[2,1,1], index: 2, kind: input, shape index: {}]   ;;  %s4176_s3 = inlined_call_operand.vmem [shape: f32[32,512], index: 3, kind: input, shape index: {}]   ;;  %s4177_s4 = inlined_call_operand.vmem [shape: f32[128,512], index: 4, kind: input, shape index: {}]   ;;  %s4178_s5 = inlined_call_operand.vmem [shape: f32[1,512], index: 5, kind: input, shape index: {}]   ;;  %s4179_s6 = inlined_call_operand.vmem [shape: f32[128,128], index: 6, kind: input, shape index: {}]   ;;  %s4180_s7 = inlined_call_operand.vmem [shape: f32[1,128], index: 7, kind: input, shape index: {}]   ;;  %s4181_s8 = inlined_call_operand.hbm [shape: f32[2,8,128], index: 8, kind: output, shape index: {}]  }
   0x1   :  { %34 = vst [vmem:[#allocation4] sm:$0x3] %v2430_v0  ;;  %p2159_p0 = scmp.le.s32.totalorder %s4173_s0, 0 }
   0x2   :  { %35 = vst [vmem:[#allocation5] sm:$0x3] %v2430_v0 }
   0x3   :  { %40 = sbr.rel (%p2159_p0) target bundleno = 1845 (0x735), region = 37 }
   0x8   :  { %v57_v1 = vld [vmem:[%s4176_s3 + $0x60] sm:$0xff]  ;;  %v59_v2 = vld [vmem:[%s4176_s3 + $0x70] sm:$0xff]  ;;  %v60_v3 = vld [vmem:[%s4176_s3 + $0x78] sm:$0xff]  ;;  %vm71_vm0 = vcmask 261120   ;;  %vm334_vm7 = vcmask 1040384   ;;  %vm340_vm8 = vcmask 1041409  }
   0x9   :  { %90 = vmatpush.msra.mxu1 %v57_v1  ;;  %136 = vmatpush.msra.mxu2 %v59_v2  ;;  %v53_v4 = vld [vmem:[%s4176_s3 + $0x40] sm:$0xff]  ;;  %v55_v5 = vld [vmem:[%s4176_s3 + $0x50] sm:$0xff]  ;;  %v56_v6 = vld [vmem:[%s4176_s3 + $0x58] sm:$0xff]  ;;  %vm336_vm9 = vcmask 1042434   ;;  %vm342_vm10 = vcmask 1043459   ;;  %vm338_vm11 = vcmask 1041408  }
   0xa   :  { %159 = vmatpush.msra.mxu3 %v60_v3  ;;  %v49_v7 = vld [vmem:[%s4176_s3 + $0x20] sm:$0xff]  ;;  %v51_v8 = vld [vmem:[%s4176_s3 + $0x30] sm:$0xff]  ;;  %v52_v9 = vld [vmem:[%s4176_s3 + $0x38] sm:$0xff]  ;;  %vm344_vm12 = vcmask 1042433  }
   0xb   :  { %91 = vmatpush.msra.mxu1 %v53_v4  ;;  %137 = vmatpush.msra.mxu2 %v55_v5  ;;  %v45_v10 = vld [vmem:[%s4176_s3] sm:$0xff]  ;;  %v47_v11 = vld [vmem:[%s4176_s3 + $0x10] sm:$0xff]  ;;  %v48_v13 = vld [vmem:[%s4176_s3 + $0x18] sm:$0xff] }
   0xc   :  { %160 = vmatpush.msra.mxu3 %v56_v6  ;;  %v2519_v12 = vld [vmem:[%s4174_s1] sm:$0xff]  ;;  %v58_v14 = vld [vmem:[%s4176_s3 + $0x68] sm:$0xff]  ;;  %v2530_v15 = vld [vmem:[%s4177_s4 + $0x1f0] sm:$0xff] }
   0xd   :  { %92 = vmatpush.msra.mxu1 %v49_v7  ;;  %138 = vmatpush.msra.mxu2 %v51_v8  ;;  %v2535_v16 = vld [vmem:[%s4177_s4 + $0x1f8] sm:$0xff]  ;;  %v54_v17 = vld [vmem:[%s4176_s3 + $0x48] sm:$0xff]  ;;  %v2545_v18 = vld [vmem:[%s4177_s4 + $0x1d0] sm:$0xff] }
   0xe   :  { %161 = vmatpush.msra.mxu3 %v52_v9  ;;  %v2551_v19 = vld [vmem:[%s4177_s4 + $0x1d8] sm:$0xff]  ;;  %v2556_v20 = vld [vmem:[%s4177_s4 + $0x1e0] sm:$0xff]  ;;  %v50_v21 = vld [vmem:[%s4176_s3 + $0x28] sm:$0xff] }
   0xf   :  { %93 = vmatpush.msra.mxu1 %v45_v10  ;;  %139 = vmatpush.msra.mxu2 %v47_v11  ;;  %v2565_v22 = vld [vmem:[%s4177_s4 + $0x1b0] sm:$0xff]  ;;  %v2572_v23 = vld [vmem:[%s4177_s4 + $0x1b8] sm:$0xff]  ;;  %v2577_v24 = vld [vmem:[%s4177_s4 + $0x1c0] sm:$0xff] }
  0x10   :  { %2160 = vmatmul.msk.f32.vlgmr.msra.gmra.mxu1 %vm71_vm0, %v2519_v12  ;;  %162 = vmatpush.msra.mxu3 %v48_v13  ;;  %v46_v25 = vld [vmem:[%s4176_s3 + $0x8] sm:$0xff]  ;;  %v2586_v26 = vld [vmem:[%s4177_s4 + $0x190] sm:$0xff]  ;;  %v2599_v28 = vld [vmem:[%s4177_s4 + $0x198] sm:$0xff] }
  0x11   :  { %113 = vmatpush.msrb.mxu1 %v58_v14  ;;  %287 = vmatpush.msrb.mxu2 %v2530_v15  ;;  %v2594_v27 = vld [vmem:[%s4177_s4 + $0x1e8] sm:$0xff]  ;;  %v2610_v30 = vld [vmem:[%s4177_s4 + $0x170] sm:$0xff]  ;;  %v2622_v32 = vld [vmem:[%s4177_s4 + $0x178] sm:$0xff] }
  0x12   :  { %307 = vmatpush.msrb.mxu3 %v2535_v16  ;;  %247 = vmatpush.msra.mxu0 %v2556_v20  ;;  %v2605_v29 = vld [vmem:[%s4174_s1 + $0x8] sm:$0xff]  ;;  %v2629_v33 = vld [vmem:[%s4177_s4 + $0x150] sm:$0xff]  ;;  %v2642_v35 = vld [vmem:[%s4177_s4 + $0x158] sm:$0xff] }
  0x13   :  { %114 = vmatpush.msrb.mxu1 %v54_v17  ;;  %288 = vmatpush.msrb.mxu2 %v2545_v18  ;;  %v2617_v31 = vld [vmem:[%s4177_s4 + $0x1c8] sm:$0xff]  ;;  %v2649_v36 = vld [vmem:[%s4177_s4 + $0x1a0] sm:$0xff]  ;;  %v2654_v37 = vld [vmem:[%s4177_s4 + $0x130] sm:$0xff] }
  0x14   :  { %308 = vmatpush.msrb.mxu3 %v2551_v19  ;;  %2164 = vmatmul.msk.f32.vlgmr.msra.gmra.mxu2 %vm71_vm0, %v2519_v12  ;;  %v2637_v34 = vld [vmem:[%s4177_s4 + $0x1a8] sm:$0xff]  ;;  %v2667_v39 = vld [vmem:[%s4177_s4 + $0x138] sm:$0xff]  ;;  %v2674_v40 = vld [vmem:[%s4177_s4 + $0x180] sm:$0xff] }
  0x15   :  { %115 = vmatpush.msrb.mxu1 %v50_v21  ;;  %289 = vmatpush.msrb.mxu2 %v2565_v22  ;;  %v2662_v38 = vld [vmem:[%s4177_s4 + $0x188] sm:$0xff]  ;;  %v2679_v41 = vld [vmem:[%s4177_s4 + $0x110] sm:$0xff]  ;;  %v2691_v43 = vld [vmem:[%s4177_s4 + $0x118] sm:$0xff] }
  0x16   :  { %309 = vmatpush.msrb.mxu3 %v2572_v23  ;;  %248 = vmatpush.msra.mxu0 %v2577_v24  ;;  %v2686_v42 = vld [vmem:[%s4177_s4 + $0x168] sm:$0xff]  ;;  %v2698_v44 = vld [vmem:[%s4177_s4 + $0x160] sm:$0xff]  ;;  %v2710_v46 = vld [vmem:[%s4177_s4 + $0xf0] sm:$0xff] }
  0x17   :  { %116 = vmatpush.msrb.mxu1 %v46_v25  ;;  %290 = vmatpush.msrb.mxu2 %v2586_v26  ;;  %v2705_v45 = vld [vmem:[%s4177_s4 + $0x148] sm:$0xff]  ;;  %v2717_v47 = vld [vmem:[%s4177_s4 + $0xf8] sm:$0xff]  ;;  %v2725_v48 = vld [vmem:[%s4177_s4 + $0x140] sm:$0xff] }
  0x18   :  { %310 = vmatpush.msrb.mxu3 %v2599_v28  ;;  %2161 = vmatmul.msk.f32.gmra.mxu1 %vm71_vm0, %v2605_v29  ;;  %4286 = vst [vmem:[#allocation11_spill] sm:$0xff] %v2717_v47  ;;  %v2732_v49 = vld [vmem:[%s4177_s4 + $0x128] sm:$0xff]  ;;  %v2737_v50 = vld [vmem:[%s4177_s4 + $0xd0] sm:$0xff]  ;;  %v2745_v51 = vld [vmem:[%s4177_s4 + $0xd8] sm:$0xff] }
  0x19   :  { %267 = vmatpush.msra.mxu1 %v2594_v27  ;;  %291 = vmatpush.msrb.mxu2 %v2610_v30  ;;  %4287 = vst [vmem:[#allocation12_spill] sm:$0xff] %v2737_v50  ;;  %v2750_v52 = vld [vmem:[%s4177_s4 + $0x120] sm:$0xff]  ;;  %v2758_v53 = vld [vmem:[%s4177_s4 + $0x108] sm:$0xff]  ;;  %v2763_v54 = vld [vmem:[%s4177_s4 + $0xb0] sm:$0xff] }
  0x1a   :  { %311 = vmatpush.msrb.mxu3 %v2622_v32  ;;  %249 = vmatpush.msra.mxu0 %v2649_v36  ;;  %4288 = vst [vmem:[#allocation13_spill] sm:$0xff] %v2745_v51  ;;  %v2770_v55 = vld [vmem:[%s4177_s4 + $0xb8] sm:$0xff]  ;;  %v2775_v56 = vld [vmem:[%s4177_s4 + $0x100] sm:$0xff]  ;;  %v2782_v57 = vld [vmem:[%s4177_s4 + $0xe8] sm:$0xff] }
  0x1b   :  { %268 = vmatpush.msra.mxu1 %v2617_v31  ;;  %2166 = vmatmul.msk.f32.vlgmr.msra.gmra.mxu3 %vm71_vm0, %v2519_v12  ;;  %4289 = vst [vmem:[#allocation14_spill] sm:$0xff] %v2763_v54  ;;  %v2787_v58 = vld [vmem:[%s4177_s4 + $0x90] sm:$0xff]  ;;  %v2794_v59 = vld [vmem:[%s4177_s4 + $0x98] sm:$0xff]  ;;  %v2801_v60 = vld [vmem:[%s4177_s4 + $0xe0] sm:$0xff] }
  0x1c   :  { %292 = vmatpush.msrb.mxu2 %v2629_v33  ;;  %312 = vmatpush.msrb.mxu3 %v2642_v35  ;;  %4290 = vst [vmem:[#allocation15_spill] sm:$0xff] %v2770_v55  ;;  %v2806_v61 = vld [vmem:[%s4177_s4 + $0xc8] sm:$0xff]  ;;  %v2813_v62 = vld [vmem:[%s4177_s4 + $0x70] sm:$0xff]  ;;  %v2818_v63 = vld [vmem:[%s4177_s4 + $0x78] sm:$0xff] }
  0x1d   :  { %269 = vmatpush.msra.mxu1 %v2637_v34  ;;  %250 = vmatpush.msra.mxu0 %v2674_v40  ;;  %4291 = vst [vmem:[#allocation16_spill] sm:$0xff] %v2787_v58  ;;  %v2826_v0 = vld [vmem:[%s4177_s4 + $0xc0] sm:$0xff]  ;;  %v2831_v1 = vld [vmem:[%s4177_s4 + $0xa8] sm:$0xff]  ;;  %v2838_v2 = vld [vmem:[%s4177_s4 + $0x50] sm:$0xff] }
  0x1e   :  { %293 = vmatpush.msrb.mxu2 %v2654_v37  ;;  %313 = vmatpush.msrb.mxu3 %v2667_v39  ;;  %4292 = vst [vmem:[#allocation17_spill] sm:$0xff] %v2794_v59  ;;  %v2843_v3 = vld [vmem:[%s4177_s4 + $0x58] sm:$0xff]  ;;  %v2850_v4 = vld [vmem:[%s4177_s4 + $0xa0] sm:$0xff]  ;;  %v2855_v5 = vld [vmem:[%s4177_s4 + $0x88] sm:$0xff] }
  0x1f   :  { %270 = vmatpush.msra.mxu1 %v2662_v38  ;;  %251 = vmatpush.msra.mxu0 %v2698_v44  ;;  %4293 = vst [vmem:[#allocation18_spill] sm:$0xff] %v2806_v61  ;;  %v2862_v6 = vld [vmem:[%s4177_s4 + $0x30] sm:$0xff]  ;;  %v2867_v7 = vld [vmem:[%s4177_s4 + $0x38] sm:$0xff]  ;;  %v2874_v8 = vld [vmem:[%s4177_s4 + $0x80] sm:$0xff] }
  0x20   :  { %294 = vmatpush.msrb.mxu2 %v2679_v41  ;;  %314 = vmatpush.msrb.mxu3 %v2691_v43  ;;  %4294 = vst [vmem:[#allocation19_spill] sm:$0xff] %v2813_v62  ;;  %v2879_v9 = vld [vmem:[%s4177_s4 + $0x68] sm:$0xff]  ;;  %v2884_v10 = vld [vmem:[%s4175_s2] sm:$0x1]  ;;  %v2891_v11 = vld [vmem:[%s4177_s4 + $0x10] sm:$0xff] }
  0x21   :  { %271 = vmatpush.msra.mxu1 %v2686_v42  ;;  %2165 = vmatmul.msk.f32.gmra.mxu2 %vm71_vm0, %v2605_v29  ;;  %4295 = vst [vmem:[#allocation20_spill] sm:$0xff] %v2818_v63  ;;  %v2900_v13 = vld [vmem:[#allocation4] sm:$0x3]  ;;  %v2907_v14 = vld [vmem:[%s4177_s4 + $0x60] sm:$0xff]  ;;  %v2912_v17 = vld [vmem:[%s4177_s4 + $0x48] sm:$0xff]  ;;  %vm2170_vm1 = vcmp.gt.s32.totalorder %v2884_v10, 0 }
  0x22   :  { %2162 = vmatmul.msk.f32.vlgmr.msrb.gmra.mxu1 %vm71_vm0, %v2519_v12  ;;  %295 = vmatpush.msrb.mxu2 %v2710_v46  ;;  %4296 = vst [vmem:[#allocation21_spill] sm:$0xff] %v2826_v0  ;;  %v2896_v12 = vld [vmem:[%s4177_s4 + $0x18] sm:$0xff]  ;;  %v2922_v21 = vld [vmem:[%s4177_s4 + $0x40] sm:$0xff]  ;;  %v2927_v25 = vld [vmem:[%s4177_s4 + $0x28] sm:$0xff]  ;;  %vm2182_vm3 = vcmp.gt.s32.totalorder %v2884_v10, 3  ;;  %vm2194_vm5 = vcmp.gt.s32.totalorder %v2884_v10, 6 }
  0x23   :  { %272 = vmatpush.msra.mxu1 %v2705_v45  ;;  %315 = vmatpush.msrb.mxu3 %v2717_v47  ;;  %4297 = vst [vmem:[#allocation22_spill] sm:$0xff] %v2831_v1 }
  0x24   :  { %2167 = vmatmul.msk.f32.gmra.mxu3 %vm71_vm0, %v2605_v29  ;;  %252 = vmatpush.msra.mxu0 %v2725_v48  ;;  %4298 = vst [vmem:[#allocation23_spill] sm:$0xff] %v2838_v2 }
  0x25   :  { %273 = vmatpush.msra.mxu1 %v2732_v49  ;;  %296 = vmatpush.msrb.mxu2 %v2737_v50  ;;  %4299 = vst [vmem:[#allocation24_spill] sm:$0xff] %v2843_v3 }
  0x26   :  { %316 = vmatpush.msrb.mxu3 %v2745_v51  ;;  %253 = vmatpush.msra.mxu0 %v2750_v52  ;;  %4300 = vst [vmem:[#allocation25_spill] sm:$0xff] %v2850_v4 }
  0x27   :  { %274 = vmatpush.msra.mxu1 %v2758_v53  ;;  %297 = vmatpush.msrb.mxu2 %v2763_v54  ;;  %4301 = vst [vmem:[#allocation26_spill] sm:$0xff] %v2855_v5 }
  0x28   :  { %317 = vmatpush.msrb.mxu3 %v2770_v55  ;;  %254 = vmatpush.msra.mxu0 %v2775_v56  ;;  %4302 = vst [vmem:[#allocation27_spill] sm:$0xff] %v2862_v6 }
  0x29   :  { %275 = vmatpush.msra.mxu1 %v2782_v57  ;;  %298 = vmatpush.msrb.mxu2 %v2787_v58  ;;  %4303 = vst [vmem:[#allocation28_spill] sm:$0xff] %v2867_v7 }
  0x2a   :  { %318 = vmatpush.msrb.mxu3 %v2794_v59  ;;  %2163 = vmatmul.msk.f32.gmra.mxu1 %vm71_vm0, %v2605_v29  ;;  %4304 = vst [vmem:[#allocation29_spill] sm:$0xff] %v2874_v8  ;;  %v4196_v29 = vmov 0  }
  0x2b   :  { %255 = vmatpush.msra.mxu0 %v2801_v60  ;;  %276 = vmatpush.msra.mxu1 %v2806_v61  ;;  %4305 = vst [vmem:[#allocation30_spill] sm:$0xff] %v2879_v9 }
  0x2c   :  { %299 = vmatpush.msrb.mxu2 %v2813_v62  ;;  %319 = vmatpush.msrb.mxu3 %v2818_v63  ;;  %4306 = vst [vmem:[#allocation31_spill] sm:$0xff] %v2884_v10 }
  0x2d   :  { %256 = vmatpush.msra.mxu0 %v2826_v0  ;;  %277 = vmatpush.msra.mxu1 %v2831_v1  ;;  %4307 = vst [vmem:[#allocation32_spill] sm:$0xff] %v2891_v11 }
  0x2e   :  { %300 = vmatpush.msrb.mxu2 %v2838_v2  ;;  %320 = vmatpush.msrb.mxu3 %v2843_v3  ;;  %4308 = vst [vmem:[#allocation33_spill] sm:$0xff] %v2896_v12  ;;  %v2954_v3 = vld [vmem:[%s4177_s4] sm:$0xff] }
  0x2f   :  { %257 = vmatpush.msra.mxu0 %v2850_v4  ;;  %278 = vmatpush.msra.mxu1 %v2855_v5  ;;  %4309 = vst [vmem:[#allocation34_spill] sm:$0xff] %v2900_v13  ;;  %v4318_v10 = vld [vmem:[#allocation27_spill] sm:$0xff] }
  0x30   :  { %301 = vmatpush.msrb.mxu2 %v2862_v6  ;;  %321 = vmatpush.msrb.mxu3 %v2867_v7  ;;  %4310 = vst [vmem:[#allocation35_spill] sm:$0xff] %v2907_v14  ;;  %v2940_v7 = vld [vmem:[%s4177_s4 + $0x8] sm:$0xff]  ;;  %v2949_v6 = vld [vmem:[%s4175_s2 + $0x1] sm:$0x1] }
  0x31   :  { %258 = vmatpush.msra.mxu0 %v2874_v8  ;;  %279 = vmatpush.msra.mxu1 %v2879_v9  ;;  %4311 = vst [vmem:[#allocation36_spill] sm:$0xff] %v2912_v17  ;;  %vm2171_vm2 = vcmp.gt.s32.totalorder %v2949_v6, 0  ;;  %vm2187_vm4 = vcmp.gt.s32.totalorder %v2949_v6, 4  ;;  %vm2199_vm6 = vcmp.gt.s32.totalorder %v2949_v6, 7 }
  0x32   :  { %302 = vmatpush.msrb.mxu2 %v2891_v11  ;;  %322 = vmatpush.msrb.mxu3 %v2896_v12  ;;  %4312 = vst [vmem:[#allocation37_spill] sm:$0xff] %v2922_v21  ;;  %v423_v12 = vsel %vm2170_vm1, 1, %v4196_v29  ;;  %v2935_v11 = vld [vmem:[%s4177_s4 + $0x20] sm:$0xff] }
  0x33   :  { %303 = vmatmul.f32.vlgmr.msrb.gmra.mxu2 %v2900_v13  ;;  %323 = vmatmul.f32.vlgmr.msrb.gmra.mxu3 %v2900_v13  ;;  %4313 = vst [vmem:[#allocation38_spill] sm:$0xff] %v2927_v25 }
  0x34   :  { %259 = vmatpush.msra.mxu0 %v2907_v14  ;;  %280 = vmatpush.msra.mxu1 %v2912_v17  ;;  %4314 = vst [vmem:[#allocation39_spill] sm:$0xff] %v2935_v11 }
  0x35   :  { %4315 = vst [vmem:[#allocation40_spill] sm:$0xff] %v2940_v7  ;;  %2207 = vset.pattern.permute.xlu0 %v4196_v29  ;;  %503 = vmatpush.msra.mxu2 %v2530_v15 }
  0x36   :  { %260 = vmatpush.msra.mxu0 %v2922_v21  ;;  %281 = vmatpush.msra.mxu1 %v2927_v25  ;;  %4316 = vst [vmem:[#allocation41_spill] sm:$0xff] %v2954_v3 }
  0x37   :  { %426 = vperm.xlu0 %2207, %v423_v12   ;;  %523 = vmatpush.msra.mxu3 %v2535_v16  ;;  %v424_v12 = vsel %vm2171_vm2, 1, %v4196_v29 }
  0x38   :  { %261 = vmatpush.msra.mxu0 %v2935_v11  ;;  %282 = vmatpush.msra.mxu1 %v2940_v7 }
  0x39   :  { %283 = vmatmul.f32.vlgmr.msra.gmra.mxu1 %v2900_v13  ;;  %504 = vmatpush.msra.mxu2 %v2545_v18 }
  0x3a   :  { %262 = vmatpush.msra.mxu0 %v2954_v3  ;;  %483 = vmatpush.msrb.mxu1 %v2594_v27 }
  0x3b   :  { %263 = vmatmul.f32.vlgmr.msra.gmra.mxu0 %v2900_v13  ;;  %524 = vmatpush.msra.mxu3 %v2551_v19  ;;  %v4317_v13 = vld [vmem:[#allocation24_spill] sm:$0xff] }
  0x3c   :  { %463 = vmatpush.msrb.mxu0 %v2556_v20  ;;  %484 = vmatpush.msrb.mxu1 %v2617_v31 }
  0x3d   :  { %505 = vmatpush.msra.mxu2 %v2565_v22  ;;  %525 = vmatpush.msra.mxu3 %v2572_v23 }
  0x3e   :  { %464 = vmatpush.msrb.mxu0 %v2577_v24  ;;  %485 = vmatpush.msrb.mxu1 %v2637_v34 }
  0x3f   :  { %430 = vperm.xlu0 %2207, %v424_v12   ;;  %506 = vmatpush.msra.mxu2 %v2586_v26  ;;  %v1043_v12 = vsel %vm2182_vm3, 1, %v4196_v29 }
  0x40   :  { %465 = vmatpush.msrb.mxu0 %v2649_v36  ;;  %486 = vmatpush.msrb.mxu1 %v2662_v38 }
  0x41   :  { %526 = vmatpush.msra.mxu3 %v2599_v28  ;;  %507 = vmatpush.msra.mxu2 %v2610_v30 }
  0x42   :  { %466 = vmatpush.msrb.mxu0 %v2674_v40  ;;  %487 = vmatpush.msrb.mxu1 %v2686_v42 }
  0x43   :  { %527 = vmatpush.msra.mxu3 %v2622_v32  ;;  %508 = vmatpush.msra.mxu2 %v2629_v33 }
  0x44   :  { %467 = vmatpush.msrb.mxu0 %v2698_v44  ;;  %488 = vmatpush.msrb.mxu1 %v2705_v45 }
  0x45   :  { %528 = vmatpush.msra.mxu3 %v2642_v35  ;;  %509 = vmatpush.msra.mxu2 %v2654_v37 }
  0x46   :  { %468 = vmatpush.msrb.mxu0 %v2725_v48  ;;  %489 = vmatpush.msrb.mxu1 %v2732_v49 }
  0x47   :  { %1046 = vperm.xlu0 %2207, %v1043_v12   ;;  %529 = vmatpush.msra.mxu3 %v2667_v39  ;;  %v1250_v12 = vsel %vm2187_vm4, 1, %v4196_v29 }
  0x48   :  { %469 = vmatpush.msrb.mxu0 %v2750_v52  ;;  %490 = vmatpush.msrb.mxu1 %v2758_v53 }
  0x49   :  { %510 = vmatpush.msra.mxu2 %v2679_v41  ;;  %530 = vmatpush.msra.mxu3 %v2691_v43 }
  0x4a   :  { %470 = vmatpush.msrb.mxu0 %v2775_v56  ;;  %491 = vmatpush.msrb.mxu1 %v2782_v57 }
  0x4b   :  { %511 = vmatpush.msra.mxu2 %v2710_v46  ;;  %531 = vmatpush.msra.mxu3 %v2717_v47 }
  0x4c   :  { %471 = vmatpush.msrb.mxu0 %v2801_v60  ;;  %492 = vmatpush.msrb.mxu1 %v2806_v61 }
  0x4d   :  { %512 = vmatpush.msra.mxu2 %v2737_v50  ;;  %532 = vmatpush.msra.mxu3 %v2745_v51 }
  0x4e   :  { %472 = vmatpush.msrb.mxu0 %v2826_v0  ;;  %493 = vmatpush.msrb.mxu1 %v2831_v1 }
  0x4f   :  { %1256 = vperm.xlu0 %2207, %v1250_v12   ;;  %513 = vmatpush.msra.mxu2 %v2763_v54  ;;  %v1661_v12 = vsel %vm2194_vm5, 1, %v4196_v29  ;;  %v4319_v29 = vld [vmem:[#allocation28_spill] sm:$0xff] }
  0x50   :  { %473 = vmatpush.msrb.mxu0 %v2850_v4  ;;  %533 = vmatpush.msra.mxu3 %v2770_v55 }
  0x51   :  { %494 = vmatpush.msrb.mxu1 %v2855_v5  ;;  %514 = vmatpush.msra.mxu2 %v2787_v58 }
  0x52   :  { %474 = vmatpush.msrb.mxu0 %v2874_v8  ;;  %534 = vmatpush.msra.mxu3 %v2794_v59 }
  0x53   :  { %495 = vmatpush.msrb.mxu1 %v2879_v9  ;;  %515 = vmatpush.msra.mxu2 %v2813_v62 }
  0x54   :  { %475 = vmatpush.msrb.mxu0 %v2907_v14  ;;  %535 = vmatpush.msra.mxu3 %v2818_v63 }
  0x55   :  { %496 = vmatpush.msrb.mxu1 %v2912_v17  ;;  %516 = vmatpush.msra.mxu2 %v2838_v2  ;;  %v4320_v2 = vld [vmem:[#allocation32_spill] sm:$0xff]  ;;  %v4321_v17 = vld [vmem:[#allocation33_spill] sm:$0xff] }
  0x56   :  { %476 = vmatpush.msrb.mxu0 %v2922_v21  ;;  %536 = vmatpush.msra.mxu3 %v4317_v13  ;;  %v4322_v13 = vmov 0  }
  0x57   :  { %1664 = vperm.xlu0 %2207, %v1661_v12   ;;  %497 = vmatpush.msrb.mxu1 %v2927_v25  ;;  %v1868_v12 = vsel %vm2199_vm6, 1, %v4322_v13 }
  0x58   :  { %477 = vmatpush.msrb.mxu0 %v2935_v11  ;;  %517 = vmatpush.msra.mxu2 %v4318_v10 }
  0x59   :  { %537 = vmatpush.msra.mxu3 %v4319_v29  ;;  %498 = vmatpush.msrb.mxu1 %v2940_v7 }
  0x5a   :  { %478 = vmatpush.msrb.mxu0 %v2954_v3  ;;  %518 = vmatpush.msra.mxu2 %v4320_v2 }
  0x5b   :  { %538 = vmatpush.msra.mxu3 %v4321_v17  ;;  %2208 = vset.pattern.permute.xlu1 %v4322_v13 }
  0x5c   :  { %669 = vmatpush.msra.mxu0 %v2556_v20  ;;  %689 = vmatpush.msra.mxu1 %v2594_v27 }
  0x5d   :  { %709 = vmatpush.msrb.mxu2 %v2530_v15  ;;  %729 = vmatpush.msrb.mxu3 %v2535_v16 }
  0x5e   :  { %670 = vmatpush.msra.mxu0 %v2577_v24  ;;  %690 = vmatpush.msra.mxu1 %v2617_v31 }
  0x5f   :  { %1874 = vperm.xlu0 %2207, %v1868_v12   ;;  %710 = vmatpush.msrb.mxu2 %v2545_v18  ;;  %v4323_v12 = vld [vmem:[#allocation36_spill] sm:$0xff] }
  0x60   :  { %730 = vmatpush.msrb.mxu3 %v2551_v19  ;;  %671 = vmatpush.msra.mxu0 %v2649_v36 }
  0x61   :  { %691 = vmatpush.msra.mxu1 %v2637_v34  ;;  %711 = vmatpush.msrb.mxu2 %v2565_v22 }
  0x62   :  { %731 = vmatpush.msrb.mxu3 %v2572_v23  ;;  %672 = vmatpush.msra.mxu0 %v2674_v40 }
  0x63   :  { %692 = vmatpush.msra.mxu1 %v2662_v38  ;;  %712 = vmatpush.msrb.mxu2 %v2586_v26 }
  0x64   :  { %732 = vmatpush.msrb.mxu3 %v2599_v28  ;;  %673 = vmatpush.msra.mxu0 %v2698_v44 }
  0x65   :  { %693 = vmatpush.msra.mxu1 %v2686_v42  ;;  %713 = vmatpush.msrb.mxu2 %v2610_v30 }
  0x66   :  { %733 = vmatpush.msrb.mxu3 %v2622_v32  ;;  %674 = vmatpush.msra.mxu0 %v2725_v48 }
  0x67   :  { %694 = vmatpush.msra.mxu1 %v2705_v45  ;;  %714 = vmatpush.msrb.mxu2 %v2629_v33 }
  0x68   :  { %734 = vmatpush.msrb.mxu3 %v2642_v35  ;;  %675 = vmatpush.msra.mxu0 %v2750_v52 }
  0x69   :  { %695 = vmatpush.msra.mxu1 %v2732_v49  ;;  %715 = vmatpush.msrb.mxu2 %v2654_v37 }
  0x6a   :  { %735 = vmatpush.msrb.mxu3 %v2667_v39  ;;  %676 = vmatpush.msra.mxu0 %v2775_v56 }
  0x6b   :  { %696 = vmatpush.msra.mxu1 %v2758_v53  ;;  %716 = vmatpush.msrb.mxu2 %v2679_v41 }
  0x6c   :  { %736 = vmatpush.msrb.mxu3 %v2691_v43  ;;  %677 = vmatpush.msra.mxu0 %v2801_v60 }
  0x6d   :  { %697 = vmatpush.msra.mxu1 %v2782_v57  ;;  %717 = vmatpush.msrb.mxu2 %v2710_v46 }
  0x6e   :  { %737 = vmatpush.msrb.mxu3 %v2717_v47  ;;  %678 = vmatpush.msra.mxu0 %v2826_v0 }
  0x6f   :  { %698 = vmatpush.msra.mxu1 %v2806_v61  ;;  %718 = vmatpush.msrb.mxu2 %v2737_v50 }
  0x70   :  { %738 = vmatpush.msrb.mxu3 %v2745_v51  ;;  %679 = vmatpush.msra.mxu0 %v2850_v4  ;;  %v243_v4 = vld [vmem:[#allocation5] sm:$0x3] }
  0x71   :  { %699 = vmatpush.msra.mxu1 %v2831_v1  ;;  %719 = vmatpush.msrb.mxu2 %v2763_v54 }
  0x72   :  { %739 = vmatpush.msrb.mxu3 %v2770_v55  ;;  %680 = vmatpush.msra.mxu0 %v2874_v8  ;;  %v4324_v55 = vld [vmem:[#allocation23_spill] sm:$0xff]  ;;  %v4325_v8 = vld [vmem:[#allocation24_spill] sm:$0xff] }
  0x73   :  { %700 = vmatpush.msra.mxu1 %v2855_v5  ;;  %720 = vmatpush.msrb.mxu2 %v2787_v58 }
  0x74   :  { %740 = vmatpush.msrb.mxu3 %v2794_v59  ;;  %681 = vmatpush.msra.mxu0 %v2907_v14 }
  0x75   :  { %701 = vmatpush.msra.mxu1 %v2879_v9  ;;  %721 = vmatpush.msrb.mxu2 %v2813_v62 }
  0x76   :  { %741 = vmatpush.msrb.mxu3 %v2818_v63  ;;  %682 = vmatpush.msra.mxu0 %v2922_v21 }
  0x77   :  { %702 = vmatpush.msra.mxu1 %v4323_v12  ;;  %722 = vmatpush.msrb.mxu2 %v4324_v55 }
  0x78   :  { %742 = vmatpush.msrb.mxu3 %v4325_v8  ;;  %683 = vmatpush.msra.mxu0 %v2935_v11  ;;  %v61_v11 = vld [vmem:[%s4178_s5] sm:$0xf] }
  0x79   :  { %703 = vmatpush.msra.mxu1 %v2927_v25  ;;  %723 = vmatpush.msrb.mxu2 %v4318_v10  ;;  %v63_v8 = vperm.slane %v61_v11, 0  ;;  %v65_v10 = vperm.slane %v61_v11, 2 }
  0x7a   :  { %743 = vmatpush.msrb.mxu3 %v4319_v29  ;;  %684 = vmatpush.msra.mxu0 %v2954_v3 }
  0x7b   :  { %704 = vmatpush.msra.mxu1 %v2940_v7  ;;  %724 = vmatpush.msrb.mxu2 %v4320_v2  ;;  %v64_v2 = vperm.slane %v61_v11, 1  ;;  %v66_v7 = vperm.slane %v61_v11, 3 }
  0x7c   :  { %744 = vmatpush.msrb.mxu3 %v4321_v17  ;;  %2209 = vset.pattern.permute.xlu2 %v4322_v13 }
  0x8d   :  { %v95_v25 = vpop.f32.mrf.mxu1 }
  0x8e   :  { %v96_v55 = vadd.f32 %v95_v25, %v63_v8 }
  0x90   :  { %170 = vst [vmem:[#allocation2] sm:$0xff] %v96_v55 }
  0x95   :  { %v98_v29 = vpop.f32.mrf.mxu1 }
  0x96   :  { %v99_v12 = vadd.f32 %v98_v29, %v63_v8 }
  0x97   :  { %v141_v3 = vpop.f32.mrf.mxu2 }
  0x98   :  { %v142_v21 = vadd.f32 %v141_v3, %v65_v10  ;;  %174 = vst [vmem:[#allocation2 + $0x20] sm:$0xff] %v99_v12 }
  0x9a   :  { %172 = vst [vmem:[#allocation2 + $0x10] sm:$0xff] %v142_v21 }
  0x9e   :  { %v164_v63 = vpop.f32.mrf.mxu3 }
  0x9f   :  { %v118_v17 = vpop.f32.mrf.mxu1  ;;  %v165_v9 = vadd.f32 %v164_v63, %v66_v7 }
  0xa0   :  { %v119_v62 = vadd.f32 %v118_v17, %v64_v2 }
  0xa1   :  { %173 = vst [vmem:[#allocation2 + $0x18] sm:$0xff] %v165_v9 }
  0xa2   :  { %171 = vst [vmem:[#allocation2 + $0x8] sm:$0xff] %v119_v62 }
  0xa4   :  { %v144_v14 = vpop.f32.mrf.mxu2 }
  0xa5   :  { %v145_v58 = vadd.f32 %v144_v14, %v65_v10 }
  0xa7   :  { %v121_v59 = vpop.f32.mrf.mxu1  ;;  %v167_v25 = vpop.f32.mrf.mxu3  ;;  %176 = vst [vmem:[#allocation2 + $0x30] sm:$0xff] %v145_v58 }
  0xa8   :  { %v122_v55 = vadd.f32 %v121_v59, %v64_v2  ;;  %v168_v5 = vadd.f32 %v167_v25, %v66_v7 }
  0xaa   :  { %175 = vst [vmem:[#allocation2 + $0x28] sm:$0xff] %v122_v55 }
  0xab   :  { %177 = vst [vmem:[#allocation2 + $0x38] sm:$0xff] %v168_v5  ;;  %v244_v5 = vld [vmem:[#allocation2] ss:$8 sm:$0xf] }
  0xb2   :  { %v246_v12 = vld [vmem:[#allocation2 + $0x20] ss:$8 sm:$0xf] }
  0xb6   :  { %v284_v3 = vpop.f32.mrf.mxu1  ;;  %v304_v8 = vpop.f32.mrf.mxu2 }
  0xb7   :  { %v331_v11 = vrot.slane %v284_v3, 7  ;;  %v332_v21 = vrot.slane %v304_v8, 6  ;;  %v324_v29 = vpop.f32.mrf.mxu3 }
  0xb8   :  { %v333_v62 = vrot.slane %v324_v29, 5  ;;  %v264_v63 = vpop.f32.mrf.mxu0 }
  0xb9   :  { %v335_v9 = vsel %vm334_vm7, %v264_v63, %v331_v11  ;;  %v341_v59 = vsel %vm340_vm8, %v264_v63, %v331_v11 }
  0xba   :  { %v337_v58 = vsel %vm336_vm9, %v332_v21, %v333_v62  ;;  %v343_v2 = vsel %vm342_vm10, %v332_v21, %v333_v62  ;;  %v427_v62 = vpop.permute.xlu0 %426 }
  0xbb   :  { %v339_v7 = vsel %vm338_vm11, %v335_v9, %v337_v58  ;;  %v345_v10 = vsel %vm344_vm12, %v341_v59, %v343_v2 }
  0xbc   :  { %v346_v14 = vrot.slane %v345_v10, 1  ;;  %v349_v17 = vadd.f32 %v339_v7, %v244_v5 }
  0xbe   :  { %v350_v25 = vadd.f32 %v346_v14, %v246_v12  ;;  %v2168_v55 = vmul.f32 -1.442695, %v349_v17  ;;  %v391_v58 = vrot.slane %v349_v17, 3 }
  0xc0   :  { %2211 = vpow2.f32 %v2168_v55  ;;  %v2169_v3 = vmul.f32 -1.442695, %v350_v25  ;;  %v392_v7 = vrot.slane %v350_v25, 3  ;;  %v428_v25 = vperm.slane %v427_v62, 0 }
  0xc2   :  { %2213 = vpow2.f32 %v2169_v3  ;;  %vm3109_vm5 = vcmp.eq.s32.totalorder %v428_v25, 1 }
  0xc6   :  { %v2212_v8 = vpop.eup %2211 }
  0xc7   :  { %v357_v29 = vadd.f32 1.0, %v2212_v8 }
  0xc8   :  { %v2214_v11 = vpop.eup %2213 }
  0xc9   :  { %v358_v63 = vadd.f32 1.0, %v2214_v11  ;;  %2215 = vrcp.f32 %v357_v29  ;;  %v370_v5 = vand.u32 2147483648, %v357_v29  ;;  %v368_v14 = vand.u32 2147483647, %v357_v29 }
  0xca   :  { %vm364_vm14 = vweird.f32 %v357_v29 }
  0xcb   :  { %2217 = vrcp.f32 %v358_v63  ;;  %v385_v55 = vand.u32 2147483648, %v358_v63  ;;  %v383_v11 = vand.u32 2147483647, %v358_v63  ;;  %v371_v1 = vor.u32 1.1754944e-38, %v370_v5 }
  0xcc   :  { %2219 = vtanh.f32 %v391_v58  ;;  %vm369_vm1 = vcmp.eq.f32.partialorder %v368_v14, 8.507059e+37  ;;  %vm379_vm2 = vweird.f32 %v358_v63  ;;  %v404_v58 = vrot.slane %v243_v4, 1  ;;  %v4328_v14 = vld [vmem:[#allocation31_spill] sm:$0xff] }
  0xcd   :  { %2221 = vtanh.f32 %v392_v7  ;;  %v386_v51 = vor.u32 1.1754944e-38, %v385_v55  ;;  %vm384_vm4 = vcmp.eq.f32.partialorder %v383_v11, 8.507059e+37  ;;  %vm2174_vm6 = vcmp.gt.s32.totalorder %v4328_v14, 1 }
  0xcf   :  { %v2216_v21 = vpop.eup %2215 }
  0xd0   :  { %v360_v54 = vmul.f32 %v2216_v21, %v357_v29  ;;  %vm365_vm13 = vweird.f32 %v2216_v21 }
  0xd1   :  { %v2218_v9 = vpop.eup %2217  ;;  %vm366_vm0 = vmor %vm364_vm14, %vm365_vm13  ;;  %vm2175_vm14 = vcmp.gt.s32.totalorder %v2949_v6, 1 }
  0xd2   :  { %v361_v59 = vsub.f32 1.0, %v360_v54  ;;  %v375_v2 = vmul.f32 %v2218_v9, %v358_v63  ;;  %vm380_vm15 = vweird.f32 %v2218_v9 }
  0xd3   :  { %vm381_vm3 = vmor %vm379_vm2, %vm380_vm15  ;;  %vm2183_vm15 = vcmp.gt.s32.totalorder %v2949_v6, 3 }
  0xd4   :  { %v362_v10 = vmul.f32 %v2216_v21, %v361_v59  ;;  %v376_v12 = vsub.f32 1.0, %v375_v2 }
  0xd6   :  { %v363_v3 = vadd.f32 %v2216_v21, %v362_v10  ;;  %v377_v8 = vmul.f32 %v2218_v9, %v376_v12  ;;  %v431_v10 = vpop.permute.xlu0 %430  ;;  %v2220_v12 = vpop.eup %2219 }
  0xd7   :  { %v432_v61 = vperm.slane %v431_v10, 0  ;;  %v2222_v47 = vpop.eup %2221 }
  0xd8   :  { %v367_v17 = vsel %vm366_vm0, %v2216_v21, %v363_v3  ;;  %v378_v54 = vadd.f32 %v2218_v9, %v377_v8  ;;  %vm2190_vm0 = vcmp.gt.s32.totalorder %v4328_v14, 5 }
  0xd9   :  { %v372_v59 = vsel %vm369_vm1, %v371_v1, %v367_v17  ;;  %vm3114_vm13 = vcmp.eq.s32.totalorder %v432_v61, 1  ;;  %vm2195_vm1 = vcmp.gt.s32.totalorder %v2949_v6, 6 }
  0xda   :  { %v382_v2 = vsel %vm381_vm3, %v2218_v9, %v378_v54  ;;  %v399_v29 = vrot.slane %v372_v59, 1  ;;  %v408_v0 = vmul.f32 %v2220_v12, %v372_v59  ;;  %v414_v61 = vrot.slane %v372_v59, 2 }
  0xdb   :  { %v387_v50 = vsel %vm384_vm4, %v386_v51, %v382_v2  ;;  %v631_v51 = vsel %vm2174_vm6, 1, %v4322_v13  ;;  %v1044_v59 = vsel %vm2183_vm15, 1, %v4322_v13  ;;  %v1662_v21 = vsel %vm2195_vm1, 1, %v4322_v13 }
  0xdc   :  { %v400_v5 = vrot.slane %v387_v50, 1  ;;  %v406_v7 = vmul.f32 %v399_v29, %v243_v4  ;;  %v409_v1 = vmul.f32 %v2222_v47, %v387_v50  ;;  %634 = vperm.xlu1 %2208, %v631_v51   ;;  %v415_v11 = vrot.slane %v387_v50, 2  ;;  %v4331_v29 = vld [vmem:[#allocation34_spill] sm:$0xff] }
  0xdd   :  { %vm2178_vm1 = vcmp.gt.s32.totalorder %v4328_v14, 2 }
  0xde   :  { %v407_v63 = vmul.f32 %v404_v58, %v400_v5  ;;  %v410_v62 = vadd.f32 %v408_v0, %v406_v7  ;;  %v632_v0 = vsel %vm2175_vm14, 1, %v4322_v13  ;;  %v1455_v5 = vsel %vm2190_vm0, 1, %v4322_v13 }
  0xe0   :  { %v411_v55 = vadd.f32 %v409_v1, %v407_v63  ;;  %2223 = vtanh.f32 %v410_v62  ;;  %v3121_v3 = vsel %vm3109_vm5, %v410_v62, %v243_v4 }
  0xe2   :  { %2225 = vtanh.f32 %v411_v55  ;;  %v3125_v47 = vsel %vm3114_vm13, %v411_v55, %v404_v58  ;;  %v436_v58 = vrot.slane %v4331_v29, 1  ;;  %v453_v55 = vld [vmem:[#allocation2 + $0x1] ss:$8 sm:$0xf] }
  0xe4   :  { %638 = vperm.xlu1 %2208, %v632_v0  }
  0xe6   :  { %v2224_v8 = vpop.eup %2223 }
  0xe7   :  { %v418_v17 = vmul.f32 %v2224_v8, %v414_v61 }
  0xe8   :  { %v2226_v54 = vpop.eup %2225 }
  0xe9   :  { %v419_v25 = vmul.f32 %v2226_v54, %v415_v11  ;;  %v442_v4 = vsel %vm3109_vm5, %v418_v17, 0.0  ;;  %v3140_v50 = vsel %vm3109_vm5, %v418_v17, %v4331_v29  ;;  %v455_v17 = vld [vmem:[#allocation2 + $0x21] ss:$8 sm:$0xf] }
  0xea   :  { %446 = vst [vmem:[#allocation1] ss:$9 sm:$0xff] %v442_v4 }
  0xeb   :  { %v443_v2 = vsel %vm3114_vm13, %v419_v25, 0.0  ;;  %v3144_v12 = vsel %vm3114_vm13, %v419_v25, %v436_v58 }
  0xec   :  { %448 = vst [vmem:[#allocation1 + $0x1] ss:$9 sm:$0xff] %v443_v2  ;;  %1050 = vperm.xlu1 %2208, %v1044_v59  }
  0xf3   :  { %v449_v10 = vld [vmem:[#allocation1] sm:$0xff] }
  0xf4   :  { %458 = vst [vmem:[#allocation1] ss:$9 sm:$0xff] %v3140_v50  ;;  %1458 = vperm.xlu1 %2208, %v1455_v5  }
  0xf5   :  { %460 = vst [vmem:[#allocation1 + $0x1] ss:$9 sm:$0xff] %v3144_v12 }
  0xf6   :  { %451 = vst [vmem:[#allocation3] sm:$0x3] %v449_v10 }
  0xfc   :  { %v461_v7 = vld [vmem:[#allocation1] sm:$0xff]  ;;  %1668 = vperm.xlu1 %2208, %v1662_v21  }
  0xfd   :  { %479 = vmatmul.f32.vlgmr.msrb.gmra.mxu0 %v461_v7  ;;  %499 = vmatmul.f32.vlgmr.msrb.gmra.mxu1 %v461_v7 }
  0xfe   :  { %519 = vmatmul.f32.vlgmr.msra.gmra.mxu2 %v461_v7  ;;  %539 = vmatmul.f32.vlgmr.msra.gmra.mxu3 %v461_v7 }
  0xff   :  { %875 = vmatpush.msrb.mxu0 %v2556_v20  ;;  %895 = vmatpush.msrb.mxu1 %v2594_v27  ;;  %v4336_v20 = vld [vmem:[#allocation13_spill] sm:$0xff] }
 0x100   :  { %915 = vmatpush.msra.mxu2 %v2530_v15  ;;  %935 = vmatpush.msra.mxu3 %v2535_v16  ;;  %v4332_v15 = vld [vmem:[#allocation11_spill] sm:$0xff]  ;;  %v4333_v16 = vld [vmem:[#allocation21_spill] sm:$0xff] }
 0x101   :  { %876 = vmatpush.msrb.mxu0 %v2577_v24  ;;  %896 = vmatpush.msrb.mxu1 %v2617_v31  ;;  %v4339_v24 = vld [vmem:[#allocation14_spill] sm:$0xff]  ;;  %v4341_v27 = vld [vmem:[#allocation29_spill] sm:$0xff] }
 0x102   :  { %916 = vmatpush.msra.mxu2 %v2545_v18  ;;  %936 = vmatpush.msra.mxu3 %v2551_v19  ;;  %v4334_v18 = vld [vmem:[#allocation18_spill] sm:$0xff]  ;;  %v4335_v19 = vld [vmem:[#allocation12_spill] sm:$0xff]  ;;  %v4344_v31 = vld [vmem:[#allocation17_spill] sm:$0xff] }
 0x103   :  { %877 = vmatpush.msrb.mxu0 %v2649_v36  ;;  %897 = vmatpush.msrb.mxu1 %v2637_v34  ;;  %v4347_v34 = vld [vmem:[#allocation19_spill] sm:$0xff]  ;;  %v4349_v36 = vld [vmem:[#allocation37_spill] sm:$0xff] }
 0x104   :  { %917 = vmatpush.msra.mxu2 %v2565_v22  ;;  %937 = vmatpush.msra.mxu3 %v2572_v23  ;;  %v4337_v22 = vld [vmem:[#allocation25_spill] sm:$0xff]  ;;  %v4338_v23 = vld [vmem:[#allocation22_spill] sm:$0xff] }
 0x105   :  { %878 = vmatpush.msrb.mxu0 %v2674_v40  ;;  %898 = vmatpush.msrb.mxu1 %v2662_v38  ;;  %v4351_v38 = vld [vmem:[#allocation23_spill] sm:$0xff] }
 0x106   :  { %918 = vmatpush.msra.mxu2 %v2586_v26  ;;  %938 = vmatpush.msra.mxu3 %v2599_v28  ;;  %v4340_v26 = vld [vmem:[#allocation15_spill] sm:$0xff]  ;;  %v4342_v28 = vld [vmem:[#allocation26_spill] sm:$0xff] }
 0x107   :  { %879 = vmatpush.msrb.mxu0 %v2698_v44  ;;  %899 = vmatpush.msrb.mxu1 %v2686_v42  ;;  %v4353_v40 = vld [vmem:[#allocation39_spill] sm:$0xff]  ;;  %v4357_v44 = vld [vmem:[#allocation41_spill] sm:$0xff] }
 0x108   :  { %919 = vmatpush.msra.mxu2 %v2610_v30  ;;  %939 = vmatpush.msra.mxu3 %v2622_v32  ;;  %v4343_v30 = vld [vmem:[#allocation16_spill] sm:$0xff]  ;;  %v4345_v32 = vld [vmem:[#allocation35_spill] sm:$0xff] }
 0x109   :  { %880 = vmatpush.msrb.mxu0 %v2725_v48  ;;  %900 = vmatpush.msrb.mxu1 %v2705_v45  ;;  %v4355_v42 = vld [vmem:[#allocation27_spill] sm:$0xff]  ;;  %v4358_v45 = vld [vmem:[#allocation40_spill] sm:$0xff]  ;;  %v4360_v48 = vld [vmem:[#allocation33_spill] sm:$0xff] }
 0x10a   :  { %920 = vmatpush.msra.mxu2 %v2629_v33  ;;  %940 = vmatpush.msra.mxu3 %v2642_v35  ;;  %v4346_v33 = vld [vmem:[#allocation30_spill] sm:$0xff]  ;;  %v4348_v35 = vld [vmem:[#allocation20_spill] sm:$0xff] }
 0x10b   :  { %881 = vmatpush.msrb.mxu0 %v2750_v52  ;;  %901 = vmatpush.msrb.mxu1 %v2732_v49 }
 0x10c   :  { %921 = vmatpush.msra.mxu2 %v2654_v37  ;;  %941 = vmatpush.msra.mxu3 %v2667_v39  ;;  %v4350_v37 = vld [vmem:[#allocation36_spill] sm:$0xff] }
 0x10d   :  { %882 = vmatpush.msrb.mxu0 %v2775_v56  ;;  %902 = vmatpush.msrb.mxu1 %v2758_v53  ;;  %v4352_v39 = vld [vmem:[#allocation24_spill] sm:$0xff] }
 0x10e   :  { %922 = vmatpush.msra.mxu2 %v2679_v41  ;;  %942 = vmatpush.msra.mxu3 %v2691_v43  ;;  %v4354_v41 = vld [vmem:[#allocation38_spill] sm:$0xff]  ;;  %v4356_v43 = vld [vmem:[#allocation28_spill] sm:$0xff] }
 0x10f   :  { %883 = vmatpush.msrb.mxu0 %v2801_v60  ;;  %903 = vmatpush.msrb.mxu1 %v2782_v57 }
 0x110   :  { %923 = vmatpush.msra.mxu2 %v2710_v46  ;;  %943 = vmatpush.msra.mxu3 %v4332_v15  ;;  %v4359_v46 = vld [vmem:[#allocation32_spill] sm:$0xff] }
 0x111   :  { %884 = vmatpush.msrb.mxu0 %v4333_v16  ;;  %904 = vmatpush.msrb.mxu1 %v4334_v18 }
 0x112   :  { %924 = vmatpush.msra.mxu2 %v4335_v19  ;;  %944 = vmatpush.msra.mxu3 %v4336_v20 }
 0x113   :  { %885 = vmatpush.msrb.mxu0 %v4337_v22  ;;  %905 = vmatpush.msrb.mxu1 %v4338_v23 }
 0x114   :  { %925 = vmatpush.msra.mxu2 %v4339_v24  ;;  %945 = vmatpush.msra.mxu3 %v4340_v26 }
 0x115   :  { %886 = vmatpush.msrb.mxu0 %v4341_v27  ;;  %906 = vmatpush.msrb.mxu1 %v4342_v28 }
 0x116   :  { %926 = vmatpush.msra.mxu2 %v4343_v30  ;;  %946 = vmatpush.msra.mxu3 %v4344_v31 }
 0x117   :  { %887 = vmatpush.msrb.mxu0 %v4345_v32  ;;  %907 = vmatpush.msrb.mxu1 %v4346_v33 }
 0x118   :  { %927 = vmatpush.msra.mxu2 %v4347_v34  ;;  %947 = vmatpush.msra.mxu3 %v4348_v35 }
 0x119   :  { %888 = vmatpush.msrb.mxu0 %v4349_v36  ;;  %908 = vmatpush.msrb.mxu1 %v4350_v37 }
 0x11a   :  { %928 = vmatpush.msra.mxu2 %v4351_v38  ;;  %948 = vmatpush.msra.mxu3 %v4352_v39 }
 0x11b   :  { %889 = vmatpush.msrb.mxu0 %v4353_v40  ;;  %909 = vmatpush.msrb.mxu1 %v4354_v41 }
 0x11c   :  { %929 = vmatpush.msra.mxu2 %v4355_v42  ;;  %949 = vmatpush.msra.mxu3 %v4356_v43 }
 0x11d   :  { %890 = vmatpush.msrb.mxu0 %v4357_v44  ;;  %910 = vmatpush.msrb.mxu1 %v4358_v45 }
 0x11e   :  { %930 = vmatpush.msra.mxu2 %v4359_v46  ;;  %950 = vmatpush.msra.mxu3 %v4360_v48  ;;  %v3504_v48 = vld [vmem:[%s4177_s4 + $0xd8] sm:$0xff] }
 0x11f   :  { %4369 = vst [vmem:[#allocation18_spill] sm:$0xff] %v3504_v48 }
 0x14e   :  { %v635_v5 = vpop.permute.xlu1 %634 }
 0x14f   :  { %v636_v35 = vperm.slane %v635_v5, 0  ;;  %v3318_v5 = vld [vmem:[%s4177_s4 + $0x1a0] sm:$0xff] }
 0x151   :  { %vm3222_vm0 = vcmp.eq.s32.totalorder %v636_v35, 1  ;;  %v3432_v35 = vld [vmem:[%s4177_s4 + $0x138] sm:$0xff] }
 0x156   :  { %v639_v38 = vpop.permute.xlu1 %638 }
 0x157   :  { %v640_v42 = vperm.slane %v639_v38, 0  ;;  %v3450_v38 = vld [vmem:[%s4177_s4 + $0x110] sm:$0xff] }
 0x17a   :  { %v500_v49 = vpop.f32.mrf.mxu1  ;;  %v480_v63 = vpop.f32.mrf.mxu0 }
 0x17b   :  { %v547_v52 = vrot.slane %v500_v49, 7 }
 0x17d   :  { %v550_v1 = vsel %vm334_vm7, %v480_v63, %v547_v52  ;;  %v553_v62 = vsel %vm340_vm8, %v480_v63, %v547_v52 }
 0x181   :  { %v520_v53 = vpop.f32.mrf.mxu2  ;;  %v540_v56 = vpop.f32.mrf.mxu3 }
 0x182   :  { %v548_v57 = vrot.slane %v520_v53, 6  ;;  %v549_v60 = vrot.slane %v540_v56, 5  ;;  %v3528_v56 = vld [vmem:[%s4177_s4 + $0xb8] sm:$0xff] }
 0x183   :  { %4373 = vst [vmem:[#allocation22_spill] sm:$0xff] %v3528_v56 }
 0x184   :  { %v551_v9 = vsel %vm336_vm9, %v548_v57, %v549_v60  ;;  %v554_v51 = vsel %vm342_vm10, %v548_v57, %v549_v60  ;;  %v837_v57 = vsel %vm2178_vm1, 1, %v4322_v13 }
 0x185   :  { %v552_v61 = vsel %vm338_vm11, %v550_v1, %v551_v9  ;;  %v555_v0 = vsel %vm344_vm12, %v553_v62, %v554_v51  ;;  %840 = vperm.xlu2 %2209, %v837_v57   ;;  %v3534_v57 = vld [vmem:[%s4177_s4 + $0x80] sm:$0xff] }
 0x186   :  { %v556_v8 = vrot.slane %v555_v0, 1  ;;  %v559_v11 = vadd.f32 %v552_v61, %v453_v55  ;;  %4374 = vst [vmem:[#allocation14_spill] sm:$0xff] %v3534_v57 }
 0x188   :  { %v560_v54 = vadd.f32 %v556_v8, %v455_v17  ;;  %v2172_v25 = vmul.f32 -1.442695, %v559_v11  ;;  %v601_v15 = vrot.slane %v559_v11, 3 }
 0x18a   :  { %2227 = vpow2.f32 %v2172_v25  ;;  %v2173_v4 = vmul.f32 -1.442695, %v560_v54  ;;  %v602_v19 = vrot.slane %v560_v54, 3 }
 0x18c   :  { %2229 = vpow2.f32 %v2173_v4 }
 0x190   :  { %v2228_v2 = vpop.eup %2227 }
 0x191   :  { %v567_v59 = vadd.f32 1.0, %v2228_v2  ;;  %v3276_v2 = vld [vmem:[%s4177_s4 + $0x1e8] sm:$0xff] }
 0x192   :  { %v2230_v29 = vpop.eup %2229 }
 0x193   :  { %v568_v58 = vadd.f32 1.0, %v2230_v29  ;;  %2231 = vrcp.f32 %v567_v59  ;;  %v580_v20 = vand.u32 2147483648, %v567_v59  ;;  %v578_v23 = vand.u32 2147483647, %v567_v59  ;;  %v3300_v29 = vld [vmem:[%s4177_s4 + $0x1c8] sm:$0xff] }
 0x194   :  { %vm574_vm3 = vweird.f32 %v567_v59 }
 0x195   :  { %2233 = vrcp.f32 %v568_v58  ;;  %v595_v26 = vand.u32 2147483648, %v568_v58  ;;  %v593_v30 = vand.u32 2147483647, %v568_v58  ;;  %v581_v31 = vor.u32 1.1754944e-38, %v580_v20  ;;  %v3360_v20 = vld [vmem:[%s4177_s4 + $0x198] sm:$0xff] }
 0x196   :  { %2235 = vtanh.f32 %v601_v15  ;;  %vm579_vm6 = vcmp.eq.f32.partialorder %v578_v23, 8.507059e+37  ;;  %vm589_vm13 = vweird.f32 %v568_v58  ;;  %v3336_v15 = vld [vmem:[%s4177_s4 + $0x1b8] sm:$0xff]  ;;  %v3372_v23 = vld [vmem:[%s4177_s4 + $0x168] sm:$0xff] }
 0x197   :  { %2237 = vtanh.f32 %v602_v19  ;;  %v596_v36 = vor.u32 1.1754944e-38, %v595_v26  ;;  %vm594_vm15 = vcmp.eq.f32.partialorder %v593_v30, 8.507059e+37  ;;  %v3354_v19 = vld [vmem:[%s4177_s4 + $0x190] sm:$0xff]  ;;  %v3384_v26 = vld [vmem:[%s4177_s4 + $0x178] sm:$0xff] }
 0x198   :  { %v3402_v30 = vld [vmem:[%s4177_s4 + $0x150] sm:$0xff] }
 0x199   :  { %v2232_v10 = vpop.eup %2231 }
 0x19a   :  { %v570_v7 = vmul.f32 %v2232_v10, %v567_v59  ;;  %vm575_vm2 = vweird.f32 %v2232_v10  ;;  %v3294_v59 = vld [vmem:[%s4177_s4 + $0x1c0] sm:$0xff] }
 0x19b   :  { %v2234_v21 = vpop.eup %2233  ;;  %vm576_vm5 = vmor %vm574_vm3, %vm575_vm2  ;;  %vm3228_vm2 = vcmp.eq.s32.totalorder %v640_v42, 1  ;;  %vm2179_vm3 = vcmp.gt.s32.totalorder %v2949_v6, 2  ;;  %v3474_v42 = vld [vmem:[%s4177_s4 + $0xf0] sm:$0xff] }
 0x19c   :  { %v571_v16 = vsub.f32 1.0, %v570_v7  ;;  %v585_v18 = vmul.f32 %v2234_v21, %v568_v58  ;;  %vm590_vm4 = vweird.f32 %v2234_v21  ;;  %v2236_v40 = vpop.eup %2235  ;;  %v838_v9 = vsel %vm2179_vm3, 1, %v4322_v13  ;;  %v3306_v58 = vld [vmem:[%s4177_s4 + $0x1d0] sm:$0xff]  ;;  %v3324_v7 = vld [vmem:[%s4177_s4 + $0x1a8] sm:$0xff] }
 0x19d   :  { %vm591_vm14 = vmor %vm589_vm13, %vm590_vm4  ;;  %v2238_v46 = vpop.eup %2237  ;;  %844 = vperm.xlu2 %2209, %v838_v9   ;;  %vm2186_vm4 = vcmp.gt.s32.totalorder %v4328_v14, 4  ;;  %v3552_v9 = vld [vmem:[%s4177_s4 + $0x98] sm:$0xff] }
 0x19e   :  { %v572_v22 = vmul.f32 %v2232_v10, %v571_v16  ;;  %v586_v24 = vsub.f32 1.0, %v585_v18  ;;  %v1249_v11 = vsel %vm2186_vm4, 1, %v4322_v13  ;;  %v3342_v16 = vld [vmem:[%s4177_s4 + $0x180] sm:$0xff]  ;;  %v3348_v18 = vld [vmem:[%s4177_s4 + $0x188] sm:$0xff]  ;;  %4377 = vst [vmem:[#allocation26_spill] sm:$0xff] %v3552_v9 }
 0x1a0   :  { %v573_v27 = vadd.f32 %v2232_v10, %v572_v22  ;;  %v587_v28 = vmul.f32 %v2234_v21, %v586_v24  ;;  %v3366_v22 = vld [vmem:[%s4177_s4 + $0x160] sm:$0xff]  ;;  %v3378_v24 = vld [vmem:[%s4177_s4 + $0x170] sm:$0xff] }
 0x1a2   :  { %v577_v32 = vsel %vm576_vm5, %v2232_v10, %v573_v27  ;;  %v588_v33 = vadd.f32 %v2234_v21, %v587_v28  ;;  %vm2191_vm5 = vcmp.gt.s32.totalorder %v2949_v6, 5  ;;  %v3312_v10 = vld [vmem:[%s4177_s4 + $0x1d8] sm:$0xff]  ;;  %v3390_v27 = vld [vmem:[%s4177_s4 + $0x140] sm:$0xff]  ;;  %v3396_v28 = vld [vmem:[%s4177_s4 + $0x148] sm:$0xff] }
 0x1a3   :  { %v582_v34 = vsel %vm579_vm6, %v581_v31, %v577_v32  ;;  %v1456_v4 = vsel %vm2191_vm5, 1, %v4322_v13  ;;  %vm2198_vm6 = vcmp.gt.s32.totalorder %v4328_v14, 7  ;;  %v3288_v14 = vld [vmem:[%s4177_s4 + $0x1f8] sm:$0xff]  ;;  %v3414_v32 = vld [vmem:[%s4177_s4 + $0x120] sm:$0xff] }
 0x1a4   :  { %v609_v37 = vrot.slane %v582_v34, 1  ;;  %v592_v39 = vsel %vm591_vm14, %v2234_v21, %v588_v33  ;;  %v615_v44 = vmul.f32 %v2236_v40, %v582_v34  ;;  %v621_v62 = vrot.slane %v582_v34, 2  ;;  %v3330_v21 = vld [vmem:[%s4177_s4 + $0x1b0] sm:$0xff]  ;;  %v3408_v31 = vld [vmem:[%s4177_s4 + $0x158] sm:$0xff]  ;;  %v3420_v33 = vld [vmem:[%s4177_s4 + $0x128] sm:$0xff] }
 0x1a5   :  { %v597_v41 = vsel %vm594_vm15, %v596_v36, %v592_v39  ;;  %1252 = vperm.xlu2 %2209, %v1249_v11   ;;  %v3426_v34 = vld [vmem:[%s4177_s4 + $0x130] sm:$0xff]  ;;  %v3438_v36 = vld [vmem:[%s4177_s4 + $0x100] sm:$0xff]  ;;  %v3456_v39 = vld [vmem:[%s4177_s4 + $0x118] sm:$0xff] }
 0x1a6   :  { %v613_v43 = vmul.f32 %v609_v37, %v3121_v3  ;;  %v610_v45 = vrot.slane %v597_v41, 1  ;;  %v616_v53 = vmul.f32 %v2238_v46, %v597_v41  ;;  %v622_v61 = vrot.slane %v597_v41, 2  ;;  %v3444_v37 = vld [vmem:[%s4177_s4 + $0x108] sm:$0xff]  ;;  %v3462_v40 = vld [vmem:[%s4177_s4 + $0xe0] sm:$0xff]  ;;  %v3498_v46 = vld [vmem:[%s4177_s4 + $0xd0] sm:$0xff] }
 0x1a7   :  { %v3468_v41 = vld [vmem:[%s4177_s4 + $0xe8] sm:$0xff]  ;;  %4368 = vst [vmem:[#allocation21_spill] sm:$0xff] %v3498_v46  ;;  %v3600_v11 = vld [vmem:[%s4177_s4 + $0x58] sm:$0xff] }
 0x1a8   :  { %v617_v49 = vadd.f32 %v615_v44, %v613_v43  ;;  %v614_v52 = vmul.f32 %v610_v45, %v3125_v47  ;;  %v3480_v43 = vld [vmem:[%s4177_s4 + $0xf8] sm:$0xff]  ;;  %v3486_v44 = vld [vmem:[%s4177_s4 + $0xc0] sm:$0xff]  ;;  %v3492_v45 = vld [vmem:[%s4177_s4 + $0xc8] sm:$0xff]  ;;  %4385 = vst [vmem:[#allocation36_spill] sm:$0xff] %v3600_v11 }
 0x1a9   :  { %4365 = vst [vmem:[#allocation31_spill] sm:$0xff] %v3480_v43 }
 0x1aa   :  { %2239 = vtanh.f32 %v617_v49  ;;  %v3236_v60 = vsel %vm3222_vm0, %v617_v49, %v3121_v3  ;;  %v618_v63 = vadd.f32 %v616_v53, %v614_v52  ;;  %4366 = vst [vmem:[#allocation34_spill] sm:$0xff] %v3486_v44  ;;  %v3510_v49 = vld [vmem:[%s4177_s4 + $0xa0] sm:$0xff]  ;;  %v3516_v52 = vld [vmem:[%s4177_s4 + $0xa8] sm:$0xff]  ;;  %v3522_v53 = vld [vmem:[%s4177_s4 + $0xb0] sm:$0xff] }
 0x1ab   :  { %4367 = vst [vmem:[#allocation11_spill] sm:$0xff] %v3492_v45 }
 0x1ac   :  { %2241 = vtanh.f32 %v618_v63  ;;  %v3241_v1 = vsel %vm3228_vm2, %v618_v63, %v3125_v47  ;;  %4370 = vst [vmem:[#allocation12_spill] sm:$0xff] %v3510_v49  ;;  %v3540_v63 = vld [vmem:[%s4177_s4 + $0x88] sm:$0xff] }
 0x1ad   :  { %1462 = vperm.xlu2 %2209, %v1456_v4   ;;  %4371 = vst [vmem:[#allocation13_spill] sm:$0xff] %v3516_v52  ;;  %v3612_v4 = vld [vmem:[%s4177_s4 + $0x28] sm:$0xff] }
 0x1ae   :  { %4372 = vst [vmem:[#allocation25_spill] sm:$0xff] %v3522_v53 }
 0x1af   :  { %4375 = vst [vmem:[#allocation15_spill] sm:$0xff] %v3540_v63 }
 0x1b0   :  { %v2240_v51 = vpop.eup %2239  ;;  %4387 = vst [vmem:[#allocation24_spill] sm:$0xff] %v3612_v4 }
 0x1b1   :  { %v625_v55 = vmul.f32 %v2240_v51, %v621_v62  ;;  %v3546_v62 = vld [vmem:[%s4177_s4 + $0x90] sm:$0xff]  ;;  %v3558_v51 = vld [vmem:[%s4177_s4 + $0x60] sm:$0xff] }
 0x1b2   :  { %v2242_v0 = vpop.eup %2241  ;;  %4376 = vst [vmem:[#allocation29_spill] sm:$0xff] %v3546_v62 }
 0x1b3   :  { %v647_v3 = vsel %vm3222_vm0, %v625_v55, 0.0  ;;  %v626_v8 = vmul.f32 %v2242_v0, %v622_v61  ;;  %v3255_v17 = vsel %vm3222_vm0, %v625_v55, %v3140_v50  ;;  %v1867_v50 = vsel %vm2198_vm6, 1, %v4322_v13  ;;  %v3282_v13 = vld [vmem:[%s4177_s4 + $0x1f0] sm:$0xff]  ;;  %4378 = vst [vmem:[#allocation16_spill] sm:$0xff] %v3558_v51  ;;  %v3564_v55 = vld [vmem:[%s4177_s4 + $0x68] sm:$0xff]  ;;  %v3576_v0 = vld [vmem:[%s4177_s4 + $0x78] sm:$0xff] }
 0x1b4   :  { %651 = vst [vmem:[#allocation1] ss:$9 sm:$0xff] %v647_v3  ;;  %v3570_v61 = vld [vmem:[%s4177_s4 + $0x70] sm:$0xff]  ;;  %v3582_v3 = vld [vmem:[%s4177_s4 + $0x40] sm:$0xff] }
 0x1b5   :  { %v648_v47 = vsel %vm3228_vm2, %v626_v8, 0.0  ;;  %v3260_v25 = vsel %vm3228_vm2, %v626_v8, %v3144_v12  ;;  %v3270_v12 = vld [vmem:[%s4177_s4 + $0x1e0] sm:$0xff]  ;;  %1870 = vperm.xlu2 %2209, %v1867_v50   ;;  %4379 = vst [vmem:[#allocation17_spill] sm:$0xff] %v3564_v55  ;;  %v3588_v8 = vld [vmem:[%s4177_s4 + $0x48] sm:$0xff]  ;;  %v3624_v50 = vld [vmem:[%s4177_s4 + $0x38] sm:$0xff] }
 0x1b6   :  { %653 = vst [vmem:[#allocation1 + $0x1] ss:$9 sm:$0xff] %v648_v47  ;;  %v3594_v47 = vld [vmem:[%s4177_s4 + $0x50] sm:$0xff] }
 0x1b7   :  { %4380 = vst [vmem:[#allocation35_spill] sm:$0xff] %v3570_v61 }
 0x1b8   :  { %4381 = vst [vmem:[#allocation30_spill] sm:$0xff] %v3576_v0 }
 0x1b9   :  { %4382 = vst [vmem:[#allocation19_spill] sm:$0xff] %v3582_v3 }
 0x1ba   :  { %4383 = vst [vmem:[#allocation20_spill] sm:$0xff] %v3588_v8 }
 0x1bb   :  { %4384 = vst [vmem:[#allocation37_spill] sm:$0xff] %v3594_v47 }
 0x1bc   :  { %4389 = vst [vmem:[#allocation38_spill] sm:$0xff] %v3624_v50 }
 0x1bd   :  { %v654_v54 = vld [vmem:[#allocation1] sm:$0xff] }
 0x1be   :  { %664 = vst [vmem:[#allocation1] ss:$9 sm:$0xff] %v3255_v17 }
 0x1bf   :  { %666 = vst [vmem:[#allocation1 + $0x1] ss:$9 sm:$0xff] %v3260_v25 }
 0x1c0   :  { %657 = vst [vmem:[#allocation3 + $0x2] sm:$0x3] %v654_v54  ;;  %v3606_v54 = vld [vmem:[%s4177_s4 + $0x20] sm:$0xff] }
 0x1c1   :  { %4386 = vst [vmem:[#allocation23_spill] sm:$0xff] %v3606_v54 }
 0x1c6   :  { %v667_v6 = vld [vmem:[#allocation1] sm:$0xff] }
 0x1c7   :  { %685 = vmatmul.f32.vlgmr.msra.gmra.mxu0 %v667_v6  ;;  %705 = vmatmul.f32.vlgmr.msra.gmra.mxu1 %v667_v6 }
 0x1c8   :  { %725 = vmatmul.f32.vlgmr.msrb.gmra.mxu2 %v667_v6  ;;  %745 = vmatmul.f32.vlgmr.msrb.gmra.mxu3 %v667_v6  ;;  %v3618_v6 = vld [vmem:[%s4177_s4 + $0x30] sm:$0xff] }
 0x1c9   :  { %1081 = vmatpush.msra.mxu0 %v3270_v12  ;;  %1101 = vmatpush.msra.mxu1 %v3276_v2  ;;  %4388 = vst [vmem:[#allocation39_spill] sm:$0xff] %v3618_v6 }
 0x1ca   :  { %1121 = vmatpush.msrb.mxu2 %v3282_v13  ;;  %1141 = vmatpush.msrb.mxu3 %v3288_v14 }
 0x1cb   :  { %1082 = vmatpush.msra.mxu0 %v3294_v59  ;;  %1102 = vmatpush.msra.mxu1 %v3300_v29 }
 0x1cc   :  { %1122 = vmatpush.msrb.mxu2 %v3306_v58  ;;  %1142 = vmatpush.msrb.mxu3 %v3312_v10 }
 0x1cd   :  { %1083 = vmatpush.msra.mxu0 %v3318_v5  ;;  %1103 = vmatpush.msra.mxu1 %v3324_v7 }
 0x1ce   :  { %1123 = vmatpush.msrb.mxu2 %v3330_v21  ;;  %1143 = vmatpush.msrb.mxu3 %v3336_v15 }
 0x1cf   :  { %1084 = vmatpush.msra.mxu0 %v3342_v16  ;;  %1104 = vmatpush.msra.mxu1 %v3348_v18 }
 0x1d0   :  { %1124 = vmatpush.msrb.mxu2 %v3354_v19  ;;  %1144 = vmatpush.msrb.mxu3 %v3360_v20 }
 0x1d1   :  { %1085 = vmatpush.msra.mxu0 %v3366_v22  ;;  %1105 = vmatpush.msra.mxu1 %v3372_v23 }
 0x1d2   :  { %1125 = vmatpush.msrb.mxu2 %v3378_v24  ;;  %1145 = vmatpush.msrb.mxu3 %v3384_v26 }
 0x1d3   :  { %1086 = vmatpush.msra.mxu0 %v3390_v27  ;;  %1106 = vmatpush.msra.mxu1 %v3396_v28 }
 0x1d4   :  { %1126 = vmatpush.msrb.mxu2 %v3402_v30  ;;  %1146 = vmatpush.msrb.mxu3 %v3408_v31 }
 0x1d5   :  { %1087 = vmatpush.msra.mxu0 %v3414_v32  ;;  %1107 = vmatpush.msra.mxu1 %v3420_v33 }
 0x1d6   :  { %1127 = vmatpush.msrb.mxu2 %v3426_v34  ;;  %1147 = vmatpush.msrb.mxu3 %v3432_v35 }
 0x1d7   :  { %1088 = vmatpush.msra.mxu0 %v3438_v36  ;;  %1108 = vmatpush.msra.mxu1 %v3444_v37 }
 0x1d8   :  { %1128 = vmatpush.msrb.mxu2 %v3450_v38  ;;  %1148 = vmatpush.msrb.mxu3 %v3456_v39 }
 0x1d9   :  { %1089 = vmatpush.msra.mxu0 %v3462_v40  ;;  %1109 = vmatpush.msra.mxu1 %v3468_v41 }
 0x1da   :  { %1129 = vmatpush.msrb.mxu2 %v3474_v42  ;;  %1149 = vmatpush.msrb.mxu3 %v3480_v43 }
 0x1db   :  { %1090 = vmatpush.msra.mxu0 %v3486_v44  ;;  %1110 = vmatpush.msra.mxu1 %v3492_v45 }
 0x1dc   :  { %1130 = vmatpush.msrb.mxu2 %v3498_v46  ;;  %1150 = vmatpush.msrb.mxu3 %v3504_v48 }
 0x1dd   :  { %1091 = vmatpush.msra.mxu0 %v3510_v49  ;;  %1111 = vmatpush.msra.mxu1 %v3516_v52 }
 0x1de   :  { %1131 = vmatpush.msrb.mxu2 %v3522_v53  ;;  %1151 = vmatpush.msrb.mxu3 %v3528_v56 }
 0x1df   :  { %1092 = vmatpush.msra.mxu0 %v3534_v57  ;;  %1112 = vmatpush.msra.mxu1 %v3540_v63  ;;  %v661_v57 = vld [vmem:[#allocation2 + $0x22] ss:$8 sm:$0xf] }
 0x1e0   :  { %1132 = vmatpush.msrb.mxu2 %v3546_v62  ;;  %1152 = vmatpush.msrb.mxu3 %v3552_v9  ;;  %v659_v9 = vld [vmem:[#allocation2 + $0x2] ss:$8 sm:$0xf] }
 0x1e1   :  { %1093 = vmatpush.msra.mxu0 %v3558_v51  ;;  %1113 = vmatpush.msra.mxu1 %v3564_v55 }
 0x1e2   :  { %1133 = vmatpush.msrb.mxu2 %v3570_v61  ;;  %1153 = vmatpush.msrb.mxu3 %v3576_v0 }
 0x1e3   :  { %1094 = vmatpush.msra.mxu0 %v3582_v3  ;;  %1114 = vmatpush.msra.mxu1 %v3588_v8 }
 0x1e4   :  { %1134 = vmatpush.msrb.mxu2 %v3594_v47  ;;  %1154 = vmatpush.msrb.mxu3 %v3600_v11 }
 0x1e5   :  { %1095 = vmatpush.msra.mxu0 %v3606_v54  ;;  %1115 = vmatpush.msra.mxu1 %v3612_v4  ;;  %v3630_v54 = vld [vmem:[%s4177_s4] sm:$0xff]  ;;  %v3636_v4 = vld [vmem:[%s4177_s4 + $0x8] sm:$0xff] }
 0x1e6   :  { %1135 = vmatpush.msrb.mxu2 %v3618_v6  ;;  %1155 = vmatpush.msrb.mxu3 %v3624_v50  ;;  %4390 = vst [vmem:[#allocation27_spill] sm:$0xff] %v3630_v54  ;;  %v3642_v6 = vld [vmem:[%s4177_s4 + $0x10] sm:$0xff]  ;;  %v3648_v50 = vld [vmem:[%s4177_s4 + $0x18] sm:$0xff] }
 0x1e7   :  { %1096 = vmatpush.msra.mxu0 %v3630_v54  ;;  %4391 = vst [vmem:[#allocation28_spill] sm:$0xff] %v3636_v4  ;;  %1116 = vmatpush.msra.mxu1 %v3636_v4 }
 0x1e8   :  { %4392 = vst [vmem:[#allocation41_spill] sm:$0xff] %v3642_v6  ;;  %1136 = vmatpush.msrb.mxu2 %v3642_v6  ;;  %1156 = vmatpush.msrb.mxu3 %v3648_v50 }
 0x1e9   :  { %4393 = vst [vmem:[#allocation40_spill] sm:$0xff] %v3648_v50 }
 0x244   :  { %v706_v54 = vpop.f32.mrf.mxu1  ;;  %v686_v0 = vpop.f32.mrf.mxu0 }
 0x245   :  { %v753_v11 = vrot.slane %v706_v54, 7 }
 0x247   :  { %v756_v61 = vsel %vm334_vm7, %v686_v0, %v753_v11  ;;  %v759_v55 = vsel %vm340_vm8, %v686_v0, %v753_v11 }
 0x24b   :  { %v726_v47 = vpop.f32.mrf.mxu2  ;;  %v746_v8 = vpop.f32.mrf.mxu3 }
 0x24c   :  { %v754_v3 = vrot.slane %v726_v47, 6  ;;  %v755_v4 = vrot.slane %v746_v8, 5 }
 0x24e   :  { %v757_v6 = vsel %vm336_vm9, %v754_v3, %v755_v4  ;;  %v760_v51 = vsel %vm342_vm10, %v754_v3, %v755_v4  ;;  %v841_v4 = vpop.permute.xlu2 %840 }
 0x24f   :  { %v758_v62 = vsel %vm338_vm11, %v756_v61, %v757_v6  ;;  %v761_v50 = vsel %vm344_vm12, %v759_v55, %v760_v51 }
 0x250   :  { %v762_v63 = vrot.slane %v761_v50, 1  ;;  %v765_v54 = vadd.f32 %v758_v62, %v659_v9 }
 0x252   :  { %v766_v56 = vadd.f32 %v762_v63, %v661_v57  ;;  %v2176_v47 = vmul.f32 -1.442695, %v765_v54  ;;  %v807_v6 = vrot.slane %v765_v54, 3  ;;  %v842_v54 = vperm.slane %v841_v4, 0  ;;  %v4411_v4 = vld [vmem:[#allocation16_spill] sm:$0xff] }
 0x254   :  { %2243 = vpow2.f32 %v2176_v47  ;;  %v2177_v8 = vmul.f32 -1.442695, %v766_v56  ;;  %v808_v62 = vrot.slane %v766_v56, 3  ;;  %vm3658_vm5 = vcmp.eq.s32.totalorder %v842_v54, 1 }
 0x256   :  { %2245 = vpow2.f32 %v2177_v8 }
 0x25a   :  { %v2244_v53 = vpop.eup %2243 }
 0x25b   :  { %v773_v52 = vadd.f32 1.0, %v2244_v53 }
 0x25c   :  { %v2246_v0 = vpop.eup %2245 }
 0x25d   :  { %v774_v11 = vadd.f32 1.0, %v2246_v0  ;;  %2247 = vrcp.f32 %v773_v52  ;;  %v786_v9 = vand.u32 2147483648, %v773_v52  ;;  %v784_v63 = vand.u32 2147483647, %v773_v52 }
 0x25e   :  { %vm780_vm14 = vweird.f32 %v773_v52 }
 0x25f   :  { %2249 = vrcp.f32 %v774_v11  ;;  %v801_v53 = vand.u32 2147483648, %v774_v11  ;;  %v799_v0 = vand.u32 2147483647, %v774_v11  ;;  %v787_v48 = vor.u32 1.1754944e-38, %v786_v9 }
 0x260   :  { %2251 = vtanh.f32 %v807_v6  ;;  %vm785_vm1 = vcmp.eq.f32.partialorder %v784_v63, 8.507059e+37  ;;  %vm795_vm2 = vweird.f32 %v774_v11 }
 0x261   :  { %2253 = vtanh.f32 %v808_v62  ;;  %vm800_vm4 = vcmp.eq.f32.partialorder %v799_v0, 8.507059e+37 }
 0x263   :  { %v2248_v3 = vpop.eup %2247 }
 0x264   :  { %v776_v49 = vmul.f32 %v2248_v3, %v773_v52  ;;  %vm781_vm13 = vweird.f32 %v2248_v3 }
 0x265   :  { %v2250_v61 = vpop.eup %2249  ;;  %vm782_vm0 = vmor %vm780_vm14, %vm781_vm13 }
 0x266   :  { %v777_v51 = vsub.f32 1.0, %v776_v49  ;;  %v791_v55 = vmul.f32 %v2250_v61, %v774_v11  ;;  %vm796_vm15 = vweird.f32 %v2250_v61  ;;  %v2252_v52 = vpop.eup %2251 }
 0x267   :  { %vm797_vm3 = vmor %vm795_vm2, %vm796_vm15  ;;  %v2254_v9 = vpop.eup %2253 }
 0x268   :  { %v778_v57 = vmul.f32 %v2248_v3, %v777_v51  ;;  %v792_v50 = vsub.f32 1.0, %v791_v55  ;;  %v802_v51 = vor.u32 1.1754944e-38, %v801_v53  ;;  %v845_v55 = vpop.permute.xlu2 %844 }
 0x26a   :  { %v779_v47 = vadd.f32 %v2248_v3, %v778_v57  ;;  %v793_v8 = vmul.f32 %v2250_v61, %v792_v50  ;;  %v846_v50 = vperm.slane %v845_v55, 0  ;;  %v4400_v55 = vld [vmem:[#allocation11_spill] sm:$0xff] }
 0x26c   :  { %v783_v46 = vsel %vm782_vm0, %v2248_v3, %v779_v47  ;;  %v794_v49 = vadd.f32 %v2250_v61, %v793_v8  ;;  %vm3663_vm6 = vcmp.eq.s32.totalorder %v846_v50, 1  ;;  %v4404_v50 = vld [vmem:[#allocation13_spill] sm:$0xff]  ;;  %v4407_v3 = vld [vmem:[#allocation14_spill] sm:$0xff] }
 0x26d   :  { %v788_v56 = vsel %vm785_vm1, %v787_v48, %v783_v46 }
 0x26e   :  { %v815_v45 = vrot.slane %v788_v56, 1  ;;  %v798_v6 = vsel %vm797_vm3, %v2250_v61, %v794_v49  ;;  %v821_v62 = vmul.f32 %v2252_v52, %v788_v56  ;;  %v4402_v52 = vld [vmem:[#allocation18_spill] sm:$0xff] }
 0x26f   :  { %v803_v57 = vsel %vm800_vm4, %v802_v51, %v798_v6  ;;  %v4401_v6 = vld [vmem:[#allocation21_spill] sm:$0xff] }
 0x270   :  { %v819_v44 = vmul.f32 %v815_v45, %v3236_v60  ;;  %v816_v43 = vrot.slane %v803_v57, 1  ;;  %v822_v11 = vmul.f32 %v2254_v9, %v803_v57  ;;  %v828_v47 = vrot.slane %v803_v57, 2  ;;  %v4403_v57 = vld [vmem:[#allocation12_spill] sm:$0xff]  ;;  %v4406_v9 = vld [vmem:[#allocation22_spill] sm:$0xff] }
 0x272   :  { %v823_v46 = vadd.f32 %v821_v62, %v819_v44  ;;  %v820_v48 = vmul.f32 %v816_v43, %v3241_v1  ;;  %v827_v44 = vrot.slane %v788_v56, 2  ;;  %v4405_v62 = vld [vmem:[#allocation25_spill] sm:$0xff] }
 0x274   :  { %2255 = vtanh.f32 %v823_v46  ;;  %v3670_v45 = vsel %vm3658_vm5, %v823_v46, %v3236_v60  ;;  %v824_v61 = vadd.f32 %v822_v11, %v820_v48  ;;  %v4408_v46 = vld [vmem:[#allocation15_spill] sm:$0xff]  ;;  %v4409_v48 = vld [vmem:[#allocation29_spill] sm:$0xff]  ;;  %v4410_v11 = vld [vmem:[#allocation26_spill] sm:$0xff] }
 0x276   :  { %2257 = vtanh.f32 %v824_v61  ;;  %v3675_v63 = vsel %vm3663_vm6, %v824_v61, %v3241_v1  ;;  %v4412_v61 = vld [vmem:[#allocation17_spill] sm:$0xff] }
 0x27a   :  { %v2256_v43 = vpop.eup %2255 }
 0x27b   :  { %v831_v53 = vmul.f32 %v2256_v43, %v827_v44  ;;  %v4413_v44 = vld [vmem:[#allocation35_spill] sm:$0xff]  ;;  %v4414_v43 = vld [vmem:[#allocation30_spill] sm:$0xff] }
 0x27c   :  { %v2258_v8 = vpop.eup %2257 }
 0x27d   :  { %v853_v0 = vsel %vm3658_vm5, %v831_v53, 0.0  ;;  %v832_v49 = vmul.f32 %v2258_v8, %v828_v47  ;;  %v3684_v54 = vsel %vm3658_vm5, %v831_v53, %v3255_v17  ;;  %v4398_v17 = vld [vmem:[#allocation31_spill] sm:$0xff]  ;;  %v4416_v47 = vld [vmem:[#allocation20_spill] sm:$0xff]  ;;  %v4417_v8 = vld [vmem:[#allocation37_spill] sm:$0xff] }
 0x27e   :  { %857 = vst [vmem:[#allocation1] ss:$9 sm:$0xff] %v853_v0  ;;  %v4415_v53 = vld [vmem:[#allocation19_spill] sm:$0xff]  ;;  %v4418_v0 = vld [vmem:[#allocation36_spill] sm:$0xff] }
 0x27f   :  { %v854_v60 = vsel %vm3663_vm6, %v832_v49, 0.0  ;;  %v3689_v56 = vsel %vm3663_vm6, %v832_v49, %v3260_v25  ;;  %v4399_v25 = vld [vmem:[#allocation34_spill] sm:$0xff]  ;;  %v4419_v49 = vld [vmem:[#allocation23_spill] sm:$0xff] }
 0x280   :  { %859 = vst [vmem:[#allocation1 + $0x1] ss:$9 sm:$0xff] %v854_v60  ;;  %v4420_v60 = vld [vmem:[#allocation24_spill] sm:$0xff] }
 0x287   :  { %v860_v1 = vld [vmem:[#allocation1] sm:$0xff] }
 0x288   :  { %870 = vst [vmem:[#allocation1] ss:$9 sm:$0xff] %v3684_v54 }
 0x289   :  { %872 = vst [vmem:[#allocation1 + $0x1] ss:$9 sm:$0xff] %v3689_v56 }
 0x28a   :  { %863 = vst [vmem:[#allocation3 + $0x4] sm:$0x3] %v860_v1  ;;  %v4421_v1 = vld [vmem:[#allocation39_spill] sm:$0xff] }
 0x290   :  { %v873_v51 = vld [vmem:[#allocation1] sm:$0xff] }
 0x291   :  { %891 = vmatmul.f32.vlgmr.msrb.gmra.mxu0 %v873_v51  ;;  %911 = vmatmul.f32.vlgmr.msrb.gmra.mxu1 %v873_v51 }
 0x292   :  { %931 = vmatmul.f32.vlgmr.msra.gmra.mxu2 %v873_v51  ;;  %951 = vmatmul.f32.vlgmr.msra.gmra.mxu3 %v873_v51  ;;  %v4422_v51 = vld [vmem:[#allocation38_spill] sm:$0xff] }
 0x293   :  { %1287 = vmatpush.msrb.mxu0 %v3270_v12  ;;  %1307 = vmatpush.msrb.mxu1 %v3276_v2 }
 0x294   :  { %1327 = vmatpush.msra.mxu2 %v3282_v13  ;;  %1347 = vmatpush.msra.mxu3 %v3288_v14 }
 0x295   :  { %1288 = vmatpush.msrb.mxu0 %v3294_v59  ;;  %1308 = vmatpush.msrb.mxu1 %v3300_v29 }
 0x296   :  { %1328 = vmatpush.msra.mxu2 %v3306_v58  ;;  %1348 = vmatpush.msra.mxu3 %v3312_v10 }
 0x297   :  { %1289 = vmatpush.msrb.mxu0 %v3318_v5  ;;  %1309 = vmatpush.msrb.mxu1 %v3324_v7 }
 0x298   :  { %1329 = vmatpush.msra.mxu2 %v3330_v21  ;;  %1349 = vmatpush.msra.mxu3 %v3336_v15 }
 0x299   :  { %1290 = vmatpush.msrb.mxu0 %v3342_v16  ;;  %1310 = vmatpush.msrb.mxu1 %v3348_v18 }
 0x29a   :  { %1330 = vmatpush.msra.mxu2 %v3354_v19  ;;  %1350 = vmatpush.msra.mxu3 %v3360_v20 }
 0x29b   :  { %1291 = vmatpush.msrb.mxu0 %v3366_v22  ;;  %1311 = vmatpush.msrb.mxu1 %v3372_v23 }
 0x29c   :  { %1331 = vmatpush.msra.mxu2 %v3378_v24  ;;  %1351 = vmatpush.msra.mxu3 %v3384_v26 }
 0x29d   :  { %1292 = vmatpush.msrb.mxu0 %v3390_v27  ;;  %1312 = vmatpush.msrb.mxu1 %v3396_v28 }
 0x29e   :  { %1332 = vmatpush.msra.mxu2 %v3402_v30  ;;  %1352 = vmatpush.msra.mxu3 %v3408_v31 }
 0x29f   :  { %1293 = vmatpush.msrb.mxu0 %v3414_v32  ;;  %1313 = vmatpush.msrb.mxu1 %v3420_v33 }
 0x2a0   :  { %1333 = vmatpush.msra.mxu2 %v3426_v34  ;;  %1353 = vmatpush.msra.mxu3 %v3432_v35 }
 0x2a1   :  { %1294 = vmatpush.msrb.mxu0 %v3438_v36  ;;  %1314 = vmatpush.msrb.mxu1 %v3444_v37 }
 0x2a2   :  { %1334 = vmatpush.msra.mxu2 %v3450_v38  ;;  %1354 = vmatpush.msra.mxu3 %v3456_v39 }
 0x2a3   :  { %1295 = vmatpush.msrb.mxu0 %v3462_v40  ;;  %1315 = vmatpush.msrb.mxu1 %v3468_v41 }
 0x2a4   :  { %1335 = vmatpush.msra.mxu2 %v3474_v42  ;;  %1355 = vmatpush.msra.mxu3 %v4398_v17 }
 0x2a5   :  { %1296 = vmatpush.msrb.mxu0 %v4399_v25  ;;  %1316 = vmatpush.msrb.mxu1 %v4400_v55 }
 0x2a6   :  { %1336 = vmatpush.msra.mxu2 %v4401_v6  ;;  %1356 = vmatpush.msra.mxu3 %v4402_v52 }
 0x2a7   :  { %1297 = vmatpush.msrb.mxu0 %v4403_v57  ;;  %1317 = vmatpush.msrb.mxu1 %v4404_v50 }
 0x2a8   :  { %1337 = vmatpush.msra.mxu2 %v4405_v62  ;;  %1357 = vmatpush.msra.mxu3 %v4406_v9 }
 0x2a9   :  { %1298 = vmatpush.msrb.mxu0 %v4407_v3  ;;  %1318 = vmatpush.msrb.mxu1 %v4408_v46  ;;  %v867_v3 = vld [vmem:[#allocation2 + $0x23] ss:$8 sm:$0xf] }
 0x2aa   :  { %1338 = vmatpush.msra.mxu2 %v4409_v48  ;;  %1358 = vmatpush.msra.mxu3 %v4410_v11 }
 0x2ab   :  { %1299 = vmatpush.msrb.mxu0 %v4411_v4  ;;  %1319 = vmatpush.msrb.mxu1 %v4412_v61  ;;  %v4423_v61 = vld [vmem:[#allocation27_spill] sm:$0xff] }
 0x2ac   :  { %1339 = vmatpush.msra.mxu2 %v4413_v44  ;;  %1359 = vmatpush.msra.mxu3 %v4414_v43  ;;  %v4424_v44 = vld [vmem:[#allocation28_spill] sm:$0xff]  ;;  %v4425_v43 = vld [vmem:[#allocation41_spill] sm:$0xff] }
 0x2ad   :  { %1300 = vmatpush.msrb.mxu0 %v4415_v53  ;;  %1320 = vmatpush.msrb.mxu1 %v4416_v47  ;;  %v4426_v53 = vld [vmem:[#allocation40_spill] sm:$0xff] }
 0x2ae   :  { %1340 = vmatpush.msra.mxu2 %v4417_v8  ;;  %1360 = vmatpush.msra.mxu3 %v4418_v0 }
 0x2af   :  { %1301 = vmatpush.msrb.mxu0 %v4419_v49  ;;  %1321 = vmatpush.msrb.mxu1 %v4420_v60 }
 0x2b0   :  { %1341 = vmatpush.msra.mxu2 %v4421_v1  ;;  %1361 = vmatpush.msra.mxu3 %v4422_v51 }
 0x2b1   :  { %1302 = vmatpush.msrb.mxu0 %v4423_v61  ;;  %1322 = vmatpush.msrb.mxu1 %v4424_v44  ;;  %v865_v44 = vld [vmem:[#allocation2 + $0x3] ss:$8 sm:$0xf] }
 0x2b2   :  { %1342 = vmatpush.msra.mxu2 %v4425_v43  ;;  %1362 = vmatpush.msra.mxu3 %v4426_v53 }
 0x30e   :  { %v912_v47 = vpop.f32.mrf.mxu1  ;;  %v892_v48 = vpop.f32.mrf.mxu0 }
 0x30f   :  { %v959_v8 = vrot.slane %v912_v47, 7 }
 0x311   :  { %v962_v60 = vsel %vm334_vm7, %v892_v48, %v959_v8  ;;  %v965_v1 = vsel %vm340_vm8, %v892_v48, %v959_v8 }
 0x315   :  { %v932_v4 = vpop.f32.mrf.mxu2  ;;  %v952_v0 = vpop.f32.mrf.mxu3 }
 0x316   :  { %v960_v11 = vrot.slane %v932_v4, 6  ;;  %v961_v49 = vrot.slane %v952_v0, 5 }
 0x318   :  { %v963_v51 = vsel %vm336_vm9, %v960_v11, %v961_v49  ;;  %v966_v61 = vsel %vm342_vm10, %v960_v11, %v961_v49 }
 0x319   :  { %v964_v43 = vsel %vm338_vm11, %v962_v60, %v963_v51  ;;  %v967_v53 = vsel %vm344_vm12, %v965_v1, %v966_v61 }
 0x31a   :  { %v968_v46 = vrot.slane %v967_v53, 1  ;;  %v971_v47 = vadd.f32 %v964_v43, %v865_v44 }
 0x31c   :  { %v972_v9 = vadd.f32 %v968_v46, %v867_v3  ;;  %v2180_v4 = vmul.f32 -1.442695, %v971_v47  ;;  %v1013_v60 = vrot.slane %v971_v47, 3 }
 0x31e   :  { %2259 = vpow2.f32 %v2180_v4  ;;  %v2181_v0 = vmul.f32 -1.442695, %v972_v9  ;;  %v1014_v44 = vrot.slane %v972_v9, 3 }
 0x320   :  { %2261 = vpow2.f32 %v2181_v0 }
 0x324   :  { %v2260_v62 = vpop.eup %2259 }
 0x325   :  { %v979_v50 = vadd.f32 1.0, %v2260_v62 }
 0x326   :  { %v2262_v48 = vpop.eup %2261 }
 0x327   :  { %v980_v8 = vadd.f32 1.0, %v2262_v48  ;;  %2263 = vrcp.f32 %v979_v50  ;;  %v992_v53 = vand.u32 2147483648, %v979_v50  ;;  %v990_v3 = vand.u32 2147483647, %v979_v50 }
 0x328   :  { %vm986_vm14 = vweird.f32 %v979_v50 }
 0x329   :  { %2265 = vrcp.f32 %v980_v8  ;;  %v1007_v1 = vand.u32 2147483648, %v980_v8  ;;  %v1005_v0 = vand.u32 2147483647, %v980_v8  ;;  %v993_v48 = vor.u32 1.1754944e-38, %v992_v53 }
 0x32a   :  { %2267 = vtanh.f32 %v1013_v60  ;;  %vm991_vm1 = vcmp.eq.f32.partialorder %v990_v3, 8.507059e+37  ;;  %vm1001_vm2 = vweird.f32 %v980_v8 }
 0x32b   :  { %2269 = vtanh.f32 %v1014_v44  ;;  %v1008_v9 = vor.u32 1.1754944e-38, %v1007_v1  ;;  %vm1006_vm4 = vcmp.eq.f32.partialorder %v1005_v0, 8.507059e+37  ;;  %v4441_v1 = vld [vmem:[#allocation16_spill] sm:$0xff] }
 0x32d   :  { %v2264_v11 = vpop.eup %2263 }
 0x32e   :  { %v982_v49 = vmul.f32 %v2264_v11, %v979_v50  ;;  %vm987_vm13 = vweird.f32 %v2264_v11 }
 0x32f   :  { %v2266_v57 = vpop.eup %2265  ;;  %vm988_vm0 = vmor %vm986_vm14, %vm987_vm13 }
 0x330   :  { %v983_v51 = vsub.f32 1.0, %v982_v49  ;;  %v997_v61 = vmul.f32 %v2266_v57, %v980_v8  ;;  %vm1002_vm15 = vweird.f32 %v2266_v57 }
 0x331   :  { %vm1003_vm3 = vmor %vm1001_vm2, %vm1002_vm15 }
 0x332   :  { %v984_v43 = vmul.f32 %v2264_v11, %v983_v51  ;;  %v998_v46 = vsub.f32 1.0, %v997_v61  ;;  %v1047_v51 = vpop.permute.xlu0 %1046  ;;  %v2268_v61 = vpop.eup %2267 }
 0x333   :  { %v1048_v60 = vperm.slane %v1047_v51, 0  ;;  %v2270_v44 = vpop.eup %2269 }
 0x334   :  { %v985_v62 = vadd.f32 %v2264_v11, %v984_v43  ;;  %v999_v4 = vmul.f32 %v2266_v57, %v998_v46  ;;  %v1051_v46 = vpop.permute.xlu1 %1050 }
 0x335   :  { %vm3765_vm5 = vcmp.eq.s32.totalorder %v1048_v60, 1  ;;  %v4432_v60 = vld [vmem:[#allocation18_spill] sm:$0xff] }
 0x336   :  { %v989_v52 = vsel %vm988_vm0, %v2264_v11, %v985_v62  ;;  %v1000_v47 = vadd.f32 %v2266_v57, %v999_v4  ;;  %v1052_v11 = vperm.slane %v1051_v46, 0  ;;  %v4434_v46 = vld [vmem:[#allocation13_spill] sm:$0xff] }
 0x337   :  { %v994_v49 = vsel %vm991_vm1, %v993_v48, %v989_v52 }
 0x338   :  { %v1004_v6 = vsel %vm1003_vm3, %v2266_v57, %v1000_v47  ;;  %v1021_v50 = vrot.slane %v994_v49, 1  ;;  %v1027_v53 = vmul.f32 %v2268_v61, %v994_v49  ;;  %vm1054_vm6 = vcmp.eq.s32.totalorder %v1052_v11, 1  ;;  %v4431_v61 = vld [vmem:[#allocation21_spill] sm:$0xff]  ;;  %v4437_v11 = vld [vmem:[#allocation14_spill] sm:$0xff] }
 0x339   :  { %v1009_v43 = vsel %vm1006_vm4, %v1008_v9, %v1004_v6  ;;  %v1033_v4 = vrot.slane %v994_v49, 2 }
 0x33a   :  { %v1022_v55 = vrot.slane %v1009_v43, 1  ;;  %v1025_v25 = vmul.f32 %v1021_v50, %v3670_v45  ;;  %v1028_v8 = vmul.f32 %v2270_v44, %v1009_v43  ;;  %v1034_v0 = vrot.slane %v1009_v43, 2  ;;  %v4433_v43 = vld [vmem:[#allocation12_spill] sm:$0xff]  ;;  %v4436_v44 = vld [vmem:[#allocation22_spill] sm:$0xff] }
 0x33c   :  { %v1026_v3 = vmul.f32 %v1022_v55, %v3675_v63  ;;  %v1029_v52 = vadd.f32 %v1027_v53, %v1025_v25  ;;  %v4435_v53 = vld [vmem:[#allocation25_spill] sm:$0xff] }
 0x33e   :  { %v1030_v57 = vadd.f32 %v1028_v8, %v1026_v3  ;;  %2271 = vtanh.f32 %v1029_v52  ;;  %v3772_v6 = vsel %vm3765_vm5, %v1029_v52, %v3670_v45  ;;  %v4438_v3 = vld [vmem:[#allocation15_spill] sm:$0xff]  ;;  %v4439_v8 = vld [vmem:[#allocation29_spill] sm:$0xff]  ;;  %v4440_v52 = vld [vmem:[#allocation26_spill] sm:$0xff] }
 0x340   :  { %2273 = vtanh.f32 %v1030_v57  ;;  %v3775_v62 = vsel %vm1054_vm6, %v1030_v57, %v3675_v63  ;;  %v4442_v57 = vld [vmem:[#allocation17_spill] sm:$0xff] }
 0x344   :  { %v2272_v55 = vpop.eup %2271 }
 0x345   :  { %v1037_v25 = vmul.f32 %v2272_v55, %v1033_v4  ;;  %v4443_v4 = vld [vmem:[#allocation35_spill] sm:$0xff]  ;;  %v4444_v55 = vld [vmem:[#allocation30_spill] sm:$0xff] }
 0x346   :  { %v2274_v48 = vpop.eup %2273 }
 0x347   :  { %v1038_v47 = vmul.f32 %v2274_v48, %v1034_v0  ;;  %v1059_v9 = vsel %vm3765_vm5, %v1037_v25, 0.0  ;;  %v3782_v45 = vsel %vm3765_vm5, %v1037_v25, %v3684_v54  ;;  %v4429_v54 = vld [vmem:[#allocation34_spill] sm:$0xff]  ;;  %v4445_v0 = vld [vmem:[#allocation19_spill] sm:$0xff]  ;;  %v4446_v25 = vld [vmem:[#allocation20_spill] sm:$0xff] }
 0x348   :  { %1063 = vst [vmem:[#allocation1] ss:$9 sm:$0xff] %v1059_v9  ;;  %v4447_v48 = vld [vmem:[#allocation37_spill] sm:$0xff]  ;;  %v4449_v9 = vld [vmem:[#allocation23_spill] sm:$0xff] }
 0x349   :  { %v1060_v51 = vsel %vm1054_vm6, %v1038_v47, 0.0  ;;  %v3785_v63 = vsel %vm1054_vm6, %v1038_v47, %v3689_v56  ;;  %v4430_v56 = vld [vmem:[#allocation11_spill] sm:$0xff]  ;;  %v4448_v47 = vld [vmem:[#allocation36_spill] sm:$0xff] }
 0x34a   :  { %1065 = vst [vmem:[#allocation1 + $0x1] ss:$9 sm:$0xff] %v1060_v51  ;;  %v4450_v51 = vld [vmem:[#allocation24_spill] sm:$0xff] }
 0x351   :  { %v1066_v50 = vld [vmem:[#allocation1] sm:$0xff] }
 0x352   :  { %1076 = vst [vmem:[#allocation1] ss:$9 sm:$0xff] %v3782_v45 }
 0x353   :  { %1078 = vst [vmem:[#allocation1 + $0x1] ss:$9 sm:$0xff] %v3785_v63 }
 0x354   :  { %1069 = vst [vmem:[#allocation3 + $0x6] sm:$0x3] %v1066_v50  ;;  %v4451_v50 = vld [vmem:[#allocation39_spill] sm:$0xff] }
 0x35a   :  { %v1079_v49 = vld [vmem:[#allocation1] sm:$0xff] }
 0x35b   :  { %1097 = vmatmul.f32.vlgmr.msra.gmra.mxu0 %v1079_v49  ;;  %1117 = vmatmul.f32.vlgmr.msra.gmra.mxu1 %v1079_v49 }
 0x35c   :  { %1137 = vmatmul.f32.vlgmr.msrb.gmra.mxu2 %v1079_v49  ;;  %1157 = vmatmul.f32.vlgmr.msrb.gmra.mxu3 %v1079_v49  ;;  %v4452_v49 = vld [vmem:[#allocation38_spill] sm:$0xff] }
 0x35d   :  { %1493 = vmatpush.msra.mxu0 %v3270_v12  ;;  %1513 = vmatpush.msra.mxu1 %v3276_v2 }
 0x35e   :  { %1533 = vmatpush.msrb.mxu2 %v3282_v13  ;;  %1553 = vmatpush.msrb.mxu3 %v3288_v14 }
 0x35f   :  { %1494 = vmatpush.msra.mxu0 %v3294_v59  ;;  %1514 = vmatpush.msra.mxu1 %v3300_v29 }
 0x360   :  { %1534 = vmatpush.msrb.mxu2 %v3306_v58  ;;  %1554 = vmatpush.msrb.mxu3 %v3312_v10 }
 0x361   :  { %1495 = vmatpush.msra.mxu0 %v3318_v5  ;;  %1515 = vmatpush.msra.mxu1 %v3324_v7 }
 0x362   :  { %1535 = vmatpush.msrb.mxu2 %v3330_v21  ;;  %1555 = vmatpush.msrb.mxu3 %v3336_v15 }
 0x363   :  { %1496 = vmatpush.msra.mxu0 %v3342_v16  ;;  %1516 = vmatpush.msra.mxu1 %v3348_v18 }
 0x364   :  { %1536 = vmatpush.msrb.mxu2 %v3354_v19  ;;  %1556 = vmatpush.msrb.mxu3 %v3360_v20 }
 0x365   :  { %1497 = vmatpush.msra.mxu0 %v3366_v22  ;;  %1517 = vmatpush.msra.mxu1 %v3372_v23 }
 0x366   :  { %1537 = vmatpush.msrb.mxu2 %v3378_v24  ;;  %1557 = vmatpush.msrb.mxu3 %v3384_v26 }
 0x367   :  { %1498 = vmatpush.msra.mxu0 %v3390_v27  ;;  %1518 = vmatpush.msra.mxu1 %v3396_v28 }
 0x368   :  { %1538 = vmatpush.msrb.mxu2 %v3402_v30  ;;  %1558 = vmatpush.msrb.mxu3 %v3408_v31 }
 0x369   :  { %1499 = vmatpush.msra.mxu0 %v3414_v32  ;;  %1519 = vmatpush.msra.mxu1 %v3420_v33 }
 0x36a   :  { %1539 = vmatpush.msrb.mxu2 %v3426_v34  ;;  %1559 = vmatpush.msrb.mxu3 %v3432_v35 }
 0x36b   :  { %1500 = vmatpush.msra.mxu0 %v3438_v36  ;;  %1520 = vmatpush.msra.mxu1 %v3444_v37 }
 0x36c   :  { %1540 = vmatpush.msrb.mxu2 %v3450_v38  ;;  %1560 = vmatpush.msrb.mxu3 %v3456_v39 }
 0x36d   :  { %1501 = vmatpush.msra.mxu0 %v3462_v40  ;;  %1521 = vmatpush.msra.mxu1 %v3468_v41 }
 0x36e   :  { %1541 = vmatpush.msrb.mxu2 %v3474_v42  ;;  %1561 = vmatpush.msrb.mxu3 %v4398_v17 }
 0x36f   :  { %1502 = vmatpush.msra.mxu0 %v4429_v54  ;;  %1522 = vmatpush.msra.mxu1 %v4430_v56 }
 0x370   :  { %1542 = vmatpush.msrb.mxu2 %v4431_v61  ;;  %1562 = vmatpush.msrb.mxu3 %v4432_v60 }
 0x371   :  { %1503 = vmatpush.msra.mxu0 %v4433_v43  ;;  %1523 = vmatpush.msra.mxu1 %v4434_v46 }
 0x372   :  { %1543 = vmatpush.msrb.mxu2 %v4435_v53  ;;  %1563 = vmatpush.msrb.mxu3 %v4436_v44 }
 0x373   :  { %1504 = vmatpush.msra.mxu0 %v4437_v11  ;;  %1524 = vmatpush.msra.mxu1 %v4438_v3  ;;  %v1073_v11 = vld [vmem:[#allocation2 + $0x24] ss:$8 sm:$0xf] }
 0x374   :  { %1544 = vmatpush.msrb.mxu2 %v4439_v8  ;;  %1564 = vmatpush.msrb.mxu3 %v4440_v52 }
 0x375   :  { %1505 = vmatpush.msra.mxu0 %v4441_v1  ;;  %1525 = vmatpush.msra.mxu1 %v4442_v57  ;;  %v4453_v57 = vld [vmem:[#allocation27_spill] sm:$0xff] }
 0x376   :  { %1545 = vmatpush.msrb.mxu2 %v4443_v4  ;;  %1565 = vmatpush.msrb.mxu3 %v4444_v55  ;;  %v4454_v4 = vld [vmem:[#allocation28_spill] sm:$0xff]  ;;  %v4455_v55 = vld [vmem:[#allocation41_spill] sm:$0xff] }
 0x377   :  { %1506 = vmatpush.msra.mxu0 %v4445_v0  ;;  %1526 = vmatpush.msra.mxu1 %v4446_v25  ;;  %v4456_v0 = vld [vmem:[#allocation40_spill] sm:$0xff] }
 0x378   :  { %1546 = vmatpush.msrb.mxu2 %v4447_v48  ;;  %1566 = vmatpush.msrb.mxu3 %v4448_v47 }
 0x379   :  { %1507 = vmatpush.msra.mxu0 %v4449_v9  ;;  %1527 = vmatpush.msra.mxu1 %v4450_v51 }
 0x37a   :  { %1547 = vmatpush.msrb.mxu2 %v4451_v50  ;;  %1567 = vmatpush.msrb.mxu3 %v4452_v49 }
 0x37b   :  { %1508 = vmatpush.msra.mxu0 %v4453_v57  ;;  %1528 = vmatpush.msra.mxu1 %v4454_v4  ;;  %v1071_v4 = vld [vmem:[#allocation2 + $0x4] ss:$8 sm:$0xf] }
 0x37c   :  { %1548 = vmatpush.msrb.mxu2 %v4455_v55  ;;  %1568 = vmatpush.msrb.mxu3 %v4456_v0 }
 0x3d8   :  { %v1118_v25 = vpop.f32.mrf.mxu1  ;;  %v1098_v8 = vpop.f32.mrf.mxu0 }
 0x3d9   :  { %v1165_v48 = vrot.slane %v1118_v25, 7 }
 0x3db   :  { %v1168_v51 = vsel %vm334_vm7, %v1098_v8, %v1165_v48  ;;  %v1171_v50 = vsel %vm340_vm8, %v1098_v8, %v1165_v48 }
 0x3df   :  { %v1138_v1 = vpop.f32.mrf.mxu2  ;;  %v1158_v47 = vpop.f32.mrf.mxu3 }
 0x3e0   :  { %v1166_v52 = vrot.slane %v1138_v1, 6  ;;  %v1167_v9 = vrot.slane %v1158_v47, 5 }
 0x3e2   :  { %v1169_v49 = vsel %vm336_vm9, %v1166_v52, %v1167_v9  ;;  %v1172_v57 = vsel %vm342_vm10, %v1166_v52, %v1167_v9 }
 0x3e3   :  { %v1170_v55 = vsel %vm338_vm11, %v1168_v51, %v1169_v49  ;;  %v1173_v0 = vsel %vm344_vm12, %v1171_v50, %v1172_v57 }
 0x3e4   :  { %v1174_v3 = vrot.slane %v1173_v0, 1  ;;  %v1177_v25 = vadd.f32 %v1170_v55, %v1071_v4 }
 0x3e6   :  { %v1178_v44 = vadd.f32 %v1174_v3, %v1073_v11  ;;  %v2184_v1 = vmul.f32 -1.442695, %v1177_v25  ;;  %v1219_v51 = vrot.slane %v1177_v25, 3 }
 0x3e8   :  { %2275 = vpow2.f32 %v2184_v1  ;;  %v2185_v47 = vmul.f32 -1.442695, %v1178_v44  ;;  %v1220_v4 = vrot.slane %v1178_v44, 3 }
 0x3ea   :  { %2277 = vpow2.f32 %v2185_v47 }
 0x3ee   :  { %v2276_v53 = vpop.eup %2275 }
 0x3ef   :  { %v1185_v46 = vadd.f32 1.0, %v2276_v53 }
 0x3f0   :  { %v2278_v8 = vpop.eup %2277 }
 0x3f1   :  { %v1186_v48 = vadd.f32 1.0, %v2278_v8  ;;  %2279 = vrcp.f32 %v1185_v46  ;;  %v1198_v0 = vand.u32 2147483648, %v1185_v46  ;;  %v1196_v11 = vand.u32 2147483647, %v1185_v46 }
 0x3f2   :  { %vm1192_vm14 = vweird.f32 %v1185_v46 }
 0x3f3   :  { %2281 = vrcp.f32 %v1186_v48  ;;  %v1213_v50 = vand.u32 2147483648, %v1186_v48  ;;  %v1211_v47 = vand.u32 2147483647, %v1186_v48  ;;  %v1199_v8 = vor.u32 1.1754944e-38, %v1198_v0 }
 0x3f4   :  { %2283 = vtanh.f32 %v1219_v51  ;;  %vm1197_vm1 = vcmp.eq.f32.partialorder %v1196_v11, 8.507059e+37  ;;  %vm1207_vm2 = vweird.f32 %v1186_v48 }
 0x3f5   :  { %2285 = vtanh.f32 %v1220_v4  ;;  %v1214_v44 = vor.u32 1.1754944e-38, %v1213_v50  ;;  %vm1212_vm4 = vcmp.eq.f32.partialorder %v1211_v47, 8.507059e+37 }
 0x3f7   :  { %v2280_v52 = vpop.eup %2279 }
 0x3f8   :  { %v1188_v9 = vmul.f32 %v2280_v52, %v1185_v46  ;;  %vm1193_vm13 = vweird.f32 %v2280_v52 }
 0x3f9   :  { %v2282_v43 = vpop.eup %2281  ;;  %vm1194_vm0 = vmor %vm1192_vm14, %vm1193_vm13 }
 0x3fa   :  { %v1189_v49 = vsub.f32 1.0, %v1188_v9  ;;  %v1203_v57 = vmul.f32 %v2282_v43, %v1186_v48  ;;  %vm1208_vm15 = vweird.f32 %v2282_v43 }
 0x3fb   :  { %vm1209_vm3 = vmor %vm1207_vm2, %vm1208_vm15 }
 0x3fc   :  { %v1190_v55 = vmul.f32 %v2280_v52, %v1189_v49  ;;  %v1204_v3 = vsub.f32 1.0, %v1203_v57  ;;  %v1253_v49 = vpop.permute.xlu2 %1252  ;;  %v2284_v57 = vpop.eup %2283 }
 0x3fd   :  { %v1254_v51 = vperm.slane %v1253_v49, 0  ;;  %v2286_v4 = vpop.eup %2285 }
 0x3fe   :  { %v1191_v53 = vadd.f32 %v2280_v52, %v1190_v55  ;;  %v1205_v1 = vmul.f32 %v2282_v43, %v1204_v3  ;;  %v1257_v3 = vpop.permute.xlu0 %1256 }
 0x3ff   :  { %vm3861_vm5 = vcmp.eq.s32.totalorder %v1254_v51, 1  ;;  %v1277_v51 = vld [vmem:[#allocation2 + $0x5] ss:$8 sm:$0xf] }
 0x400   :  { %v1195_v60 = vsel %vm1194_vm0, %v2280_v52, %v1191_v53  ;;  %v1206_v25 = vadd.f32 %v2282_v43, %v1205_v1  ;;  %v1258_v52 = vperm.slane %v1257_v3, 0 }
 0x401   :  { %v1200_v9 = vsel %vm1197_vm1, %v1199_v8, %v1195_v60 }
 0x402   :  { %v1210_v61 = vsel %vm1209_vm3, %v2282_v43, %v1206_v25  ;;  %v1227_v46 = vrot.slane %v1200_v9, 1  ;;  %v1233_v0 = vmul.f32 %v2284_v57, %v1200_v9  ;;  %vm1260_vm6 = vcmp.eq.s32.totalorder %v1258_v52, 1  ;;  %v1279_v52 = vld [vmem:[#allocation2 + $0x25] ss:$8 sm:$0xf] }
 0x403   :  { %v1215_v55 = vsel %vm1212_vm4, %v1214_v44, %v1210_v61  ;;  %v1239_v1 = vrot.slane %v1200_v9, 2 }
 0x404   :  { %v1228_v56 = vrot.slane %v1215_v55, 1  ;;  %v1231_v54 = vmul.f32 %v1227_v46, %v3772_v6  ;;  %v1234_v48 = vmul.f32 %v2286_v4, %v1215_v55  ;;  %v1240_v47 = vrot.slane %v1215_v55, 2 }
 0x406   :  { %v1232_v11 = vmul.f32 %v1228_v56, %v3775_v62  ;;  %v1235_v60 = vadd.f32 %v1233_v0, %v1231_v54 }
 0x408   :  { %v1236_v43 = vadd.f32 %v1234_v48, %v1232_v11  ;;  %2287 = vtanh.f32 %v1235_v60  ;;  %v3868_v61 = vsel %vm3861_vm5, %v1235_v60, %v3772_v6 }
 0x40a   :  { %2289 = vtanh.f32 %v1236_v43  ;;  %v3871_v53 = vsel %vm1260_vm6, %v1236_v43, %v3775_v62 }
 0x40e   :  { %v2288_v56 = vpop.eup %2287 }
 0x40f   :  { %v1243_v54 = vmul.f32 %v2288_v56, %v1239_v1 }
 0x410   :  { %v2290_v8 = vpop.eup %2289 }
 0x411   :  { %v1244_v25 = vmul.f32 %v2290_v8, %v1240_v47  ;;  %v1265_v44 = vsel %vm3861_vm5, %v1243_v54, 0.0  ;;  %v3878_v6 = vsel %vm3861_vm5, %v1243_v54, %v3782_v45 }
 0x412   :  { %1269 = vst [vmem:[#allocation1] ss:$9 sm:$0xff] %v1265_v44 }
 0x413   :  { %v1266_v49 = vsel %vm1260_vm6, %v1244_v25, 0.0  ;;  %v3881_v62 = vsel %vm1260_vm6, %v1244_v25, %v3785_v63 }
 0x414   :  { %1271 = vst [vmem:[#allocation1 + $0x1] ss:$9 sm:$0xff] %v1266_v49 }
 0x41b   :  { %v1272_v46 = vld [vmem:[#allocation1] sm:$0xff] }
 0x41c   :  { %1282 = vst [vmem:[#allocation1] ss:$9 sm:$0xff] %v3878_v6 }
 0x41d   :  { %1284 = vst [vmem:[#allocation1 + $0x1] ss:$9 sm:$0xff] %v3881_v62 }
 0x41e   :  { %1275 = vst [vmem:[#allocation3 + $0x8] sm:$0x3] %v1272_v46 }
 0x424   :  { %v1285_v9 = vld [vmem:[#allocation1] sm:$0xff] }
 0x425   :  { %1303 = vmatmul.f32.vlgmr.msrb.gmra.mxu0 %v1285_v9  ;;  %1323 = vmatmul.f32.vlgmr.msrb.gmra.mxu1 %v1285_v9 }
 0x426   :  { %1343 = vmatmul.f32.vlgmr.msra.gmra.mxu2 %v1285_v9  ;;  %1363 = vmatmul.f32.vlgmr.msra.gmra.mxu3 %v1285_v9 }
 0x427   :  { %1699 = vmatpush.msrb.mxu0 %v3270_v12  ;;  %1719 = vmatpush.msrb.mxu1 %v3276_v2  ;;  %v4459_v12 = vld [vmem:[#allocation34_spill] sm:$0xff]  ;;  %v4460_v2 = vld [vmem:[#allocation11_spill] sm:$0xff] }
 0x428   :  { %1739 = vmatpush.msra.mxu2 %v3282_v13  ;;  %1759 = vmatpush.msra.mxu3 %v3288_v14  ;;  %v4461_v13 = vld [vmem:[#allocation21_spill] sm:$0xff]  ;;  %v4462_v14 = vld [vmem:[#allocation18_spill] sm:$0xff] }
 0x429   :  { %1700 = vmatpush.msrb.mxu0 %v3294_v59  ;;  %1720 = vmatpush.msrb.mxu1 %v3300_v29  ;;  %v4463_v59 = vld [vmem:[#allocation12_spill] sm:$0xff]  ;;  %v4464_v29 = vld [vmem:[#allocation13_spill] sm:$0xff] }
 0x42a   :  { %1740 = vmatpush.msra.mxu2 %v3306_v58  ;;  %1760 = vmatpush.msra.mxu3 %v3312_v10  ;;  %v4465_v58 = vld [vmem:[#allocation25_spill] sm:$0xff]  ;;  %v4466_v10 = vld [vmem:[#allocation22_spill] sm:$0xff] }
 0x42b   :  { %1701 = vmatpush.msrb.mxu0 %v3318_v5  ;;  %1721 = vmatpush.msrb.mxu1 %v3324_v7  ;;  %v4467_v5 = vld [vmem:[#allocation14_spill] sm:$0xff]  ;;  %v4468_v7 = vld [vmem:[#allocation15_spill] sm:$0xff] }
 0x42c   :  { %1741 = vmatpush.msra.mxu2 %v3330_v21  ;;  %1761 = vmatpush.msra.mxu3 %v3336_v15  ;;  %v4469_v21 = vld [vmem:[#allocation29_spill] sm:$0xff]  ;;  %v4470_v15 = vld [vmem:[#allocation26_spill] sm:$0xff] }
 0x42d   :  { %1702 = vmatpush.msrb.mxu0 %v3342_v16  ;;  %1722 = vmatpush.msrb.mxu1 %v3348_v18  ;;  %v4471_v16 = vld [vmem:[#allocation16_spill] sm:$0xff]  ;;  %v4472_v18 = vld [vmem:[#allocation17_spill] sm:$0xff] }
 0x42e   :  { %1742 = vmatpush.msra.mxu2 %v3354_v19  ;;  %1762 = vmatpush.msra.mxu3 %v3360_v20  ;;  %v4473_v19 = vld [vmem:[#allocation35_spill] sm:$0xff]  ;;  %v4474_v20 = vld [vmem:[#allocation30_spill] sm:$0xff] }
 0x42f   :  { %1703 = vmatpush.msrb.mxu0 %v3366_v22  ;;  %1723 = vmatpush.msrb.mxu1 %v3372_v23  ;;  %v4475_v22 = vld [vmem:[#allocation19_spill] sm:$0xff]  ;;  %v4476_v23 = vld [vmem:[#allocation20_spill] sm:$0xff] }
 0x430   :  { %1743 = vmatpush.msra.mxu2 %v3378_v24  ;;  %1763 = vmatpush.msra.mxu3 %v3384_v26  ;;  %v4477_v24 = vld [vmem:[#allocation37_spill] sm:$0xff]  ;;  %v4478_v26 = vld [vmem:[#allocation36_spill] sm:$0xff] }
 0x431   :  { %1704 = vmatpush.msrb.mxu0 %v3390_v27  ;;  %1724 = vmatpush.msrb.mxu1 %v3396_v28  ;;  %v4479_v27 = vld [vmem:[#allocation23_spill] sm:$0xff]  ;;  %v4480_v28 = vld [vmem:[#allocation24_spill] sm:$0xff] }
 0x432   :  { %1744 = vmatpush.msra.mxu2 %v3402_v30  ;;  %1764 = vmatpush.msra.mxu3 %v3408_v31  ;;  %v4481_v30 = vld [vmem:[#allocation39_spill] sm:$0xff]  ;;  %v4482_v31 = vld [vmem:[#allocation38_spill] sm:$0xff] }
 0x433   :  { %1705 = vmatpush.msrb.mxu0 %v3414_v32  ;;  %1725 = vmatpush.msrb.mxu1 %v3420_v33  ;;  %v4483_v32 = vld [vmem:[#allocation27_spill] sm:$0xff]  ;;  %v4484_v33 = vld [vmem:[#allocation28_spill] sm:$0xff] }
 0x434   :  { %1745 = vmatpush.msra.mxu2 %v3426_v34  ;;  %1765 = vmatpush.msra.mxu3 %v3432_v35  ;;  %v4485_v34 = vld [vmem:[#allocation41_spill] sm:$0xff]  ;;  %v4486_v35 = vld [vmem:[#allocation40_spill] sm:$0xff] }
 0x435   :  { %1706 = vmatpush.msrb.mxu0 %v3438_v36  ;;  %1726 = vmatpush.msrb.mxu1 %v3444_v37 }
 0x436   :  { %1746 = vmatpush.msra.mxu2 %v3450_v38  ;;  %1766 = vmatpush.msra.mxu3 %v3456_v39 }
 0x437   :  { %1707 = vmatpush.msrb.mxu0 %v3462_v40  ;;  %1727 = vmatpush.msrb.mxu1 %v3468_v41 }
 0x438   :  { %1747 = vmatpush.msra.mxu2 %v3474_v42  ;;  %1767 = vmatpush.msra.mxu3 %v4398_v17 }
 0x439   :  { %1708 = vmatpush.msrb.mxu0 %v4459_v12  ;;  %1728 = vmatpush.msrb.mxu1 %v4460_v2 }
 0x43a   :  { %1748 = vmatpush.msra.mxu2 %v4461_v13  ;;  %1768 = vmatpush.msra.mxu3 %v4462_v14 }
 0x43b   :  { %1709 = vmatpush.msrb.mxu0 %v4463_v59  ;;  %1729 = vmatpush.msrb.mxu1 %v4464_v29 }
 0x43c   :  { %1749 = vmatpush.msra.mxu2 %v4465_v58  ;;  %1769 = vmatpush.msra.mxu3 %v4466_v10 }
 0x43d   :  { %1710 = vmatpush.msrb.mxu0 %v4467_v5  ;;  %1730 = vmatpush.msrb.mxu1 %v4468_v7 }
 0x43e   :  { %1750 = vmatpush.msra.mxu2 %v4469_v21  ;;  %1770 = vmatpush.msra.mxu3 %v4470_v15 }
 0x43f   :  { %1711 = vmatpush.msrb.mxu0 %v4471_v16  ;;  %1731 = vmatpush.msrb.mxu1 %v4472_v18  ;;  %v1459_v16 = vpop.permute.xlu1 %1458 }
 0x440   :  { %1751 = vmatpush.msra.mxu2 %v4473_v19  ;;  %1771 = vmatpush.msra.mxu3 %v4474_v20 }
 0x441   :  { %1712 = vmatpush.msrb.mxu0 %v4475_v22  ;;  %1732 = vmatpush.msrb.mxu1 %v4476_v23  ;;  %v1460_v22 = vperm.slane %v1459_v16, 0 }
 0x442   :  { %1752 = vmatpush.msra.mxu2 %v4477_v24  ;;  %1772 = vmatpush.msra.mxu3 %v4478_v26  ;;  %v1463_v24 = vpop.permute.xlu2 %1462 }
 0x443   :  { %1713 = vmatpush.msrb.mxu0 %v4479_v27  ;;  %1733 = vmatpush.msrb.mxu1 %v4480_v28  ;;  %vm3957_vm5 = vcmp.eq.s32.totalorder %v1460_v22, 1 }
 0x444   :  { %1753 = vmatpush.msra.mxu2 %v4481_v30  ;;  %1773 = vmatpush.msra.mxu3 %v4482_v31  ;;  %v1464_v31 = vperm.slane %v1463_v24, 0 }
 0x445   :  { %1714 = vmatpush.msrb.mxu0 %v4483_v32  ;;  %1734 = vmatpush.msrb.mxu1 %v4484_v33 }
 0x446   :  { %1754 = vmatpush.msra.mxu2 %v4485_v34  ;;  %1774 = vmatpush.msra.mxu3 %v4486_v35  ;;  %vm1466_vm6 = vcmp.eq.s32.totalorder %v1464_v31, 1  ;;  %v1665_v31 = vpop.permute.xlu0 %1664 }
 0x4a2   :  { %v1324_v36 = vpop.f32.mrf.mxu1  ;;  %v1304_v42 = vpop.f32.mrf.mxu0 }
 0x4a3   :  { %v1371_v37 = vrot.slane %v1324_v36, 7 }
 0x4a5   :  { %v1374_v17 = vsel %vm334_vm7, %v1304_v42, %v1371_v37  ;;  %v1377_v45 = vsel %vm340_vm8, %v1304_v42, %v1371_v37 }
 0x4a9   :  { %v1344_v38 = vpop.f32.mrf.mxu2  ;;  %v1364_v39 = vpop.f32.mrf.mxu3 }
 0x4aa   :  { %v1372_v40 = vrot.slane %v1344_v38, 6  ;;  %v1373_v41 = vrot.slane %v1364_v39, 5 }
 0x4ac   :  { %v1375_v63 = vsel %vm336_vm9, %v1372_v40, %v1373_v41  ;;  %v1378_v57 = vsel %vm342_vm10, %v1372_v40, %v1373_v41 }
 0x4ad   :  { %v1376_v55 = vsel %vm338_vm11, %v1374_v17, %v1375_v63  ;;  %v1379_v3 = vsel %vm344_vm12, %v1377_v45, %v1378_v57 }
 0x4ae   :  { %v1380_v0 = vrot.slane %v1379_v3, 1  ;;  %v1383_v4 = vadd.f32 %v1376_v55, %v1277_v51 }
 0x4b0   :  { %v1384_v11 = vadd.f32 %v1380_v0, %v1279_v52  ;;  %v2188_v48 = vmul.f32 -1.442695, %v1383_v4  ;;  %v1425_v25 = vrot.slane %v1383_v4, 3 }
 0x4b2   :  { %2291 = vpow2.f32 %v2188_v48  ;;  %v2189_v60 = vmul.f32 -1.442695, %v1384_v11  ;;  %v1426_v9 = vrot.slane %v1384_v11, 3 }
 0x4b4   :  { %2293 = vpow2.f32 %v2189_v60 }
 0x4b8   :  { %v2292_v50 = vpop.eup %2291 }
 0x4b9   :  { %v1391_v43 = vadd.f32 1.0, %v2292_v50 }
 0x4ba   :  { %v2294_v1 = vpop.eup %2293 }
 0x4bb   :  { %v1392_v56 = vadd.f32 1.0, %v2294_v1  ;;  %2295 = vrcp.f32 %v1391_v43  ;;  %v1404_v46 = vand.u32 2147483648, %v1391_v43  ;;  %v1402_v2 = vand.u32 2147483647, %v1391_v43 }
 0x4bc   :  { %vm1398_vm14 = vweird.f32 %v1391_v43  ;;  %v1483_v1 = vld [vmem:[#allocation2 + $0x6] ss:$8 sm:$0xf] }
 0x4bd   :  { %2297 = vrcp.f32 %v1392_v56  ;;  %v1419_v14 = vand.u32 2147483648, %v1392_v56  ;;  %v1417_v58 = vand.u32 2147483647, %v1392_v56  ;;  %v1405_v10 = vor.u32 1.1754944e-38, %v1404_v46 }
 0x4be   :  { %2299 = vtanh.f32 %v1425_v25  ;;  %vm1403_vm1 = vcmp.eq.f32.partialorder %v1402_v2, 8.507059e+37  ;;  %vm1413_vm2 = vweird.f32 %v1392_v56  ;;  %v1485_v25 = vld [vmem:[#allocation2 + $0x26] ss:$8 sm:$0xf] }
 0x4bf   :  { %2301 = vtanh.f32 %v1426_v9  ;;  %v1420_v15 = vor.u32 1.1754944e-38, %v1419_v14  ;;  %vm1418_vm4 = vcmp.eq.f32.partialorder %v1417_v58, 8.507059e+37 }
 0x4c1   :  { %v2296_v47 = vpop.eup %2295 }
 0x4c2   :  { %v1394_v54 = vmul.f32 %v2296_v47, %v1391_v43  ;;  %vm1399_vm13 = vweird.f32 %v2296_v47 }
 0x4c3   :  { %v2298_v8 = vpop.eup %2297  ;;  %vm1400_vm0 = vmor %vm1398_vm14, %vm1399_vm13 }
 0x4c4   :  { %v1395_v44 = vsub.f32 1.0, %v1394_v54  ;;  %v1409_v49 = vmul.f32 %v2298_v8, %v1392_v56  ;;  %vm1414_vm15 = vweird.f32 %v2298_v8  ;;  %v2300_v20 = vpop.eup %2299 }
 0x4c5   :  { %vm1415_vm3 = vmor %vm1413_vm2, %vm1414_vm15  ;;  %v2302_v30 = vpop.eup %2301 }
 0x4c6   :  { %v1396_v12 = vmul.f32 %v2296_v47, %v1395_v44  ;;  %v1410_v13 = vsub.f32 1.0, %v1409_v49 }
 0x4c8   :  { %v1397_v59 = vadd.f32 %v2296_v47, %v1396_v12  ;;  %v1411_v29 = vmul.f32 %v2298_v8, %v1410_v13 }
 0x4ca   :  { %v1401_v5 = vsel %vm1400_vm0, %v2296_v47, %v1397_v59  ;;  %v1412_v7 = vadd.f32 %v2298_v8, %v1411_v29 }
 0x4cb   :  { %v1406_v21 = vsel %vm1403_vm1, %v1405_v10, %v1401_v5 }
 0x4cc   :  { %v1416_v18 = vsel %vm1415_vm3, %v2298_v8, %v1412_v7  ;;  %v1433_v19 = vrot.slane %v1406_v21, 1  ;;  %v1439_v28 = vmul.f32 %v2300_v20, %v1406_v21  ;;  %v1445_v39 = vrot.slane %v1406_v21, 2 }
 0x4cd   :  { %v1421_v23 = vsel %vm1418_vm4, %v1420_v15, %v1416_v18 }
 0x4ce   :  { %v1434_v26 = vrot.slane %v1421_v23, 1  ;;  %v1437_v27 = vmul.f32 %v1433_v19, %v3868_v61  ;;  %v1440_v33 = vmul.f32 %v2302_v30, %v1421_v23  ;;  %v1446_v41 = vrot.slane %v1421_v23, 2 }
 0x4d0   :  { %v1438_v32 = vmul.f32 %v1434_v26, %v3871_v53  ;;  %v1441_v34 = vadd.f32 %v1439_v28, %v1437_v27 }
 0x4d2   :  { %v1442_v36 = vadd.f32 %v1440_v33, %v1438_v32  ;;  %2303 = vtanh.f32 %v1441_v34  ;;  %v3964_v37 = vsel %vm3957_vm5, %v1441_v34, %v3868_v61  ;;  %v1669_v32 = vpop.permute.xlu1 %1668 }
 0x4d4   :  { %2305 = vtanh.f32 %v1442_v36  ;;  %v3967_v38 = vsel %vm1466_vm6, %v1442_v36, %v3871_v53  ;;  %v1666_v36 = vperm.slane %v1665_v31, 0 }
 0x4d8   :  { %v2304_v40 = vpop.eup %2303 }
 0x4d9   :  { %v1449_v42 = vmul.f32 %v2304_v40, %v1445_v39 }
 0x4da   :  { %v2306_v17 = vpop.eup %2305 }
 0x4db   :  { %v1450_v45 = vmul.f32 %v2306_v17, %v1446_v41  ;;  %v1471_v63 = vsel %vm3957_vm5, %v1449_v42, 0.0  ;;  %v3974_v61 = vsel %vm3957_vm5, %v1449_v42, %v3878_v6  ;;  %vm3989_vm5 = vcmp.eq.s32.totalorder %v1666_v36, 1 }
 0x4dc   :  { %1475 = vst [vmem:[#allocation1] ss:$9 sm:$0xff] %v1471_v63 }
 0x4dd   :  { %v1472_v57 = vsel %vm1466_vm6, %v1450_v45, 0.0  ;;  %v3977_v53 = vsel %vm1466_vm6, %v1450_v45, %v3881_v62  ;;  %v1670_v45 = vperm.slane %v1669_v32, 0 }
 0x4de   :  { %1477 = vst [vmem:[#allocation1 + $0x1] ss:$9 sm:$0xff] %v1472_v57 }
 0x4df   :  { %vm3998_vm6 = vcmp.eq.s32.totalorder %v1670_v45, 1 }
 0x4e5   :  { %v1478_v51 = vld [vmem:[#allocation1] sm:$0xff] }
 0x4e6   :  { %1488 = vst [vmem:[#allocation1] ss:$9 sm:$0xff] %v3974_v61 }
 0x4e7   :  { %1490 = vst [vmem:[#allocation1 + $0x1] ss:$9 sm:$0xff] %v3977_v53 }
 0x4e8   :  { %1481 = vst [vmem:[#allocation3 + $0xa] sm:$0x3] %v1478_v51 }
 0x4ee   :  { %v1491_v55 = vld [vmem:[#allocation1] sm:$0xff] }
 0x4ef   :  { %1509 = vmatmul.f32.vlgmr.msra.gmra.mxu0 %v1491_v55  ;;  %1529 = vmatmul.f32.vlgmr.msra.gmra.mxu1 %v1491_v55 }
 0x4f0   :  { %1549 = vmatmul.f32.vlgmr.msrb.gmra.mxu2 %v1491_v55  ;;  %1569 = vmatmul.f32.vlgmr.msrb.gmra.mxu3 %v1491_v55 }
 0x56c   :  { %v1530_v3 = vpop.f32.mrf.mxu1  ;;  %v1510_v48 = vpop.f32.mrf.mxu0 }
 0x56d   :  { %v1577_v0 = vrot.slane %v1530_v3, 7 }
 0x56f   :  { %v1580_v62 = vsel %vm334_vm7, %v1510_v48, %v1577_v0  ;;  %v1583_v60 = vsel %vm340_vm8, %v1510_v48, %v1577_v0 }
 0x573   :  { %v1550_v4 = vpop.f32.mrf.mxu2  ;;  %v1570_v52 = vpop.f32.mrf.mxu3 }
 0x574   :  { %v1578_v6 = vrot.slane %v1550_v4, 6  ;;  %v1579_v11 = vrot.slane %v1570_v52, 5  ;;  %v1928_v4 = vld [vmem:[%s4179_s6 + $0x50] sm:$0xff] }
 0x576   :  { %v1581_v50 = vsel %vm336_vm9, %v1578_v6, %v1579_v11  ;;  %v1584_v43 = vsel %vm342_vm10, %v1578_v6, %v1579_v11 }
 0x577   :  { %v1582_v56 = vsel %vm338_vm11, %v1580_v62, %v1581_v50  ;;  %v1585_v47 = vsel %vm344_vm12, %v1583_v60, %v1584_v43 }
 0x578   :  { %v1586_v54 = vrot.slane %v1585_v47, 1  ;;  %v1589_v8 = vadd.f32 %v1582_v56, %v1483_v1 }
 0x57a   :  { %v1590_v44 = vadd.f32 %v1586_v54, %v1485_v25  ;;  %v2192_v49 = vmul.f32 -1.442695, %v1589_v8  ;;  %v1631_v58 = vrot.slane %v1589_v8, 3 }
 0x57c   :  { %2307 = vpow2.f32 %v2192_v49  ;;  %v2193_v46 = vmul.f32 -1.442695, %v1590_v44  ;;  %v1632_v21 = vrot.slane %v1590_v44, 3 }
 0x57e   :  { %2309 = vpow2.f32 %v2193_v46 }
 0x582   :  { %v2308_v9 = vpop.eup %2307 }
 0x583   :  { %v1597_v12 = vadd.f32 1.0, %v2308_v9 }
 0x584   :  { %v2310_v2 = vpop.eup %2309 }
 0x585   :  { %v1598_v13 = vadd.f32 1.0, %v2310_v2  ;;  %2311 = vrcp.f32 %v1597_v12  ;;  %v1610_v7 = vand.u32 2147483648, %v1597_v12  ;;  %v1608_v16 = vand.u32 2147483647, %v1597_v12 }
 0x586   :  { %vm1604_vm14 = vweird.f32 %v1597_v12 }
 0x587   :  { %2313 = vrcp.f32 %v1598_v13  ;;  %v1625_v19 = vand.u32 2147483648, %v1598_v13  ;;  %v1623_v23 = vand.u32 2147483647, %v1598_v13  ;;  %v1611_v24 = vor.u32 1.1754944e-38, %v1610_v7 }
 0x588   :  { %2315 = vtanh.f32 %v1631_v58  ;;  %vm1609_vm1 = vcmp.eq.f32.partialorder %v1608_v16, 8.507059e+37  ;;  %vm1619_vm2 = vweird.f32 %v1598_v13 }
 0x589   :  { %2317 = vtanh.f32 %v1632_v21  ;;  %v1626_v30 = vor.u32 1.1754944e-38, %v1625_v19  ;;  %vm1624_vm4 = vcmp.eq.f32.partialorder %v1623_v23, 8.507059e+37 }
 0x58b   :  { %v2312_v14 = vpop.eup %2311 }
 0x58c   :  { %v1600_v59 = vmul.f32 %v2312_v14, %v1597_v12  ;;  %vm1605_vm13 = vweird.f32 %v2312_v14 }
 0x58d   :  { %v2314_v29 = vpop.eup %2313  ;;  %vm1606_vm0 = vmor %vm1604_vm14, %vm1605_vm13 }
 0x58e   :  { %v1601_v10 = vsub.f32 1.0, %v1600_v59  ;;  %v1615_v5 = vmul.f32 %v2314_v29, %v1598_v13  ;;  %vm1620_vm15 = vweird.f32 %v2314_v29  ;;  %v2316_v35 = vpop.eup %2315  ;;  %v1689_v13 = vld [vmem:[#allocation2 + $0x7] ss:$8 sm:$0xf] }
 0x58f   :  { %vm1621_vm3 = vmor %vm1619_vm2, %vm1620_vm15  ;;  %v2318_v17 = vpop.eup %2317 }
 0x590   :  { %v1602_v15 = vmul.f32 %v2312_v14, %v1601_v10  ;;  %v1616_v18 = vsub.f32 1.0, %v1615_v5  ;;  %v1691_v10 = vld [vmem:[#allocation2 + $0x27] ss:$8 sm:$0xf] }
 0x592   :  { %v1603_v20 = vadd.f32 %v2312_v14, %v1602_v15  ;;  %v1617_v22 = vmul.f32 %v2314_v29, %v1616_v18 }
 0x594   :  { %v1607_v26 = vsel %vm1606_vm0, %v2312_v14, %v1603_v20  ;;  %v1618_v27 = vadd.f32 %v2314_v29, %v1617_v22  ;;  %v1933_v22 = vld [vmem:[%s4179_s6 + $0x78] sm:$0xff] }
 0x595   :  { %v1612_v28 = vsel %vm1609_vm1, %v1611_v24, %v1607_v26  ;;  %1961 = vmatpush.msra.mxu0 %v1933_v22  ;;  %v1918_v22 = vld [vmem:[%s4179_s6] sm:$0xff] }
 0x596   :  { %v1622_v33 = vsel %vm1621_vm3, %v2314_v29, %v1618_v27  ;;  %v1639_v34 = vrot.slane %v1612_v28, 1  ;;  %v1645_v42 = vmul.f32 %v2316_v35, %v1612_v28  ;;  %v1651_v6 = vrot.slane %v1612_v28, 2  ;;  %v1932_v27 = vld [vmem:[%s4179_s6 + $0x70] sm:$0xff] }
 0x597   :  { %v1627_v39 = vsel %vm1624_vm4, %v1626_v30, %v1622_v33  ;;  %1962 = vmatpush.msra.mxu0 %v1932_v27  ;;  %v1931_v33 = vld [vmem:[%s4179_s6 + $0x68] sm:$0xff] }
 0x598   :  { %v1640_v40 = vrot.slane %v1627_v39, 1  ;;  %v1643_v41 = vmul.f32 %v1639_v34, %v3964_v37  ;;  %v1646_v57 = vmul.f32 %v2318_v17, %v1627_v39  ;;  %v1652_v48 = vrot.slane %v1627_v39, 2 }
 0x599   :  { %1963 = vmatpush.msra.mxu0 %v1931_v33 }
 0x59a   :  { %v1644_v63 = vmul.f32 %v1640_v40, %v3967_v38  ;;  %v1647_v51 = vadd.f32 %v1645_v42, %v1643_v41  ;;  %v1930_v40 = vld [vmem:[%s4179_s6 + $0x60] sm:$0xff] }
 0x59b   :  { %1964 = vmatpush.msra.mxu0 %v1930_v40  ;;  %v4106_v40 = vld [vmem:[%s4180_s7] ss:$0 sm:$0xff] }
 0x59c   :  { %v1648_v3 = vadd.f32 %v1646_v57, %v1644_v63  ;;  %2319 = vtanh.f32 %v1647_v51  ;;  %v3996_v0 = vsel %vm3989_vm5, %v1647_v51, %v3964_v37  ;;  %v1929_v63 = vld [vmem:[%s4179_s6 + $0x58] sm:$0xff] }
 0x59d   :  { %1965 = vmatpush.msra.mxu0 %v1929_v63 }
 0x59e   :  { %2321 = vtanh.f32 %v1648_v3  ;;  %v4005_v52 = vsel %vm3998_vm6, %v1648_v3, %v3967_v38 }
 0x59f   :  { %1966 = vmatpush.msra.mxu0 %v1928_v4 }
 0x5a2   :  { %v2320_v11 = vpop.eup %2319 }
 0x5a3   :  { %v1655_v62 = vmul.f32 %v2320_v11, %v1651_v6 }
 0x5a4   :  { %v2322_v60 = vpop.eup %2321 }
 0x5a5   :  { %v1656_v50 = vmul.f32 %v2322_v60, %v1652_v48  ;;  %v1677_v37 = vsel %vm3989_vm5, %v1655_v62, 0.0  ;;  %v4014_v38 = vsel %vm3989_vm5, %v1655_v62, %v3974_v61  ;;  %v1927_v60 = vld [vmem:[%s4179_s6 + $0x48] sm:$0xff] }
 0x5a6   :  { %1681 = vst [vmem:[#allocation1] ss:$9 sm:$0xff] %v1677_v37  ;;  %1967 = vmatpush.msra.mxu0 %v1927_v60 }
 0x5a7   :  { %v1678_v43 = vsel %vm3998_vm6, %v1656_v50, 0.0  ;;  %v4019_v56 = vsel %vm3998_vm6, %v1656_v50, %v3977_v53 }
 0x5a8   :  { %1683 = vst [vmem:[#allocation1 + $0x1] ss:$9 sm:$0xff] %v1678_v43 }
 0x5af   :  { %v1684_v1 = vld [vmem:[#allocation1] sm:$0xff] }
 0x5b0   :  { %1687 = vst [vmem:[#allocation3 + $0xc] sm:$0x3] %v1684_v1 }
 0x5b1   :  { %1694 = vst [vmem:[#allocation1] ss:$9 sm:$0xff] %v4014_v38 }
 0x5b2   :  { %1696 = vst [vmem:[#allocation1 + $0x1] ss:$9 sm:$0xff] %v4019_v56 }
 0x5b9   :  { %v1697_v47 = vld [vmem:[#allocation1] sm:$0xff] }
 0x5ba   :  { %1715 = vmatmul.f32.vlgmr.msrb.gmra.mxu0 %v1697_v47  ;;  %1735 = vmatmul.f32.vlgmr.msrb.gmra.mxu1 %v1697_v47 }
 0x5bb   :  { %1755 = vmatmul.f32.vlgmr.msra.gmra.mxu2 %v1697_v47  ;;  %1775 = vmatmul.f32.vlgmr.msra.gmra.mxu3 %v1697_v47  ;;  %v1926_v47 = vld [vmem:[%s4179_s6 + $0x40] sm:$0xff] }
 0x5bc   :  { %1968 = vmatpush.msra.mxu0 %v1926_v47 }
 0x637   :  { %v1736_v54 = vpop.f32.mrf.mxu1  ;;  %v1716_v46 = vpop.f32.mrf.mxu0 }
 0x638   :  { %v1783_v8 = vrot.slane %v1736_v54, 7 }
 0x63a   :  { %v1786_v9 = vsel %vm334_vm7, %v1716_v46, %v1783_v8  ;;  %v1789_v53 = vsel %vm340_vm8, %v1716_v46, %v1783_v8  ;;  %v1871_v46 = vpop.permute.xlu2 %1870 }
 0x63e   :  { %v1756_v25 = vpop.f32.mrf.mxu2  ;;  %v1776_v61 = vpop.f32.mrf.mxu3 }
 0x63f   :  { %v1784_v44 = vrot.slane %v1756_v25, 6  ;;  %v1785_v49 = vrot.slane %v1776_v61, 5  ;;  %v1925_v61 = vld [vmem:[%s4179_s6 + $0x38] sm:$0xff] }
 0x640   :  { %1969 = vmatpush.msra.mxu0 %v1925_v61 }
 0x641   :  { %v1787_v12 = vsel %vm336_vm9, %v1784_v44, %v1785_v49  ;;  %v1790_v2 = vsel %vm342_vm10, %v1784_v44, %v1785_v49  ;;  %v1924_v44 = vld [vmem:[%s4179_s6 + $0x30] sm:$0xff] }
 0x642   :  { %v1788_v14 = vsel %vm338_vm11, %v1786_v9, %v1787_v12  ;;  %v1791_v59 = vsel %vm344_vm12, %v1789_v53, %v1790_v2  ;;  %v1923_v9 = vld [vmem:[%s4179_s6 + $0x28] sm:$0xff]  ;;  %1970 = vmatpush.msra.mxu0 %v1924_v44  ;;  %v1875_v53 = vpop.permute.xlu0 %1874  ;;  %v1922_v12 = vld [vmem:[%s4179_s6 + $0x20] sm:$0xff]  ;;  %v1872_v2 = vperm.slane %v1871_v46, 0 }
 0x643   :  { %v1792_v29 = vrot.slane %v1791_v59, 1  ;;  %v1795_v58 = vadd.f32 %v1788_v14, %v1689_v13  ;;  %v1921_v14 = vld [vmem:[%s4179_s6 + $0x18] sm:$0xff] }
 0x644   :  { %1971 = vmatpush.msra.mxu0 %v1923_v9  ;;  %vm4073_vm5 = vcmp.eq.s32.totalorder %v1872_v2, 1 }
 0x645   :  { %v1796_v5 = vadd.f32 %v1792_v29, %v1691_v10  ;;  %v2196_v7 = vmul.f32 -1.442695, %v1795_v58  ;;  %v1837_v26 = vrot.slane %v1795_v58, 3  ;;  %v1876_v29 = vperm.slane %v1875_v53, 0 }
 0x646   :  { %1972 = vmatpush.msra.mxu0 %v1922_v12 }
 0x647   :  { %2323 = vpow2.f32 %v2196_v7  ;;  %v2197_v21 = vmul.f32 -1.442695, %v1796_v5  ;;  %v1838_v32 = vrot.slane %v1796_v5, 3  ;;  %v1920_v5 = vld [vmem:[%s4179_s6 + $0x10] sm:$0xff]  ;;  %vm4082_vm6 = vcmp.eq.s32.totalorder %v1876_v29, 1 }
 0x648   :  { %1973 = vmatpush.msra.mxu0 %v1921_v14 }
 0x649   :  { %2325 = vpow2.f32 %v2197_v21 }
 0x64a   :  { %1974 = vmatpush.msra.mxu0 %v1920_v5 }
 0x64d   :  { %v2324_v15 = vpop.eup %2323 }
 0x64e   :  { %v1803_v16 = vadd.f32 1.0, %v2324_v15 }
 0x64f   :  { %v2326_v18 = vpop.eup %2325 }
 0x650   :  { %v1804_v19 = vadd.f32 1.0, %v2326_v18  ;;  %2327 = vrcp.f32 %v1803_v16  ;;  %v1816_v31 = vand.u32 2147483648, %v1803_v16  ;;  %v1814_v35 = vand.u32 2147483647, %v1803_v16  ;;  %v1919_v18 = vld [vmem:[%s4179_s6 + $0x8] sm:$0xff] }
 0x651   :  { %vm1810_vm14 = vweird.f32 %v1803_v16  ;;  %1975 = vmatpush.msra.mxu0 %v1919_v18 }
 0x652   :  { %2329 = vrcp.f32 %v1804_v19  ;;  %v1831_v39 = vand.u32 2147483648, %v1804_v19  ;;  %v1829_v17 = vand.u32 2147483647, %v1804_v19  ;;  %v1817_v45 = vor.u32 1.1754944e-38, %v1816_v31  ;;  %v1915_v31 = vld [vmem:[#allocation3 + $0xa] sm:$0x3] }
 0x653   :  { %2331 = vtanh.f32 %v1837_v26  ;;  %vm1815_vm1 = vcmp.eq.f32.partialorder %v1814_v35, 8.507059e+37  ;;  %vm1825_vm2 = vweird.f32 %v1804_v19  ;;  %1976 = vmatpush.msra.mxu0 %v1918_v22  ;;  %v1911_v35 = vld [vmem:[#allocation3 + $0x2] sm:$0x3] }
 0x654   :  { %2333 = vtanh.f32 %v1838_v32  ;;  %v1832_v3 = vor.u32 1.1754944e-38, %v1831_v39  ;;  %vm1830_vm4 = vcmp.eq.f32.partialorder %v1829_v17, 8.507059e+37 }
 0x656   :  { %v2328_v20 = vpop.eup %2327 }
 0x657   :  { %v1806_v23 = vmul.f32 %v2328_v20, %v1803_v16  ;;  %vm1811_vm13 = vweird.f32 %v2328_v20 }
 0x658   :  { %v2330_v24 = vpop.eup %2329  ;;  %vm1812_vm0 = vmor %vm1810_vm14, %vm1811_vm13 }
 0x659   :  { %v1807_v28 = vsub.f32 1.0, %v1806_v23  ;;  %v1821_v30 = vmul.f32 %v2330_v24, %v1804_v19  ;;  %vm1826_vm15 = vweird.f32 %v2330_v24  ;;  %v2332_v48 = vpop.eup %2331 }
 0x65a   :  { %vm1827_vm3 = vmor %vm1825_vm2, %vm1826_vm15  ;;  %v2334_v1 = vpop.eup %2333 }
 0x65b   :  { %v1808_v34 = vmul.f32 %v2328_v20, %v1807_v28  ;;  %v1822_v36 = vsub.f32 1.0, %v1821_v30 }
 0x65d   :  { %v1809_v41 = vadd.f32 %v2328_v20, %v1808_v34  ;;  %v1823_v42 = vmul.f32 %v2330_v24, %v1822_v36  ;;  %v1910_v34 = vld [vmem:[#allocation3] sm:$0x3]  ;;  %v1913_v36 = vld [vmem:[#allocation3 + $0x6] sm:$0x3] }
 0x65f   :  { %v1813_v57 = vsel %vm1812_vm0, %v2328_v20, %v1809_v41  ;;  %v1824_v51 = vadd.f32 %v2330_v24, %v1823_v42 }
 0x660   :  { %v1818_v55 = vsel %vm1815_vm1, %v1817_v45, %v1813_v57 }
 0x661   :  { %v1828_v6 = vsel %vm1827_vm3, %v2330_v24, %v1824_v51  ;;  %v1845_v11 = vrot.slane %v1818_v55, 1  ;;  %v1851_v43 = vmul.f32 %v2332_v48, %v1818_v55  ;;  %v1857_v13 = vrot.slane %v1818_v55, 2 }
 0x662   :  { %v1833_v62 = vsel %vm1830_vm4, %v1832_v3, %v1828_v6 }
 0x663   :  { %v1846_v50 = vrot.slane %v1833_v62, 1  ;;  %v1849_v37 = vmul.f32 %v1845_v11, %v3996_v0  ;;  %v1852_v8 = vmul.f32 %v2334_v1, %v1833_v62  ;;  %v1858_v58 = vrot.slane %v1833_v62, 2 }
 0x665   :  { %v1850_v54 = vmul.f32 %v1846_v50, %v4005_v52  ;;  %v1853_v25 = vadd.f32 %v1851_v43, %v1849_v37 }
 0x667   :  { %v1854_v49 = vadd.f32 %v1852_v8, %v1850_v54  ;;  %2335 = vtanh.f32 %v1853_v25  ;;  %v1881_v28 = vsel %vm4073_vm5, %v1853_v25, %v3996_v0  ;;  %v1912_v0 = vld [vmem:[#allocation3 + $0x4] sm:$0x3] }
 0x669   :  { %2337 = vtanh.f32 %v1854_v49  ;;  %v1882_v30 = vsel %vm4082_vm6, %v1854_v49, %v4005_v52 }
 0x66d   :  { %v2336_v59 = vpop.eup %2335 }
 0x66e   :  { %v1861_v10 = vmul.f32 %v2336_v59, %v1857_v13 }
 0x66f   :  { %v2338_v7 = vpop.eup %2337 }
 0x670   :  { %v1862_v15 = vmul.f32 %v2338_v7, %v1858_v58  ;;  %v1883_v16 = vsel %vm4073_vm5, %v1861_v10, 0.0  ;;  %v1879_v23 = vsel %vm4073_vm5, %v1861_v10, %v4014_v38  ;;  %v1914_v38 = vld [vmem:[#allocation3 + $0x8] sm:$0x3] }
 0x671   :  { %1887 = vst [vmem:[#allocation1] ss:$9 sm:$0xff] %v1883_v16 }
 0x672   :  { %v1884_v20 = vsel %vm4082_vm6, %v1862_v15, 0.0  ;;  %v1880_v26 = vsel %vm4082_vm6, %v1862_v15, %v4019_v56  ;;  %v1916_v56 = vld [vmem:[#allocation3 + $0xc] sm:$0x3] }
 0x673   :  { %1889 = vst [vmem:[#allocation1 + $0x1] ss:$9 sm:$0xff] %v1884_v20 }
 0x67a   :  { %v1890_v24 = vld [vmem:[#allocation1] sm:$0xff] }
 0x67b   :  { %1896 = vst [vmem:[#allocation1] ss:$9 sm:$0xff] %v1879_v23 }
 0x67c   :  { %1898 = vst [vmem:[#allocation1 + $0x1] ss:$9 sm:$0xff] %v1880_v26 }
 0x67d   :  { %1893 = vst [vmem:[#allocation3 + $0xe] sm:$0x3] %v1890_v24 }
 0x683   :  { %v1899_v27 = vld [vmem:[#allocation1] sm:$0xff] }
 0x684   :  { %1901 = vst [vmem:[#allocation4] sm:$0x3] %v1899_v27  ;;  %v1917_v32 = vld [vmem:[#allocation3 + $0xe] sm:$0x3] }
 0x685   :  { %1904 = vst [vmem:[#allocation1] ss:$9 sm:$0xff] %v1881_v28 }
 0x686   :  { %1906 = vst [vmem:[#allocation1 + $0x1] ss:$9 sm:$0xff] %v1882_v30 }
 0x687   :  { %1950 = vst [vmem:[#allocation1 + $0x20] ss:$4 sm:$0xff] %v1914_v38 }
 0x688   :  { %1952 = vst [vmem:[#allocation1 + $0x21] ss:$4 sm:$0xff] %v1915_v31 }
 0x689   :  { %1954 = vst [vmem:[#allocation1 + $0x22] ss:$4 sm:$0xff] %v1916_v56 }
 0x68a   :  { %1956 = vst [vmem:[#allocation1 + $0x23] ss:$4 sm:$0xff] %v1917_v32 }
 0x68d   :  { %v1907_v33 = vld [vmem:[#allocation1] sm:$0xff] }
 0x68e   :  { %1909 = vst [vmem:[#allocation5] sm:$0x3] %v1907_v33 }
 0x68f   :  { %1942 = vst [vmem:[#allocation1] ss:$4 sm:$0xff] %v1910_v34 }
 0x690   :  { %1944 = vst [vmem:[#allocation1 + $0x1] ss:$4 sm:$0xff] %v1911_v35 }
 0x691   :  { %1946 = vst [vmem:[#allocation1 + $0x2] ss:$4 sm:$0xff] %v1912_v0  ;;  %v1958_v39 = vld.sshfl [vmem:[#allocation1 + $0x20] sm:$0xff pattern:$0x73625140] }
 0x692   :  { %1948 = vst [vmem:[#allocation1 + $0x3] ss:$4 sm:$0xff] %v1913_v36 }
 0x699   :  { %v1957_v52 = vld.sshfl [vmem:[#allocation1] sm:$0xff pattern:$0x73625140] }
 0x69a   :  { %1977 = vmatmul.f32.vlgmr.msra.gmra.mxu0 %v1957_v52 }
 0x6a2   :  { %1980 = vmatmul.f32.gmra.mxu0 %v1958_v39 }
 0x717   :  { %v1978_v41 = vpop.f32.mrf.mxu0 }
 0x718   :  { %v1986_v42 = vrot.slane %v1978_v41, 2  ;;  %v1987_v17 = vrot.slane %v1978_v41, 4  ;;  %v1988_v45 = vrot.slane %v1978_v41, 6  ;;  %v2002_v63 = vadd.f32 %v4106_v40, %v1978_v41 }
 0x71a   :  { %v2003_v57 = vadd.f32 %v4106_v40, %v1986_v42  ;;  %v2004_v51 = vadd.f32 %v4106_v40, %v1987_v17  ;;  %v2011_v55 = vrot.slane %v2002_v63, 1  ;;  %v2005_v3 = vadd.f32 %v4106_v40, %v1988_v45 }
 0x71b   :  { %v2012_v4 = vrot.slane %v2002_v63, 2  ;;  %v2013_v6 = vrot.slane %v2002_v63, 3 }
 0x71c   :  { %v2014_v11 = vsel %vm334_vm7, %v2002_v63, %v2011_v55  ;;  %v2017_v48 = vsel %vm340_vm8, %v2002_v63, %v2011_v55  ;;  %v2026_v62 = vrot.slane %v2003_v57, 1  ;;  %v2027_v60 = vrot.slane %v2003_v57, 2 }
 0x71d   :  { %v2015_v50 = vsel %vm336_vm9, %v2012_v4, %v2013_v6  ;;  %v2018_v37 = vsel %vm342_vm10, %v2012_v4, %v2013_v6  ;;  %v2028_v43 = vrot.slane %v2003_v57, 3  ;;  %v2041_v1 = vrot.slane %v2004_v51, 1 }
 0x71e   :  { %v2016_v47 = vsel %vm338_vm11, %v2014_v11, %v2015_v50  ;;  %v2019_v54 = vsel %vm344_vm12, %v2017_v48, %v2018_v37  ;;  %v2029_v8 = vsel %vm334_vm7, %v2003_v57, %v2026_v62  ;;  %v2032_v25 = vsel %vm340_vm8, %v2003_v57, %v2026_v62 }
 0x71f   :  { %v2020_v61 = vrot.slane %v2019_v54, 1  ;;  %2023 = vst [vmem:[#allocation8] sm:$0x1] %v2016_v47  ;;  %v2030_v44 = vsel %vm336_vm9, %v2027_v60, %v2028_v43  ;;  %v2033_v49 = vsel %vm342_vm10, %v2027_v60, %v2028_v43  ;;  %v2042_v46 = vrot.slane %v2004_v51, 2  ;;  %v1981_v9 = vpop.f32.mrf.mxu0 }
 0x720   :  { %v2031_v53 = vsel %vm338_vm11, %v2029_v8, %v2030_v44  ;;  %v2034_v12 = vsel %vm344_vm12, %v2032_v25, %v2033_v49  ;;  %v2043_v2 = vrot.slane %v2004_v51, 3  ;;  %v2044_v13 = vsel %vm334_vm7, %v2004_v51, %v2041_v1 }
 0x721   :  { %2024 = vst [vmem:[#allocation8 + $0x8] sm:$0x1] %v2020_v61  ;;  %v2035_v14 = vrot.slane %v2034_v12, 1  ;;  %v2047_v59 = vsel %vm340_vm8, %v2004_v51, %v2041_v1  ;;  %v2056_v29 = vrot.slane %v2005_v3, 1  ;;  %v2057_v58 = vrot.slane %v2005_v3, 2 }
 0x722   :  { %2038 = vst [vmem:[#allocation8 + $0x1] sm:$0x1] %v2031_v53  ;;  %v2045_v10 = vsel %vm336_vm9, %v2042_v46, %v2043_v2  ;;  %v2048_v5 = vsel %vm342_vm10, %v2042_v46, %v2043_v2  ;;  %v2058_v7 = vrot.slane %v2005_v3, 3  ;;  %v1989_v21 = vrot.slane %v1981_v9, 2 }
 0x723   :  { %2039 = vst [vmem:[#allocation8 + $0x9] sm:$0x1] %v2035_v14  ;;  %v2046_v15 = vsel %vm338_vm11, %v2044_v13, %v2045_v10  ;;  %v2049_v16 = vsel %vm344_vm12, %v2047_v59, %v2048_v5  ;;  %v2059_v18 = vsel %vm334_vm7, %v2005_v3, %v2056_v29  ;;  %v2062_v19 = vsel %vm340_vm8, %v2005_v3, %v2056_v29 }
 0x724   :  { %v2050_v20 = vrot.slane %v2049_v16, 1  ;;  %2053 = vst [vmem:[#allocation8 + $0x2] sm:$0x1] %v2046_v15  ;;  %v2060_v22 = vsel %vm336_vm9, %v2057_v58, %v2058_v7  ;;  %v2063_v23 = vsel %vm342_vm10, %v2057_v58, %v2058_v7  ;;  %v1990_v24 = vrot.slane %v1981_v9, 4 }
 0x725   :  { %v2061_v26 = vsel %vm338_vm11, %v2059_v18, %v2060_v22  ;;  %v2064_v27 = vsel %vm344_vm12, %v2062_v19, %v2063_v23  ;;  %v1991_v28 = vrot.slane %v1981_v9, 6  ;;  %v2006_v30 = vadd.f32 %v4106_v40, %v1981_v9 }
 0x726   :  { %2054 = vst [vmem:[#allocation8 + $0xa] sm:$0x1] %v2050_v20  ;;  %v2065_v38 = vrot.slane %v2064_v27, 1  ;;  %v2007_v31 = vadd.f32 %v4106_v40, %v1989_v21  ;;  %v2008_v32 = vadd.f32 %v4106_v40, %v1990_v24 }
 0x727   :  { %2068 = vst [vmem:[#allocation8 + $0x3] sm:$0x1] %v2061_v26  ;;  %v2009_v56 = vadd.f32 %v4106_v40, %v1991_v28  ;;  %v2071_v33 = vrot.slane %v2006_v30, 1  ;;  %v2072_v34 = vrot.slane %v2006_v30, 2  ;;  %v2073_v35 = vrot.slane %v2006_v30, 3 }
 0x728   :  { %2069 = vst [vmem:[#allocation8 + $0xb] sm:$0x1] %v2065_v38  ;;  %v2086_v0 = vrot.slane %v2007_v31, 1  ;;  %v2087_v36 = vrot.slane %v2007_v31, 2  ;;  %v2088_v52 = vrot.slane %v2007_v31, 3  ;;  %v2101_v39 = vrot.slane %v2008_v32, 1 }
 0x729   :  { %v2074_v41 = vsel %vm334_vm7, %v2006_v30, %v2071_v33  ;;  %v2075_v42 = vsel %vm336_vm9, %v2072_v34, %v2073_v35  ;;  %v2077_v17 = vsel %vm340_vm8, %v2006_v30, %v2071_v33  ;;  %v2078_v45 = vsel %vm342_vm10, %v2072_v34, %v2073_v35 }
 0x72a   :  { %v2076_v63 = vsel %vm338_vm11, %v2074_v41, %v2075_v42  ;;  %v2079_v40 = vsel %vm344_vm12, %v2077_v17, %v2078_v45  ;;  %v2089_v57 = vsel %vm334_vm7, %v2007_v31, %v2086_v0  ;;  %v2090_v51 = vsel %vm336_vm9, %v2087_v36, %v2088_v52 }
 0x72b   :  { %v2080_v55 = vrot.slane %v2079_v40, 1  ;;  %2083 = vst [vmem:[#allocation8 + $0x4] sm:$0x1] %v2076_v63  ;;  %v2091_v3 = vsel %vm338_vm11, %v2089_v57, %v2090_v51  ;;  %v2092_v4 = vsel %vm340_vm8, %v2007_v31, %v2086_v0  ;;  %v2093_v6 = vsel %vm342_vm10, %v2087_v36, %v2088_v52 }
 0x72c   :  { %v2094_v11 = vsel %vm344_vm12, %v2092_v4, %v2093_v6  ;;  %2098 = vst [vmem:[#allocation8 + $0x5] sm:$0x1] %v2091_v3  ;;  %v2102_v48 = vrot.slane %v2008_v32, 2  ;;  %v2103_v62 = vrot.slane %v2008_v32, 3  ;;  %v2104_v60 = vsel %vm334_vm7, %v2008_v32, %v2101_v39 }
 0x72d   :  { %2084 = vst [vmem:[#allocation8 + $0xc] sm:$0x1] %v2080_v55  ;;  %v2095_v50 = vrot.slane %v2094_v11, 1  ;;  %v2107_v37 = vsel %vm340_vm8, %v2008_v32, %v2101_v39  ;;  %v2116_v43 = vrot.slane %v2009_v56, 1  ;;  %v2117_v1 = vrot.slane %v2009_v56, 2 }
 0x72e   :  { %v2105_v47 = vsel %vm336_vm9, %v2102_v48, %v2103_v62  ;;  %v2108_v54 = vsel %vm342_vm10, %v2102_v48, %v2103_v62  ;;  %v2118_v8 = vrot.slane %v2009_v56, 3 }
 0x72f   :  { %2099 = vst [vmem:[#allocation8 + $0xd] sm:$0x1] %v2095_v50  ;;  %v2106_v25 = vsel %vm338_vm11, %v2104_v60, %v2105_v47  ;;  %v2109_v61 = vsel %vm344_vm12, %v2107_v37, %v2108_v54  ;;  %v2119_v44 = vsel %vm334_vm7, %v2009_v56, %v2116_v43  ;;  %v2122_v49 = vsel %vm340_vm8, %v2009_v56, %v2116_v43 }
 0x730   :  { %v2110_v46 = vrot.slane %v2109_v61, 1  ;;  %2113 = vst [vmem:[#allocation8 + $0x6] sm:$0x1] %v2106_v25  ;;  %v2120_v9 = vsel %vm336_vm9, %v2117_v1, %v2118_v8  ;;  %v2123_v53 = vsel %vm342_vm10, %v2117_v1, %v2118_v8 }
 0x731   :  { %v2121_v12 = vsel %vm338_vm11, %v2119_v44, %v2120_v9  ;;  %v2124_v2 = vsel %vm344_vm12, %v2122_v49, %v2123_v53 }
 0x732   :  { %2114 = vst [vmem:[#allocation8 + $0xe] sm:$0x1] %v2110_v46  ;;  %v2125_v13 = vrot.slane %v2124_v2, 1 }
 0x733   :  { %2128 = vst [vmem:[#allocation8 + $0x7] sm:$0x1] %v2121_v12 }
 0x734   :  { %2129 = vst [vmem:[#allocation8 + $0xf] sm:$0x1] %v2125_v13 }
 0x735 PF:  { %p2201_p1 = scmp.gt.s32.totalorder %s4173_s0, 0 }
 0x737   :  { %2133 = sbr.rel (%p2201_p1) target bundleno = 1855 (0x73f), region = 41 }
 0x73c   :  { %v2403_v14 = vld [vmem:[%s4180_s7] ss:$0 sm:$0xff] }
 0x73d   :  { %2138 = vst [vmem:[#allocation8] sm:$0xff] %v2403_v14 }
 0x73e   :  { %2139 = vst [vmem:[#allocation8 + $0x8] sm:$0xff] %v2403_v14 }
 0x73f PF:  { %s2146_s19 = sshll.u32 %s4181_s8, 4  ;;  %s2432_s20 = smov [#allocation8]   ;;  %s2147_s19 = int_to_ptr.hbm [resolvable:$true] %s2146_s19 }
 0x740   :  { %s2144_s21 = sshll.u32 %s2432_s20, 4  ;;  %s2433_s22 = smov 128   ;;  %s2145_s21 = int_to_ptr.vmem [resolvable:$true] %s2144_s21 }
 0x741   :  { %s2434_s23 = smov 8  }
 0x742   :  { %2152 = dma.vmem_to_hbm [thread:$0]  %s2145_s21, 256, %s2147_s19, [#allocation9], %s2433_s22, %s2433_s22, %s2434_s23  }
 0x743   :  { %2428 = dma.done.wait [#allocation9], 256  }
 0x744   :  { %2429 = vsyncadd [#allocation9], 4294967040 }
 0x745   :  { %2157 = vsyncpa [#allocation9], 1 }

</bundles_post_ra>
